<compile_context>
chip_gen: v5e
topology: v5e:2x2
jax: 0.10.0
libtpu: 0.0.40
codegen_flags: <defaults>
</compile_context>

<pallas_src>
import numpy as np
import jax
import jax.numpy as jnp
from jax import lax
from jax.experimental import pallas as pl
from jax.experimental.pallas import tpu as pltpu


def _round_up(x, m):
    return ((x + m - 1) // m) * m


# ------------------------------ Pallas kernel -------------------------------

def _make_covblock_kernel(group_info, rpg, k_rows, k_pad, kk,
                          tl, tlc, tlp, sd, sh, patch_dtype):
    """Fused circular-conv3d + bias + PReLU + 2x2x2 ceil-mode max-pool.

    Per grid step (one batch element):
      alpha_ref : (1,)  SMEM            PReLU slope
      xs_ref    : (1, n_pat*rpg, LX)    flattened padded input, per-pattern slabs
      w_ref     : (kk, c_out, k_pad)    per-kw weight slabs, cols = (kd, kh, ci)
      b_ref     : (c_out, 1)            bias
      mask_ref  : (1, tlc)              0 at valid conv lanes, -inf elsewhere
      o_ref     : (1, c_out, tl)        pooled-anchor values on padded flat grid
      patch_ref : (k_pad, tlp)          VMEM scratch: in-kernel im2col slab
    """

    def kernel(alpha_ref, xs_ref, w_ref, b_ref, mask_ref, o_ref, patch_ref):
        # Fused im2col over the (kd, kh) taps only (kw folded out).  Each
        # iteration is ONE tile-aligned load from the matching slab and ONE
        # full-native-tile unmasked store into the patch.
        for gi, (pat, shift) in enumerate(group_info):
            patch_ref[gi * rpg:(gi + 1) * rpg, :] = (
                xs_ref[0, pat * rpg:(pat + 1) * rpg, pl.ds(shift, tlp)])

        # Zero the K-padding rows so zero weight columns never meet junk VMEM.
        # Unconditional on purpose: under 'parallel' core sharding each
        # TensorCore owns its own scratch and runs only a subset of steps.
        if k_rows < k_pad:
            patch_ref[k_rows:k_pad, :] = jnp.zeros(
                (k_pad - k_rows, tlp), patch_dtype)

        # Conv: kk lane-dense MXU matmuls (one per kw tap) against the same
        # patch, combined with 0..kk-1 lane-shifted adds (XLU, cheap).
        acc = None
        for kw in range(kk):
            part = jnp.dot(w_ref[kw], patch_ref[...],
                           preferred_element_type=jnp.float32)
            part = part[:, kw:kw + tlc]
            acc = part if acc is None else acc + part

        conv = acc + b_ref[...]                               # bias
        alpha = alpha_ref[0]
        conv = jnp.where(conv >= 0.0, conv, alpha * conv)     # PReLU

        # Lanes outside the valid conv box -> -inf so the ceil-mode pool never
        # picks them up (applied AFTER PReLU: no inf*0 hazard).
        conv = conv + mask_ref[...]

        # Fused MaxPool3d(2, stride=2, ceil_mode=True): separable shifted
        # maxes over flat offsets {0,1} x {0,sh} x {0,sd}.  The +sd shift is a
        # 128-aligned vreg-tile offset (free); +1 / +sh are the XLU rotates.
        # (If bundle dumps ever show spills here, process in ~1024-lane strips.)
        w1 = tl + sd + sh
        m = jnp.maximum(conv[:, :w1], conv[:, 1:w1 + 1])      # +w neighbour
        w2 = tl + sd
        m = jnp.maximum(m[:, :w2], m[:, sh:w2 + sh])          # +h neighbour
        m = jnp.maximum(m[:, :tl], m[:, sd:tl + sd])          # +d neighbour
        o_ref[0, :, :] = m

    return kernel


# ------------------------------ host wrapper --------------------------------

def cov_block_forward(x, conv_w, conv_b, prelu_alpha, conv_patch=5,
                      pool_patch=2, use_bf16=True):
    if pool_patch != 2:
        raise NotImplementedError("fused pool kernel assumes pool_patch == 2")

    n, c_in, d, h, w = x.shape
    c_out = conv_w.shape[0]
    k = conv_patch
    p = k - 1
    cdt = jnp.bfloat16 if use_bf16 else jnp.float32

    pd, ph, pw = d + 2 * p, h + 2 * p, w + 2 * p      # padded input extents
    dc, hc, wc = d + p, h + p, w + p                  # conv output extents
    sd, sh = ph * pw, pw                              # flat strides (d, h)
    l0 = pd * ph * pw

    # ---- lane geometry (all static) ----
    tl = _round_up(dc * sd, 128)            # output lanes per batch element
    halo = sd + sh + 1                      # max pool-window flat offset
    tlc = tl + _round_up(halo, 128)         # conv lanes computed per step
    tlp = tlc + 128                         # patch lanes (covers +kw shifts)
    max_tap_shift = (k - 1) * (sd + sh)     # largest (kd, kh) flat shift
    lx = _round_up(max(tlp + max_tap_shift, l0), 128)

    # ---- tap grouping -> full-native-tile patch stores ----
    tap_shifts = [kd * sd + kh * sh for kd in range(k) for kh in range(k)]
    n_taps = k * k
    if c_in >= 8:
        c_in_pad = _round_up(c_in, 8)
    else:
        c_in_pad = 1
        while c_in_pad < c_in:
            c_in_pad *= 2                    # -> 1, 2, 4, 8
    rows_target = 16 if use_bf16 else 8      # native sublane tile height
    g = max(1, rows_target // c_in_pad)      # taps per store
    rpg = g * c_in_pad                       # rows per store (full tile(s))
    n_groups = -(-n_taps // g)
    base_deltas = [tap_shifts[j] - tap_shifts[0] for j in range(g)]
    patterns, group_info = [], []
    for gi in range(n_groups):
        ts = list(range(gi * g, min((gi + 1) * g, n_taps)))
        s0 = tap_shifts[ts[0]]
        deltas = [tap_shifts[t] - s0 for t in ts]
        deltas += base_deltas[len(deltas):]  # phantom taps reuse group-0 deltas
        deltas = tuple(deltas)
        if deltas not in patterns:
            patterns.append(deltas)
        group_info.append((patterns.index(deltas), s0))
    n_pat = len(patterns)
    max_delta = max(max(pt) for pt in patterns)
    k_rows = n_groups * rpg
    k_pad = _round_up(k_rows, 128)

    # ---- circular pad (== padding_mode='circular'), flatten, build slabs ----
    xp = jnp.pad(x.astype(cdt), ((0, 0), (0, 0), (p, p), (p, p), (p, p)),
                 mode="wrap")
    xflat = xp.reshape(n, c_in, l0)
    if c_in_pad > c_in:
        xflat = jnp.pad(xflat, ((0, 0), (0, c_in_pad - c_in), (0, 0)))
    xflat = jnp.pad(xflat, ((0, 0), (0, 0), (0, lx + max_delta - l0)))
    # One slab per distinct within-group offset pattern; channel order inside
    # a slab is (group member j, ci) to match the patch row / weight col order.
    xs = jnp.concatenate(
        [jnp.concatenate([xflat[:, :, dlt:dlt + lx] for dlt in pt], axis=1)
         for pt in patterns], axis=1)                  # (n, n_pat*rpg, lx)

    # ---- per-kw weight slabs, columns ordered (kd, kh, ci) ----
    wt = jnp.transpose(conv_w.astype(cdt), (4, 0, 2, 3, 1))   # (kw,o,kd,kh,ci)
    if c_in_pad > c_in:
        wt = jnp.pad(wt, ((0, 0), (0, 0), (0, 0), (0, 0), (0, c_in_pad - c_in)))
    w_slabs = wt.reshape(k, c_out, n_taps * c_in_pad)
    w_slabs = jnp.pad(w_slabs,
                      ((0, 0), (0, 0), (0, k_pad - n_taps * c_in_pad)))
    b2d = conv_b.reshape(c_out, 1).astype(jnp.float32)

    # ---- 0 / -inf validity mask over the padded flat conv grid ----
    lane = np.arange(tlc)
    a_i, r = lane // sd, lane % sd
    b_i, c_i = r // sh, r % sh
    valid = (a_i < dc) & (b_i < hc) & (c_i < wc)
    neg_mask = jnp.asarray(np.where(valid, 0.0, -np.inf),
                           dtype=jnp.float32).reshape(1, tlc)

    kernel = _make_covblock_kernel(tuple(group_info), rpg, k_rows, k_pad, k,
                                   tl, tlc, tlp, sd, sh, cdt)

    out = pl.pallas_call(
        kernel,
        out_shape=jax.ShapeDtypeStruct((n, c_out, tl), jnp.float32),
        grid=(n,),
        in_specs=[
            pl.BlockSpec(memory_space=pltpu.MemorySpace.SMEM),      # alpha (1,)
            pl.BlockSpec((1, n_pat * rpg, lx), lambda i: (i, 0, 0)),  # slabs
            pl.BlockSpec((k, c_out, k_pad), lambda i: (0, 0, 0)),   # weights
            pl.BlockSpec((c_out, 1), lambda i: (0, 0)),             # bias
            pl.BlockSpec((1, tlc), lambda i: (0, 0)),               # -inf mask
        ],
        out_specs=pl.BlockSpec((1, c_out, tl), lambda i: (i, 0, 0)),
        scratch_shapes=[pltpu.VMEM((k_pad, tlp), cdt)],
        compiler_params=pltpu.CompilerParams(
            dimension_semantics=("parallel",),
            vmem_limit_bytes=16 * 1024 * 1024),
    )(prelu_alpha.astype(jnp.float32), xs, w_slabs, b2d, neg_mask)

    # Tiny host-side decimation: pooled anchors live at even (d, h, w) coords
    # of the padded flat grid (output here is ~100 KB).
    out = out[:, :, :dc * sd].reshape(n, c_out, dc, ph, pw)
    return out[:, :, 0:dc:2, 0:hc:2, 0:wc:2]


# ------------------------- pure-JAX reference check -------------------------

def cov_block_reference(x, conv_w, conv_b, prelu_alpha, conv_patch=5):
    p = conv_patch - 1
    xp = jnp.pad(x, ((0, 0), (0, 0), (p, p), (p, p), (p, p)), mode="wrap")
    h = lax.conv_general_dilated(
        xp, conv_w, window_strides=(1, 1, 1), padding="VALID",
        dimension_numbers=("NCDHW", "OIDHW", "NCDHW"))
    h = h + conv_b.reshape(1, -1, 1, 1, 1)
    h = jnp.where(h >= 0, h, prelu_alpha[0] * h)
    d, hh, w = h.shape[2:]
    dp, hp, wp = -(-d // 2), -(-hh // 2), -(-w // 2)
    hpad = jnp.pad(
        h, ((0, 0), (0, 0), (0, 2 * dp - d), (0, 2 * hp - hh), (0, 2 * wp - w)),
        constant_values=-jnp.inf)
    return lax.reduce_window(hpad, -jnp.inf, lax.max,
                             (1, 1, 2, 2, 2), (1, 1, 2, 2, 2), "VALID")


if __name__ == "__main__":
    key = jax.random.PRNGKey(0)
    k_x, k_w, k_b = jax.random.split(key, 3)

    N, C_in, C_out, D = 2, 4, 8, 8
    conv_patch = 5

    x = jax.random.normal(k_x, (N, C_in, D, D, D), jnp.float32)

    # Conv3d default init: U(-1/sqrt(fan_in), 1/sqrt(fan_in))
    fan_in = C_in * conv_patch ** 3
    bound = 1.0 / (fan_in ** 0.5)
    conv_w = jax.random.uniform(
        k_w, (C_out, C_in, conv_patch, conv_patch, conv_patch),
        jnp.float32, -bound, bound)
    conv_b = jax.random.uniform(k_b, (C_out,), jnp.float32, -bound, bound)
    prelu_alpha = jnp.array([0.25], jnp.float32)   # nn.PReLU() default

    # Pre-round x / w to bf16-representable values so the f32 reference and
    # the bf16-MXU kernel multiply identical operands (the comparison then
    # only probes accumulation order, keeping the tolerance tight).
    x = x.astype(jnp.bfloat16).astype(jnp.float32)
    conv_w = conv_w.astype(jnp.bfloat16).astype(jnp.float32)

    out = jax.jit(cov_block_forward)(x, conv_w, conv_b, prelu_alpha)
    out = jax.block_until_ready(out)

    ref = cov_block_reference(x, conv_w, conv_b, prelu_alpha)
    assert out.shape == ref.shape == (N, C_out, 6, 6, 6), (out.shape, ref.shape)
    max_err = float(jnp.max(jnp.abs(out - ref)))
    assert jnp.allclose(out, ref, atol=2e-3, rtol=2e-3), max_err

    print("KERNEL_OK")
</pallas_src>

<mosaic_0001>
module attributes {stable_mosaic.version = 11 : i64} {
  func.func @kernel(%arg0: i32, %arg1: memref<1xf32, #tpu.memory_space<smem>>, %arg2: memref<1x64x4736xbf16, #tpu.memory_space<vmem>>, %arg3: memref<5x8x128xbf16, #tpu.memory_space<vmem>>, %arg4: memref<8x1xf32, #tpu.memory_space<vmem>>, %arg5: memref<1x3456xf32, #tpu.memory_space<vmem>>, %arg6: memref<1x8x3072xf32, #tpu.memory_space<vmem>>, %arg7: memref<128x3584xbf16, #tpu.memory_space<vmem>>) attributes {dimension_semantics = [#tpu.dimension_semantics<parallel>], iteration_bounds = array<i64: 2>, scalar_prefetch = 0 : i64, scratch_operands = 1 : i64, tpu.core_type = #tpu.core_type<tc>, window_params = [{transform_indices = @transform_0, window_bounds = array<i64: 1>}, {transform_indices = @transform_1, window_bounds = array<i64: 1, 64, 4736>}, {pipeline_mode = #tpu.pipeline_mode<synchronous>, transform_indices = @transform_2, window_bounds = array<i64: 5, 8, 128>}, {pipeline_mode = #tpu.pipeline_mode<synchronous>, transform_indices = @transform_3, window_bounds = array<i64: 8, 1>}, {pipeline_mode = #tpu.pipeline_mode<synchronous>, transform_indices = @transform_4, window_bounds = array<i64: 1, 3456>}, {transform_indices = @transform_5, window_bounds = array<i64: 1, 8, 3072>}]} {
    %c0 = arith.constant 0 : index
    %c0_0 = arith.constant 0 : index
    %c0_1 = arith.constant 0 : index
    %0 = vector.load %arg2[%c0, %c0_0, %c0_1] : memref<1x64x4736xbf16, #tpu.memory_space<vmem>>, vector<1x16x3584xbf16>
    %1 = vector.shape_cast %0 : vector<1x16x3584xbf16> to vector<16x3584xbf16>
    %c0_2 = arith.constant 0 : index
    %c0_3 = arith.constant 0 : index
    %2 = vector.load %arg7[%c0_2, %c0_3] : memref<128x3584xbf16, #tpu.memory_space<vmem>>, vector<16x3584xbf16>
    tpu.vector_store %arg7[%c0_2, %c0_3], %1 {strides = array<i32>} : memref<128x3584xbf16, #tpu.memory_space<vmem>>, vector<16x3584xbf16>,
    %c0_4 = arith.constant 0 : index
    %c16 = arith.constant 16 : index
    %c64 = arith.constant 64 : index
    %3 = vector.load %arg2[%c0_4, %c16, %c64] : memref<1x64x4736xbf16, #tpu.memory_space<vmem>>, vector<1x16x3584xbf16>
    %4 = vector.shape_cast %3 : vector<1x16x3584xbf16> to vector<16x3584xbf16>
    %c16_5 = arith.constant 16 : index
    %c0_6 = arith.constant 0 : index
    %5 = vector.load %arg7[%c16_5, %c0_6] : memref<128x3584xbf16, #tpu.memory_space<vmem>>, vector<16x3584xbf16>
    tpu.vector_store %arg7[%c16_5, %c0_6], %4 {strides = array<i32>} : memref<128x3584xbf16, #tpu.memory_space<vmem>>, vector<16x3584xbf16>,
    %c0_7 = arith.constant 0 : index
    %c32 = arith.constant 32 : index
    %c304 = arith.constant 304 : index
    %6 = vector.load %arg2[%c0_7, %c32, %c304] : memref<1x64x4736xbf16, #tpu.memory_space<vmem>>, vector<1x16x3584xbf16>
    %7 = vector.shape_cast %6 : vector<1x16x3584xbf16> to vector<16x3584xbf16>
    %c32_8 = arith.constant 32 : index
    %c0_9 = arith.constant 0 : index
    %8 = vector.load %arg7[%c32_8, %c0_9] : memref<128x3584xbf16, #tpu.memory_space<vmem>>, vector<16x3584xbf16>
    tpu.vector_store %arg7[%c32_8, %c0_9], %7 {strides = array<i32>} : memref<128x3584xbf16, #tpu.memory_space<vmem>>, vector<16x3584xbf16>,
    %c0_10 = arith.constant 0 : index
    %c48 = arith.constant 48 : index
    %c544 = arith.constant 544 : index
    %9 = vector.load %arg2[%c0_10, %c48, %c544] : memref<1x64x4736xbf16, #tpu.memory_space<vmem>>, vector<1x16x3584xbf16>
    %10 = vector.shape_cast %9 : vector<1x16x3584xbf16> to vector<16x3584xbf16>
    %c48_11 = arith.constant 48 : index
    %c0_12 = arith.constant 0 : index
    %11 = vector.load %arg7[%c48_11, %c0_12] : memref<128x3584xbf16, #tpu.memory_space<vmem>>, vector<16x3584xbf16>
    tpu.vector_store %arg7[%c48_11, %c0_12], %10 {strides = array<i32>} : memref<128x3584xbf16, #tpu.memory_space<vmem>>, vector<16x3584xbf16>,
    %c0_13 = arith.constant 0 : index
    %c0_14 = arith.constant 0 : index
    %c784 = arith.constant 784 : index
    %12 = vector.load %arg2[%c0_13, %c0_14, %c784] : memref<1x64x4736xbf16, #tpu.memory_space<vmem>>, vector<1x16x3584xbf16>
    %13 = vector.shape_cast %12 : vector<1x16x3584xbf16> to vector<16x3584xbf16>
    %c64_15 = arith.constant 64 : index
    %c0_16 = arith.constant 0 : index
    %14 = vector.load %arg7[%c64_15, %c0_16] : memref<128x3584xbf16, #tpu.memory_space<vmem>>, vector<16x3584xbf16>
    tpu.vector_store %arg7[%c64_15, %c0_16], %13 {strides = array<i32>} : memref<128x3584xbf16, #tpu.memory_space<vmem>>, vector<16x3584xbf16>,
    %c0_17 = arith.constant 0 : index
    %c0_18 = arith.constant 0 : index
    %c1024 = arith.constant 1024 : index
    %15 = vector.load %arg2[%c0_17, %c0_18, %c1024] : memref<1x64x4736xbf16, #tpu.memory_space<vmem>>, vector<1x16x3584xbf16>
    %16 = vector.shape_cast %15 : vector<1x16x3584xbf16> to vector<16x3584xbf16>
    %c80 = arith.constant 80 : index
    %c0_19 = arith.constant 0 : index
    %17 = vector.load %arg7[%c80, %c0_19] : memref<128x3584xbf16, #tpu.memory_space<vmem>>, vector<16x3584xbf16>
    tpu.vector_store %arg7[%c80, %c0_19], %16 {strides = array<i32>} : memref<128x3584xbf16, #tpu.memory_space<vmem>>, vector<16x3584xbf16>,
    %c0_20 = arith.constant 0 : index
    %c0_21 = arith.constant 0 : index
    %c1088 = arith.constant 1088 : index
    %18 = vector.load %arg2[%c0_20, %c0_21, %c1088] : memref<1x64x4736xbf16, #tpu.memory_space<vmem>>, vector<1x16x3584xbf16>
    %19 = vector.shape_cast %18 : vector<1x16x3584xbf16> to vector<16x3584xbf16>
    %c96 = arith.constant 96 : index
    %c0_22 = arith.constant 0 : index
    %20 = vector.load %arg7[%c96, %c0_22] : memref<128x3584xbf16, #tpu.memory_space<vmem>>, vector<16x3584xbf16>
    tpu.vector_store %arg7[%c96, %c0_22], %19 {strides = array<i32>} : memref<128x3584xbf16, #tpu.memory_space<vmem>>, vector<16x3584xbf16>,
    %cst = arith.constant 0.000000e+00 : bf16
    %21 = vector.broadcast %cst : bf16 to vector<16x3584xbf16>
    %c112 = arith.constant 112 : index
    %c0_23 = arith.constant 0 : index
    %22 = vector.load %arg7[%c112, %c0_23] : memref<128x3584xbf16, #tpu.memory_space<vmem>>, vector<16x3584xbf16>
    tpu.vector_store %arg7[%c112, %c0_23], %21 {strides = array<i32>} : memref<128x3584xbf16, #tpu.memory_space<vmem>>, vector<16x3584xbf16>,
    %c0_24 = arith.constant 0 : index
    %c0_25 = arith.constant 0 : index
    %c0_26 = arith.constant 0 : index
    %23 = vector.load %arg3[%c0_24, %c0_25, %c0_26] : memref<5x8x128xbf16, #tpu.memory_space<vmem>>, vector<1x8x128xbf16>
    %24 = vector.shape_cast %23 : vector<1x8x128xbf16> to vector<8x128xbf16>
    %c0_27 = arith.constant 0 : index
    %c0_28 = arith.constant 0 : index
    %25 = vector.load %arg7[%c0_27, %c0_28] : memref<128x3584xbf16, #tpu.memory_space<vmem>>, vector<128x3584xbf16>
    %cst_29 = arith.constant dense<0.000000e+00> : vector<8x3584xf32>
    %26 = tpu.matmul %24, %25, %cst_29 {dimension_numbers = #tpu.dot_dimension_numbers<[1], [0], [0], [1], [0, 0, 1, 1], [], []>} : vector<8x128xbf16>, vector<128x3584xbf16>, vector<8x3584xf32> -> vector<8x3584xf32>
    %27 = vector.extract_strided_slice %26 {offsets = [0, 0], sizes = [8, 3456], strides = [1, 1]} : vector<8x3584xf32> to vector<8x3456xf32>
    %c1 = arith.constant 1 : index
    %c0_30 = arith.constant 0 : index
    %c0_31 = arith.constant 0 : index
    %28 = vector.load %arg3[%c1, %c0_30, %c0_31] : memref<5x8x128xbf16, #tpu.memory_space<vmem>>, vector<1x8x128xbf16>
    %29 = vector.shape_cast %28 : vector<1x8x128xbf16> to vector<8x128xbf16>
    %c0_32 = arith.constant 0 : index
    %c0_33 = arith.constant 0 : index
    %30 = vector.load %arg7[%c0_32, %c0_33] : memref<128x3584xbf16, #tpu.memory_space<vmem>>, vector<128x3584xbf16>
    %cst_34 = arith.constant dense<0.000000e+00> : vector<8x3584xf32>
    %31 = tpu.matmul %29, %30, %cst_34 {dimension_numbers = #tpu.dot_dimension_numbers<[1], [0], [0], [1], [0, 0, 1, 1], [], []>} : vector<8x128xbf16>, vector<128x3584xbf16>, vector<8x3584xf32> -> vector<8x3584xf32>
    %32 = vector.extract_strided_slice %31 {offsets = [0, 1], sizes = [8, 3456], strides = [1, 1]} : vector<8x3584xf32> to vector<8x3456xf32>
    %33 = arith.addf %27, %32 : vector<8x3456xf32>
    %c2 = arith.constant 2 : index
    %c0_35 = arith.constant 0 : index
    %c0_36 = arith.constant 0 : index
    %34 = vector.load %arg3[%c2, %c0_35, %c0_36] : memref<5x8x128xbf16, #tpu.memory_space<vmem>>, vector<1x8x128xbf16>
    %35 = vector.shape_cast %34 : vector<1x8x128xbf16> to vector<8x128xbf16>
    %c0_37 = arith.constant 0 : index
    %c0_38 = arith.constant 0 : index
    %36 = vector.load %arg7[%c0_37, %c0_38] : memref<128x3584xbf16, #tpu.memory_space<vmem>>, vector<128x3584xbf16>
    %cst_39 = arith.constant dense<0.000000e+00> : vector<8x3584xf32>
    %37 = tpu.matmul %35, %36, %cst_39 {dimension_numbers = #tpu.dot_dimension_numbers<[1], [0], [0], [1], [0, 0, 1, 1], [], []>} : vector<8x128xbf16>, vector<128x3584xbf16>, vector<8x3584xf32> -> vector<8x3584xf32>
    %38 = vector.extract_strided_slice %37 {offsets = [0, 2], sizes = [8, 3456], strides = [1, 1]} : vector<8x3584xf32> to vector<8x3456xf32>
    %39 = arith.addf %33, %38 : vector<8x3456xf32>
    %c3 = arith.constant 3 : index
    %c0_40 = arith.constant 0 : index
    %c0_41 = arith.constant 0 : index
    %40 = vector.load %arg3[%c3, %c0_40, %c0_41] : memref<5x8x128xbf16, #tpu.memory_space<vmem>>, vector<1x8x128xbf16>
    %41 = vector.shape_cast %40 : vector<1x8x128xbf16> to vector<8x128xbf16>
    %c0_42 = arith.constant 0 : index
    %c0_43 = arith.constant 0 : index
    %42 = vector.load %arg7[%c0_42, %c0_43] : memref<128x3584xbf16, #tpu.memory_space<vmem>>, vector<128x3584xbf16>
    %cst_44 = arith.constant dense<0.000000e+00> : vector<8x3584xf32>
    %43 = tpu.matmul %41, %42, %cst_44 {dimension_numbers = #tpu.dot_dimension_numbers<[1], [0], [0], [1], [0, 0, 1, 1], [], []>} : vector<8x128xbf16>, vector<128x3584xbf16>, vector<8x3584xf32> -> vector<8x3584xf32>
    %44 = vector.extract_strided_slice %43 {offsets = [0, 3], sizes = [8, 3456], strides = [1, 1]} : vector<8x3584xf32> to vector<8x3456xf32>
    %45 = arith.addf %39, %44 : vector<8x3456xf32>
    %c4 = arith.constant 4 : index
    %c0_45 = arith.constant 0 : index
    %c0_46 = arith.constant 0 : index
    %46 = vector.load %arg3[%c4, %c0_45, %c0_46] : memref<5x8x128xbf16, #tpu.memory_space<vmem>>, vector<1x8x128xbf16>
    %47 = vector.shape_cast %46 : vector<1x8x128xbf16> to vector<8x128xbf16>
    %c0_47 = arith.constant 0 : index
    %c0_48 = arith.constant 0 : index
    %48 = vector.load %arg7[%c0_47, %c0_48] : memref<128x3584xbf16, #tpu.memory_space<vmem>>, vector<128x3584xbf16>
    %cst_49 = arith.constant dense<0.000000e+00> : vector<8x3584xf32>
    %49 = tpu.matmul %47, %48, %cst_49 {dimension_numbers = #tpu.dot_dimension_numbers<[1], [0], [0], [1], [0, 0, 1, 1], [], []>} : vector<8x128xbf16>, vector<128x3584xbf16>, vector<8x3584xf32> -> vector<8x3584xf32>
    %50 = vector.extract_strided_slice %49 {offsets = [0, 4], sizes = [8, 3456], strides = [1, 1]} : vector<8x3584xf32> to vector<8x3456xf32>
    %51 = arith.addf %45, %50 : vector<8x3456xf32>
    %c0_50 = arith.constant 0 : index
    %c0_51 = arith.constant 0 : index
    %52 = vector.load %arg4[%c0_50, %c0_51] : memref<8x1xf32, #tpu.memory_space<vmem>>, vector<8x1xf32>
    %53 = vector.broadcast %52 : vector<8x1xf32> to vector<8x3456xf32>
    %54 = arith.addf %51, %53 : vector<8x3456xf32>
    %c0_52 = arith.constant 0 : index
    %55 = memref.load %arg1[%c0_52] : memref<1xf32, #tpu.memory_space<smem>>
    %cst_53 = arith.constant 0.000000e+00 : f32
    %56 = vector.broadcast %cst_53 : f32 to vector<8x3456xf32>
    %57 = arith.cmpf oge, %54, %56 : vector<8x3456xf32>
    %58 = vector.broadcast %55 : f32 to vector<8x3456xf32>
    %59 = arith.mulf %58, %54 : vector<8x3456xf32>
    %60 = arith.select %57, %54, %59 : vector<8x3456xi1>, vector<8x3456xf32>
    %c0_54 = arith.constant 0 : index
    %c0_55 = arith.constant 0 : index
    %61 = vector.load %arg5[%c0_54, %c0_55] : memref<1x3456xf32, #tpu.memory_space<vmem>>, vector<1x3456xf32>
    %62 = vector.broadcast %61 : vector<1x3456xf32> to vector<8x3456xf32>
    %63 = arith.addf %60, %62 : vector<8x3456xf32>
    %64 = vector.extract_strided_slice %63 {offsets = [0, 0], sizes = [8, 3344], strides = [1, 1]} : vector<8x3456xf32> to vector<8x3344xf32>
    %65 = vector.extract_strided_slice %63 {offsets = [0, 1], sizes = [8, 3344], strides = [1, 1]} : vector<8x3456xf32> to vector<8x3344xf32>
    %66 = arith.maximumf %64, %65 : vector<8x3344xf32>
    %67 = vector.extract_strided_slice %66 {offsets = [0, 0], sizes = [8, 3328], strides = [1, 1]} : vector<8x3344xf32> to vector<8x3328xf32>
    %68 = vector.extract_strided_slice %66 {offsets = [0, 16], sizes = [8, 3328], strides = [1, 1]} : vector<8x3344xf32> to vector<8x3328xf32>
    %69 = arith.maximumf %67, %68 : vector<8x3328xf32>
    %70 = vector.extract_strided_slice %69 {offsets = [0, 0], sizes = [8, 3072], strides = [1, 1]} : vector<8x3328xf32> to vector<8x3072xf32>
    %71 = vector.extract_strided_slice %69 {offsets = [0, 256], sizes = [8, 3072], strides = [1, 1]} : vector<8x3328xf32> to vector<8x3072xf32>
    %72 = arith.maximumf %70, %71 : vector<8x3072xf32>
    %c0_56 = arith.constant 0 : index
    %c0_57 = arith.constant 0 : index
    %c0_58 = arith.constant 0 : index
    %73 = vector.load %arg6[%c0_56, %c0_57, %c0_58] : memref<1x8x3072xf32, #tpu.memory_space<vmem>>, vector<1x8x3072xf32>
    %74 = vector.shape_cast %73 : vector<1x8x3072xf32> to vector<8x3072xf32>
    %75 = vector.shape_cast %72 : vector<8x3072xf32> to vector<1x8x3072xf32>
    tpu.vector_store %arg6[%c0_56, %c0_57, %c0_58], %75 {strides = array<i32>} : memref<1x8x3072xf32, #tpu.memory_space<vmem>>, vector<1x8x3072xf32>,
    return
  }
  func.func @transform_0(%arg0: i32) -> i32 {
    %c0_i32 = arith.constant 0 : i32
    %c0_i32_0 = arith.constant 0 : i32
    return %c0_i32 : i32
  }
  func.func @transform_1(%arg0: i32) -> (i32, i32, i32) {
    %c0_i32 = arith.constant 0 : i32
    %c0_i32_0 = arith.constant 0 : i32
    %c0_i32_1 = arith.constant 0 : i32
    return %arg0, %c0_i32, %c0_i32_0 : i32, i32, i32
  }
  func.func @transform_2(%arg0: i32) -> (i32, i32, i32) {
    %c0_i32 = arith.constant 0 : i32
    %c0_i32_0 = arith.constant 0 : i32
    %c0_i32_1 = arith.constant 0 : i32
    %c0_i32_2 = arith.constant 0 : i32
    return %c0_i32, %c0_i32_0, %c0_i32_1 : i32, i32, i32
  }
  func.func @transform_3(%arg0: i32) -> (i32, i32) {
    %c0_i32 = arith.constant 0 : i32
    %c0_i32_0 = arith.constant 0 : i32
    %c0_i32_1 = arith.constant 0 : i32
    return %c0_i32, %c0_i32_0 : i32, i32
  }
  func.func @transform_4(%arg0: i32) -> (i32, i32) {
    %c0_i32 = arith.constant 0 : i32
    %c0_i32_0 = arith.constant 0 : i32
    %c0_i32_1 = arith.constant 0 : i32
    return %c0_i32, %c0_i32_0 : i32, i32
  }
  func.func @transform_5(%arg0: i32) -> (i32, i32, i32) {
    %c0_i32 = arith.constant 0 : i32
    %c0_i32_0 = arith.constant 0 : i32
    %c0_i32_1 = arith.constant 0 : i32
    return %arg0, %c0_i32, %c0_i32_0 : i32, i32, i32
  }
}

</mosaic_0001>

<bundles_post_ra>
// kernel: cov_block_forward.1
= control target key start
LH: loop header
LB: loop body
LE: loop exit
PB: predicated region body
PF: predicated region fallthrough
CT: control target
= control target key end

     0   :  { %s7341_s20 = smov 0   ;;  %s11444_s0 = inlined_call_operand.<no memory space> [shape: f32[1], index: 0, kind: input, shape index: {}]   ;;  %s11445_s1 = inlined_call_operand.vmem [shape: bf16[2,64,4736], index: 1, kind: input, shape index: {}]   ;;  %s11446_s2 = inlined_call_operand.vmem [shape: bf16[5,8,128], index: 2, kind: input, shape index: {}]   ;;  %s11447_s3 = inlined_call_operand.vmem [shape: f32[8,1], index: 3, kind: input, shape index: {}]   ;;  %s11448_s4 = inlined_call_operand.vmem [shape: f32[1,3456], index: 4, kind: input, shape index: {}]   ;;  %s11449_s5 = inlined_call_operand.vmem [shape: f32[2,8,3072], index: 5, kind: output, shape index: {}]  }
   0x1   :  { %10 = sst [smem:[#allocation3]] %s11444_s0 }
   0x2 LB: > { %s6135_s21 = sadd.s32 4294967295, %s7297_s20   ;;  %p6139_p0 = scmp.ge.s32.totalorder %s7297_s20, 1  ;;  %s7297_s20 = sphi %s7341_s20, %s16_s20  }
   0x3   : > { %p188_p1 = scmp.lt.s32.totalorder %s7297_s20, 3 }
   0x5   : > { %p189_p2 = pnand %p6139_p0, %p188_p1 }
   0x7   : > { %192 = sbr.rel (%p189_p2) target bundleno = 2013 (0x7dd), region = 40 }
   0xc   : > { %p216_p3 = scmp.lt.s32.totalorder %s6135_s21, 1  ;;  %s7299_s25 = smov 64   ;;  %vm433_vm0 = vcmask 1043456   ;;  %vm435_vm1 = vcmask 523264   ;;  %vm1224_vm2 = vcmask 916480   ;;  %vm961_vm3 = vcmask 785408  }
   0xd   : > { %s7300_s26 = smov 112   ;;  %s7301_s27 = smov 96   ;;  %vm698_vm4 = vcmask 654336   ;;  %vm3828_vm5 = vcmask 1039360   ;;  %vm4360_vm6 = vcmask 1031168   ;;  %vm4892_vm7 = vcmask 1022976  }
   0xe   : > { %s13107_s21 = smov (!%p216_p3, %s6135_s21), 1  ;;  %s7302_s28 = smov 80   ;;  %vm5424_vm8 = vcmask 1014784  }
   0xf   : > { %s7268_s0 = smul.u32 1184, %s13107_s21  ;;  %s7304_s12 = smov 127  }
  0x10   : > { %s7305_s17 = smov 126   ;;  %s7269_s10 = smul.u32 192, %s13107_s21 }
  0x11   : > { %s7355_s24 = scalar_lea.vmem %s11445_s1, %s7268_s0  ;;  %s7306_s0 = smov 125  }
  0x12   : > { %v287_v0 = vld [vmem:[%s7355_s24 + $0x148] sm:$0xff]  ;;  %v285_v1 = vld [vmem:[%s7355_s24 + $0x138] sm:$0xff]  ;;  %v288_v3 = vld [vmem:[%s7355_s24 + $0x150] sm:$0xff] }
  0x13   : > { %v283_v2 = vld [vmem:[%s7355_s24 + $0x128] sm:$0xff]  ;;  %351 = vrot.lane.b32.xlu2 %v287_v0, %s7299_s25  ;;  %347 = vrot.lane.b32.xlu1 %v285_v1, %s7299_s25  ;;  %v286_v4 = vld [vmem:[%s7355_s24 + $0x140] sm:$0xff] }
  0x14   : > { %343 = vrot.lane.b32.xlu0 %v283_v2, %s7299_s25  ;;  %v284_v5 = vld [vmem:[%s7355_s24 + $0x130] sm:$0xff]  ;;  %v291_v6 = vld [vmem:[%s7355_s24 + $0x168] sm:$0xff]  ;;  %v290_v7 = vld [vmem:[%s7355_s24 + $0x160] sm:$0xff] }
  0x15   : > { %v289_v8 = vld [vmem:[%s7355_s24 + $0x158] sm:$0xff]  ;;  %v294_v10 = vld [vmem:[%s7355_s24 + $0x180] sm:$0xff]  ;;  %v292_v12 = vld [vmem:[%s7355_s24 + $0x170] sm:$0xff] }
  0x16   : > { %v1408_v9 = vld [vmem:[%s7355_s24 + $0xbc] sm:$0xff]  ;;  %v1393_v13 = vld [vmem:[%s7355_s24 + $0x28] sm:$0xff]  ;;  %v1407_v14 = vld [vmem:[%s7355_s24 + $0xb4] sm:$0xff] }
  0x17   : > { %1379 = vst [vmem:[#allocation2 + $0x4d8] sm:$0xff] %v1408_v9  ;;  %v293_v11 = vld [vmem:[%s7355_s24 + $0x178] sm:$0xff]  ;;  %v296_v16 = vld [vmem:[%s7355_s24 + $0x190] sm:$0xff]  ;;  %v295_v17 = vld [vmem:[%s7355_s24 + $0x188] sm:$0xff] }
  0x18   : > { %1365 = vst [vmem:[#allocation2 + $0x468] sm:$0xff] %v1393_v13  ;;  %v297_v15 = vld [vmem:[%s7355_s24 + $0x198] sm:$0xf]  ;;  %v1392_v18 = vld [vmem:[%s7355_s24 + $0x20] sm:$0xff]  ;;  %v300_v19 = vld [vmem:[%s7355_s24 + $0x1cc] sm:$0xff] }
  0x19   : > { %1378 = vst [vmem:[#allocation2 + $0x4d0] sm:$0xff] %v1407_v14  ;;  %v299_v20 = vld [vmem:[%s7355_s24 + $0x1c4] sm:$0xff]  ;;  %v298_v21 = vld [vmem:[%s7355_s24 + $0x1bc] sm:$0xff]  ;;  %v301_v24 = vld [vmem:[%s7355_s24 + $0x1d4] sm:$0xff] }
  0x1a   : > { %1364 = vst [vmem:[#allocation2 + $0x460] sm:$0xff] %v1392_v18  ;;  %v303_v22 = vld [vmem:[%s7355_s24 + $0x1e4] sm:$0xff]  ;;  %v302_v23 = vld [vmem:[%s7355_s24 + $0x1dc] sm:$0xff]  ;;  %v7404_v25 = vld [vmem:[%s7355_s24 + $0x30] sm:$0xff] }
  0x1b   : > { %353 = vrot.lane.b32.xlu2 %v288_v3, %s7299_s25  ;;  %349 = vrot.lane.b32.xlu1 %v286_v4, %s7299_s25  ;;  %v7411_v26 = vld [vmem:[%s7355_s24 + $0xc4] sm:$0xff]  ;;  %v812_v27 = vld [vmem:[%s7355_s24 + $0x398] sm:$0xff] }
  0x1c   : > { %345 = vrot.lane.b32.xlu0 %v284_v5, %s7299_s25  ;;  %v811_v28 = vld [vmem:[%s7355_s24 + $0x390] sm:$0xff]  ;;  %v1073_v29 = vld [vmem:[%s7355_s24 + $0x18] sm:$0xff]  ;;  %v826_v31 = vld [vmem:[%s7355_s24 + $0x424] sm:$0xff] }
  0x1d   : > { %v827_v30 = vld [vmem:[%s7355_s24 + $0x42c] sm:$0xff]  ;;  %v548_v34 = vld [vmem:[%s7355_s24 + $0x260] sm:$0xff]  ;;  %v1395_v40 = vld [vmem:[%s7355_s24 + $0x38] sm:$0xff] }
  0x1e   : > { %v549_v33 = vld [vmem:[%s7355_s24 + $0x268] sm:$0xff]  ;;  %v564_v41 = vld [vmem:[%s7355_s24 + $0x2fc] sm:$0xff]  ;;  %v563_v43 = vld [vmem:[%s7355_s24 + $0x2f4] sm:$0xff] }
  0x1f   : > { %v1088_v35 = vld [vmem:[%s7355_s24 + $0xac] sm:$0xff]  ;;  %v7451_v45 = vld [vmem:[%s7355_s24 + $0xd4] sm:$0xff]  ;;  %v7455_v47 = vld [vmem:[%s7355_s24 + $0x40] sm:$0xff] }
  0x20   : > { %v1410_v46 = vld [vmem:[%s7355_s24 + $0xcc] sm:$0xff]  ;;  %v547_v51 = vld [vmem:[%s7355_s24 + $0x258] sm:$0xff] }
  0x21   : > { %v825_v52 = vld [vmem:[%s7355_s24 + $0x41c] sm:$0xff]  ;;  %v810_v53 = vld [vmem:[%s7355_s24 + $0x388] sm:$0xff] }
  0x22   : > { %v562_v3 = vld [vmem:[%s7355_s24 + $0x2ec] sm:$0xff] }
  0x23   : > { %359 = vrot.lane.b32.xlu2 %v291_v6, %s7299_s25  ;;  %357 = vrot.lane.b32.xlu1 %v290_v7, %s7299_s25 }
  0x24   : > { %355 = vrot.lane.b32.xlu0 %v289_v8, %s7299_s25 }
  0x2b   : > { %365 = vrot.lane.b32.xlu2 %v294_v10, %s7299_s25  ;;  %363 = vrot.lane.b32.xlu1 %v293_v11, %s7299_s25 }
  0x2c   : > { %361 = vrot.lane.b32.xlu0 %v292_v12, %s7299_s25 }
  0x33   : > { %371 = vrot.lane.b32.xlu2 %v297_v15, %s7299_s25  ;;  %369 = vrot.lane.b32.xlu1 %v296_v16, %s7299_s25 }
  0x34   : > { %367 = vrot.lane.b32.xlu0 %v295_v17, %s7299_s25 }
  0x3b   : > { %377 = vrot.lane.b32.xlu2 %v300_v19, %s7299_s25  ;;  %375 = vrot.lane.b32.xlu1 %v299_v20, %s7299_s25 }
  0x3c   : > { %373 = vrot.lane.b32.xlu0 %v298_v21, %s7299_s25 }
  0x43   : > { %383 = vrot.lane.b32.xlu2 %v303_v22, %s7299_s25  ;;  %381 = vrot.lane.b32.xlu1 %v302_v23, %s7299_s25 }
  0x44   : > { %379 = vrot.lane.b32.xlu0 %v301_v24, %s7299_s25 }
  0x4b   : > { %1484 = vrot.lane.b32.xlu2 %v1408_v9, %s7299_s25  ;;  %1456 = vrot.lane.b32.xlu1 %v7404_v25, %s7299_s25 }
  0x4c   : > { %1454 = vrot.lane.b32.xlu0 %v1393_v13, %s7299_s25 }
  0x53   : > { %1482 = vrot.lane.b32.xlu2 %v1407_v14, %s7299_s25  ;;  %1452 = vrot.lane.b32.xlu1 %v1392_v18, %s7299_s25 }
  0x54   : > { %1486 = vrot.lane.b32.xlu0 %v7411_v26, %s7299_s25 }
  0x5b   : > { %1165 = vrot.lane.b32.xlu2 %v1407_v14, %s7300_s26  ;;  %1137 = vrot.lane.b32.xlu1 %v1393_v13, %s7300_s26  ;;  %v813_v13 = vld [vmem:[%s7355_s24 + $0x3a0] sm:$0xff] }
  0x5c   : > { %1135 = vrot.lane.b32.xlu0 %v1392_v18, %s7300_s26 }
  0x63   : > { %874 = vrot.lane.b32.xlu2 %v812_v27, %s7301_s27  ;;  %872 = vrot.lane.b32.xlu1 %v811_v28, %s7301_s27  ;;  %v829_v27 = vld [vmem:[%s7355_s24 + $0x43c] sm:$0xff]  ;;  %v828_v28 = vld [vmem:[%s7355_s24 + $0x434] sm:$0xff] }
  0x64   : > { %1167 = vrot.lane.b32.xlu0 %v1408_v9, %s7300_s26 }
  0x6b   : > { %1133 = vrot.lane.b32.xlu2 %v1073_v29, %s7300_s26  ;;  %904 = vrot.lane.b32.xlu1 %v827_v30, %s7301_s27 }
  0x6c   : > { %902 = vrot.lane.b32.xlu0 %v826_v31, %s7301_s27 }
  0x6d   : > { %v352_v32 = vpop.permute.xlu2 %351 }
  0x6e   : > { %v407_v36 = vrot.slane %v352_v32, 4 }
  0x73   : > { %611 = vrot.lane.b32.xlu2 %v549_v33, %s7302_s28  ;;  %609 = vrot.lane.b32.xlu1 %v548_v34, %s7302_s28 }
  0x74   : > { %1163 = vrot.lane.b32.xlu0 %v1088_v35, %s7300_s26 }
  0x75   : > { %v7437_v37 = vpop.permute.xlu2 %353 }
  0x76   : > { %v408_v38 = vrot.slane %v7437_v37, 4 }
  0x78   : > { %v443_v39 = vsel %vm433_vm0, %v407_v36, %v408_v38 }
  0x79   : > { %v444_v42 = vsel %vm435_vm1, %v352_v32, %v443_v39  ;;  %v814_v32 = vld [vmem:[%s7355_s24 + $0x3a8] sm:$0xff] }
  0x7a   : > { %523 = vst [vmem:[#allocation2 + $0x100] sm:$0xff] %v444_v42  ;;  %v551_v42 = vld [vmem:[%s7355_s24 + $0x278] sm:$0xff] }
  0x7b   : > { %1458 = vrot.lane.b32.xlu2 %v1395_v40, %s7299_s25  ;;  %641 = vrot.lane.b32.xlu1 %v564_v41, %s7302_s28  ;;  %v565_v41 = vld [vmem:[%s7355_s24 + $0x304] sm:$0xff] }
  0x7c   : > { %639 = vrot.lane.b32.xlu0 %v563_v43, %s7302_s28 }
  0x7d   : > { %v7448_v44 = vpop.permute.xlu2 %359 }
  0x7e   : > { %v411_v6 = vrot.slane %v7448_v44, 4 }
  0x83   : > { %1490 = vrot.lane.b32.xlu2 %v7451_v45, %s7299_s25  ;;  %1488 = vrot.lane.b32.xlu1 %v1410_v46, %s7299_s25 }
  0x84   : > { %1460 = vrot.lane.b32.xlu0 %v7455_v47, %s7299_s25 }
  0x85   : > { %v7462_v48 = vpop.permute.xlu2 %365  ;;  %v348_v49 = vpop.permute.xlu1 %347 }
  0x86   : > { %v344_v50 = vpop.permute.xlu0 %343  ;;  %v405_v56 = vrot.slane %v348_v49, 4  ;;  %v414_v19 = vrot.slane %v7462_v48, 4 }
  0x87   : > { %v403_v59 = vrot.slane %v344_v50, 4 }
  0x8b   : > { %607 = vrot.lane.b32.xlu2 %v547_v51, %s7302_s28  ;;  %900 = vrot.lane.b32.xlu1 %v825_v52, %s7301_s27 }
  0x8c   : > { %870 = vrot.lane.b32.xlu0 %v810_v53, %s7301_s27 }
  0x8d   : > { %v7470_v54 = vpop.permute.xlu2 %371  ;;  %v350_v55 = vpop.permute.xlu1 %349 }
  0x8e   : > { %v406_v57 = vrot.slane %v350_v55, 4  ;;  %v346_v58 = vpop.permute.xlu0 %345  ;;  %v417_v34 = vrot.slane %v7470_v54, 4 }
  0x8f   : > { %v404_v60 = vrot.slane %v346_v58, 4 }
  0x90   : > { %v439_v61 = vsel %vm433_vm0, %v405_v56, %v406_v57  ;;  %v441_v62 = vsel %vm433_vm0, %v406_v57, %v407_v36 }
  0x91   : > { %v440_v63 = vsel %vm435_vm1, %v348_v49, %v439_v61  ;;  %v442_v0 = vsel %vm435_vm1, %v350_v55, %v441_v62  ;;  %v434_v1 = vsel %vm433_vm0, %v403_v59, %v404_v60  ;;  %v437_v2 = vsel %vm433_vm0, %v404_v60, %v405_v56  ;;  %v550_v49 = vld [vmem:[%s7355_s24 + $0x270] sm:$0xff] }
  0x92   : > { %521 = vst [vmem:[#allocation2 + $0xf0] sm:$0xff] %v440_v63  ;;  %v436_v4 = vsel %vm435_vm1, %v344_v50, %v434_v1  ;;  %v438_v5 = vsel %vm435_vm1, %v346_v58, %v437_v2  ;;  %v7303_v50 = vmov 0   ;;  %v7545_v62 = vld [vmem:[%s7355_s24 + $0x50] sm:$0xff]  ;;  %v1397_v63 = vld [vmem:[%s7355_s24 + $0x48] sm:$0xff] }
  0x93   : > { %522 = vst [vmem:[#allocation2 + $0xf8] sm:$0xff] %v442_v0  ;;  %1141 = vrot.lane.b32.xlu2 %v1395_v40, %s7300_s26  ;;  %1139 = vrot.lane.b32.xlu1 %v7404_v25, %s7300_s26 }
  0x94   : > { %519 = vst [vmem:[#allocation2 + $0xe0] sm:$0xff] %v436_v4  ;;  %637 = vrot.lane.b32.xlu0 %v562_v3, %s7302_s28  ;;  %7287 = vset.pattern.permute.xlu1 %v7303_v50  ;;  %v566_v3 = vld [vmem:[%s7355_s24 + $0x30c] sm:$0xff] }
  0x95   : > { %520 = vst [vmem:[#allocation2 + $0xe8] sm:$0xff] %v438_v5  ;;  %v7486_v7 = vpop.permute.xlu2 %377  ;;  %v358_v8 = vpop.permute.xlu1 %357  ;;  %7288 = vset.pattern.permute.xlu0 %v7303_v50 }
  0x96   : > { %v410_v9 = vrot.slane %v358_v8, 4  ;;  %v356_v10 = vpop.permute.xlu0 %355  ;;  %1654 = vst [vmem:[#allocation2 + $0x620] sm:$0xff] %v7303_v50  ;;  %v420_v53 = vrot.slane %v7486_v7, 4 }
  0x97   : > { %v409_v11 = vrot.slane %v356_v10, 4  ;;  %1668 = vst [vmem:[#allocation2 + $0x690] sm:$0xff] %v7303_v50 }
  0x98   : > { %v449_v12 = vsel %vm433_vm0, %v410_v9, %v411_v6  ;;  %1655 = vst [vmem:[#allocation2 + $0x628] sm:$0xff] %v7303_v50 }
  0x99   : > { %v450_v14 = vsel %vm435_vm1, %v358_v8, %v449_v12  ;;  %v445_v15 = vsel %vm433_vm0, %v408_v38, %v409_v11  ;;  %v447_v16 = vsel %vm433_vm0, %v409_v11, %v410_v9  ;;  %1656 = vst [vmem:[#allocation2 + $0x630] sm:$0xff] %v7303_v50 }
  0x9a   : > { %526 = vst [vmem:[#allocation2 + $0x118] sm:$0xff] %v450_v14  ;;  %v446_v17 = vsel %vm435_vm1, %v7437_v37, %v445_v15  ;;  %v448_v18 = vsel %vm435_vm1, %v356_v10, %v447_v16 }
  0x9b   : > { %524 = vst [vmem:[#allocation2 + $0x108] sm:$0xff] %v446_v17  ;;  %876 = vrot.lane.b32.xlu2 %v813_v13, %s7301_s27  ;;  %1171 = vrot.lane.b32.xlu1 %v1410_v46, %s7300_s26 }
  0x9c   : > { %525 = vst [vmem:[#allocation2 + $0x110] sm:$0xff] %v448_v18  ;;  %1169 = vrot.lane.b32.xlu0 %v7411_v26, %s7300_s26 }
  0x9d   : > { %v7501_v20 = vpop.permute.xlu2 %383  ;;  %v364_v21 = vpop.permute.xlu1 %363  ;;  %1657 = vst [vmem:[#allocation2 + $0x638] sm:$0xff] %v7303_v50  ;;  %v6900_v5 = vld [vmem:[#allocation2 + $0x620] sm:$0xf] }
  0x9e   : > { %v413_v22 = vrot.slane %v364_v21, 4  ;;  %v362_v23 = vpop.permute.xlu0 %361  ;;  %1658 = vst [vmem:[#allocation2 + $0x640] sm:$0xff] %v7303_v50  ;;  %v11450_v8 = vrot.slane %v7501_v20, 4  ;;  %v7254_v9 = vld [vmem:[#allocation2 + $0x68c] sm:$0xf0] }
  0x9f   : > { %v412_v24 = vrot.slane %v362_v23, 4  ;;  %v6902_v10 = vld [vmem:[#allocation2 + $0x690] sm:$0xf0]  ;;  %v7562_v13 = vor.u32 %v7254_v9, %v6900_v5  ;;  %1659 = vst [vmem:[#allocation2 + $0x648] sm:$0xff] %v7303_v50  ;;  %v7198_v5 = vld [vmem:[#allocation2 + $0x4cc] sm:$0xf0] }
  0xa0   : > { %v455_v25 = vsel %vm433_vm0, %v413_v22, %v414_v19  ;;  %1660 = vst [vmem:[#allocation2 + $0x650] sm:$0xff] %v7303_v50 }
  0xa1   : > { %v456_v29 = vsel %vm435_vm1, %v364_v21, %v455_v25  ;;  %v451_v30 = vsel %vm433_vm0, %v411_v6, %v412_v24  ;;  %v453_v31 = vsel %vm433_vm0, %v412_v24, %v413_v22  ;;  %v7240_v6 = vld [vmem:[#allocation2 + $0x624] sm:$0xf]  ;;  %11987 = vst [vmem:[#allocation4_spill] sm:$0xff] %v7562_v13  ;;  %2995 = vmatpush.bf16.msra.mxu0 %v7562_v13  ;;  %v1412_v24 = vld [vmem:[%s7355_s24 + $0xdc] sm:$0xff] }
  0xa2   : > { %529 = vst [vmem:[#allocation2 + $0x130] sm:$0xff] %v456_v29  ;;  %v452_v26 = vsel %vm435_vm1, %v7448_v44, %v451_v30  ;;  %v454_v33 = vsel %vm435_vm1, %v362_v23, %v453_v31  ;;  %v7565_v14 = vor.u32 %v7240_v6, %v6902_v10 }
  0xa3   : > { %527 = vst [vmem:[#allocation2 + $0x120] sm:$0xff] %v452_v26  ;;  %908 = vrot.lane.b32.xlu2 %v829_v27, %s7301_s27  ;;  %906 = vrot.lane.b32.xlu1 %v828_v28, %s7301_s27 }
  0xa4   : > { %528 = vst [vmem:[#allocation2 + $0x128] sm:$0xff] %v454_v33  ;;  %878 = vrot.lane.b32.xlu0 %v814_v32, %s7301_s27  ;;  %3008 = vmatpush.bf16.msra.mxu1 %v7565_v14 }
  0xa5   : > { %v7517_v35 = vpop.permute.xlu2 %1484  ;;  %v370_v36 = vpop.permute.xlu1 %369  ;;  %11988 = vst [vmem:[#allocation5_spill] sm:$0xff] %v7565_v14 }
  0xa6   : > { %v416_v37 = vrot.slane %v370_v36, 4  ;;  %v368_v38 = vpop.permute.xlu0 %367  ;;  %v1528_v54 = vrot.slane %v7517_v35, 4  ;;  %1661 = vst [vmem:[#allocation2 + $0x658] sm:$0xff] %v7303_v50 }
  0xa7   : > { %v415_v39 = vrot.slane %v368_v38, 4  ;;  %1662 = vst [vmem:[#allocation2 + $0x660] sm:$0xff] %v7303_v50 }
  0xa8   : > { %v461_v40 = vsel %vm433_vm0, %v416_v37, %v417_v34  ;;  %1663 = vst [vmem:[#allocation2 + $0x668] sm:$0xff] %v7303_v50 }
  0xa9   : > { %v462_v43 = vsel %vm435_vm1, %v370_v36, %v461_v40  ;;  %v457_v44 = vsel %vm433_vm0, %v414_v19, %v415_v39  ;;  %v459_v46 = vsel %vm433_vm0, %v415_v39, %v416_v37  ;;  %v7575_v19 = vld [vmem:[%s7355_s24 + $0xe4] sm:$0xff]  ;;  %1664 = vst [vmem:[#allocation2 + $0x670] sm:$0xff] %v7303_v50 }
  0xaa   : > { %532 = vst [vmem:[#allocation2 + $0x148] sm:$0xff] %v462_v43  ;;  %v458_v51 = vsel %vm435_vm1, %v7462_v48, %v457_v44  ;;  %v460_v52 = vsel %vm435_vm1, %v368_v38, %v459_v46  ;;  %v6908_v37 = vld [vmem:[#allocation2 + $0x628] sm:$0xf]  ;;  %v7241_v38 = vld [vmem:[#allocation2 + $0x62c] sm:$0xf] }
  0xab   : > { %530 = vst [vmem:[#allocation2 + $0x138] sm:$0xff] %v458_v51  ;;  %643 = vrot.lane.b32.xlu2 %v565_v41, %s7302_s28  ;;  %615 = vrot.lane.b32.xlu1 %v551_v42, %s7302_s28  ;;  %v830_v40 = vld [vmem:[%s7355_s24 + $0x444] sm:$0xff]  ;;  %v816_v41 = vld [vmem:[%s7355_s24 + $0x3b8] sm:$0xff] }
  0xac   : > { %531 = vst [vmem:[#allocation2 + $0x140] sm:$0xff] %v460_v52  ;;  %613 = vrot.lane.b32.xlu0 %v550_v49, %s7302_s28  ;;  %v815_v49 = vld [vmem:[%s7355_s24 + $0x3b0] sm:$0xff] }
  0xad   : > { %v1483_v55 = vpop.permute.xlu2 %1482  ;;  %v376_v56 = vpop.permute.xlu1 %375  ;;  %1665 = vst [vmem:[#allocation2 + $0x678] sm:$0xff] %v7303_v50 }
  0xae   : > { %v1527_v48 = vrot.slane %v1483_v55, 4  ;;  %v419_v57 = vrot.slane %v376_v56, 4  ;;  %v374_v58 = vpop.permute.xlu0 %373  ;;  %1666 = vst [vmem:[#allocation2 + $0x680] sm:$0xff] %v7303_v50 }
  0xaf   : > { %v418_v59 = vrot.slane %v374_v58, 4  ;;  %1667 = vst [vmem:[#allocation2 + $0x688] sm:$0xff] %v7303_v50 }
  0xb0   : > { %v1570_v60 = vsel %vm433_vm0, %v1527_v48, %v1528_v54  ;;  %v465_v61 = vsel %vm433_vm0, %v419_v57, %v420_v53  ;;  %1669 = vst [vmem:[#allocation2 + $0x698] sm:$0xff] %v7303_v50 }
  0xb1   : > { %v1571_v0 = vsel %vm435_vm1, %v1483_v55, %v1570_v60  ;;  %v466_v1 = vsel %vm435_vm1, %v376_v56, %v465_v61  ;;  %v463_v2 = vsel %vm433_vm0, %v418_v59, %v419_v57  ;;  %1670 = vst [vmem:[#allocation2 + $0x6a0] sm:$0xff] %v7303_v50  ;;  %v553_v57 = vld [vmem:[%s7355_s24 + $0x288] sm:$0xff] }
  0xb2   : > { %1640 = vst [vmem:[#allocation2 + $0x5b0] sm:$0xff] %v1571_v0  ;;  %v464_v4 = vsel %vm435_vm1, %v374_v58, %v463_v2  ;;  %v552_v58 = vld [vmem:[%s7355_s24 + $0x280] sm:$0xff]  ;;  %v6692_v2 = vld [vmem:[#allocation2 + $0x468] sm:$0xf] }
  0xb3   : > { %534 = vst [vmem:[#allocation2 + $0x158] sm:$0xff] %v466_v1  ;;  %1464 = vrot.lane.b32.xlu2 %v7545_v62, %s7299_s25  ;;  %1462 = vrot.lane.b32.xlu1 %v1397_v63, %s7299_s25 }
  0xb4   : > { %533 = vst [vmem:[#allocation2 + $0x150] sm:$0xff] %v464_v4  ;;  %645 = vrot.lane.b32.xlu0 %v566_v3, %s7302_s28  ;;  %v7199_v3 = vld [vmem:[#allocation2 + $0x4d4] sm:$0xf0]  ;;  %v6684_v4 = vld [vmem:[#allocation2 + $0x460] sm:$0xf] }
  0xb5   : > { %v7560_v11 = vpop.permute.xlu2 %1165  ;;  %v382_v12 = vpop.permute.xlu1 %381  ;;  %1671 = vst [vmem:[#allocation2 + $0x6a8] sm:$0xff] %v7303_v50 }
  0xb6   : > { %v422_v15 = vrot.slane %v382_v12, 4  ;;  %v380_v16 = vpop.permute.xlu0 %379  ;;  %1672 = vst [vmem:[#allocation2 + $0x6b0] sm:$0xff] %v7303_v50 }
  0xb7   : > { %v421_v17 = vrot.slane %v380_v16, 4  ;;  %1673 = vst [vmem:[#allocation2 + $0x6b8] sm:$0xff] %v7303_v50  ;;  %v7255_v42 = vld [vmem:[#allocation2 + $0x694] sm:$0xf0]  ;;  %v6910_v43 = vld [vmem:[#allocation2 + $0x698] sm:$0xf0] }
  0xb8   : > { %v471_v18 = vsel %vm433_vm0, %v422_v15, %v11450_v8  ;;  %1674 = vst [vmem:[#allocation2 + $0x6c0] sm:$0xff] %v7303_v50  ;;  %v7629_v51 = vor.u32 %v7255_v42, %v6908_v37  ;;  %v7631_v52 = vor.u32 %v7241_v38, %v6910_v43  ;;  %v7243_v8 = vld [vmem:[#allocation2 + $0x63c] sm:$0xf] }
  0xb9   : > { %v472_v21 = vsel %vm435_vm1, %v382_v12, %v471_v18  ;;  %v467_v22 = vsel %vm433_vm0, %v420_v53, %v421_v17  ;;  %v469_v23 = vsel %vm433_vm0, %v421_v17, %v422_v15  ;;  %1675 = vst [vmem:[#allocation2 + $0x6c8] sm:$0xff] %v7303_v50  ;;  %v7226_v60 = vld [vmem:[#allocation2 + $0x5ac] sm:$0xf0]  ;;  %v6794_v61 = vld [vmem:[#allocation2 + $0x5b0] sm:$0xf0] }
  0xba   : > { %537 = vst [vmem:[#allocation2 + $0x170] sm:$0xff] %v472_v21  ;;  %v468_v25 = vsel %vm435_vm1, %v7486_v7, %v467_v22  ;;  %v470_v27 = vsel %vm435_vm1, %v380_v16, %v469_v23  ;;  %3021 = vmatpush.bf16.msra.mxu2 %v7629_v51  ;;  %3034 = vmatpush.bf16.msra.mxu3 %v7631_v52  ;;  %v7184_v15 = vld [vmem:[#allocation2 + $0x464] sm:$0xf]  ;;  %v6686_v23 = vld [vmem:[#allocation2 + $0x4d0] sm:$0xf0] }
  0xbb   : > { %535 = vst [vmem:[#allocation2 + $0x160] sm:$0xff] %v468_v25  ;;  %1143 = vrot.lane.b32.xlu2 %v7455_v47, %s7300_s26  ;;  %1494 = vrot.lane.b32.xlu1 %v7575_v19, %s7299_s25 }
  0xbc   : > { %536 = vst [vmem:[#allocation2 + $0x168] sm:$0xff] %v470_v27  ;;  %1492 = vrot.lane.b32.xlu0 %v1412_v24, %s7299_s25  ;;  %v7185_v27 = vld [vmem:[#allocation2 + $0x46c] sm:$0xf] }
  0xbd   : > { %v7591_v28 = vpop.permute.xlu2 %874  ;;  %v7593_v29 = vpop.permute.xlu1 %1456  ;;  %1676 = vst [vmem:[#allocation2 + $0x6d0] sm:$0xff] %v7303_v50 }
  0xbe   : > { %v1514_v7 = vrot.slane %v7593_v29, 4  ;;  %v1455_v30 = vpop.permute.xlu0 %1454  ;;  %11989 = vst [vmem:[#allocation6_spill] sm:$0xff] %v7629_v51 }
  0xbf   : > { %v1513_v31 = vrot.slane %v1455_v30, 4  ;;  %11990 = vst [vmem:[#allocation7_spill] sm:$0xff] %v7631_v52 }
  0xc0   : > { %1677 = vst [vmem:[#allocation2 + $0x6d8] sm:$0xff] %v7303_v50 }
  0xc1   : > { %v1544_v47 = vsel %vm433_vm0, %v1513_v31, %v1514_v7  ;;  %1678 = vst [vmem:[#allocation2 + $0x6e0] sm:$0xff] %v7303_v50 }
  0xc2   : > { %v1545_v32 = vsel %vm435_vm1, %v1455_v30, %v1544_v47  ;;  %1679 = vst [vmem:[#allocation2 + $0x6e8] sm:$0xff] %v7303_v50  ;;  %v6694_v30 = vld [vmem:[#allocation2 + $0x4d8] sm:$0xf0]  ;;  %v7672_v47 = vor.u32 %v7198_v5, %v6684_v4 }
  0xc3   : > { %1627 = vst [vmem:[#allocation2 + $0x548] sm:$0xff] %v1545_v32  ;;  %1175 = vrot.lane.b32.xlu2 %v1412_v24, %s7300_s26  ;;  %1173 = vrot.lane.b32.xlu1 %v7451_v45, %s7300_s26 }
  0xc4   : > { %1145 = vrot.lane.b32.xlu0 %v1397_v63, %s7300_s26  ;;  %1680 = vst [vmem:[#allocation2 + $0x6f0] sm:$0xff] %v7303_v50  ;;  %v831_v63 = vld [vmem:[%s7355_s24 + $0x44c] sm:$0xff] }
  0xc5   : > { %v1134_v26 = vpop.permute.xlu2 %1133  ;;  %v1453_v33 = vpop.permute.xlu1 %1452  ;;  %1681 = vst [vmem:[#allocation2 + $0x6f8] sm:$0xff] %v7303_v50 }
  0xc6   : > { %v1512_v34 = vrot.slane %v1453_v33, 4  ;;  %v7612_v36 = vpop.permute.xlu0 %1486  ;;  %11995 = vst [vmem:[#allocation12_spill] sm:$0xff] %v7672_v47 }
  0xc7   : > { %v1529_v39 = vrot.slane %v7612_v36, 4 }
  0xc8   : > { %v1542_v45 = vsel %vm433_vm0, %v1512_v34, %v1513_v31  ;;  %v932_v31 = vrot.slane %v7591_v28, 4  ;;  %v7682_v34 = vor.u32 %v7184_v15, %v6686_v23 }
  0xc9   : > { %v1543_v44 = vsel %vm435_vm1, %v1453_v33, %v1542_v45  ;;  %v1572_v46 = vsel %vm433_vm0, %v1528_v54, %v1529_v39  ;;  %v1193_v54 = vrot.slane %v1134_v26, 4  ;;  %v7680_v33 = vor.u32 %v7199_v3, %v6692_v2  ;;  %v7745_v3 = vld [vmem:[%s7355_s24 + $0x60] sm:$0xff] }
  0xca   : > { %1626 = vst [vmem:[#allocation2 + $0x540] sm:$0xff] %v1543_v44  ;;  %v1573_v53 = vsel %vm435_vm1, %v7517_v35, %v1572_v46  ;;  %v6800_v0 = vld [vmem:[#allocation2 + $0x548] sm:$0xf]  ;;  %v7213_v1 = vld [vmem:[#allocation2 + $0x54c] sm:$0xf]  ;;  %v7689_v45 = vor.u32 %v7185_v27, %v6694_v30  ;;  %v7704_v46 = vld [vmem:[%s7355_s24 + $0x58] sm:$0xff] }
  0xcb   : > { %1641 = vst [vmem:[#allocation2 + $0x5b8] sm:$0xff] %v1573_v53  ;;  %910 = vrot.lane.b32.xlu2 %v830_v40, %s7301_s27  ;;  %882 = vrot.lane.b32.xlu1 %v816_v41, %s7301_s27  ;;  %v1209_v41 = vrot.slane %v7560_v11, 4 }
  0xcc   : > { %880 = vrot.lane.b32.xlu0 %v815_v49, %s7301_s27  ;;  %11996 = vst [vmem:[#allocation13_spill] sm:$0xff] %v7680_v33  ;;  %v568_v49 = vld [vmem:[%s7355_s24 + $0x31c] sm:$0xff] }
  0xcd   : > { %v7640_v55 = vpop.permute.xlu2 %611  ;;  %v7642_v56 = vpop.permute.xlu1 %1137  ;;  %11997 = vst [vmem:[#allocation14_spill] sm:$0xff] %v7682_v34 }
  0xce   : > { %v11458_v35 = vrot.slane %v7642_v56, 4  ;;  %v1136_v48 = vpop.permute.xlu0 %1135  ;;  %11998 = vst [vmem:[#allocation15_spill] sm:$0xff] %v7689_v45 }
  0xcf   : > { %v1194_v59 = vrot.slane %v1136_v48, 4 }
  0xd1   : > { %v1223_v6 = vsel %vm433_vm0, %v1193_v54, %v1194_v59  ;;  %v1226_v9 = vsel %vm433_vm0, %v1194_v59, %v11458_v35  ;;  %v6792_v10 = vld [vmem:[#allocation2 + $0x540] sm:$0xf]  ;;  %v7212_v12 = vld [vmem:[#allocation2 + $0x544] sm:$0xf] }
  0xd2   : > { %v1225_v16 = vsel %vm1224_vm2, %v1134_v26, %v1223_v6  ;;  %v1227_v50 = vsel %vm1224_vm2, %v1136_v48, %v1226_v9  ;;  %v7659_v17 = vor.u32 %v7226_v60, %v6792_v10  ;;  %v7661_v18 = vor.u32 %v7212_v12, %v6794_v61  ;;  %v7227_v21 = vld [vmem:[#allocation2 + $0x5b4] sm:$0xf0]  ;;  %v6802_v22 = vld [vmem:[#allocation2 + $0x5b8] sm:$0xf0]  ;;  %v228_v60 = vld [vmem:[%s7355_s24 + $0x8] sm:$0xff] }
  0xd3   : > { %1308 = vst [vmem:[#allocation2 + $0x380] sm:$0xff] %v1225_v16  ;;  %619 = vrot.lane.b32.xlu2 %v553_v57, %s7302_s28  ;;  %617 = vrot.lane.b32.xlu1 %v552_v58, %s7302_s28  ;;  %v7665_v24 = vor.u32 %v7227_v21, %v6800_v0  ;;  %v7667_v25 = vor.u32 %v7213_v1, %v6802_v22  ;;  %v567_v48 = vld [vmem:[%s7355_s24 + $0x314] sm:$0xff]  ;;  %v242_v61 = vld [vmem:[%s7355_s24 + $0x9c] sm:$0xff]  ;;  %v11453_v12 = vrot.slane %v7640_v55, 4 }
  0xd4   : > { %11991 = vst [vmem:[#allocation8_spill] sm:$0xff] %v7659_v17  ;;  %912 = vrot.lane.b32.xlu0 %v831_v63, %s7301_s27  ;;  %2996 = vmatpush.bf16.msra.mxu0 %v7659_v17  ;;  %v7736_v0 = vld [vmem:[%s7355_s24 + $0xf4] sm:$0xff]  ;;  %v1414_v1 = vld [vmem:[%s7355_s24 + $0xec] sm:$0xff] }
  0xd5   : > { %11992 = vst [vmem:[#allocation9_spill] sm:$0xff] %v7661_v18  ;;  %3009 = vmatpush.bf16.msra.mxu1 %v7661_v18  ;;  %3022 = vmatpush.bf16.msra.mxu2 %v7665_v24  ;;  %v7676_v32 = vpop.permute.xlu2 %1458  ;;  %v7678_v26 = vpop.permute.xlu1 %872 }
  0xd6   : > { %11993 = vst [vmem:[#allocation10_spill] sm:$0xff] %v7665_v24  ;;  %3035 = vmatpush.bf16.msra.mxu3 %v7667_v25  ;;  %v1515_v37 = vrot.slane %v7676_v32, 4  ;;  %v931_v38 = vrot.slane %v7678_v26, 4  ;;  %v7687_v40 = vpop.permute.xlu0 %1167 }
  0xd7   : > { %11994 = vst [vmem:[#allocation11_spill] sm:$0xff] %v7667_v25  ;;  %v11456_v42 = vrot.slane %v7687_v40, 4 }
  0xd8   : > { %1309 = vst [vmem:[#allocation2 + $0x388] sm:$0xff] %v1227_v50  ;;  %v1546_v43 = vsel %vm433_vm0, %v1514_v7, %v1515_v37  ;;  %v963_v44 = vsel %vm433_vm0, %v931_v38, %v932_v31  ;;  %2997 = vmatpush.bf16.msra.mxu0 %v7672_v47 }
  0xd9   : > { %v1547_v53 = vsel %vm435_vm1, %v7593_v29, %v1546_v43  ;;  %v964_v54 = vsel %vm961_vm3, %v7678_v26, %v963_v44  ;;  %v1254_v7 = vsel %vm433_vm0, %v1209_v41, %v11456_v42  ;;  %3023 = vmatpush.bf16.msra.mxu2 %v7680_v33  ;;  %3010 = vmatpush.bf16.msra.mxu1 %v7682_v34 }
  0xda   : > { %1628 = vst [vmem:[#allocation2 + $0x550] sm:$0xff] %v1547_v53  ;;  %v1255_v57 = vsel %vm1224_vm2, %v7560_v11, %v1254_v7  ;;  %3036 = vmatpush.bf16.msra.mxu3 %v7689_v45  ;;  %v304_v7 = vld [vmem:[%s7355_s24 + $0x1ec] sm:$0xff]  ;;  %v7244_v45 = vld [vmem:[#allocation2 + $0x644] sm:$0xf] }
  0xdb   : > { %1046 = vst [vmem:[#allocation2 + $0x2a8] sm:$0xff] %v964_v54  ;;  %1466 = vrot.lane.b32.xlu2 %v7704_v46, %s7299_s25  ;;  %649 = vrot.lane.b32.xlu1 %v568_v49, %s7302_s28 }
  0xdc   : > { %1323 = vst [vmem:[#allocation2 + $0x3f8] sm:$0xff] %v1255_v57  ;;  %647 = vrot.lane.b32.xlu0 %v567_v48, %s7302_s28 }
  0xdd   : > { %v7725_v29 = vpop.permute.xlu2 %1490  ;;  %v7727_v58 = vpop.permute.xlu1 %904  ;;  %256 = vst [vmem:[#allocation2 + $0x8] sm:$0xff] %v228_v60 }
  0xde   : > { %v11455_v59 = vrot.slane %v7727_v58, 4  ;;  %v7730_v11 = vpop.permute.xlu0 %902  ;;  %270 = vst [vmem:[#allocation2 + $0x78] sm:$0xff] %v242_v61 }
  0xdf   : > { %v946_v63 = vrot.slane %v7730_v11, 4  ;;  %v6584_v5 = vld [vmem:[#allocation2 + $0x388] sm:$0xf]  ;;  %v7157_v6 = vld [vmem:[#allocation2 + $0x38c] sm:$0xf] }
  0xe1   : > { %v991_v2 = vsel %vm433_vm0, %v946_v63, %v11455_v59  ;;  %v555_v59 = vld [vmem:[%s7355_s24 + $0x298] sm:$0xff] }
  0xe2   : > { %v992_v4 = vsel %vm961_vm3, %v7730_v11, %v991_v2  ;;  %v6476_v48 = vld [vmem:[#allocation2 + $0x2a8] sm:$0xf]  ;;  %v7129_v57 = vld [vmem:[#allocation2 + $0x2ac] sm:$0xf] }
  0xe3   : > { %1060 = vst [vmem:[#allocation2 + $0x318] sm:$0xff] %v992_v4  ;;  %1498 = vrot.lane.b32.xlu2 %v7736_v0, %s7299_s25  ;;  %1496 = vrot.lane.b32.xlu1 %v1414_v1, %s7299_s25  ;;  %v7171_v9 = vld [vmem:[#allocation2 + $0x3f4] sm:$0xf0]  ;;  %v6586_v10 = vld [vmem:[#allocation2 + $0x3f8] sm:$0xf0] }
  0xe4   : > { %1468 = vrot.lane.b32.xlu0 %v7745_v3, %s7299_s25  ;;  %v7755_v15 = vor.u32 %v7171_v9, %v6584_v5  ;;  %v7757_v16 = vor.u32 %v7157_v6, %v6586_v10  ;;  %v817_v10 = vld [vmem:[%s7355_s24 + $0x3c0] sm:$0xff] }
  0xe5   : > { %v608_v50 = vpop.permute.xlu2 %607  ;;  %v610_v21 = vpop.permute.xlu1 %609 }
  0xe6   : > { %11999 = vst [vmem:[#allocation16_spill] sm:$0xff] %v7755_v15  ;;  %3024 = vmatpush.bf16.msra.mxu2 %v7755_v15  ;;  %3037 = vmatpush.bf16.msra.mxu3 %v7757_v16  ;;  %v667_v22 = vrot.slane %v608_v50, 4  ;;  %v668_v23 = vrot.slane %v610_v21, 4  ;;  %v1164_v27 = vpop.permute.xlu0 %1163  ;;  %v6934_v15 = vld [vmem:[#allocation2 + $0x6b0] sm:$0xf0] }
  0xe7   : > { %12000 = vst [vmem:[#allocation17_spill] sm:$0xff] %v7757_v16  ;;  %v1208_v30 = vrot.slane %v1164_v27, 4 }
  0xe8   : > { %v697_v43 = vsel %vm433_vm0, %v667_v22, %v668_v23  ;;  %v700_v44 = vsel %vm433_vm0, %v668_v23, %v11453_v12  ;;  %v6576_v23 = vld [vmem:[#allocation2 + $0x380] sm:$0xf] }
  0xe9   : > { %v699_v49 = vsel %vm698_vm4, %v608_v50, %v697_v43  ;;  %v701_v53 = vsel %vm698_vm4, %v610_v21, %v700_v44  ;;  %v1252_v54 = vsel %vm433_vm0, %v1208_v30, %v1209_v41  ;;  %v1339_v21 = vld [vmem:[%s7355_s24 + $0x38] sm:$0xff]  ;;  %v1353_v30 = vld [vmem:[%s7355_s24 + $0xcc] sm:$0xff] }
  0xea   : > { %782 = vst [vmem:[#allocation2 + $0x1c0] sm:$0xff] %v699_v49  ;;  %v1253_v60 = vsel %vm1224_vm2, %v1164_v27, %v1252_v54  ;;  %v7143_v61 = vld [vmem:[#allocation2 + $0x314] sm:$0xf0]  ;;  %v6478_v2 = vld [vmem:[#allocation2 + $0x318] sm:$0xf0]  ;;  %v11451_v49 = vrot.slane %v7725_v29, 4 }
  0xeb   : > { %783 = vst [vmem:[#allocation2 + $0x1c8] sm:$0xff] %v701_v53  ;;  %1149 = vrot.lane.b32.xlu2 %v7704_v46, %s7300_s26  ;;  %1147 = vrot.lane.b32.xlu1 %v7545_v62, %s7300_s26  ;;  %v7774_v4 = vor.u32 %v7143_v61, %v6476_v48  ;;  %v7776_v41 = vor.u32 %v7129_v57, %v6478_v2  ;;  %v7156_v27 = vld [vmem:[#allocation2 + $0x384] sm:$0xf] }
  0xec   : > { %1322 = vst [vmem:[#allocation2 + $0x3f0] sm:$0xff] %v1253_v60  ;;  %385 = vrot.lane.b32.xlu0 %v304_v7, %s7299_s25  ;;  %v227_v57 = vld [vmem:[%s7355_s24] sm:$0xff]  ;;  %v241_v60 = vld [vmem:[%s7355_s24 + $0x94] sm:$0xff] }
  0xed   : > { %12001 = vst [vmem:[#allocation18_spill] sm:$0xff] %v7774_v4  ;;  %3025 = vmatpush.bf16.msra.mxu2 %v7774_v4  ;;  %3038 = vmatpush.bf16.msra.mxu3 %v7776_v41  ;;  %v7781_v5 = vpop.permute.xlu2 %1141  ;;  %v7783_v6 = vpop.permute.xlu1 %641 }
  0xee   : > { %12002 = vst [vmem:[#allocation19_spill] sm:$0xff] %v7776_v41  ;;  %v684_v46 = vrot.slane %v7783_v6, 4  ;;  %v7786_v9 = vpop.permute.xlu0 %639  ;;  %v11462_v26 = vrot.slane %v7781_v5, 4 }
  0xef   : > { %v11457_v62 = vrot.slane %v7786_v9, 4  ;;  %1367 = vst [vmem:[#allocation2 + $0x478] sm:$0xff] %v1339_v21 }
  0xf0   : > { %1381 = vst [vmem:[#allocation2 + $0x4e8] sm:$0xff] %v1353_v30 }
  0xf1   : > { %v728_v50 = vsel %vm433_vm0, %v11457_v62, %v684_v46  ;;  %255 = vst [vmem:[#allocation2] sm:$0xff] %v227_v57  ;;  %v1352_v62 = vld [vmem:[%s7355_s24 + $0xc4] sm:$0xff] }
  0xf2   : > { %v729_v22 = vsel %vm698_vm4, %v7786_v9, %v728_v50  ;;  %269 = vst [vmem:[#allocation2 + $0x70] sm:$0xff] %v241_v60  ;;  %v7101_v57 = vld [vmem:[#allocation2 + $0x1cc] sm:$0xf] }
  0xf3   : > { %797 = vst [vmem:[#allocation2 + $0x238] sm:$0xff] %v729_v22  ;;  %884 = vrot.lane.b32.xlu2 %v817_v10, %s7301_s27  ;;  %1179 = vrot.lane.b32.xlu1 %v1414_v1, %s7300_s26  ;;  %v7170_v43 = vld [vmem:[#allocation2 + $0x3ec] sm:$0xf0]  ;;  %v6578_v44 = vld [vmem:[#allocation2 + $0x3f0] sm:$0xf0]  ;;  %v833_v22 = vld [vmem:[%s7355_s24 + $0x45c] sm:$0xff] }
  0xf4   : > { %1177 = vrot.lane.b32.xlu0 %v7575_v19, %s7300_s26  ;;  %v7804_v53 = vor.u32 %v7170_v43, %v6576_v23  ;;  %v7806_v54 = vor.u32 %v7156_v27, %v6578_v44  ;;  %v832_v23 = vld [vmem:[%s7355_s24 + $0x454] sm:$0xff]  ;;  %v6368_v44 = vld [vmem:[#allocation2 + $0x1c8] sm:$0xf]  ;;  %1380 = vst [vmem:[#allocation2 + $0x4e0] sm:$0xff] %v1352_v62 }
  0xf5   : > { %v7808_v7 = vpop.permute.xlu2 %876  ;;  %v1489_v48 = vpop.permute.xlu1 %1488 }
  0xf6   : > { %12003 = vst [vmem:[#allocation20_spill] sm:$0xff] %v7804_v53  ;;  %2998 = vmatpush.bf16.msra.mxu0 %v7804_v53  ;;  %3011 = vmatpush.bf16.msra.mxu1 %v7806_v54  ;;  %v11454_v1 = vrot.slane %v7808_v7, 4  ;;  %v1530_v19 = vrot.slane %v1489_v48, 4  ;;  %v7815_v61 = vpop.permute.xlu0 %1460 }
  0xf7   : > { %12004 = vst [vmem:[#allocation21_spill] sm:$0xff] %v7806_v54  ;;  %v11452_v2 = vrot.slane %v7815_v61, 4  ;;  %v556_v54 = vld [vmem:[%s7355_s24 + $0x2a0] sm:$0xff] }
  0xf8   : > { %v965_v10 = vsel %vm433_vm0, %v932_v31, %v11454_v1  ;;  %v1574_v50 = vsel %vm433_vm0, %v1529_v39, %v1530_v19  ;;  %v1576_v21 = vsel %vm433_vm0, %v1530_v19, %v11451_v49  ;;  %v818_v31 = vld [vmem:[%s7355_s24 + $0x3c8] sm:$0xff] }
  0xf9   : > { %v966_v27 = vsel %vm961_vm3, %v7591_v28, %v965_v10  ;;  %v1575_v30 = vsel %vm435_vm1, %v7612_v36, %v1574_v50  ;;  %v1577_v43 = vsel %vm435_vm1, %v1489_v48, %v1576_v21  ;;  %v1548_v39 = vsel %vm433_vm0, %v1515_v37, %v11452_v2  ;;  %v7087_v10 = vld [vmem:[#allocation2 + $0x154] sm:$0xf0]  ;;  %v6262_v37 = vld [vmem:[#allocation2 + $0x158] sm:$0xf0]  ;;  %v6260_v50 = vld [vmem:[#allocation2 + $0xe8] sm:$0xf] }
  0xfa   : > { %1047 = vst [vmem:[#allocation2 + $0x2b0] sm:$0xff] %v966_v27  ;;  %v1549_v60 = vsel %vm435_vm1, %v7676_v32, %v1548_v39  ;;  %v7115_v19 = vld [vmem:[#allocation2 + $0x234] sm:$0xf0]  ;;  %v6370_v28 = vld [vmem:[#allocation2 + $0x238] sm:$0xf0]  ;;  %v1338_v2 = vld [vmem:[%s7355_s24 + $0x30] sm:$0xff] }
  0xfb   : > { %1642 = vst [vmem:[#allocation2 + $0x5c0] sm:$0xff] %v1575_v30  ;;  %916 = vrot.lane.b32.xlu2 %v833_v22, %s7301_s27  ;;  %914 = vrot.lane.b32.xlu1 %v832_v23, %s7301_s27  ;;  %v7846_v36 = vor.u32 %v7115_v19, %v6368_v44  ;;  %v7848_v48 = vor.u32 %v7101_v57, %v6370_v28  ;;  %v7073_v21 = vld [vmem:[#allocation2 + $0xec] sm:$0xf]  ;;  %v6152_v27 = vld [vmem:[#allocation2 + $0x8] sm:$0xf] }
  0xfc   : > { %1643 = vst [vmem:[#allocation2 + $0x5c8] sm:$0xff] %v1577_v43  ;;  %886 = vrot.lane.b32.xlu0 %v818_v31, %s7301_s27  ;;  %v7045_v32 = vld [vmem:[#allocation2 + $0xc] sm:$0xf]  ;;  %v7059_v30 = vld [vmem:[#allocation2 + $0x74] sm:$0xf0]  ;;  %v7857_v28 = vor.u32 %v7073_v21, %v6262_v37  ;;  %v569_v1 = vld [vmem:[%s7355_s24 + $0x324] sm:$0xff] }
  0xfd   : > { %12005 = vst [vmem:[#allocation22_spill] sm:$0xff] %v7846_v36  ;;  %3026 = vmatpush.bf16.msra.mxu2 %v7846_v36  ;;  %3039 = vmatpush.bf16.msra.mxu3 %v7848_v48  ;;  %v7853_v22 = vpop.permute.xlu2 %908  ;;  %v901_v23 = vpop.permute.xlu1 %900  ;;  %v6154_v43 = vld [vmem:[#allocation2 + $0x78] sm:$0xf0]  ;;  %v6924_v44 = vld [vmem:[#allocation2 + $0x638] sm:$0xf]  ;;  %v7865_v42 = vor.u32 %v7059_v30, %v6152_v27  ;;  %v554_v37 = vld [vmem:[%s7355_s24 + $0x290] sm:$0xff] }
  0xfe   : > { %12006 = vst [vmem:[#allocation23_spill] sm:$0xff] %v7848_v48  ;;  %v945_v39 = vrot.slane %v901_v23, 4  ;;  %v871_v31 = vpop.permute.xlu0 %870  ;;  %v7257_v57 = vld [vmem:[#allocation2 + $0x6a4] sm:$0xf0]  ;;  %v6926_v49 = vld [vmem:[#allocation2 + $0x6a8] sm:$0xf0]  ;;  %v7875_v11 = vor.u32 %v7045_v32, %v6154_v43 }
  0xff   : > { %1629 = vst [vmem:[#allocation2 + $0x558] sm:$0xff] %v1549_v60  ;;  %v930_v19 = vrot.slane %v871_v31, 4  ;;  %v7855_v60 = vor.u32 %v7087_v10, %v6260_v50  ;;  %v7878_v50 = vor.u32 %v7257_v57, %v6924_v44  ;;  %v6708_v27 = vld [vmem:[#allocation2 + $0x478] sm:$0xf]  ;;  %v7187_v32 = vld [vmem:[#allocation2 + $0x47c] sm:$0xf] }
 0x100   : > { %12008 = vst [vmem:[#allocation25_spill] sm:$0xff] %v7857_v28  ;;  %v989_v12 = vsel %vm433_vm0, %v945_v39, %v946_v63  ;;  %v7201_v43 = vld [vmem:[#allocation2 + $0x4e4] sm:$0xf0]  ;;  %v6710_v39 = vld [vmem:[#allocation2 + $0x4e8] sm:$0xf0]  ;;  %v12014_v44 = vrot.slane %v7642_v56, 4 }
 0x101   : > { %12007 = vst [vmem:[#allocation24_spill] sm:$0xff] %v7855_v60  ;;  %v990_v35 = vsel %vm961_vm3, %v901_v23, %v989_v12  ;;  %v960_v10 = vsel %vm433_vm0, %v930_v19, %v931_v38  ;;  %3027 = vmatpush.bf16.msra.mxu2 %v7855_v60  ;;  %3040 = vmatpush.bf16.msra.mxu3 %v7857_v28  ;;  %v7256_v48 = vld [vmem:[#allocation2 + $0x69c] sm:$0xf0] }
 0x102   : > { %12009 = vst [vmem:[#allocation26_spill] sm:$0xff] %v7865_v42  ;;  %v962_v63 = vsel %vm961_vm3, %v871_v31, %v960_v10 }
 0x103   : > { %1366 = vst [vmem:[#allocation2 + $0x470] sm:$0xff] %v1338_v2  ;;  %v7880_v2 = vor.u32 %v7243_v8, %v6926_v49  ;;  %651 = vrot.lane.b32.xlu2 %v569_v1, %s7302_s28  ;;  %623 = vrot.lane.b32.xlu1 %v555_v59, %s7302_s28  ;;  %v7229_v12 = vld [vmem:[#allocation2 + $0x5c4] sm:$0xf0]  ;;  %v6818_v49 = vld [vmem:[#allocation2 + $0x5c8] sm:$0xf0] }
 0x104   : > { %12010 = vst [vmem:[#allocation27_spill] sm:$0xff] %v7875_v11  ;;  %621 = vrot.lane.b32.xlu0 %v554_v37, %s7302_s28  ;;  %v7909_v37 = vld [vmem:[%s7355_s24 + $0x70] sm:$0xff] }
 0x105   : > { %1059 = vst [vmem:[#allocation2 + $0x310] sm:$0xff] %v990_v35  ;;  %3028 = vmatpush.bf16.msra.mxu2 %v7865_v42  ;;  %3041 = vmatpush.bf16.msra.mxu3 %v7875_v11  ;;  %v7888_v35 = vpop.permute.xlu2 %643  ;;  %v1140_v62 = vpop.permute.xlu1 %1139  ;;  %v244_v11 = vld [vmem:[%s7355_s24 + $0xac] sm:$0xff]  ;;  %v12025_v42 = vrot.slane %v7853_v22, 4 }
 0x106   : > { %12011 = vst [vmem:[#allocation28_spill] sm:$0xff] %v7878_v50  ;;  %v6816_v38 = vld [vmem:[#allocation2 + $0x558] sm:$0xf]  ;;  %v7215_v8 = vld [vmem:[#allocation2 + $0x55c] sm:$0xf]  ;;  %v11459_v1 = vrot.slane %v7888_v35, 4  ;;  %v638_v21 = vpop.permute.xlu0 %637 }
 0x107   : > { %12012 = vst [vmem:[#allocation29_spill] sm:$0xff] %v7880_v2  ;;  %v1196_v59 = vrot.slane %v1140_v62, 4  ;;  %v682_v23 = vrot.slane %v638_v21, 4  ;;  %v7893_v30 = vor.u32 %v7229_v12, %v6816_v38  ;;  %v7906_v10 = vor.u32 %v7215_v8, %v6818_v49 }
 0x108   : > { %1045 = vst [vmem:[#allocation2 + $0x2a0] sm:$0xff] %v962_v63  ;;  %v730_v31 = vsel %vm433_vm0, %v684_v46, %v11459_v1  ;;  %v7912_v63 = vld [vmem:[%s7355_s24 + $0x68] sm:$0xff] }
 0x109   : > { %3073 = vmatpush.bf16.msrb.mxu2 %v7878_v50  ;;  %3086 = vmatpush.bf16.msrb.mxu3 %v7880_v2  ;;  %12013 = vst [vmem:[#allocation30_spill] sm:$0xff] %v7893_v30  ;;  %v1228_v57 = vsel %vm433_vm0, %v12014_v44, %v1196_v59  ;;  %v1230_v19 = vsel %vm433_vm0, %v1196_v59, %v11462_v26  ;;  %v12016_v44 = vrot.slane %v7786_v9, 4  ;;  %v570_v2 = vld [vmem:[%s7355_s24 + $0x32c] sm:$0xff] }
 0x10a   : > { %12015 = vst [vmem:[#allocation31_spill] sm:$0xff] %v7906_v10  ;;  %v731_v38 = vsel %vm698_vm4, %v7783_v6, %v730_v31  ;;  %v1229_v46 = vsel %vm1224_vm2, %v7642_v56, %v1228_v57  ;;  %v1231_v12 = vsel %vm1224_vm2, %v1140_v62, %v1230_v19  ;;  %v7926_v26 = vor.u32 %v7201_v43, %v6708_v27  ;;  %v7950_v43 = vld [vmem:[%s7355_s24 + $0x104] sm:$0xff] }
 0x10b   : > { %v726_v1 = vsel %vm433_vm0, %v682_v23, %v12016_v44  ;;  %798 = vst [vmem:[#allocation2 + $0x240] sm:$0xff] %v731_v38  ;;  %v7928_v56 = vor.u32 %v7187_v32, %v6710_v39  ;;  %1472 = vrot.lane.b32.xlu2 %v7909_v37, %s7299_s25  ;;  %1470 = vrot.lane.b32.xlu1 %v7912_v63, %s7299_s25  ;;  %v12021_v39 = vrot.slane %v7687_v40, 4  ;;  %v7959_v38 = vld [vmem:[%s7355_s24 + $0xfc] sm:$0xff]  ;;  %v7086_v44 = vld [vmem:[#allocation2 + $0x14c] sm:$0xf0] }
 0x10c   : > { %v7142_v59 = vld [vmem:[#allocation2 + $0x30c] sm:$0xf0]  ;;  %v6470_v8 = vld [vmem:[#allocation2 + $0x310] sm:$0xf0]  ;;  %v727_v49 = vsel %vm698_vm4, %v638_v21, %v726_v1  ;;  %12017 = vst [vmem:[#allocation32_spill] sm:$0xff] %v7926_v26  ;;  %653 = vrot.lane.b32.xlu0 %v570_v2, %s7302_s28 }
 0x10d   : > { %3074 = vmatpush.bf16.msrb.mxu2 %v7893_v30  ;;  %3087 = vmatpush.bf16.msrb.mxu3 %v7906_v10  ;;  %12018 = vst [vmem:[#allocation33_spill] sm:$0xff] %v7928_v56  ;;  %v7941_v1 = vpop.permute.xlu2 %1464  ;;  %v7943_v21 = vpop.permute.xlu1 %1171  ;;  %v305_v2 = vld [vmem:[%s7355_s24 + $0x1f4] sm:$0xff]  ;;  %v7044_v30 = vld [vmem:[#allocation2 + $0x4] sm:$0xf] }
 0x10e   : > { %1310 = vst [vmem:[#allocation2 + $0x390] sm:$0xff] %v1229_v46  ;;  %v11463_v27 = vrot.slane %v7943_v21, 4  ;;  %v1170_v32 = vpop.permute.xlu0 %1169 }
 0x10f   : > { %v6468_v6 = vld [vmem:[#allocation2 + $0x2a0] sm:$0xf]  ;;  %v7128_v31 = vld [vmem:[#allocation2 + $0x2a4] sm:$0xf]  ;;  %1311 = vst [vmem:[#allocation2 + $0x398] sm:$0xff] %v1231_v12  ;;  %v1211_v23 = vrot.slane %v1170_v32, 4 }
 0x110   : > { %v7934_v9 = vor.u32 %v7142_v59, %v6468_v6  ;;  %v7936_v62 = vor.u32 %v7128_v31, %v6470_v8  ;;  %796 = vst [vmem:[#allocation2 + $0x230] sm:$0xff] %v727_v49  ;;  %v229_v59 = vld [vmem:[%s7355_s24 + $0x10] sm:$0xff]  ;;  %v6360_v8 = vld [vmem:[#allocation2 + $0x1c0] sm:$0xf]  ;;  %v7100_v49 = vld [vmem:[#allocation2 + $0x1c4] sm:$0xf] }
 0x111   : > { %3075 = vmatpush.bf16.msrb.mxu2 %v7926_v26  ;;  %3088 = vmatpush.bf16.msrb.mxu3 %v7928_v56  ;;  %v1256_v57 = vsel %vm433_vm0, %v12021_v39, %v1211_v23  ;;  %v1258_v19 = vsel %vm433_vm0, %v1211_v23, %v11463_v27  ;;  %v243_v6 = vld [vmem:[%s7355_s24 + $0xa4] sm:$0xff]  ;;  %v6252_v23 = vld [vmem:[#allocation2 + $0xe0] sm:$0xf]  ;;  %v6254_v27 = vld [vmem:[#allocation2 + $0x150] sm:$0xf0]  ;;  %257 = vst [vmem:[#allocation2 + $0x10] sm:$0xff] %v229_v59 }
 0x112   : > { %12019 = vst [vmem:[#allocation34_spill] sm:$0xff] %v7934_v9  ;;  %2999 = vmatpush.bf16.msra.mxu0 %v7934_v9  ;;  %3012 = vmatpush.bf16.msra.mxu1 %v7936_v62  ;;  %v1257_v46 = vsel %vm1224_vm2, %v7687_v40, %v1256_v57  ;;  %v1259_v12 = vsel %vm1224_vm2, %v1170_v32, %v1258_v19  ;;  %v230_v56 = vld [vmem:[%s7355_s24 + $0x18] sm:$0xff]  ;;  %v6144_v26 = vld [vmem:[#allocation2] sm:$0xf]  ;;  %v6146_v59 = vld [vmem:[#allocation2 + $0x70] sm:$0xf0] }
 0x113   : > { %12020 = vst [vmem:[#allocation35_spill] sm:$0xff] %v7936_v62  ;;  %387 = vrot.lane.b32.xlu2 %v305_v2, %s7299_s25  ;;  %1502 = vrot.lane.b32.xlu1 %v7950_v43, %s7299_s25 }
 0x114   : > { %1324 = vst [vmem:[#allocation2 + $0x400] sm:$0xff] %v1257_v46  ;;  %1500 = vrot.lane.b32.xlu0 %v7959_v38, %s7299_s25  ;;  %v7072_v46 = vld [vmem:[#allocation2 + $0xe4] sm:$0xf] }
 0x115   : > { %1325 = vst [vmem:[#allocation2 + $0x408] sm:$0xff] %v1259_v12  ;;  %v7976_v57 = vpop.permute.xlu2 %1143  ;;  %v907_v19 = vpop.permute.xlu1 %906 }
 0x116   : > { %v11484_v12 = vrot.slane %v7976_v57, 4  ;;  %v948_v31 = vrot.slane %v907_v19, 4  ;;  %v7980_v10 = vpop.permute.xlu0 %878  ;;  %271 = vst [vmem:[#allocation2 + $0x80] sm:$0xff] %v243_v6  ;;  %v12024_v6 = vrot.slane %v7727_v58, 4 }
 0x117   : > { %v7114_v40 = vld [vmem:[#allocation2 + $0x22c] sm:$0xf0]  ;;  %v6362_v32 = vld [vmem:[#allocation2 + $0x230] sm:$0xf0]  ;;  %258 = vst [vmem:[#allocation2 + $0x18] sm:$0xff] %v230_v56 }
 0x118   : > { %v7972_v39 = vor.u32 %v7114_v40, %v6360_v8  ;;  %v7974_v2 = vor.u32 %v7100_v49, %v6362_v32  ;;  %v7986_v49 = vor.u32 %v7086_v44, %v6252_v23  ;;  %v7058_v40 = vld [vmem:[#allocation2 + $0x6c] sm:$0xf0]  ;;  %v12023_v32 = vrot.slane %v7781_v5, 4  ;;  %272 = vst [vmem:[#allocation2 + $0x88] sm:$0xff] %v244_v11  ;;  %v7046_v62 = vld [vmem:[#allocation2 + $0x14] sm:$0xf] }
 0x119   : > { %v993_v28 = vsel %vm433_vm0, %v12024_v6, %v948_v31  ;;  %v995_v8 = vsel %vm433_vm0, %v948_v31, %v12025_v42  ;;  %v7999_v44 = vor.u32 %v7072_v46, %v6254_v27  ;;  %v6916_v23 = vld [vmem:[#allocation2 + $0x630] sm:$0xf]  ;;  %v12028_v6 = vrot.slane %v7808_v7, 4  ;;  %v7242_v42 = vld [vmem:[#allocation2 + $0x634] sm:$0xf]  ;;  %v306_v31 = vld [vmem:[%s7355_s24 + $0x1fc] sm:$0xff] }
 0x11a   : > { %12022 = vst [vmem:[#allocation36_spill] sm:$0xff] %v7974_v2  ;;  %3000 = vmatpush.bf16.msra.mxu0 %v7972_v39  ;;  %3013 = vmatpush.bf16.msra.mxu1 %v7974_v2  ;;  %v1232_v50 = vsel %vm433_vm0, %v12023_v32, %v11484_v12  ;;  %v994_v60 = vsel %vm961_vm3, %v7727_v58, %v993_v28  ;;  %v12027_v12 = vrot.slane %v7980_v10, 4  ;;  %v6918_v27 = vld [vmem:[#allocation2 + $0x6a0] sm:$0xf0]  ;;  %v6600_v46 = vld [vmem:[#allocation2 + $0x398] sm:$0xf] }
 0x11b   : > { %12026 = vst [vmem:[#allocation37_spill] sm:$0xff] %v7999_v44  ;;  %v1233_v56 = vsel %vm1224_vm2, %v7781_v5, %v1232_v50  ;;  %v996_v32 = vsel %vm961_vm3, %v907_v19, %v995_v8  ;;  %v7159_v5 = vld [vmem:[#allocation2 + $0x39c] sm:$0xf]  ;;  %v8016_v58 = vor.u32 %v7058_v40, %v6144_v26  ;;  %v8018_v28 = vor.u32 %v7044_v30, %v6146_v59  ;;  %v1340_v30 = vld [vmem:[%s7355_s24 + $0x40] sm:$0xff]  ;;  %v6808_v8 = vld [vmem:[#allocation2 + $0x550] sm:$0xf] }
 0x11c   : > { %v967_v41 = vsel %vm433_vm0, %v12028_v6, %v12027_v12  ;;  %1312 = vst [vmem:[#allocation2 + $0x3a0] sm:$0xff] %v1233_v56  ;;  %v7173_v50 = vld [vmem:[#allocation2 + $0x404] sm:$0xf0]  ;;  %v6602_v19 = vld [vmem:[#allocation2 + $0x408] sm:$0xf0]  ;;  %v8020_v12 = vor.u32 %v7256_v48, %v6916_v23  ;;  %1153 = vrot.lane.b32.xlu2 %v7912_v63, %s7300_s26  ;;  %1151 = vrot.lane.b32.xlu1 %v7745_v3, %s7300_s26 }
 0x11d   : > { %v968_v11 = vsel %vm961_vm3, %v7808_v7, %v967_v41  ;;  %1061 = vst [vmem:[#allocation2 + $0x320] sm:$0xff] %v994_v60  ;;  %v8026_v41 = vor.u32 %v7173_v50, %v6600_v46  ;;  %v8028_v7 = vor.u32 %v7159_v5, %v6602_v19  ;;  %v8030_v60 = vor.u32 %v7242_v42, %v6918_v27  ;;  %v8033_v26 = vpop.permute.xlu2 %1175  ;;  %v8035_v48 = vpop.permute.xlu1 %615  ;;  %v7228_v40 = vld [vmem:[#allocation2 + $0x5bc] sm:$0xf0]  ;;  %v6810_v23 = vld [vmem:[#allocation2 + $0x5c0] sm:$0xf0] }
 0x11e   : > { %3001 = vmatpush.bf16.msra.mxu0 %v7986_v49  ;;  %3014 = vmatpush.bf16.msra.mxu1 %v7999_v44  ;;  %12029 = vst [vmem:[#allocation38_spill] sm:$0xff] %v8016_v58  ;;  %v11489_v3 = vrot.slane %v8035_v48, 4  ;;  %v614_v63 = vpop.permute.xlu0 %613  ;;  %v8046_v56 = vld [vmem:[%s11446_s2] sm:$0xf]  ;;  %v6700_v6 = vld [vmem:[#allocation2 + $0x470] sm:$0xf] }
 0x11f   : > { %12030 = vst [vmem:[#allocation39_spill] sm:$0xff] %v8018_v28  ;;  %389 = vrot.lane.b32.xlu0 %v306_v31, %s7299_s25  ;;  %3076 = vmatpush.bf16.msrb.mxu2 %v8026_v41  ;;  %v670_v59 = vrot.slane %v614_v63, 4  ;;  %v12035_v42 = vrot.slane %v7640_v55, 4  ;;  %v8056_v31 = vor.u32 %v7228_v40, %v6808_v8  ;;  %v7200_v46 = vld [vmem:[#allocation2 + $0x4dc] sm:$0xf0]  ;;  %v819_v8 = vld [vmem:[%s7355_s24 + $0x3d0] sm:$0xff] }
 0x120   : > { %12031 = vst [vmem:[#allocation40_spill] sm:$0xff] %v8020_v12  ;;  %3089 = vmatpush.bf16.msrb.mxu3 %v8028_v7  ;;  %v7186_v5 = vld [vmem:[#allocation2 + $0x474] sm:$0xf]  ;;  %v6702_v50 = vld [vmem:[#allocation2 + $0x4e0] sm:$0xf0]  ;;  %3029 = vmatmul.bf16.vlgmr.msra.gmra.mxu2 %v8046_v56  ;;  %v11536_v33 = vrot.slane %v8033_v26, 4 }
 0x121   : > { %1062 = vst [vmem:[#allocation2 + $0x328] sm:$0xff] %v996_v32  ;;  %v7214_v32 = vld [vmem:[#allocation2 + $0x554] sm:$0xf]  ;;  %v702_v27 = vsel %vm433_vm0, %v12035_v42, %v670_v59  ;;  %3042 = vmatmul.bf16.vlgmr.msra.gmra.mxu3 %v8046_v56  ;;  %v6160_v44 = vld [vmem:[#allocation2 + $0x10] sm:$0xf] }
 0x122   : > { %12032 = vst [vmem:[#allocation41_spill] sm:$0xff] %v8026_v41  ;;  %3002 = vmatpush.bf16.msra.mxu0 %v8016_v58  ;;  %3015 = vmatpush.bf16.msra.mxu1 %v8018_v28  ;;  %v1355_v41 = vld [vmem:[%s7355_s24 + $0xdc] sm:$0xff]  ;;  %v6278_v28 = vld [vmem:[#allocation2 + $0x168] sm:$0xf0] }
 0x123   : > { %12033 = vst [vmem:[#allocation42_spill] sm:$0xff] %v8028_v7  ;;  %v8064_v7 = vor.u32 %v7214_v32, %v6810_v23  ;;  %v8074_v23 = vor.u32 %v7186_v5, %v6702_v50  ;;  %v1341_v32 = vld [vmem:[%s7355_s24 + $0x48] sm:$0xff]  ;;  %v7172_v50 = vld [vmem:[#allocation2 + $0x3fc] sm:$0xf0] }
 0x124   : > { %12034 = vst [vmem:[#allocation43_spill] sm:$0xff] %v8030_v60  ;;  %888 = vrot.lane.b32.xlu2 %v819_v8, %s7301_s27  ;;  %1183 = vrot.lane.b32.xlu1 %v7959_v38, %s7300_s26  ;;  %v6594_v8 = vld [vmem:[#allocation2 + $0x400] sm:$0xf0]  ;;  %v7060_v36 = vld [vmem:[#allocation2 + $0x7c] sm:$0xf0] }
 0x125   : > { %1048 = vst [vmem:[#allocation2 + $0x2b8] sm:$0xff] %v968_v11  ;;  %v704_v11 = vsel %vm433_vm0, %v670_v59, %v11489_v3  ;;  %3003 = vmatmul.bf16.vlgmr.msra.gmra.mxu0 %v8046_v56  ;;  %3016 = vmatmul.bf16.vlgmr.msra.gmra.mxu1 %v8046_v56  ;;  %v1354_v3 = vld [vmem:[%s7355_s24 + $0xd4] sm:$0xff]  ;;  %v1463_v19 = vpop.permute.xlu1 %1462 }
 0x126   : > { %3047 = vmatpush.bf16.msrb.mxu0 %v8020_v12  ;;  %3060 = vmatpush.bf16.msrb.mxu1 %v8030_v60  ;;  %1368 = vst [vmem:[#allocation2 + $0x480] sm:$0xff] %v1340_v30  ;;  %v703_v30 = vsel %vm698_vm4, %v7640_v55, %v702_v27  ;;  %v705_v42 = vsel %vm698_vm4, %v614_v63, %v704_v11  ;;  %v8090_v5 = vpop.permute.xlu0 %645  ;;  %v7074_v60 = vld [vmem:[#allocation2 + $0xf4] sm:$0xf] }
 0x127   : > { %12036 = vst [vmem:[#allocation44_spill] sm:$0xff] %v8056_v31  ;;  %v8072_v27 = vor.u32 %v7200_v46, %v6700_v6  ;;  %1181 = vrot.lane.b32.xlu0 %v7736_v0, %s7300_s26  ;;  %v1517_v46 = vrot.slane %v1463_v19, 4  ;;  %v11497_v38 = vrot.slane %v8090_v5, 4 }
 0x128   : > { %12037 = vst [vmem:[#allocation45_spill] sm:$0xff] %v8064_v7  ;;  %v7145_v40 = vld [vmem:[#allocation2 + $0x324] sm:$0xf0]  ;;  %v6494_v59 = vld [vmem:[#allocation2 + $0x328] sm:$0xf0] }
 0x129   : > { %784 = vst [vmem:[#allocation2 + $0x1d0] sm:$0xff] %v703_v30 }
 0x12a   : > { %785 = vst [vmem:[#allocation2 + $0x1d8] sm:$0xff] %v705_v42  ;;  %3048 = vmatpush.bf16.msrb.mxu0 %v8056_v31  ;;  %3061 = vmatpush.bf16.msrb.mxu1 %v8064_v7  ;;  %v8084_v42 = vpop.permute.xlu2 %910  ;;  %v6268_v7 = vld [vmem:[#allocation2 + $0xf0] sm:$0xf] }
 0x12b   : > { %12038 = vst [vmem:[#allocation46_spill] sm:$0xff] %v8072_v27  ;;  %v11492_v6 = vrot.slane %v8084_v42, 4 }
 0x12c   : > { %v6492_v55 = vld [vmem:[#allocation2 + $0x2b8] sm:$0xf]  ;;  %v7131_v63 = vld [vmem:[#allocation2 + $0x2bc] sm:$0xf]  ;;  %12039 = vst [vmem:[#allocation47_spill] sm:$0xff] %v8074_v23 }
 0x12d   : > { %v8080_v11 = vor.u32 %v7145_v40, %v6492_v55  ;;  %v8082_v30 = vor.u32 %v7131_v63, %v6494_v59  ;;  %1382 = vst [vmem:[#allocation2 + $0x4f0] sm:$0xff] %v1354_v3  ;;  %v12042_v40 = vrot.slane %v7853_v22, 4  ;;  %v12043_v59 = vrot.slane %v7815_v61, 4 }
 0x12e   : > { %1369 = vst [vmem:[#allocation2 + $0x488] sm:$0xff] %v1341_v32  ;;  %v12044_v55 = vrot.slane %v7941_v1, 4  ;;  %3049 = vmatpush.bf16.msrb.mxu0 %v8072_v27  ;;  %3062 = vmatpush.bf16.msrb.mxu1 %v8074_v23  ;;  %v7089_v23 = vld [vmem:[#allocation2 + $0x164] sm:$0xf0] }
 0x12f   : > { %12040 = vst [vmem:[#allocation48_spill] sm:$0xff] %v8080_v11  ;;  %3077 = vmatpush.bf16.msrb.mxu2 %v8080_v11  ;;  %3090 = vmatpush.bf16.msrb.mxu3 %v8082_v30  ;;  %v997_v0 = vsel %vm433_vm0, %v12042_v40, %v11492_v6  ;;  %v1550_v3 = vsel %vm433_vm0, %v12043_v59, %v1517_v46  ;;  %v12045_v59 = vrot.slane %v7888_v35, 4 }
 0x130   : > { %12041 = vst [vmem:[#allocation49_spill] sm:$0xff] %v8082_v30  ;;  %v1552_v63 = vsel %vm433_vm0, %v1517_v46, %v12044_v55  ;;  %v998_v32 = vsel %vm961_vm3, %v7853_v22, %v997_v0  ;;  %v1551_v40 = vsel %vm435_vm1, %v7815_v61, %v1550_v3  ;;  %v6592_v55 = vld [vmem:[#allocation2 + $0x390] sm:$0xf]  ;;  %v7158_v30 = vld [vmem:[#allocation2 + $0x394] sm:$0xf]  ;;  %v834_v61 = vld [vmem:[%s7355_s24 + $0x464] sm:$0xff] }
 0x131   : > { %1383 = vst [vmem:[#allocation2 + $0x4f8] sm:$0xff] %v1355_v41  ;;  %v1553_v6 = vsel %vm435_vm1, %v1463_v19, %v1552_v63  ;;  %v732_v46 = vsel %vm433_vm0, %v12045_v59, %v11497_v38  ;;  %v8120_v11 = vor.u32 %v7172_v50, %v6592_v55  ;;  %v8122_v22 = vor.u32 %v7158_v30, %v6594_v8  ;;  %v835_v0 = vld [vmem:[%s7355_s24 + $0x46c] sm:$0xff]  ;;  %v820_v19 = vld [vmem:[%s7355_s24 + $0x3d8] sm:$0xff]  ;;  %v7144_v3 = vld [vmem:[#allocation2 + $0x31c] sm:$0xf0]  ;;  %v8133_v30 = vpop.permute.xlu1 %1494 }
 0x132   : > { %1063 = vst [vmem:[#allocation2 + $0x330] sm:$0xff] %v998_v32  ;;  %v733_v41 = vsel %vm698_vm4, %v7888_v35, %v732_v46  ;;  %v6486_v63 = vld [vmem:[#allocation2 + $0x320] sm:$0xf0]  ;;  %920 = vrot.lane.b32.xlu2 %v835_v0, %s7301_s27  ;;  %918 = vrot.lane.b32.xlu1 %v834_v61, %s7301_s27  ;;  %v8131_v35 = vpop.permute.xlu2 %619  ;;  %v6484_v50 = vld [vmem:[#allocation2 + $0x2b0] sm:$0xf]  ;;  %v1493_v32 = vpop.permute.xlu0 %1492 }
 0x133   : > { %12046 = vst [vmem:[#allocation50_spill] sm:$0xff] %v8120_v11  ;;  %3050 = vmatpush.bf16.msrb.mxu0 %v8120_v11  ;;  %3063 = vmatpush.bf16.msrb.mxu1 %v8122_v22  ;;  %v7130_v8 = vld [vmem:[#allocation2 + $0x2b4] sm:$0xf]  ;;  %v1532_v46 = vrot.slane %v1493_v32, 4  ;;  %v6376_v55 = vld [vmem:[#allocation2 + $0x1d0] sm:$0xf] }
 0x134   : > { %12047 = vst [vmem:[#allocation51_spill] sm:$0xff] %v8122_v22  ;;  %890 = vrot.lane.b32.xlu0 %v820_v19, %s7301_s27  ;;  %v8139_v59 = vor.u32 %v7130_v8, %v6486_v63  ;;  %v7088_v0 = vld [vmem:[#allocation2 + $0x15c] sm:$0xf0]  ;;  %v6270_v61 = vld [vmem:[#allocation2 + $0x160] sm:$0xf0]  ;;  %v571_v19 = vld [vmem:[%s7355_s24 + $0x334] sm:$0xff] }
 0x135   : > { %1630 = vst [vmem:[#allocation2 + $0x560] sm:$0xff] %v1551_v40  ;;  %v8137_v40 = vor.u32 %v7144_v3, %v6484_v50  ;;  %v7116_v38 = vld [vmem:[#allocation2 + $0x23c] sm:$0xf0]  ;;  %v6378_v22 = vld [vmem:[#allocation2 + $0x240] sm:$0xf0]  ;;  %v12051_v63 = vrot.slane %v8133_v30, 4 }
 0x136   : > { %1631 = vst [vmem:[#allocation2 + $0x568] sm:$0xff] %v1553_v6  ;;  %v12050_v6 = vrot.slane %v7725_v29, 4  ;;  %v557_v8 = vld [vmem:[%s7355_s24 + $0x2a8] sm:$0xff]  ;;  %v8154_v16 = vor.u32 %v7116_v38, %v6376_v55  ;;  %v6384_v11 = vld [vmem:[#allocation2 + $0x1d8] sm:$0xf] }
 0x137   : > { %799 = vst [vmem:[#allocation2 + $0x248] sm:$0xff] %v733_v41  ;;  %v7102_v41 = vld [vmem:[#allocation2 + $0x1d4] sm:$0xf]  ;;  %3051 = vmatpush.bf16.msrb.mxu0 %v8137_v40  ;;  %3064 = vmatpush.bf16.msrb.mxu1 %v8139_v59  ;;  %v1580_v50 = vsel %vm433_vm0, %v1532_v46, %v12051_v63  ;;  %v7258_v63 = vld [vmem:[#allocation2 + $0x6ac] sm:$0xf0] }
 0x138   : > { %12048 = vst [vmem:[#allocation52_spill] sm:$0xff] %v8137_v40  ;;  %v1578_v3 = vsel %vm433_vm0, %v12050_v6, %v1532_v46  ;;  %v1581_v2 = vsel %vm435_vm1, %v1493_v32, %v1580_v50  ;;  %v8156_v4 = vor.u32 %v7102_v41, %v6378_v22  ;;  %v6276_v6 = vld [vmem:[#allocation2 + $0xf8] sm:$0xf]  ;;  %v6162_v40 = vld [vmem:[#allocation2 + $0x80] sm:$0xf0]  ;;  %v8162_v22 = vor.u32 %v7088_v0, %v6268_v7 }
 0x139   : > { %12049 = vst [vmem:[#allocation53_spill] sm:$0xff] %v8139_v59  ;;  %v1579_v59 = vsel %vm435_vm1, %v7725_v29, %v1578_v3  ;;  %v6932_v46 = vld [vmem:[#allocation2 + $0x640] sm:$0xf]  ;;  %v7103_v25 = vld [vmem:[#allocation2 + $0x1dc] sm:$0xf]  ;;  %v8164_v32 = vor.u32 %v7074_v60, %v6270_v61  ;;  %v8174_v3 = vor.u32 %v7089_v23, %v6276_v6  ;;  %v8187_v23 = vor.u32 %v7046_v62, %v6162_v40 }
 0x13a   : > { %12052 = vst [vmem:[#allocation54_spill] sm:$0xff] %v8154_v16  ;;  %655 = vrot.lane.b32.xlu2 %v571_v19, %s7302_s28  ;;  %627 = vrot.lane.b32.xlu1 %v557_v8, %s7302_s28  ;;  %v8172_v41 = vpop.permute.xlu2 %1466  ;;  %v7075_v50 = vld [vmem:[#allocation2 + $0xfc] sm:$0xf]  ;;  %v8178_v0 = vpop.permute.xlu0 %1145  ;;  %v8182_v19 = vor.u32 %v7060_v36, %v6160_v44  ;;  %v12064_v8 = vrot.slane %v7941_v1, 4  ;;  %v12065_v36 = vrot.slane %v7943_v21, 4 }
 0x13b   : > { %12053 = vst [vmem:[#allocation55_spill] sm:$0xff] %v8156_v4  ;;  %3052 = vmatpush.bf16.msrb.mxu0 %v8154_v16  ;;  %3065 = vmatpush.bf16.msrb.mxu1 %v8156_v4  ;;  %v11538_v7 = vrot.slane %v8172_v41, 4  ;;  %v8180_v61 = vor.u32 %v7075_v50, %v6278_v28  ;;  %v7047_v62 = vld [vmem:[#allocation2 + $0x1c] sm:$0xf]  ;;  %v6170_v50 = vld [vmem:[#allocation2 + $0x88] sm:$0xf0] }
 0x13c   : > { %1644 = vst [vmem:[#allocation2 + $0x5d0] sm:$0xff] %v1579_v59  ;;  %625 = vrot.lane.b32.xlu0 %v556_v54, %s7302_s28  ;;  %v8191_v54 = vor.u32 %v7244_v45, %v6934_v15  ;;  %v6168_v45 = vld [vmem:[#allocation2 + $0x18] sm:$0xf]  ;;  %v7061_v15 = vld [vmem:[#allocation2 + $0x84] sm:$0xf0] }
 0x13d   : > { %1645 = vst [vmem:[#allocation2 + $0x5d8] sm:$0xff] %v1581_v2  ;;  %v1174_v2 = vpop.permute.xlu1 %1173  ;;  %v1554_v28 = vsel %vm433_vm0, %v12064_v8, %v11538_v7  ;;  %v7259_v8 = vld [vmem:[#allocation2 + $0x6b4] sm:$0xf0] }
 0x13e   : > { %v7117_v29 = vld [vmem:[#allocation2 + $0x244] sm:$0xf0]  ;;  %v6386_v38 = vld [vmem:[#allocation2 + $0x248] sm:$0xf0]  ;;  %12054 = vst [vmem:[#allocation56_spill] sm:$0xff] %v8162_v22  ;;  %v1213_v60 = vrot.slane %v1174_v2, 4  ;;  %v1555_v40 = vsel %vm435_vm1, %v7941_v1, %v1554_v28 }
 0x13f   : > { %12055 = vst [vmem:[#allocation57_spill] sm:$0xff] %v8164_v32  ;;  %v8168_v59 = vor.u32 %v7117_v29, %v6384_v11  ;;  %v8170_v55 = vor.u32 %v7103_v25, %v6386_v38  ;;  %v11537_v25 = vrot.slane %v8178_v0, 4  ;;  %v8189_v11 = vor.u32 %v7258_v63, %v6932_v46  ;;  %3053 = vmatpush.bf16.msrb.mxu0 %v8162_v22  ;;  %v7245_v1 = vld [vmem:[#allocation2 + $0x64c] sm:$0xf]  ;;  %v6942_v28 = vld [vmem:[#allocation2 + $0x6b8] sm:$0xf0] }
 0x140   : > { %12058 = vst [vmem:[#allocation60_spill] sm:$0xff] %v8174_v3  ;;  %v1260_v44 = vsel %vm433_vm0, %v12065_v36, %v1213_v60  ;;  %v1262_v6 = vsel %vm433_vm0, %v1213_v60, %v11536_v33  ;;  %3066 = vmatpush.bf16.msrb.mxu1 %v8164_v32  ;;  %v12066_v29 = vrot.slane %v7976_v57, 4  ;;  %v6940_v60 = vld [vmem:[#allocation2 + $0x648] sm:$0xf] }
 0x141   : > { %12056 = vst [vmem:[#allocation58_spill] sm:$0xff] %v8168_v59  ;;  %3078 = vmatpush.bf16.msrb.mxu2 %v8168_v59  ;;  %3091 = vmatpush.bf16.msrb.mxu3 %v8170_v55  ;;  %v1261_v46 = vsel %vm1224_vm2, %v7943_v21, %v1260_v44  ;;  %v1263_v63 = vsel %vm1224_vm2, %v1174_v2, %v1262_v6  ;;  %v8221_v21 = vld [vmem:[%s7355_s24 + $0x80] sm:$0xff]  ;;  %v8224_v2 = vld [vmem:[%s7355_s24 + $0x78] sm:$0xff]  ;;  %v12085_v59 = vrot.slane %v8084_v42, 4 }
 0x142   : > { %12057 = vst [vmem:[#allocation59_spill] sm:$0xff] %v8170_v55  ;;  %v1234_v38 = vsel %vm433_vm0, %v12066_v29, %v11537_v25  ;;  %v8226_v44 = vor.u32 %v7061_v15, %v6168_v45  ;;  %v6716_v6 = vld [vmem:[#allocation2 + $0x480] sm:$0xf]  ;;  %v8237_v45 = vpop.permute.xlu2 %1498  ;;  %v7202_v25 = vld [vmem:[#allocation2 + $0x4ec] sm:$0xf0]  ;;  %1476 = vrot.lane.b32.xlu2 %v8221_v21, %s7299_s25  ;;  %1474 = vrot.lane.b32.xlu1 %v8224_v2, %s7299_s25 }
 0x143   : > { %12059 = vst [vmem:[#allocation61_spill] sm:$0xff] %v8180_v61  ;;  %v1235_v36 = vsel %vm1224_vm2, %v7976_v57, %v1234_v38  ;;  %3054 = vmatpush.bf16.msrb.mxu0 %v8182_v19  ;;  %v572_v57 = vld [vmem:[%s7355_s24 + $0x33c] sm:$0xff]  ;;  %v7230_v29 = vld [vmem:[#allocation2 + $0x5cc] sm:$0xf0]  ;;  %v7188_v38 = vld [vmem:[#allocation2 + $0x484] sm:$0xf] }
 0x144   : > { %12060 = vst [vmem:[#allocation62_spill] sm:$0xff] %v8182_v19  ;;  %3067 = vmatpush.bf16.msrb.mxu1 %v8187_v23  ;;  %v6826_v33 = vld [vmem:[#allocation2 + $0x5d0] sm:$0xf0]  ;;  %657 = vrot.lane.b32.xlu0 %v572_v57, %s7302_s28  ;;  %v7231_v7 = vld [vmem:[#allocation2 + $0x5d4] sm:$0xf0] }
 0x145   : > { %12061 = vst [vmem:[#allocation63_spill] sm:$0xff] %v8187_v23  ;;  %3079 = vmatpush.bf16.msrb.mxu2 %v8174_v3  ;;  %3092 = vmatpush.bf16.msrb.mxu3 %v8180_v61  ;;  %v8239_v15 = vpop.permute.xlu1 %882  ;;  %v6724_v61 = vld [vmem:[#allocation2 + $0x488] sm:$0xf]  ;;  %v8256_v23 = vor.u32 %v7202_v25, %v6716_v6  ;;  %v7189_v55 = vld [vmem:[#allocation2 + $0x48c] sm:$0xf]  ;;  %v231_v3 = vld [vmem:[%s7355_s24 + $0x20] sm:$0xff] }
 0x146   : > { %12062 = vst [vmem:[#allocation64_spill] sm:$0xff] %v8189_v11  ;;  %v245_v57 = vld [vmem:[%s7355_s24 + $0xb4] sm:$0xff]  ;;  %3055 = vmatmul.bf16.vlgmr.msrb.gmra.mxu0 %v8046_v56 }
 0x147   : > { %12063 = vst [vmem:[#allocation65_spill] sm:$0xff] %v8191_v54  ;;  %3099 = vmatpush.bf16.msra.mxu0 %v8189_v11  ;;  %v7203_v25 = vld [vmem:[#allocation2 + $0x4f4] sm:$0xf0]  ;;  %3068 = vmatmul.bf16.vlgmr.msrb.gmra.mxu1 %v8046_v56 }
 0x148   : > { %1632 = vst [vmem:[#allocation2 + $0x570] sm:$0xff] %v1555_v40  ;;  %v8231_v40 = vor.u32 %v7047_v62, %v6170_v50  ;;  %3112 = vmatpush.bf16.msra.mxu1 %v8191_v54  ;;  %v881_v50 = vpop.permute.xlu0 %880  ;;  %v6834_v54 = vld [vmem:[#allocation2 + $0x5d8] sm:$0xf0] }
 0x149   : > { %1326 = vst [vmem:[#allocation2 + $0x410] sm:$0xff] %v1261_v46  ;;  %v8233_v46 = vor.u32 %v7259_v8, %v6940_v60  ;;  %v6824_v60 = vld [vmem:[#allocation2 + $0x560] sm:$0xf]  ;;  %v6718_v8 = vld [vmem:[#allocation2 + $0x4f0] sm:$0xf0]  ;;  %3080 = vmatpush.bf16.msrb.mxu2 %v8226_v44 }
 0x14a   : > { %12067 = vst [vmem:[#allocation66_spill] sm:$0xff] %v8226_v44  ;;  %3093 = vmatpush.bf16.msrb.mxu3 %v8231_v40  ;;  %v12074_v44 = vrot.slane %v7980_v10, 4 }
 0x14b   : > { %1327 = vst [vmem:[#allocation2 + $0x418] sm:$0xff] %v1263_v63  ;;  %v8241_v63 = vor.u32 %v7245_v1, %v6942_v28  ;;  %v8250_v1 = vor.u32 %v7230_v29, %v6824_v60  ;;  %v7216_v28 = vld [vmem:[#allocation2 + $0x564] sm:$0xf]  ;;  %v12075_v60 = vrot.slane %v8239_v15, 4 }
 0x14c   : > { %12068 = vst [vmem:[#allocation67_spill] sm:$0xff] %v8231_v40  ;;  %v8254_v62 = vor.u32 %v7216_v28, %v6826_v33  ;;  %v6832_v33 = vld [vmem:[#allocation2 + $0x568] sm:$0xf]  ;;  %v8268_v28 = vor.u32 %v7188_v38, %v6718_v8  ;;  %3081 = vmatmul.bf16.vlgmr.msrb.gmra.mxu2 %v8046_v56 }
 0x14d   : > { %12069 = vst [vmem:[#allocation68_spill] sm:$0xff] %v8233_v46  ;;  %3125 = vmatpush.bf16.msra.mxu2 %v8233_v46  ;;  %3100 = vmatpush.bf16.msra.mxu0 %v8250_v1 }
 0x14e   : > { %1313 = vst [vmem:[#allocation2 + $0x3a8] sm:$0xff] %v1235_v36  ;;  %v935_v36 = vrot.slane %v881_v50, 4  ;;  %3138 = vmatpush.bf16.msra.mxu3 %v8241_v63  ;;  %3113 = vmatpush.bf16.msra.mxu1 %v8254_v62 }
 0x14f   : > { %12070 = vst [vmem:[#allocation69_spill] sm:$0xff] %v8241_v63  ;;  %v6726_v63 = vld [vmem:[#allocation2 + $0x4f8] sm:$0xf0]  ;;  %3094 = vmatmul.bf16.vlgmr.msrb.gmra.mxu3 %v8046_v56 }
 0x150   : > { %12071 = vst [vmem:[#allocation70_spill] sm:$0xff] %v8250_v1  ;;  %v969_v29 = vsel %vm433_vm0, %v12074_v44, %v935_v36  ;;  %v971_v32 = vsel %vm433_vm0, %v935_v36, %v12075_v60  ;;  %v8274_v36 = vor.u32 %v7231_v7, %v6832_v33  ;;  %v7217_v60 = vld [vmem:[#allocation2 + $0x56c] sm:$0xf]  ;;  %v7174_v8 = vld [vmem:[#allocation2 + $0x40c] sm:$0xf0] }
 0x151   : > { %12072 = vst [vmem:[#allocation71_spill] sm:$0xff] %v8254_v62  ;;  %v970_v6 = vsel %vm961_vm3, %v7980_v10, %v969_v29  ;;  %v972_v44 = vsel %vm961_vm3, %v881_v50, %v971_v32  ;;  %v8277_v38 = vor.u32 %v7217_v60, %v6834_v54  ;;  %v8285_v32 = vld [vmem:[%s7355_s24 + $0x114] sm:$0xff]  ;;  %v8288_v7 = vld [vmem:[%s7355_s24 + $0x10c] sm:$0xff]  ;;  %v8290_v50 = vor.u32 %v7203_v25, %v6724_v61  ;;  %v8295_v54 = vpop.permute.xlu2 %1149  ;;  %v8301_v61 = vpop.permute.xlu0 %912  ;;  %v6608_v25 = vld [vmem:[#allocation2 + $0x3a0] sm:$0xf] }
 0x152   : > { %12073 = vst [vmem:[#allocation72_spill] sm:$0xff] %v8256_v23  ;;  %3126 = vmatpush.bf16.msra.mxu2 %v8274_v36  ;;  %3101 = vmatpush.bf16.msra.mxu0 %v8256_v23  ;;  %v8297_v29 = vor.u32 %v7189_v55, %v6726_v63  ;;  %v6610_v33 = vld [vmem:[#allocation2 + $0x410] sm:$0xf0]  ;;  %v11569_v60 = vrot.slane %v8301_v61, 4  ;;  %v8308_v55 = vor.u32 %v7174_v8, %v6608_v25  ;;  %v7175_v10 = vld [vmem:[#allocation2 + $0x414] sm:$0xf0] }
 0x153   : > { %12076 = vst [vmem:[#allocation73_spill] sm:$0xff] %v8268_v28  ;;  %3139 = vmatpush.bf16.msra.mxu3 %v8277_v38  ;;  %3114 = vmatpush.bf16.msra.mxu1 %v8268_v28  ;;  %v12083_v28 = vrot.slane %v8131_v35, 4  ;;  %v6618_v46 = vld [vmem:[#allocation2 + $0x418] sm:$0xf0] }
 0x154   : > { %259 = vst [vmem:[#allocation2 + $0x20] sm:$0xff] %v231_v3  ;;  %v307_v3 = vld [vmem:[%s7355_s24 + $0x204] sm:$0xff]  ;;  %1506 = vrot.lane.b32.xlu1 %v8285_v32, %s7299_s25  ;;  %1504 = vrot.lane.b32.xlu0 %v8288_v7, %s7299_s25 }
 0x155   : > { %12077 = vst [vmem:[#allocation74_spill] sm:$0xff] %v8274_v36  ;;  %391 = vrot.lane.b32.xlu2 %v307_v3, %s7299_s25  ;;  %v6616_v63 = vld [vmem:[#allocation2 + $0x3a8] sm:$0xf]  ;;  %v7161_v62 = vld [vmem:[#allocation2 + $0x3ac] sm:$0xf] }
 0x156   : > { %273 = vst [vmem:[#allocation2 + $0x90] sm:$0xff] %v245_v57  ;;  %v618_v57 = vpop.permute.xlu1 %617  ;;  %3127 = vmatpush.bf16.msra.mxu2 %v8290_v50  ;;  %3102 = vmatpush.bf16.msra.mxu0 %v8308_v55 }
 0x157   : > { %1049 = vst [vmem:[#allocation2 + $0x2c0] sm:$0xff] %v970_v6  ;;  %v672_v6 = vrot.slane %v618_v57, 4  ;;  %3140 = vmatpush.bf16.msra.mxu3 %v8297_v29 }
 0x158   : > { %12078 = vst [vmem:[#allocation75_spill] sm:$0xff] %v8277_v38  ;;  %v12082_v38 = vrot.slane %v8035_v48, 4 }
 0x159   : > { %1050 = vst [vmem:[#allocation2 + $0x2c8] sm:$0xff] %v972_v44  ;;  %v7160_v44 = vld [vmem:[#allocation2 + $0x3a4] sm:$0xf]  ;;  %v708_v36 = vsel %vm433_vm0, %v672_v6, %v12083_v28  ;;  %v7146_v28 = vld [vmem:[#allocation2 + $0x32c] sm:$0xf0] }
 0x15a   : > { %12079 = vst [vmem:[#allocation76_spill] sm:$0xff] %v8290_v50  ;;  %v706_v3 = vsel %vm433_vm0, %v12082_v38, %v672_v6  ;;  %v8317_v40 = vor.u32 %v7160_v44, %v6610_v33  ;;  %v709_v25 = vsel %vm698_vm4, %v618_v57, %v708_v36  ;;  %v999_v38 = vsel %vm433_vm0, %v12085_v59, %v11569_v60  ;;  %v6502_v33 = vld [vmem:[#allocation2 + $0x330] sm:$0xf0]  ;;  %v6292_v50 = vld [vmem:[#allocation2 + $0x108] sm:$0xf] }
 0x15b   : > { %12080 = vst [vmem:[#allocation77_spill] sm:$0xff] %v8297_v29  ;;  %v707_v8 = vsel %vm698_vm4, %v8035_v48, %v706_v3  ;;  %v1000_v48 = vsel %vm961_vm3, %v8084_v42, %v999_v38  ;;  %v8332_v36 = vor.u32 %v7175_v10, %v6616_v63  ;;  %v8334_v59 = vor.u32 %v7161_v62, %v6618_v46  ;;  %v308_v42 = vld [vmem:[%s7355_s24 + $0x20c] sm:$0xff]  ;;  %v8345_v10 = vpop.permute.xlu2 %884  ;;  %v246_v46 = vld [vmem:[%s7355_s24 + $0xbc] sm:$0xff]  ;;  %v648_v38 = vpop.permute.xlu0 %647  ;;  %v836_v29 = vld [vmem:[%s7355_s24 + $0x474] sm:$0xff] }
 0x15c   : > { %12081 = vst [vmem:[#allocation78_spill] sm:$0xff] %v8308_v55  ;;  %3115 = vmatpush.bf16.msra.mxu1 %v8317_v40  ;;  %v11570_v62 = vrot.slane %v8345_v10, 4  ;;  %1155 = vrot.lane.b32.xlu1 %v7909_v37, %s7300_s26 }
 0x15d   : > { %12084 = vst [vmem:[#allocation79_spill] sm:$0xff] %v8317_v40  ;;  %3128 = vmatpush.bf16.msra.mxu2 %v8332_v36  ;;  %3141 = vmatpush.bf16.msra.mxu3 %v8334_v59  ;;  %v6286_v40 = vld [vmem:[#allocation2 + $0x170] sm:$0xf0] }
 0x15e   : > { %786 = vst [vmem:[#allocation2 + $0x1e0] sm:$0xff] %v707_v8  ;;  %v6500_v57 = vld [vmem:[#allocation2 + $0x2c0] sm:$0xf]  ;;  %v7132_v6 = vld [vmem:[#allocation2 + $0x2c4] sm:$0xf]  ;;  %v232_v8 = vld [vmem:[%s7355_s24 + $0x28] sm:$0xff]  ;;  %v8347_v63 = vpop.permute.xlu1 %649  ;;  %1157 = vrot.lane.b32.xlu2 %v8224_v2, %s7300_s26  ;;  %393 = vrot.lane.b32.xlu0 %v308_v42, %s7299_s25 }
 0x15f   : > { %12086 = vst [vmem:[#allocation80_spill] sm:$0xff] %v8332_v36  ;;  %v8336_v44 = vor.u32 %v7146_v28, %v6500_v57  ;;  %v8338_v3 = vor.u32 %v7132_v6, %v6502_v33  ;;  %v1342_v28 = vld [vmem:[%s7355_s24 + $0x50] sm:$0xff]  ;;  %v1356_v33 = vld [vmem:[%s7355_s24 + $0xe4] sm:$0xff]  ;;  %v12090_v2 = vrot.slane %v8239_v15, 4 }
 0x160   : > { %787 = vst [vmem:[#allocation2 + $0x1e8] sm:$0xff] %v709_v25  ;;  %v11573_v25 = vrot.slane %v8347_v63, 4  ;;  %v6508_v60 = vld [vmem:[#allocation2 + $0x2c8] sm:$0xf] }
 0x161   : > { %12087 = vst [vmem:[#allocation81_spill] sm:$0xff] %v8334_v59  ;;  %3103 = vmatpush.bf16.msra.mxu0 %v8336_v44  ;;  %3116 = vmatpush.bf16.msra.mxu1 %v8338_v3  ;;  %v973_v57 = vsel %vm433_vm0, %v12090_v2, %v11570_v62  ;;  %v7133_v2 = vld [vmem:[#allocation2 + $0x2cc] sm:$0xf] }
 0x162   : > { %12088 = vst [vmem:[#allocation82_spill] sm:$0xff] %v8336_v44  ;;  %v974_v6 = vsel %vm961_vm3, %v8239_v15, %v973_v57  ;;  %v11574_v57 = vrot.slane %v8237_v45, 4  ;;  %v7261_v44 = vld [vmem:[#allocation2 + $0x6c4] sm:$0xf0] }
 0x163   : > { %12089 = vst [vmem:[#allocation83_spill] sm:$0xff] %v8338_v3  ;;  %v6178_v3 = vld [vmem:[#allocation2 + $0x90] sm:$0xf0] }
 0x164   : > { %1064 = vst [vmem:[#allocation2 + $0x338] sm:$0xff] %v1000_v48  ;;  %v687_v48 = vrot.slane %v648_v38, 4  ;;  %1187 = vrot.lane.b32.xlu1 %v8288_v7, %s7300_s26 }
 0x165   : > { %260 = vst [vmem:[#allocation2 + $0x28] sm:$0xff] %v232_v8  ;;  %v12091_v8 = vrot.slane %v8090_v5, 4 }
 0x166   : > { %274 = vst [vmem:[#allocation2 + $0x98] sm:$0xff] %v246_v46  ;;  %v736_v37 = vsel %vm433_vm0, %v687_v48, %v11573_v25  ;;  %1185 = vrot.lane.b32.xlu0 %v7950_v43, %s7300_s26  ;;  %v12095_v43 = vrot.slane %v8172_v41, 4 }
 0x167   : > { %1370 = vst [vmem:[#allocation2 + $0x490] sm:$0xff] %v1342_v28  ;;  %v734_v46 = vsel %vm433_vm0, %v12091_v8, %v687_v48  ;;  %v737_v28 = vsel %vm698_vm4, %v648_v38, %v736_v37  ;;  %v8382_v48 = vpop.permute.xlu2 %916  ;;  %v8386_v38 = vpop.permute.xlu0 %1468  ;;  %v7105_v25 = vld [vmem:[#allocation2 + $0x1ec] sm:$0xf] }
 0x168   : > { %1384 = vst [vmem:[#allocation2 + $0x500] sm:$0xff] %v1356_v33  ;;  %v735_v42 = vsel %vm698_vm4, %v8090_v5, %v734_v46  ;;  %v821_v33 = vld [vmem:[%s7355_s24 + $0x3e0] sm:$0xff] }
 0x169   : > { %1051 = vst [vmem:[#allocation2 + $0x2d0] sm:$0xff] %v974_v6  ;;  %v1497_v6 = vpop.permute.xlu1 %1496  ;;  %892 = vrot.lane.b32.xlu2 %v821_v33, %s7301_s27  ;;  %v837_v33 = vld [vmem:[%s7355_s24 + $0x47c] sm:$0xff] }
 0x16a   : > { %800 = vst [vmem:[#allocation2 + $0x250] sm:$0xff] %v735_v42  ;;  %v1534_v5 = vrot.slane %v1497_v6, 4  ;;  %v6392_v42 = vld [vmem:[#allocation2 + $0x1e0] sm:$0xf] }
 0x16b   : > { %v7147_v62 = vld [vmem:[#allocation2 + $0x334] sm:$0xf0]  ;;  %v6510_v15 = vld [vmem:[#allocation2 + $0x338] sm:$0xf0]  ;;  %801 = vst [vmem:[#allocation2 + $0x258] sm:$0xff] %v737_v28 }
 0x16c   : > { %v8378_v8 = vor.u32 %v7147_v62, %v6508_v60  ;;  %v8380_v59 = vor.u32 %v7133_v2, %v6510_v15  ;;  %v11577_v60 = vrot.slane %v8386_v38, 4  ;;  %v12094_v62 = vrot.slane %v8133_v30, 4  ;;  %v7104_v15 = vld [vmem:[#allocation2 + $0x1e4] sm:$0xf]  ;;  %922 = vrot.lane.b32.xlu1 %v836_v29, %s7301_s27 }
 0x16d   : > { %v1584_v37 = vsel %vm433_vm0, %v1534_v5, %v11574_v57  ;;  %v12103_v29 = vrot.slane %v8178_v0, 4 }
 0x16e   : > { %12092 = vst [vmem:[#allocation84_spill] sm:$0xff] %v8378_v8  ;;  %3129 = vmatpush.bf16.msra.mxu2 %v8378_v8  ;;  %3142 = vmatpush.bf16.msra.mxu3 %v8380_v59  ;;  %v1582_v46 = vsel %vm433_vm0, %v12094_v62, %v1534_v5  ;;  %v1585_v28 = vsel %vm435_vm1, %v1497_v6, %v1584_v37  ;;  %v6400_v62 = vld [vmem:[#allocation2 + $0x1e8] sm:$0xf]  ;;  %v7090_v6 = vld [vmem:[#allocation2 + $0x16c] sm:$0xf0]  ;;  %v1343_v37 = vld [vmem:[%s7355_s24 + $0x58] sm:$0xff] }
 0x16f   : > { %12093 = vst [vmem:[#allocation85_spill] sm:$0xff] %v8380_v59  ;;  %v1583_v7 = vsel %vm435_vm1, %v8133_v30, %v1582_v46  ;;  %v1556_v2 = vsel %vm433_vm0, %v12095_v43, %v11577_v60  ;;  %v1357_v8 = vld [vmem:[%s7355_s24 + $0xec] sm:$0xff]  ;;  %v7204_v4 = vld [vmem:[#allocation2 + $0x4fc] sm:$0xf0] }
 0x170   : > { %1646 = vst [vmem:[#allocation2 + $0x5e0] sm:$0xff] %v1583_v7  ;;  %v1557_v5 = vsel %vm435_vm1, %v8172_v41, %v1556_v2  ;;  %v822_v7 = vld [vmem:[%s7355_s24 + $0x3e8] sm:$0xff]  ;;  %v6284_v2 = vld [vmem:[#allocation2 + $0x100] sm:$0xf] }
 0x171   : > { %v7118_v30 = vld [vmem:[#allocation2 + $0x24c] sm:$0xf0]  ;;  %v6394_v46 = vld [vmem:[#allocation2 + $0x250] sm:$0xf0]  ;;  %1647 = vst [vmem:[#allocation2 + $0x5e8] sm:$0xff] %v1585_v28  ;;  %v1148_v28 = vpop.permute.xlu1 %1147  ;;  %924 = vrot.lane.b32.xlu2 %v837_v33, %s7301_s27  ;;  %894 = vrot.lane.b32.xlu0 %v822_v7, %s7301_s27 }
 0x172   : > { %v8412_v57 = vor.u32 %v7118_v30, %v6392_v42  ;;  %v8414_v59 = vor.u32 %v7104_v15, %v6394_v46  ;;  %v7119_v43 = vld [vmem:[#allocation2 + $0x254] sm:$0xf0]  ;;  %v6402_v60 = vld [vmem:[#allocation2 + $0x258] sm:$0xf0]  ;;  %1633 = vst [vmem:[#allocation2 + $0x578] sm:$0xff] %v1557_v5  ;;  %v8426_v42 = vpop.permute.xlu2 %651  ;;  %v12104_v46 = vrot.slane %v8295_v54, 4 }
 0x173   : > { %v8420_v36 = vor.u32 %v7119_v43, %v6400_v62  ;;  %v8422_v41 = vor.u32 %v7105_v25, %v6402_v60  ;;  %v6176_v15 = vld [vmem:[#allocation2 + $0x20] sm:$0xf]  ;;  %v7062_v30 = vld [vmem:[#allocation2 + $0x8c] sm:$0xf0]  ;;  %1371 = vst [vmem:[#allocation2 + $0x498] sm:$0xff] %v1343_v37  ;;  %v11590_v62 = vrot.slane %v8426_v42, 4  ;;  %v8431_v60 = vpop.permute.xlu0 %385  ;;  %v8436_v43 = vor.u32 %v7090_v6, %v6284_v2 }
 0x174   : > { %12096 = vst [vmem:[#allocation86_spill] sm:$0xff] %v8412_v57  ;;  %3104 = vmatpush.bf16.msra.mxu0 %v8412_v57  ;;  %3117 = vmatpush.bf16.msra.mxu1 %v8414_v59  ;;  %v1200_v25 = vrot.slane %v1148_v28, 4  ;;  %v7076_v5 = vld [vmem:[#allocation2 + $0x104] sm:$0xf]  ;;  %v6948_v2 = vld [vmem:[#allocation2 + $0x650] sm:$0xf] }
 0x175   : > { %12097 = vst [vmem:[#allocation87_spill] sm:$0xff] %v8414_v59  ;;  %3130 = vmatpush.bf16.msra.mxu2 %v8420_v36  ;;  %v8438_v37 = vor.u32 %v7076_v5, %v6286_v40  ;;  %v7048_v33 = vld [vmem:[#allocation2 + $0x24] sm:$0xf]  ;;  %3143 = vmatpush.bf16.msra.mxu3 %v8422_v41  ;;  %v8452_v40 = vor.u32 %v7062_v30, %v6176_v15  ;;  %v7260_v15 = vld [vmem:[#allocation2 + $0x6bc] sm:$0xf0] }
 0x176   : > { %12098 = vst [vmem:[#allocation88_spill] sm:$0xff] %v8420_v36  ;;  %v12102_v36 = vrot.slane %v8347_v63, 4  ;;  %v1236_v7 = vsel %vm433_vm0, %v12103_v29, %v1200_v25  ;;  %v1238_v6 = vsel %vm433_vm0, %v1200_v25, %v12104_v46  ;;  %v12106_v29 = vrot.slane %v8431_v60, 4  ;;  %v7246_v30 = vld [vmem:[#allocation2 + $0x654] sm:$0xf] }
 0x177   : > { %12099 = vst [vmem:[#allocation89_spill] sm:$0xff] %v8422_v41  ;;  %v12107_v41 = vrot.slane %v7501_v20, 4  ;;  %v6950_v46 = vld [vmem:[#allocation2 + $0x6c0] sm:$0xf0] }
 0x178   : > { %1385 = vst [vmem:[#allocation2 + $0x508] sm:$0xff] %v1357_v8  ;;  %v738_v8 = vsel %vm433_vm0, %v12102_v36, %v11590_v62  ;;  %v1237_v36 = vsel %vm1224_vm2, %v8178_v0, %v1236_v7  ;;  %v1239_v62 = vsel %vm1224_vm2, %v1148_v28, %v1238_v6  ;;  %3105 = vmatpush.bf16.msra.mxu0 %v8436_v43  ;;  %v573_v28 = vld [vmem:[%s7355_s24 + $0x344] sm:$0xff]  ;;  %v558_v7 = vld [vmem:[%s7355_s24 + $0x2b0] sm:$0xff] }
 0x179   : > { %12100 = vst [vmem:[#allocation90_spill] sm:$0xff] %v8436_v43  ;;  %v739_v5 = vsel %vm698_vm4, %v8347_v63, %v738_v8  ;;  %v473_v25 = vsel %vm433_vm0, %v12107_v41, %v12106_v29  ;;  %3118 = vmatpush.bf16.msra.mxu1 %v8438_v37  ;;  %v8468_v0 = vor.u32 %v7048_v33, %v6178_v3  ;;  %v559_v8 = vld [vmem:[%s7355_s24 + $0x2b8] sm:$0xff]  ;;  %v8480_v29 = vpop.permute.xlu1 %1179  ;;  %v7232_v33 = vld [vmem:[#allocation2 + $0x5dc] sm:$0xf0]  ;;  %v6734_v57 = vld [vmem:[#allocation2 + $0x500] sm:$0xf0] }
 0x17a   : > { %12101 = vst [vmem:[#allocation91_spill] sm:$0xff] %v8438_v37  ;;  %v474_v63 = vsel %vm435_vm1, %v7501_v20, %v473_v25  ;;  %v8473_v6 = vor.u32 %v7260_v15, %v6948_v2  ;;  %v8475_v41 = vor.u32 %v7246_v30, %v6950_v46  ;;  %659 = vrot.lane.b32.xlu2 %v573_v28, %s7302_s28  ;;  %v11601_v20 = vrot.slane %v8480_v29, 4  ;;  %v6842_v2 = vld [vmem:[#allocation2 + $0x5e0] sm:$0xf0]  ;;  %v7218_v25 = vld [vmem:[#allocation2 + $0x574] sm:$0xf] }
 0x17b   : > { %12105 = vst [vmem:[#allocation92_spill] sm:$0xff] %v8452_v40  ;;  %v1178_v3 = vpop.permute.xlu0 %1177  ;;  %631 = vrot.lane.b32.xlu1 %v559_v8, %s7302_s28  ;;  %629 = vrot.lane.b32.xlu0 %v558_v7, %s7302_s28  ;;  %v12111_v30 = vrot.slane %v8033_v26, 4  ;;  %v1406_v28 = vld [vmem:[%s7355_s24 + $0x90] sm:$0xf]  ;;  %v6184_v8 = vld [vmem:[#allocation2 + $0x28] sm:$0xf]  ;;  %v8504_v59 = vor.u32 %v7218_v25, %v6842_v2 }
 0x17c   : > { %802 = vst [vmem:[#allocation2 + $0x260] sm:$0xff] %v739_v5  ;;  %3106 = vmatpush.bf16.msra.mxu0 %v8452_v40  ;;  %v8478_v5 = vpop.permute.xlu2 %1472  ;;  %v7063_v7 = vld [vmem:[#allocation2 + $0x94] sm:$0xf0]  ;;  %v7190_v37 = vld [vmem:[#allocation2 + $0x494] sm:$0xf] }
 0x17d   : > { %12108 = vst [vmem:[#allocation93_spill] sm:$0xff] %v8468_v0  ;;  %3119 = vmatpush.bf16.msra.mxu1 %v8468_v0  ;;  %v6732_v0 = vld [vmem:[#allocation2 + $0x490] sm:$0xf]  ;;  %v7049_v40 = vld [vmem:[#allocation2 + $0x2c] sm:$0xf]  ;;  %v8526_v11 = vor.u32 %v7190_v37, %v6734_v57  ;;  %v12122_v57 = vrot.slane %v8431_v60, 4 }
 0x17e   : > { %1314 = vst [vmem:[#allocation2 + $0x3b0] sm:$0xff] %v1237_v36  ;;  %v6840_v36 = vld [vmem:[#allocation2 + $0x570] sm:$0xf]  ;;  %v6186_v43 = vld [vmem:[#allocation2 + $0x98] sm:$0xf0]  ;;  %v8518_v1 = vor.u32 %v7204_v4, %v6732_v0 }
 0x17f   : > { %1315 = vst [vmem:[#allocation2 + $0x3b8] sm:$0xff] %v1239_v62  ;;  %v1215_v62 = vrot.slane %v1178_v3, 4  ;;  %3107 = vmatmul.bf16.vlgmr.msra.gmra.mxu0 %v8046_v56 }
 0x180   : > { %12109 = vst [vmem:[#allocation94_spill] sm:$0xff] %v8473_v6  ;;  %3151 = vmatpush.bf16.msrb.mxu0 %v8473_v6  ;;  %3120 = vmatmul.bf16.vlgmr.msra.gmra.mxu1 %v8046_v56  ;;  %v7077_v6 = vld [vmem:[#allocation2 + $0x10c] sm:$0xf]  ;;  %v6956_v56 = vld [vmem:[#allocation2 + $0x658] sm:$0xf] }
 0x181   : > { %12110 = vst [vmem:[#allocation95_spill] sm:$0xff] %v8475_v41  ;;  %3164 = vmatpush.bf16.msrb.mxu1 %v8475_v41  ;;  %v1264_v46 = vsel %vm433_vm0, %v12111_v30, %v1215_v62  ;;  %v8502_v30 = vor.u32 %v7232_v33, %v6840_v36  ;;  %v247_v36 = vld [vmem:[%s7355_s24 + $0xc4] sm:$0xff]  ;;  %v915_v23 = vpop.permute.xlu1 %914  ;;  %v8533_v0 = vor.u32 %v7261_v44, %v6956_v56  ;;  %v12124_v44 = vrot.slane %v8382_v48, 4 }
 0x182   : > { %538 = vst [vmem:[#allocation2 + $0x178] sm:$0xff] %v474_v63  ;;  %v1266_v63 = vsel %vm433_vm0, %v1215_v62, %v11601_v20  ;;  %v1265_v15 = vsel %vm1224_vm2, %v8033_v26, %v1264_v46  ;;  %v1405_v62 = vld [vmem:[%s7355_s24 + $0x88] sm:$0xff]  ;;  %v7247_v26 = vld [vmem:[#allocation2 + $0x65c] sm:$0xf]  ;;  %1480 = vrot.lane.b32.xlu2 %v1406_v28, %s7299_s25 }
 0x183   : > { %v1267_v41 = vsel %vm1224_vm2, %v1178_v3, %v1266_v63  ;;  %12112 = vst [vmem:[#allocation96_spill] sm:$0xff] %v8502_v30  ;;  %v574_v20 = vld [vmem:[%s7355_s24 + $0x34c] sm:$0xff]  ;;  %1478 = vrot.lane.b32.xlu1 %v1405_v62, %s7299_s25  ;;  %v12125_v62 = vrot.slane %v8345_v10, 4 }
 0x184   : > { %12113 = vst [vmem:[#allocation97_spill] sm:$0xff] %v8504_v59  ;;  %v6958_v46 = vld [vmem:[#allocation2 + $0x6c8] sm:$0xf0]  ;;  %v233_v3 = vld [vmem:[%s7355_s24 + $0x30] sm:$0xff]  ;;  %3152 = vmatpush.bf16.msrb.mxu0 %v8502_v30  ;;  %v8516_v55 = vpop.permute.xlu2 %387  ;;  %v8522_v30 = vpop.permute.xlu0 %886  ;;  %661 = vrot.lane.b32.xlu0 %v574_v20, %s7302_s28  ;;  %v12123_v20 = vrot.slane %v8301_v61, 4 }
 0x185   : > { %1328 = vst [vmem:[#allocation2 + $0x420] sm:$0xff] %v1265_v15  ;;  %3165 = vmatpush.bf16.msrb.mxu1 %v8504_v59  ;;  %v952_v15 = vrot.slane %v915_v23, 4  ;;  %v8524_v59 = vor.u32 %v7063_v7, %v6184_v8  ;;  %v11630_v4 = vrot.slane %v8522_v30, 4 }
 0x186   : > { %1329 = vst [vmem:[#allocation2 + $0x428] sm:$0xff] %v1267_v41  ;;  %v11629_v41 = vrot.slane %v8516_v55, 4 }
 0x187   : > { %12116 = vst [vmem:[#allocation100_spill] sm:$0xff] %v8518_v1  ;;  %v975_v56 = vsel %vm433_vm0, %v12125_v62, %v11630_v4  ;;  %v7191_v62 = vld [vmem:[#allocation2 + $0x49c] sm:$0xf]  ;;  %v248_v4 = vld [vmem:[%s7355_s24 + $0xcc] sm:$0xff] }
 0x188   : > { %261 = vst [vmem:[#allocation2 + $0x30] sm:$0xff] %v233_v3  ;;  %v475_v37 = vsel %vm433_vm0, %v12122_v57, %v11629_v41  ;;  %3153 = vmatpush.bf16.msrb.mxu0 %v8518_v1  ;;  %v1420_v57 = vld [vmem:[%s7355_s24 + $0x11c] sm:$0xff] }
 0x189   : > { %v7091_v33 = vld [vmem:[#allocation2 + $0x174] sm:$0xf0]  ;;  %v6294_v2 = vld [vmem:[#allocation2 + $0x178] sm:$0xf0]  ;;  %12117 = vst [vmem:[#allocation101_spill] sm:$0xff] %v8524_v59  ;;  %v476_v28 = vsel %vm435_vm1, %v8431_v60, %v475_v37  ;;  %3166 = vmatpush.bf16.msrb.mxu1 %v8526_v11 }
 0x18a   : > { %v8512_v25 = vor.u32 %v7091_v33, %v6292_v50  ;;  %v8514_v63 = vor.u32 %v7077_v6, %v6294_v2  ;;  %12118 = vst [vmem:[#allocation102_spill] sm:$0xff] %v8526_v11  ;;  %v8531_v50 = vor.u32 %v7049_v40, %v6186_v43  ;;  %v8535_v6 = vor.u32 %v7247_v26, %v6958_v46  ;;  %v6624_v26 = vld [vmem:[#allocation2 + $0x3b0] sm:$0xf]  ;;  %v1421_v60 = vld [vmem:[%s7355_s24 + $0x124] sm:$0xf]  ;;  %v309_v33 = vld [vmem:[%s7355_s24 + $0x214] sm:$0xff] }
 0x18b   : > { %275 = vst [vmem:[#allocation2 + $0xa0] sm:$0xff] %v247_v36  ;;  %v1001_v43 = vsel %vm433_vm0, %v12123_v20, %v952_v15  ;;  %v1003_v40 = vsel %vm433_vm0, %v952_v15, %v12124_v44  ;;  %v976_v46 = vsel %vm961_vm3, %v8345_v10, %v975_v56  ;;  %v7162_v36 = vld [vmem:[#allocation2 + $0x3b4] sm:$0xf]  ;;  %v6850_v15 = vld [vmem:[#allocation2 + $0x5e8] sm:$0xf0]  ;;  %395 = vrot.lane.b32.xlu2 %v309_v33, %s7299_s25 }
 0x18c   : > { %12114 = vst [vmem:[#allocation98_spill] sm:$0xff] %v8512_v25  ;;  %3131 = vmatpush.bf16.msra.mxu2 %v8512_v25  ;;  %3144 = vmatpush.bf16.msra.mxu3 %v8514_v63  ;;  %v1002_v8 = vsel %vm961_vm3, %v8301_v61, %v1001_v43  ;;  %v1004_v7 = vsel %vm961_vm3, %v915_v23, %v1003_v40  ;;  %v7176_v61 = vld [vmem:[#allocation2 + $0x41c] sm:$0xf0]  ;;  %v6626_v3 = vld [vmem:[#allocation2 + $0x420] sm:$0xf0]  ;;  %v8575_v43 = vpop.permute.xlu1 %623 }
 0x18d   : > { %12115 = vst [vmem:[#allocation99_spill] sm:$0xff] %v8514_v63  ;;  %v7233_v23 = vld [vmem:[#allocation2 + $0x5e4] sm:$0xf0]  ;;  %v8566_v2 = vor.u32 %v7176_v61, %v6624_v26  ;;  %v8571_v37 = vor.u32 %v7162_v36, %v6626_v3  ;;  %v6848_v10 = vld [vmem:[#allocation2 + $0x578] sm:$0xf]  ;;  %1510 = vrot.lane.b32.xlu1 %v1421_v60, %s7299_s25  ;;  %1508 = vrot.lane.b32.xlu0 %v1420_v57, %s7299_s25  ;;  %v12131_v60 = vrot.slane %v8131_v35, 4 }
 0x18e   : > { %12119 = vst [vmem:[#allocation103_spill] sm:$0xff] %v8531_v50  ;;  %v7219_v20 = vld [vmem:[#allocation2 + $0x57c] sm:$0xf]  ;;  %v6740_v44 = vld [vmem:[#allocation2 + $0x498] sm:$0xf] }
 0x18f   : > { %12120 = vst [vmem:[#allocation104_spill] sm:$0xff] %v8533_v0  ;;  %v7205_v40 = vld [vmem:[#allocation2 + $0x504] sm:$0xf0]  ;;  %3154 = vmatpush.bf16.msrb.mxu0 %v8566_v2  ;;  %v6742_v56 = vld [vmem:[#allocation2 + $0x508] sm:$0xf0]  ;;  %v8586_v61 = vor.u32 %v7219_v20, %v6850_v15  ;;  %3167 = vmatpush.bf16.msrb.mxu1 %v8571_v37 }
 0x190   : > { %12121 = vst [vmem:[#allocation105_spill] sm:$0xff] %v8535_v6  ;;  %3132 = vmatpush.bf16.msra.mxu2 %v8524_v59  ;;  %3145 = vmatpush.bf16.msra.mxu3 %v8531_v50  ;;  %v8589_v3 = vor.u32 %v7205_v40, %v6740_v44  ;;  %v8594_v33 = vld [vmem:[%s11446_s2] sm:$0xf]  ;;  %v8605_v15 = vor.u32 %v7191_v62, %v6742_v56  ;;  %v6516_v57 = vld [vmem:[#allocation2 + $0x2d0] sm:$0xf]  ;;  %v838_v50 = vld [vmem:[%s7355_s24 + $0x484] sm:$0xff] }
 0x191   : > { %539 = vst [vmem:[#allocation2 + $0x180] sm:$0xff] %v476_v28  ;;  %v8579_v28 = vpop.permute.xlu2 %1153  ;;  %v7134_v40 = vld [vmem:[#allocation2 + $0x2d4] sm:$0xf]  ;;  %v1087_v62 = vld [vmem:[%s7355_s24 + $0x88] sm:$0xf]  ;;  %v310_v56 = vld [vmem:[%s7355_s24 + $0x21c] sm:$0xff] }
 0x192   : > { %1065 = vst [vmem:[#allocation2 + $0x340] sm:$0xff] %v1002_v8  ;;  %v11628_v8 = vrot.slane %v8575_v43, 4 }
 0x193   : > { %12126 = vst [vmem:[#allocation106_spill] sm:$0xff] %v8566_v2  ;;  %3133 = vmatmul.bf16.vlgmr.msra.gmra.mxu2 %v8594_v33  ;;  %3146 = vmatmul.bf16.vlgmr.msra.gmra.mxu3 %v8594_v33 }
 0x194   : > { %1066 = vst [vmem:[#allocation2 + $0x348] sm:$0xff] %v1004_v7  ;;  %3177 = vmatpush.bf16.msrb.mxu2 %v8533_v0  ;;  %3190 = vmatpush.bf16.msrb.mxu3 %v8535_v6  ;;  %v622_v7 = vpop.permute.xlu0 %621  ;;  %v7248_v6 = vld [vmem:[#allocation2 + $0x664] sm:$0xf] }
 0x195   : > { %12127 = vst [vmem:[#allocation107_spill] sm:$0xff] %v8571_v37  ;;  %v674_v26 = vrot.slane %v622_v7, 4  ;;  %v1358_v37 = vld [vmem:[%s7355_s24 + $0xf4] sm:$0xff]  ;;  %1161 = vrot.lane.b32.xlu2 %v1087_v62, %s7300_s26  ;;  %1159 = vrot.lane.b32.xlu1 %v8221_v21, %s7300_s26 }
 0x196   : > { %1052 = vst [vmem:[#allocation2 + $0x2d8] sm:$0xff] %v976_v46  ;;  %v8584_v46 = vor.u32 %v7233_v23, %v6848_v10  ;;  %397 = vrot.lane.b32.xlu0 %v310_v56, %s7299_s25  ;;  %v12138_v56 = vrot.slane %v8478_v5, 4 }
 0x197   : > { %12129 = vst [vmem:[#allocation109_spill] sm:$0xff] %v8586_v61  ;;  %v710_v23 = vsel %vm433_vm0, %v12131_v60, %v674_v26  ;;  %v712_v36 = vsel %vm433_vm0, %v674_v26, %v11628_v8  ;;  %v1344_v26 = vld [vmem:[%s7355_s24 + $0x60] sm:$0xff] }
 0x198   : > { %12128 = vst [vmem:[#allocation108_spill] sm:$0xff] %v8584_v46  ;;  %3178 = vmatpush.bf16.msrb.mxu2 %v8584_v46  ;;  %3191 = vmatpush.bf16.msrb.mxu3 %v8586_v61  ;;  %v711_v10 = vsel %vm698_vm4, %v8131_v35, %v710_v23  ;;  %v713_v20 = vsel %vm698_vm4, %v622_v7, %v712_v36  ;;  %v7177_v35 = vld [vmem:[#allocation2 + $0x424] sm:$0xf0]  ;;  %v6634_v7 = vld [vmem:[#allocation2 + $0x428] sm:$0xf0]  ;;  %v234_v23 = vld [vmem:[%s7355_s24 + $0x38] sm:$0xff]  ;;  %v1471_v36 = vpop.permute.xlu1 %1470 }
 0x199   : > { %12130 = vst [vmem:[#allocation110_spill] sm:$0xff] %v8589_v3  ;;  %v7148_v44 = vld [vmem:[#allocation2 + $0x33c] sm:$0xf0]  ;;  %v6518_v60 = vld [vmem:[#allocation2 + $0x340] sm:$0xf0] }
 0x19a   : > { %12132 = vst [vmem:[#allocation111_spill] sm:$0xff] %v8605_v15  ;;  %v8614_v8 = vor.u32 %v7148_v44, %v6516_v57  ;;  %v8616_v41 = vor.u32 %v7134_v40, %v6518_v60  ;;  %v1521_v57 = vrot.slane %v1471_v36, 4  ;;  %v7163_v44 = vld [vmem:[#allocation2 + $0x3bc] sm:$0xf]  ;;  %v8631_v40 = vpop.permute.xlu2 %888 }
 0x19b   : > { %788 = vst [vmem:[#allocation2 + $0x1f0] sm:$0xff] %v711_v10  ;;  %v8636_v62 = vor.u32 %v7163_v44, %v6634_v7  ;;  %v6526_v61 = vld [vmem:[#allocation2 + $0x348] sm:$0xf0]  ;;  %v12140_v44 = vrot.slane %v8426_v42, 4 }
 0x19c   : > { %12133 = vst [vmem:[#allocation112_spill] sm:$0xff] %v8614_v8  ;;  %3179 = vmatpush.bf16.msrb.mxu2 %v8589_v3  ;;  %3192 = vmatpush.bf16.msrb.mxu3 %v8605_v15  ;;  %v8626_v10 = vpop.permute.xlu0 %653  ;;  %v7149_v15 = vld [vmem:[#allocation2 + $0x344] sm:$0xf0]  ;;  %v12137_v3 = vrot.slane %v8386_v38, 4  ;;  %v1560_v11 = vsel %vm433_vm0, %v1521_v57, %v12138_v56 }
 0x19d   : > { %789 = vst [vmem:[#allocation2 + $0x1f8] sm:$0xff] %v713_v20  ;;  %3155 = vmatpush.bf16.msrb.mxu0 %v8614_v8  ;;  %v6632_v20 = vld [vmem:[#allocation2 + $0x3b8] sm:$0xf]  ;;  %3168 = vmatpush.bf16.msrb.mxu1 %v8616_v41 }
 0x19e   : > { %12134 = vst [vmem:[#allocation113_spill] sm:$0xff] %v8616_v41  ;;  %v1558_v21 = vsel %vm433_vm0, %v12137_v3, %v1521_v57  ;;  %v6524_v60 = vld [vmem:[#allocation2 + $0x2d8] sm:$0xf]  ;;  %v7120_v3 = vld [vmem:[#allocation2 + $0x25c] sm:$0xf0]  ;;  %v12142_v57 = vrot.slane %v8522_v30, 4  ;;  %1189 = vrot.lane.b32.xlu0 %v8285_v32, %s7300_s26 }
 0x19f   : > { %262 = vst [vmem:[#allocation2 + $0x38] sm:$0xff] %v234_v23  ;;  %v8634_v23 = vor.u32 %v7177_v35, %v6632_v20  ;;  %v7135_v35 = vld [vmem:[#allocation2 + $0x2dc] sm:$0xf]  ;;  %v1559_v7 = vsel %vm435_vm1, %v8386_v38, %v1558_v21  ;;  %v12139_v20 = vrot.slane %v8626_v10, 4 }
 0x1a0   : > { %276 = vst [vmem:[#allocation2 + $0xa8] sm:$0xff] %v248_v4  ;;  %3193 = vmatpush.bf16.msrb.mxu3 %v8636_v62 }
 0x1a1   : > { %12135 = vst [vmem:[#allocation114_spill] sm:$0xff] %v8634_v23  ;;  %v740_v4 = vsel %vm433_vm0, %v12140_v44, %v12139_v20  ;;  %3180 = vmatpush.bf16.msrb.mxu2 %v8634_v23  ;;  %v8665_v20 = vor.u32 %v7149_v15, %v6524_v60  ;;  %v8667_v44 = vor.u32 %v7135_v35, %v6526_v61  ;;  %v6410_v23 = vld [vmem:[#allocation2 + $0x260] sm:$0xf0]  ;;  %v1345_v15 = vld [vmem:[%s7355_s24 + $0x68] sm:$0xff]  ;;  %v1359_v35 = vld [vmem:[%s7355_s24 + $0xfc] sm:$0xff] }
 0x1a2   : > { %12136 = vst [vmem:[#allocation115_spill] sm:$0xff] %v8636_v62  ;;  %v7106_v21 = vld [vmem:[#allocation2 + $0x1f4] sm:$0xf] }
 0x1a3   : > { %1372 = vst [vmem:[#allocation2 + $0x4a0] sm:$0xff] %v1344_v26  ;;  %v1561_v26 = vsel %vm435_vm1, %v1471_v36, %v1560_v11  ;;  %v741_v11 = vsel %vm698_vm4, %v8426_v42, %v740_v4  ;;  %v6408_v36 = vld [vmem:[#allocation2 + $0x1f0] sm:$0xf]  ;;  %v8677_v42 = vpop.permute.xlu1 %1502 }
 0x1a4   : > { %1386 = vst [vmem:[#allocation2 + $0x510] sm:$0xff] %v1358_v37  ;;  %v12141_v37 = vrot.slane %v8631_v40, 4  ;;  %v823_v62 = vld [vmem:[%s7355_s24 + $0x3f0] sm:$0xff]  ;;  %v8670_v41 = vor.u32 %v7120_v3, %v6408_v36  ;;  %3194 = vmatpush.bf16.msrb.mxu3 %v8667_v44  ;;  %v11655_v61 = vrot.slane %v8677_v42, 4  ;;  %v1501_v60 = vpop.permute.xlu0 %1500  ;;  %v12148_v36 = vrot.slane %v8237_v45, 4 }
 0x1a5   : > { %1634 = vst [vmem:[#allocation2 + $0x580] sm:$0xff] %v1559_v7  ;;  %v1102_v7 = vld [vmem:[%s7355_s24 + $0x11c] sm:$0xf]  ;;  %3181 = vmatpush.bf16.msrb.mxu2 %v8665_v20  ;;  %896 = vrot.lane.b32.xlu2 %v823_v62, %s7301_s27  ;;  %v6300_v4 = vld [vmem:[#allocation2 + $0x110] sm:$0xf]  ;;  %v1536_v3 = vrot.slane %v1501_v60, 4 }
 0x1a6   : > { %v977_v38 = vsel %vm433_vm0, %v12142_v57, %v12141_v37  ;;  %1635 = vst [vmem:[#allocation2 + $0x588] sm:$0xff] %v1561_v26  ;;  %v8673_v37 = vor.u32 %v7106_v21, %v6410_v23  ;;  %3156 = vmatpush.bf16.msrb.mxu0 %v8670_v41  ;;  %v6192_v23 = vld [vmem:[#allocation2 + $0x30] sm:$0xf]  ;;  %1191 = vrot.lane.b32.xlu1 %v1102_v7, %s7300_s26  ;;  %v8687_v26 = vpop.permute.xlu2 %920  ;;  %v6302_v57 = vld [vmem:[#allocation2 + $0x180] sm:$0xf0] }
 0x1a7   : > { %v978_v56 = vsel %vm961_vm3, %v8522_v30, %v977_v38  ;;  %12143 = vst [vmem:[#allocation116_spill] sm:$0xff] %v8665_v20  ;;  %v7092_v30 = vld [vmem:[#allocation2 + $0x17c] sm:$0xf0]  ;;  %v1586_v21 = vsel %vm433_vm0, %v12148_v36, %v1536_v3  ;;  %v1588_v32 = vsel %vm433_vm0, %v1536_v3, %v11655_v61  ;;  %v7050_v7 = vld [vmem:[#allocation2 + $0x34] sm:$0xf] }
 0x1a8   : > { %12144 = vst [vmem:[#allocation117_spill] sm:$0xff] %v8667_v44  ;;  %v7064_v38 = vld [vmem:[#allocation2 + $0x9c] sm:$0xf0]  ;;  %3169 = vmatpush.bf16.msrb.mxu1 %v8673_v37  ;;  %v8690_v62 = vor.u32 %v7092_v30, %v6300_v4  ;;  %v6194_v44 = vld [vmem:[#allocation2 + $0xa0] sm:$0xf0]  ;;  %v1589_v30 = vsel %vm435_vm1, %v1501_v60, %v1588_v32 }
 0x1a9   : > { %12145 = vst [vmem:[#allocation118_spill] sm:$0xff] %v8670_v41  ;;  %v6964_v20 = vld [vmem:[#allocation2 + $0x660] sm:$0xf]  ;;  %v8706_v36 = vor.u32 %v7064_v38, %v6192_v23  ;;  %v6966_v3 = vld [vmem:[#allocation2 + $0x6d0] sm:$0xf0]  ;;  %v8710_v60 = vor.u32 %v7050_v7, %v6194_v44 }
 0x1aa   : > { %1053 = vst [vmem:[#allocation2 + $0x2e0] sm:$0xff] %v978_v56  ;;  %v839_v56 = vld [vmem:[%s7355_s24 + $0x48c] sm:$0xf]  ;;  %3157 = vmatpush.bf16.msrb.mxu0 %v8690_v62  ;;  %v6416_v61 = vld [vmem:[#allocation2 + $0x1f8] sm:$0xf] }
 0x1ab   : > { %12146 = vst [vmem:[#allocation119_spill] sm:$0xff] %v8673_v37  ;;  %v7262_v37 = vld [vmem:[#allocation2 + $0x6cc] sm:$0xf0]  ;;  %v7107_v46 = vld [vmem:[#allocation2 + $0x1fc] sm:$0xf]  ;;  %v1152_v32 = vpop.permute.xlu1 %1151 }
 0x1ac   : > { %803 = vst [vmem:[#allocation2 + $0x268] sm:$0xff] %v741_v11  ;;  %v7078_v11 = vld [vmem:[#allocation2 + $0x114] sm:$0xf]  ;;  %v8717_v38 = vor.u32 %v7262_v37, %v6964_v20  ;;  %v1202_v7 = vrot.slane %v1152_v32, 4 }
 0x1ad   : > { %1373 = vst [vmem:[#allocation2 + $0x4a8] sm:$0xff] %v1345_v15  ;;  %v1587_v15 = vsel %vm435_vm1, %v8237_v45, %v1586_v21  ;;  %v8703_v4 = vor.u32 %v7078_v11, %v6302_v57  ;;  %v11660_v57 = vrot.slane %v8579_v28, 4  ;;  %928 = vrot.lane.b32.xlu2 %v839_v56, %s7301_s27  ;;  %v6856_v56 = vld [vmem:[#allocation2 + $0x580] sm:$0xf] }
 0x1ae   : > { %12147 = vst [vmem:[#allocation120_spill] sm:$0xff] %v8690_v62  ;;  %3158 = vmatpush.bf16.msrb.mxu0 %v8706_v36  ;;  %926 = vrot.lane.b32.xlu1 %v838_v50, %s7301_s27  ;;  %v8725_v44 = vpop.permute.xlu2 %655 }
 0x1af   : > { %1387 = vst [vmem:[#allocation2 + $0x518] sm:$0xff] %v1359_v35  ;;  %v824_v35 = vld [vmem:[%s7355_s24 + $0x3f8] sm:$0xf]  ;;  %3170 = vmatpush.bf16.msrb.mxu1 %v8703_v4  ;;  %v1242_v50 = vsel %vm433_vm0, %v1202_v7, %v11660_v57 }
 0x1b0   : > { %12149 = vst [vmem:[#allocation121_spill] sm:$0xff] %v8703_v4  ;;  %898 = vrot.lane.b32.xlu0 %v824_v35, %s7301_s27  ;;  %v7206_v35 = vld [vmem:[#allocation2 + $0x50c] sm:$0xf0] }
 0x1b1   : > { %12150 = vst [vmem:[#allocation122_spill] sm:$0xff] %v8706_v36  ;;  %3159 = vmatmul.bf16.vlgmr.msrb.gmra.mxu0 %v8594_v33  ;;  %v6974_v36 = vld [vmem:[#allocation2 + $0x6d8] sm:$0xf0] }
 0x1b2   : > { %1648 = vst [vmem:[#allocation2 + $0x5f0] sm:$0xff] %v1587_v15  ;;  %v8721_v15 = vor.u32 %v7248_v6, %v6966_v3  ;;  %v12156_v6 = vrot.slane %v8295_v54, 4  ;;  %3203 = vmatpush.bf16.msra.mxu0 %v8717_v38  ;;  %v12157_v3 = vrot.slane %v8626_v10, 4 }
 0x1b3   : > { %1649 = vst [vmem:[#allocation2 + $0x5f8] sm:$0xff] %v1589_v30  ;;  %v7121_v45 = vld [vmem:[#allocation2 + $0x264] sm:$0xf0]  ;;  %v6418_v21 = vld [vmem:[#allocation2 + $0x268] sm:$0xf0]  ;;  %3171 = vmatpush.bf16.msrb.mxu1 %v8710_v60 }
 0x1b4   : > { %12151 = vst [vmem:[#allocation123_spill] sm:$0xff] %v8710_v60  ;;  %v8713_v11 = vor.u32 %v7121_v45, %v6416_v61  ;;  %v8715_v23 = vor.u32 %v7107_v46, %v6418_v21  ;;  %v8727_v61 = vpop.permute.xlu0 %389  ;;  %v11667_v46 = vrot.slane %v8725_v44, 4  ;;  %v1240_v37 = vsel %vm433_vm0, %v12156_v6, %v1202_v7  ;;  %v6748_v30 = vld [vmem:[#allocation2 + $0x4a0] sm:$0xf] }
 0x1b5   : > { %12154 = vst [vmem:[#allocation126_spill] sm:$0xff] %v8717_v38  ;;  %v11670_v20 = vrot.slane %v8727_v61, 4  ;;  %v1241_v21 = vsel %vm1224_vm2, %v8295_v54, %v1240_v37  ;;  %v1243_v7 = vsel %vm1224_vm2, %v1152_v32, %v1242_v50  ;;  %v12158_v6 = vrot.slane %v8516_v55, 4  ;;  %v575_v32 = vld [vmem:[%s7355_s24 + $0x354] sm:$0xff]  ;;  %v7249_v38 = vld [vmem:[#allocation2 + $0x66c] sm:$0xf] }
 0x1b6   : > { %12152 = vst [vmem:[#allocation124_spill] sm:$0xff] %v8713_v11  ;;  %3182 = vmatpush.bf16.msrb.mxu2 %v8713_v11  ;;  %3195 = vmatpush.bf16.msrb.mxu3 %v8715_v23  ;;  %v742_v45 = vsel %vm433_vm0, %v12157_v3, %v11667_v46  ;;  %v7192_v46 = vld [vmem:[#allocation2 + $0x4a4] sm:$0xf]  ;;  %v6750_v11 = vld [vmem:[#allocation2 + $0x510] sm:$0xf0] }
 0x1b7   : > { %12153 = vst [vmem:[#allocation125_spill] sm:$0xff] %v8715_v23  ;;  %v477_v57 = vsel %vm433_vm0, %v12158_v6, %v11670_v20  ;;  %3216 = vmatpush.bf16.msra.mxu1 %v8721_v15  ;;  %v7220_v23 = vld [vmem:[#allocation2 + $0x584] sm:$0xf]  ;;  %v743_v3 = vsel %vm698_vm4, %v8626_v10, %v742_v45  ;;  %v561_v6 = vld [vmem:[%s7355_s24 + $0x2c8] sm:$0xf]  ;;  %663 = vrot.lane.b32.xlu2 %v575_v32, %s7302_s28 }
 0x1b8   : > { %12155 = vst [vmem:[#allocation127_spill] sm:$0xff] %v8721_v15  ;;  %v478_v54 = vsel %vm435_vm1, %v8516_v55, %v477_v57  ;;  %v560_v20 = vld [vmem:[%s7355_s24 + $0x2c0] sm:$0xff]  ;;  %3172 = vmatmul.bf16.vlgmr.msrb.gmra.mxu1 %v8594_v33  ;;  %v8769_v55 = vor.u32 %v7206_v35, %v6748_v30  ;;  %v8773_v10 = vor.u32 %v7192_v46, %v6750_v11  ;;  %v576_v35 = vld [vmem:[%s7355_s24 + $0x35c] sm:$0xf]  ;;  %v12163_v11 = vrot.slane %v8480_v29, 4 }
 0x1b9   : > { %v7234_v60 = vld [vmem:[#allocation2 + $0x5ec] sm:$0xf0]  ;;  %v6858_v4 = vld [vmem:[#allocation2 + $0x5f0] sm:$0xf0]  ;;  %1316 = vst [vmem:[#allocation2 + $0x3c0] sm:$0xff] %v1241_v21  ;;  %635 = vrot.lane.b32.xlu1 %v561_v6, %s7302_s28  ;;  %633 = vrot.lane.b32.xlu0 %v560_v20, %s7302_s28  ;;  %v311_v30 = vld [vmem:[%s7355_s24 + $0x224] sm:$0xff] }
 0x1ba   : > { %v8760_v37 = vor.u32 %v7234_v60, %v6856_v56  ;;  %v8762_v50 = vor.u32 %v7220_v23, %v6858_v4  ;;  %804 = vst [vmem:[#allocation2 + $0x270] sm:$0xff] %v743_v3  ;;  %v8777_v4 = vpop.permute.xlu1 %1183  ;;  %v8779_v60 = vpop.permute.xlu2 %1476  ;;  %v6308_v45 = vld [vmem:[#allocation2 + $0x118] sm:$0xf]  ;;  %v7079_v21 = vld [vmem:[#allocation2 + $0x11c] sm:$0xf] }
 0x1bb   : > { %1317 = vst [vmem:[#allocation2 + $0x3c8] sm:$0xff] %v1243_v7  ;;  %v11683_v57 = vrot.slane %v8777_v4, 4  ;;  %v6200_v7 = vld [vmem:[#allocation2 + $0x38] sm:$0xf]  ;;  %v7065_v3 = vld [vmem:[#allocation2 + $0xa4] sm:$0xf0] }
 0x1bc   : > { %12159 = vst [vmem:[#allocation128_spill] sm:$0xff] %v8760_v37  ;;  %3204 = vmatpush.bf16.msra.mxu0 %v8760_v37  ;;  %3217 = vmatpush.bf16.msra.mxu1 %v8762_v50  ;;  %v1182_v23 = vpop.permute.xlu0 %1181  ;;  %v6202_v32 = vld [vmem:[#allocation2 + $0xa8] sm:$0xf0]  ;;  %v7263_v37 = vld [vmem:[#allocation2 + $0x6d4] sm:$0xf0] }
 0x1bd   : > { %12160 = vst [vmem:[#allocation129_spill] sm:$0xff] %v8762_v50  ;;  %v1217_v56 = vrot.slane %v1182_v23, 4  ;;  %v312_v6 = vld [vmem:[%s7355_s24 + $0x22c] sm:$0xf]  ;;  %v235_v50 = vld [vmem:[%s7355_s24 + $0x40] sm:$0xff] }
 0x1be   : > { %12161 = vst [vmem:[#allocation130_spill] sm:$0xff] %v8769_v55 }
 0x1bf   : > { %540 = vst [vmem:[#allocation2 + $0x188] sm:$0xff] %v478_v54  ;;  %v1268_v46 = vsel %vm433_vm0, %v12163_v11, %v1217_v56  ;;  %v1270_v20 = vsel %vm433_vm0, %v1217_v56, %v11683_v57  ;;  %v7051_v54 = vld [vmem:[#allocation2 + $0x3c] sm:$0xf]  ;;  %v249_v11 = vld [vmem:[%s7355_s24 + $0xd4] sm:$0xff]  ;;  %v11692_v57 = vrot.slane %v8687_v26, 4  ;;  %401 = vrot.lane.b32.xlu2 %v312_v6, %s7299_s25 }
 0x1c0   : > { %12162 = vst [vmem:[#allocation131_spill] sm:$0xff] %v8773_v10  ;;  %3205 = vmatpush.bf16.msra.mxu0 %v8769_v55  ;;  %3218 = vmatpush.bf16.msra.mxu1 %v8773_v10  ;;  %v1269_v15 = vsel %vm1224_vm2, %v8480_v29, %v1268_v46  ;;  %v1271_v10 = vsel %vm1224_vm2, %v1182_v23, %v1270_v20  ;;  %v6972_v55 = vld [vmem:[#allocation2 + $0x668] sm:$0xf] }
 0x1c1   : > { %263 = vst [vmem:[#allocation2 + $0x40] sm:$0xff] %v235_v50  ;;  %399 = vrot.lane.b32.xlu1 %v311_v30, %s7299_s25  ;;  %665 = vrot.lane.b32.xlu0 %v576_v35, %s7302_s28  ;;  %v8814_v23 = vor.u32 %v7051_v54, %v6202_v32  ;;  %v8818_v35 = vor.u32 %v7263_v37, %v6972_v55  ;;  %v6640_v32 = vld [vmem:[#allocation2 + $0x3c0] sm:$0xf]  ;;  %s5539_s25 = sld [smem:[#allocation3]] }
 0x1c2   : > { %1330 = vst [vmem:[#allocation2 + $0x430] sm:$0xff] %v1269_v15  ;;  %v919_v29 = vpop.permute.xlu1 %918  ;;  %v8808_v15 = vpop.permute.xlu2 %391  ;;  %v8820_v20 = vor.u32 %v7249_v38, %v6974_v36  ;;  %v12172_v38 = vrot.slane %v8631_v40, 4 }
 0x1c3   : > { %1331 = vst [vmem:[#allocation2 + $0x438] sm:$0xff] %v1271_v10  ;;  %v8812_v10 = vor.u32 %v7065_v3, %v6200_v7  ;;  %v11693_v46 = vrot.slane %v8808_v15, 4  ;;  %v7235_v7 = vld [vmem:[#allocation2 + $0x5f4] sm:$0xf0]  ;;  %v12171_v3 = vrot.slane %v8727_v61, 4 }
 0x1c4   : > { %277 = vst [vmem:[#allocation2 + $0xb0] sm:$0xff] %v249_v11  ;;  %v8810_v50 = vpop.permute.xlu0 %890  ;;  %v7164_v11 = vld [vmem:[#allocation2 + $0x3c4] sm:$0xf] }
 0x1c5   : > { %12166 = vst [vmem:[#allocation134_spill] sm:$0xff] %v8812_v10  ;;  %v11694_v30 = vrot.slane %v8810_v50, 4  ;;  %v479_v54 = vsel %vm433_vm0, %v12171_v3, %v11693_v46 }
 0x1c6   : > { %v7093_v0 = vld [vmem:[#allocation2 + $0x184] sm:$0xf0]  ;;  %v6310_v56 = vld [vmem:[#allocation2 + $0x188] sm:$0xf0]  ;;  %12167 = vst [vmem:[#allocation135_spill] sm:$0xff] %v8814_v23 }
 0x1c7   : > { %v8799_v63 = vor.u32 %v7093_v0, %v6308_v45  ;;  %v8801_v59 = vor.u32 %v7079_v21, %v6310_v56  ;;  %v954_v0 = vrot.slane %v919_v29, 4  ;;  %12168 = vst [vmem:[#allocation136_spill] sm:$0xff] %v8818_v35  ;;  %v12170_v45 = vrot.slane %v8382_v48, 4  ;;  %v6866_v56 = vld [vmem:[#allocation2 + $0x5f8] sm:$0xf0] }
 0x1c8   : > { %12169 = vst [vmem:[#allocation137_spill] sm:$0xff] %v8820_v20  ;;  %v979_v55 = vsel %vm433_vm0, %v12172_v38, %v11694_v30  ;;  %v6758_v38 = vld [vmem:[#allocation2 + $0x518] sm:$0xf0]  ;;  %v7136_v30 = vld [vmem:[#allocation2 + $0x2e4] sm:$0xf] }
 0x1c9   : > { %12164 = vst [vmem:[#allocation132_spill] sm:$0xff] %v8799_v63  ;;  %3183 = vmatpush.bf16.msrb.mxu2 %v8799_v63  ;;  %3196 = vmatpush.bf16.msrb.mxu3 %v8801_v59  ;;  %v1005_v21 = vsel %vm433_vm0, %v12170_v45, %v954_v0  ;;  %v1007_v6 = vsel %vm433_vm0, %v954_v0, %v11692_v57 }
 0x1ca   : > { %12165 = vst [vmem:[#allocation133_spill] sm:$0xff] %v8801_v59  ;;  %v1006_v37 = vsel %vm961_vm3, %v8382_v48, %v1005_v21  ;;  %v1008_v36 = vsel %vm961_vm3, %v919_v29, %v1007_v6  ;;  %v480_v0 = vsel %vm435_vm1, %v8727_v61, %v479_v54  ;;  %v980_v45 = vsel %vm961_vm3, %v8631_v40, %v979_v55  ;;  %v7178_v48 = vld [vmem:[#allocation2 + $0x42c] sm:$0xf0]  ;;  %v6642_v29 = vld [vmem:[#allocation2 + $0x430] sm:$0xf0]  ;;  %v8855_v55 = vpop.permute.xlu1 %627 }
 0x1cb   : > { %1067 = vst [vmem:[#allocation2 + $0x350] sm:$0xff] %v1006_v37  ;;  %v6864_v21 = vld [vmem:[#allocation2 + $0x588] sm:$0xf]  ;;  %v7221_v6 = vld [vmem:[#allocation2 + $0x58c] sm:$0xf]  ;;  %v8849_v3 = vor.u32 %v7178_v48, %v6640_v32  ;;  %v8851_v61 = vor.u32 %v7164_v11, %v6642_v29  ;;  %v8861_v32 = vpop.permute.xlu2 %1157  ;;  %v11703_v11 = vrot.slane %v8855_v55, 4 }
 0x1cc   : > { %541 = vst [vmem:[#allocation2 + $0x190] sm:$0xff] %v480_v0  ;;  %v6756_v54 = vld [vmem:[#allocation2 + $0x4a8] sm:$0xf]  ;;  %v7193_v37 = vld [vmem:[#allocation2 + $0x4ac] sm:$0xf]  ;;  %v8857_v0 = vor.u32 %v7235_v7, %v6864_v21  ;;  %v8859_v57 = vor.u32 %v7221_v6, %v6866_v56  ;;  %v626_v48 = vpop.permute.xlu0 %625  ;;  %v12179_v29 = vrot.slane %v8575_v43, 4 }
 0x1cd   : > { %3184 = vmatpush.bf16.msrb.mxu2 %v8812_v10  ;;  %3197 = vmatpush.bf16.msrb.mxu3 %v8814_v23  ;;  %12173 = vst [vmem:[#allocation138_spill] sm:$0xff] %v8849_v3  ;;  %v7207_v40 = vld [vmem:[#allocation2 + $0x514] sm:$0xf0]  ;;  %v8870_v7 = vor.u32 %v7193_v37, %v6758_v38  ;;  %v6532_v56 = vld [vmem:[#allocation2 + $0x2e0] sm:$0xf] }
 0x1ce   : > { %12174 = vst [vmem:[#allocation139_spill] sm:$0xff] %v8851_v61  ;;  %3206 = vmatpush.bf16.msra.mxu0 %v8849_v3  ;;  %3219 = vmatpush.bf16.msra.mxu1 %v8851_v61  ;;  %v7179_v38 = vld [vmem:[#allocation2 + $0x434] sm:$0xf0] }
 0x1cf   : > { %1068 = vst [vmem:[#allocation2 + $0x358] sm:$0xff] %v1008_v36  ;;  %v676_v36 = vrot.slane %v626_v48, 4 }
 0x1d0   : > { %1054 = vst [vmem:[#allocation2 + $0x2e8] sm:$0xff] %v980_v45  ;;  %3185 = vmatmul.bf16.vlgmr.msrb.gmra.mxu2 %v8594_v33  ;;  %3198 = vmatmul.bf16.vlgmr.msrb.gmra.mxu3 %v8594_v33  ;;  %v8868_v45 = vor.u32 %v7207_v40, %v6756_v54 }
 0x1d1   : > { %3229 = vmatpush.bf16.msra.mxu2 %v8818_v35  ;;  %3242 = vmatpush.bf16.msra.mxu3 %v8820_v20  ;;  %12175 = vst [vmem:[#allocation140_spill] sm:$0xff] %v8857_v0  ;;  %v714_v21 = vsel %vm433_vm0, %v12179_v29, %v676_v36  ;;  %v716_v6 = vsel %vm433_vm0, %v676_v36, %v11703_v11  ;;  %v6650_v29 = vld [vmem:[#allocation2 + $0x438] sm:$0xf0]  ;;  %v236_v20 = vld [vmem:[%s7355_s24 + $0x48] sm:$0xff]  ;;  %v6982_v35 = vld [vmem:[#allocation2 + $0x6e0] sm:$0xf0] }
 0x1d2   : > { %12176 = vst [vmem:[#allocation141_spill] sm:$0xff] %v8859_v57  ;;  %v7150_v46 = vld [vmem:[#allocation2 + $0x34c] sm:$0xf0]  ;;  %v6534_v61 = vld [vmem:[#allocation2 + $0x350] sm:$0xf0]  ;;  %v717_v54 = vsel %vm698_vm4, %v626_v48, %v716_v6  ;;  %v250_v36 = vld [vmem:[%s7355_s24 + $0xdc] sm:$0xff]  ;;  %v1475_v11 = vpop.permute.xlu1 %1474 }
 0x1d3   : > { %12177 = vst [vmem:[#allocation142_spill] sm:$0xff] %v8868_v45  ;;  %v8881_v37 = vor.u32 %v7150_v46, %v6532_v56  ;;  %v8883_v40 = vor.u32 %v7136_v30, %v6534_v61  ;;  %v7165_v46 = vld [vmem:[#allocation2 + $0x3cc] sm:$0xf]  ;;  %v1346_v30 = vld [vmem:[%s7355_s24 + $0x70] sm:$0xff]  ;;  %v8898_v6 = vpop.permute.xlu2 %892 }
 0x1d4   : > { %12178 = vst [vmem:[#allocation143_spill] sm:$0xff] %v8870_v7  ;;  %v8895_v48 = vor.u32 %v7165_v46, %v6650_v29  ;;  %v12185_v29 = vrot.slane %v8810_v50, 4 }
 0x1d5   : > { %3230 = vmatpush.bf16.msra.mxu2 %v8857_v0  ;;  %3243 = vmatpush.bf16.msra.mxu3 %v8859_v57  ;;  %v715_v57 = vsel %vm698_vm4, %v8575_v43, %v714_v21  ;;  %12180 = vst [vmem:[#allocation144_spill] sm:$0xff] %v8881_v37  ;;  %v6648_v43 = vld [vmem:[#allocation2 + $0x3c8] sm:$0xf] }
 0x1d6   : > { %12181 = vst [vmem:[#allocation145_spill] sm:$0xff] %v8883_v40  ;;  %3207 = vmatpush.bf16.msra.mxu0 %v8881_v37  ;;  %3220 = vmatpush.bf16.msra.mxu1 %v8883_v40  ;;  %v8893_v61 = vor.u32 %v7179_v38, %v6648_v43  ;;  %v7151_v21 = vld [vmem:[#allocation2 + $0x354] sm:$0xf0]  ;;  %v1523_v40 = vrot.slane %v1475_v11, 4  ;;  %v12186_v43 = vrot.slane %v8478_v5, 4 }
 0x1d7   : > { %790 = vst [vmem:[#allocation2 + $0x200] sm:$0xff] %v715_v57  ;;  %v6540_v56 = vld [vmem:[#allocation2 + $0x2e8] sm:$0xf]  ;;  %v7137_v0 = vld [vmem:[#allocation2 + $0x2ec] sm:$0xf] }
 0x1d8   : > { %791 = vst [vmem:[#allocation2 + $0x208] sm:$0xff] %v717_v54  ;;  %v1360_v57 = vld [vmem:[%s7355_s24 + $0x104] sm:$0xff]  ;;  %v6542_v54 = vld [vmem:[#allocation2 + $0x358] sm:$0xf0]  ;;  %v1562_v46 = vsel %vm433_vm0, %v12186_v43, %v1523_v40  ;;  %v7122_v38 = vld [vmem:[#allocation2 + $0x26c] sm:$0xf0] }
 0x1d9   : > { %3231 = vmatpush.bf16.msra.mxu2 %v8868_v45  ;;  %3244 = vmatpush.bf16.msra.mxu3 %v8870_v7  ;;  %12182 = vst [vmem:[#allocation146_spill] sm:$0xff] %v8893_v61  ;;  %v11714_v7 = vrot.slane %v8898_v6, 4  ;;  %v8901_v45 = vpop.permute.xlu0 %657 }
 0x1da   : > { %12183 = vst [vmem:[#allocation147_spill] sm:$0xff] %v8895_v48 }
 0x1db   : > { %264 = vst [vmem:[#allocation2 + $0x48] sm:$0xff] %v236_v20  ;;  %v8906_v20 = vor.u32 %v7151_v21, %v6540_v56  ;;  %v1563_v21 = vsel %vm435_vm1, %v8478_v5, %v1562_v46  ;;  %v7052_v46 = vld [vmem:[#allocation2 + $0x44] sm:$0xf] }
 0x1dc   : > { %278 = vst [vmem:[#allocation2 + $0xb8] sm:$0xff] %v250_v36  ;;  %v981_v36 = vsel %vm433_vm0, %v12185_v29, %v11714_v7  ;;  %v12189_v29 = vrot.slane %v8901_v45, 4  ;;  %v12190_v7 = vrot.slane %v8725_v44, 4 }
 0x1dd   : > { %3232 = vmatpush.bf16.msra.mxu2 %v8893_v61  ;;  %3245 = vmatpush.bf16.msra.mxu3 %v8895_v48  ;;  %1374 = vst [vmem:[#allocation2 + $0x4b0] sm:$0xff] %v1346_v30  ;;  %v12187_v61 = vrot.slane %v8779_v60, 4  ;;  %v8919_v30 = vor.u32 %v7137_v0, %v6542_v54  ;;  %v982_v56 = vsel %vm961_vm3, %v8810_v50, %v981_v36  ;;  %v6426_v0 = vld [vmem:[#allocation2 + $0x270] sm:$0xf0]  ;;  %v6208_v36 = vld [vmem:[#allocation2 + $0x40] sm:$0xf] }
 0x1de   : > { %12184 = vst [vmem:[#allocation148_spill] sm:$0xff] %v8906_v20  ;;  %v744_v43 = vsel %vm433_vm0, %v12190_v7, %v12189_v29  ;;  %v6424_v23 = vld [vmem:[#allocation2 + $0x200] sm:$0xf]  ;;  %v7094_v7 = vld [vmem:[#allocation2 + $0x18c] sm:$0xf0] }
 0x1df   : > { %1388 = vst [vmem:[#allocation2 + $0x520] sm:$0xff] %v1360_v57  ;;  %v1564_v48 = vsel %vm433_vm0, %v1523_v40, %v12187_v61  ;;  %v7108_v40 = vld [vmem:[#allocation2 + $0x204] sm:$0xf]  ;;  %v745_v61 = vsel %vm698_vm4, %v8725_v44, %v744_v43  ;;  %v8935_v5 = vor.u32 %v7122_v38, %v6424_v23  ;;  %v6318_v54 = vld [vmem:[#allocation2 + $0x190] sm:$0xf0]  ;;  %v8942_v23 = vpop.permute.xlu2 %924  ;;  %v1361_v43 = vld [vmem:[%s7355_s24 + $0x10c] sm:$0xff] }
 0x1e0   : > { %12188 = vst [vmem:[#allocation149_spill] sm:$0xff] %v8919_v30  ;;  %v1565_v57 = vsel %vm435_vm1, %v1475_v11, %v1564_v48  ;;  %v8937_v50 = vor.u32 %v7108_v40, %v6426_v0  ;;  %v6316_v11 = vld [vmem:[#allocation2 + $0x120] sm:$0xf]  ;;  %v7080_v48 = vld [vmem:[#allocation2 + $0x124] sm:$0xf]  ;;  %v8945_v40 = vpop.permute.xlu1 %1506 }
 0x1e1   : > { %1055 = vst [vmem:[#allocation2 + $0x2f0] sm:$0xff] %v982_v56  ;;  %3233 = vmatpush.bf16.msra.mxu2 %v8906_v20  ;;  %3246 = vmatpush.bf16.msra.mxu3 %v8919_v30  ;;  %v1347_v56 = vld [vmem:[%s7355_s24 + $0x78] sm:$0xff]  ;;  %v7066_v44 = vld [vmem:[#allocation2 + $0xac] sm:$0xf0]  ;;  %v6210_v29 = vld [vmem:[#allocation2 + $0xb0] sm:$0xf0]  ;;  %v1505_v0 = vpop.permute.xlu0 %1504  ;;  %v8947_v30 = vor.u32 %v7094_v7, %v6316_v11  ;;  %v8949_v20 = vor.u32 %v7080_v48, %v6318_v54 }
 0x1e2   : > { %12191 = vst [vmem:[#allocation150_spill] sm:$0xff] %v8935_v5  ;;  %3208 = vmatpush.bf16.msra.mxu0 %v8935_v5  ;;  %3221 = vmatpush.bf16.msra.mxu1 %v8937_v50  ;;  %v6980_v38 = vld [vmem:[#allocation2 + $0x670] sm:$0xf]  ;;  %v1538_v59 = vrot.slane %v1505_v0, 4  ;;  %v8956_v10 = vor.u32 %v7052_v46, %v6210_v29  ;;  %v12197_v11 = vrot.slane %v8677_v42, 4 }
 0x1e3   : > { %12192 = vst [vmem:[#allocation151_spill] sm:$0xff] %v8937_v50  ;;  %v11731_v50 = vrot.slane %v8945_v40, 4  ;;  %v6432_v46 = vld [vmem:[#allocation2 + $0x208] sm:$0xf] }
 0x1e4   : > { %1636 = vst [vmem:[#allocation2 + $0x590] sm:$0xff] %v1563_v21  ;;  %v7264_v21 = vld [vmem:[#allocation2 + $0x6dc] sm:$0xf0]  ;;  %v1590_v7 = vsel %vm433_vm0, %v12197_v11, %v1538_v59 }
 0x1e5   : > { %1637 = vst [vmem:[#allocation2 + $0x598] sm:$0xff] %v1565_v57  ;;  %v7250_v57 = vld [vmem:[#allocation2 + $0x674] sm:$0xf]  ;;  %v1592_v48 = vsel %vm433_vm0, %v1538_v59, %v11731_v50  ;;  %v8964_v54 = vor.u32 %v7264_v21, %v6980_v38  ;;  %v11743_v59 = vrot.slane %v8861_v32, 4 }
 0x1e6   : > { %805 = vst [vmem:[#allocation2 + $0x278] sm:$0xff] %v745_v61  ;;  %3209 = vmatpush.bf16.msra.mxu0 %v8947_v30  ;;  %3222 = vmatpush.bf16.msra.mxu1 %v8949_v20  ;;  %v8954_v61 = vor.u32 %v7066_v44, %v6208_v36  ;;  %v1593_v36 = vsel %vm435_vm1, %v1505_v0, %v1592_v48  ;;  %v7109_v44 = vld [vmem:[#allocation2 + $0x20c] sm:$0xf] }
 0x1e7   : > { %12193 = vst [vmem:[#allocation152_spill] sm:$0xff] %v8947_v30  ;;  %v8978_v21 = vpop.permute.xlu2 %659 }
 0x1e8   : > { %12194 = vst [vmem:[#allocation153_spill] sm:$0xff] %v8949_v20  ;;  %v1591_v20 = vsel %vm435_vm1, %v8677_v42, %v1590_v7  ;;  %v11732_v42 = vrot.slane %v8978_v21, 4  ;;  %v12202_v7 = vrot.slane %v8901_v45, 4 }
 0x1e9   : > { %1375 = vst [vmem:[#allocation2 + $0x4b8] sm:$0xff] %v1347_v56  ;;  %v8966_v56 = vor.u32 %v7250_v57, %v6982_v35  ;;  %v8983_v0 = vpop.permute.xlu0 %393 }
 0x1ea   : > { %12195 = vst [vmem:[#allocation154_spill] sm:$0xff] %v8954_v61  ;;  %3210 = vmatpush.bf16.msra.mxu0 %v8954_v61  ;;  %3223 = vmatpush.bf16.msra.mxu1 %v8956_v10  ;;  %v746_v48 = vsel %vm433_vm0, %v12202_v7, %v11732_v42  ;;  %v12204_v7 = vrot.slane %v8983_v0, 4  ;;  %v12205_v42 = vrot.slane %v8808_v15, 4 }
 0x1eb   : > { %12196 = vst [vmem:[#allocation155_spill] sm:$0xff] %v8956_v10  ;;  %v6872_v10 = vld [vmem:[#allocation2 + $0x590] sm:$0xf] }
 0x1ec   : > { %1389 = vst [vmem:[#allocation2 + $0x528] sm:$0xff] %v1361_v43 }
 0x1ed   : > { %12198 = vst [vmem:[#allocation156_spill] sm:$0xff] %v8964_v54  ;;  %v7123_v29 = vld [vmem:[#allocation2 + $0x274] sm:$0xf0]  ;;  %v6434_v43 = vld [vmem:[#allocation2 + $0x278] sm:$0xf0]  ;;  %3211 = vmatmul.bf16.vlgmr.msra.gmra.mxu0 %v8594_v33  ;;  %3224 = vmatmul.bf16.vlgmr.msra.gmra.mxu1 %v8594_v33 }
 0x1ee   : > { %12199 = vst [vmem:[#allocation157_spill] sm:$0xff] %v8966_v56  ;;  %v8974_v38 = vor.u32 %v7123_v29, %v6432_v46  ;;  %v8976_v35 = vor.u32 %v7109_v44, %v6434_v43  ;;  %3255 = vmatpush.bf16.msrb.mxu0 %v8964_v54  ;;  %3268 = vmatpush.bf16.msrb.mxu1 %v8966_v56  ;;  %v7208_v46 = vld [vmem:[#allocation2 + $0x51c] sm:$0xf0]  ;;  %v7194_v44 = vld [vmem:[#allocation2 + $0x4b4] sm:$0xf]  ;;  %v12203_v43 = vrot.slane %v8579_v28, 4 }
 0x1ef   : > { %1650 = vst [vmem:[#allocation2 + $0x600] sm:$0xff] %v1591_v20  ;;  %v1156_v20 = vpop.permute.xlu1 %1155  ;;  %v747_v29 = vsel %vm698_vm4, %v8901_v45, %v746_v48  ;;  %v481_v56 = vsel %vm433_vm0, %v12205_v42, %v12204_v7 }
 0x1f0   : > { %1651 = vst [vmem:[#allocation2 + $0x608] sm:$0xff] %v1593_v36  ;;  %3234 = vmatpush.bf16.msra.mxu2 %v8974_v38  ;;  %3247 = vmatpush.bf16.msra.mxu3 %v8976_v35  ;;  %v1204_v57 = vrot.slane %v1156_v20, 4  ;;  %v6764_v36 = vld [vmem:[#allocation2 + $0x4b0] sm:$0xf] }
 0x1f1   : > { %12200 = vst [vmem:[#allocation158_spill] sm:$0xff] %v8974_v38  ;;  %v6766_v38 = vld [vmem:[#allocation2 + $0x520] sm:$0xf0] }
 0x1f2   : > { %12201 = vst [vmem:[#allocation159_spill] sm:$0xff] %v8976_v35  ;;  %v1244_v50 = vsel %vm433_vm0, %v12203_v43, %v1204_v57  ;;  %v1246_v11 = vsel %vm433_vm0, %v1204_v57, %v11743_v59  ;;  %v7222_v35 = vld [vmem:[#allocation2 + $0x594] sm:$0xf]  ;;  %v482_v43 = vsel %vm435_vm1, %v8808_v15, %v481_v56  ;;  %v9023_v15 = vor.u32 %v7194_v44, %v6766_v38  ;;  %v7081_v44 = vld [vmem:[#allocation2 + $0x12c] sm:$0xf] }
 0x1f3   : > { %806 = vst [vmem:[#allocation2 + $0x280] sm:$0xff] %v747_v29  ;;  %v1245_v45 = vsel %vm1224_vm2, %v8579_v28, %v1244_v50  ;;  %v1247_v48 = vsel %vm1224_vm2, %v1156_v20, %v1246_v11  ;;  %v9019_v28 = vpop.permute.xlu2 %1480  ;;  %v9021_v50 = vor.u32 %v7208_v46, %v6764_v36  ;;  %v1186_v20 = vpop.permute.xlu0 %1185  ;;  %v251_v11 = vld [vmem:[%s7355_s24 + $0xe4] sm:$0xff]  ;;  %v12210_v29 = vrot.slane %v8777_v4, 4 }
 0x1f4   : > { %1318 = vst [vmem:[#allocation2 + $0x3d0] sm:$0xff] %v1245_v45  ;;  %v6324_v46 = vld [vmem:[#allocation2 + $0x128] sm:$0xf] }
 0x1f5   : > { %1319 = vst [vmem:[#allocation2 + $0x3d8] sm:$0xff] %v1247_v48  ;;  %v6216_v48 = vld [vmem:[#allocation2 + $0x48] sm:$0xf] }
 0x1f6   : > { %v7236_v54 = vld [vmem:[#allocation2 + $0x5fc] sm:$0xf0]  ;;  %v6874_v57 = vld [vmem:[#allocation2 + $0x600] sm:$0xf0]  ;;  %542 = vst [vmem:[#allocation2 + $0x198] sm:$0xff] %v482_v43 }
 0x1f7   : > { %v9013_v59 = vor.u32 %v7236_v54, %v6872_v10  ;;  %v9015_v42 = vor.u32 %v7222_v35, %v6874_v57  ;;  %12208 = vst [vmem:[#allocation162_spill] sm:$0xff] %v9021_v50  ;;  %v9025_v56 = vpop.permute.xlu1 %1187  ;;  %v1219_v54 = vrot.slane %v1186_v20, 4  ;;  %v237_v35 = vld [vmem:[%s7355_s24 + $0x50] sm:$0xff]  ;;  %v7067_v43 = vld [vmem:[#allocation2 + $0xb4] sm:$0xf0] }
 0x1f8   : > { %12209 = vst [vmem:[#allocation163_spill] sm:$0xff] %v9023_v15  ;;  %v11746_v10 = vrot.slane %v9025_v56, 4  ;;  %v7053_v57 = vld [vmem:[#allocation2 + $0x4c] sm:$0xf] }
 0x1f9   : > { %12206 = vst [vmem:[#allocation160_spill] sm:$0xff] %v9013_v59  ;;  %3256 = vmatpush.bf16.msrb.mxu0 %v9013_v59  ;;  %3269 = vmatpush.bf16.msrb.mxu1 %v9015_v42  ;;  %v1272_v7 = vsel %vm433_vm0, %v12210_v29, %v1219_v54  ;;  %v6218_v29 = vld [vmem:[#allocation2 + $0xb8] sm:$0xf0] }
 0x1fa   : > { %12207 = vst [vmem:[#allocation161_spill] sm:$0xff] %v9015_v42  ;;  %v1274_v45 = vsel %vm433_vm0, %v1219_v54, %v11746_v10  ;;  %v1273_v38 = vsel %vm1224_vm2, %v8777_v4, %v1272_v7  ;;  %v6988_v42 = vld [vmem:[#allocation2 + $0x678] sm:$0xf]  ;;  %v7251_v7 = vld [vmem:[#allocation2 + $0x67c] sm:$0xf] }
 0x1fb   : > { %265 = vst [vmem:[#allocation2 + $0x50] sm:$0xff] %v237_v35  ;;  %v1275_v36 = vsel %vm1224_vm2, %v1186_v20, %v1274_v45  ;;  %v9046_v4 = vpop.permute.xlu2 %395  ;;  %v7265_v20 = vld [vmem:[#allocation2 + $0x6e4] sm:$0xf0]  ;;  %v6990_v45 = vld [vmem:[#allocation2 + $0x6e8] sm:$0xf0] }
 0x1fc   : > { %279 = vst [vmem:[#allocation2 + $0xc0] sm:$0xff] %v251_v11  ;;  %v11761_v59 = vrot.slane %v9046_v4, 4  ;;  %v9063_v61 = vor.u32 %v7265_v20, %v6988_v42  ;;  %v9065_v63 = vor.u32 %v7251_v7, %v6990_v45  ;;  %v6656_v20 = vld [vmem:[#allocation2 + $0x3d0] sm:$0xf]  ;;  %v7166_v7 = vld [vmem:[#allocation2 + $0x3d4] sm:$0xf] }
 0x1fd   : > { %3257 = vmatpush.bf16.msrb.mxu0 %v9021_v50  ;;  %3270 = vmatpush.bf16.msrb.mxu1 %v9023_v15  ;;  %1332 = vst [vmem:[#allocation2 + $0x440] sm:$0xff] %v1273_v38  ;;  %v7095_v10 = vld [vmem:[#allocation2 + $0x194] sm:$0xf0]  ;;  %v6326_v15 = vld [vmem:[#allocation2 + $0x198] sm:$0xf0]  ;;  %v9049_v38 = vpop.permute.xlu0 %894 }
 0x1fe   : > { %1333 = vst [vmem:[#allocation2 + $0x448] sm:$0xff] %v1275_v36  ;;  %v9042_v35 = vor.u32 %v7095_v10, %v6324_v46  ;;  %v9044_v50 = vor.u32 %v7081_v44, %v6326_v15  ;;  %v11762_v10 = vrot.slane %v9049_v38, 4  ;;  %v9054_v46 = vor.u32 %v7067_v43, %v6216_v48 }
 0x1ff   : > { %v923_v11 = vpop.permute.xlu1 %922  ;;  %v9056_v15 = vor.u32 %v7053_v57, %v6218_v29  ;;  %v12215_v44 = vrot.slane %v8983_v0, 4  ;;  %12216 = vst [vmem:[#allocation168_spill] sm:$0xff] %v9063_v61  ;;  %v12219_v43 = vrot.slane %v8942_v23, 4  ;;  %v12220_v29 = vrot.slane %v8898_v6, 4 }
 0x200   : > { %12211 = vst [vmem:[#allocation164_spill] sm:$0xff] %v9042_v35  ;;  %3235 = vmatpush.bf16.msra.mxu2 %v9042_v35  ;;  %3248 = vmatpush.bf16.msra.mxu3 %v9044_v50  ;;  %v956_v36 = vrot.slane %v923_v11, 4  ;;  %v12218_v35 = vrot.slane %v8687_v26, 4 }
 0x201   : > { %12212 = vst [vmem:[#allocation165_spill] sm:$0xff] %v9044_v50  ;;  %v483_v54 = vsel %vm433_vm0, %v12215_v44, %v11761_v59  ;;  %v983_v42 = vsel %vm433_vm0, %v12220_v29, %v11762_v10  ;;  %v7237_v29 = vld [vmem:[#allocation2 + $0x604] sm:$0xf0]  ;;  %v7223_v59 = vld [vmem:[#allocation2 + $0x59c] sm:$0xf] }
 0x202   : > { %12213 = vst [vmem:[#allocation166_spill] sm:$0xff] %v9054_v46  ;;  %v484_v50 = vsel %vm435_vm1, %v8983_v0, %v483_v54  ;;  %v1009_v48 = vsel %vm433_vm0, %v12218_v35, %v956_v36  ;;  %v1011_v57 = vsel %vm433_vm0, %v956_v36, %v12219_v43  ;;  %v984_v35 = vsel %vm961_vm3, %v8898_v6, %v983_v42  ;;  %v6772_v6 = vld [vmem:[#allocation2 + $0x4b8] sm:$0xf]  ;;  %v6774_v42 = vld [vmem:[#allocation2 + $0x528] sm:$0xf0] }
 0x203   : > { %12214 = vst [vmem:[#allocation167_spill] sm:$0xff] %v9056_v15  ;;  %v1010_v0 = vsel %vm961_vm3, %v8687_v26, %v1009_v48  ;;  %v1012_v54 = vsel %vm961_vm3, %v923_v11, %v1011_v57  ;;  %v6882_v26 = vld [vmem:[#allocation2 + $0x608] sm:$0xf0]  ;;  %v7195_v11 = vld [vmem:[#allocation2 + $0x4bc] sm:$0xf]  ;;  %v9095_v48 = vpop.permute.xlu2 %1161 }
 0x204   : > { %12217 = vst [vmem:[#allocation169_spill] sm:$0xff] %v9065_v63  ;;  %v7180_v45 = vld [vmem:[#allocation2 + $0x43c] sm:$0xf0]  ;;  %v6658_v44 = vld [vmem:[#allocation2 + $0x440] sm:$0xf0]  ;;  %3236 = vmatpush.bf16.msra.mxu2 %v9054_v46  ;;  %3249 = vmatpush.bf16.msra.mxu3 %v9056_v15  ;;  %v9110_v10 = vor.u32 %v7195_v11, %v6774_v42  ;;  %v252_v42 = vld [vmem:[%s7355_s24 + $0xec] sm:$0xff] }
 0x205   : > { %543 = vst [vmem:[#allocation2 + $0x1a0] sm:$0xff] %v484_v50  ;;  %v9087_v36 = vor.u32 %v7180_v45, %v6656_v20  ;;  %v9089_v43 = vor.u32 %v7166_v7, %v6658_v44  ;;  %v6880_v50 = vld [vmem:[#allocation2 + $0x598] sm:$0xf]  ;;  %v7209_v57 = vld [vmem:[#allocation2 + $0x524] sm:$0xf0]  ;;  %v630_v7 = vpop.permute.xlu0 %629 }
 0x206   : > { %1069 = vst [vmem:[#allocation2 + $0x360] sm:$0xff] %v1010_v0  ;;  %v9099_v0 = vor.u32 %v7237_v29, %v6880_v50  ;;  %v678_v45 = vrot.slane %v630_v7, 4  ;;  %v9108_v44 = vor.u32 %v7209_v57, %v6772_v6  ;;  %v12227_v50 = vrot.slane %v8855_v55, 4  ;;  %v6548_v29 = vld [vmem:[#allocation2 + $0x2f0] sm:$0xf] }
 0x207   : > { %12221 = vst [vmem:[#allocation170_spill] sm:$0xff] %v9087_v36  ;;  %3258 = vmatpush.bf16.msrb.mxu0 %v9087_v36  ;;  %3271 = vmatpush.bf16.msrb.mxu1 %v9089_v43  ;;  %v9097_v20 = vpop.permute.xlu1 %631  ;;  %v6998_v46 = vld [vmem:[#allocation2 + $0x6f0] sm:$0xf0] }
 0x208   : > { %12222 = vst [vmem:[#allocation171_spill] sm:$0xff] %v9089_v43  ;;  %3281 = vmatpush.bf16.msrb.mxu2 %v9063_v61  ;;  %3294 = vmatpush.bf16.msrb.mxu3 %v9065_v63  ;;  %v238_v43 = vld [vmem:[%s7355_s24 + $0x58] sm:$0xff] }
 0x209   : > { %1070 = vst [vmem:[#allocation2 + $0x368] sm:$0xff] %v1012_v54  ;;  %v9101_v54 = vor.u32 %v7223_v59, %v6882_v26  ;;  %3237 = vmatmul.bf16.vlgmr.msra.gmra.mxu2 %v8594_v33  ;;  %3250 = vmatmul.bf16.vlgmr.msra.gmra.mxu3 %v8594_v33  ;;  %v718_v59 = vsel %vm433_vm0, %v12227_v50, %v678_v45  ;;  %v7138_v26 = vld [vmem:[#allocation2 + $0x2f4] sm:$0xf] }
 0x20a   : > { %1056 = vst [vmem:[#allocation2 + $0x2f8] sm:$0xff] %v984_v35  ;;  %v11771_v35 = vrot.slane %v9097_v20, 4  ;;  %v719_v63 = vsel %vm698_vm4, %v8855_v55, %v718_v59  ;;  %v6664_v55 = vld [vmem:[#allocation2 + $0x3d8] sm:$0xf] }
 0x20b   : > { %12223 = vst [vmem:[#allocation172_spill] sm:$0xff] %v9099_v0  ;;  %v1362_v59 = vld [vmem:[%s7355_s24 + $0x114] sm:$0xff] }
 0x20c   : > { %12224 = vst [vmem:[#allocation173_spill] sm:$0xff] %v9101_v54  ;;  %3282 = vmatpush.bf16.msrb.mxu2 %v9099_v0  ;;  %3295 = vmatpush.bf16.msrb.mxu3 %v9101_v54  ;;  %v720_v33 = vsel %vm433_vm0, %v678_v45, %v11771_v35  ;;  %v7181_v0 = vld [vmem:[#allocation2 + $0x444] sm:$0xf0]  ;;  %v6666_v45 = vld [vmem:[#allocation2 + $0x448] sm:$0xf0]  ;;  %v1348_v35 = vld [vmem:[%s7355_s24 + $0x80] sm:$0xff] }
 0x20d   : > { %12225 = vst [vmem:[#allocation174_spill] sm:$0xff] %v9108_v44  ;;  %v721_v6 = vsel %vm698_vm4, %v630_v7, %v720_v33  ;;  %v7152_v11 = vld [vmem:[#allocation2 + $0x35c] sm:$0xf0]  ;;  %v6550_v57 = vld [vmem:[#allocation2 + $0x360] sm:$0xf0]  ;;  %v1526_v33 = vrot.slane %v9019_v28, 4 }
 0x20e   : > { %12226 = vst [vmem:[#allocation175_spill] sm:$0xff] %v9110_v10  ;;  %v9123_v50 = vor.u32 %v7152_v11, %v6548_v29  ;;  %v9125_v54 = vor.u32 %v7138_v26, %v6550_v57  ;;  %v7167_v7 = vld [vmem:[#allocation2 + $0x3dc] sm:$0xf]  ;;  %v9137_v11 = vpop.permute.xlu0 %661  ;;  %v9139_v57 = vor.u32 %v7181_v0, %v6664_v55 }
 0x20f   : > { %266 = vst [vmem:[#allocation2 + $0x58] sm:$0xff] %v238_v43  ;;  %v11787_v15 = vrot.slane %v9137_v11, 4 }
 0x210   : > { %792 = vst [vmem:[#allocation2 + $0x210] sm:$0xff] %v719_v63  ;;  %3283 = vmatpush.bf16.msrb.mxu2 %v9108_v44  ;;  %3296 = vmatpush.bf16.msrb.mxu3 %v9110_v10  ;;  %v9134_v63 = vpop.permute.xlu2 %896  ;;  %v7153_v29 = vld [vmem:[#allocation2 + $0x364] sm:$0xf0]  ;;  %v9141_v10 = vor.u32 %v7167_v7, %v6666_v45  ;;  %v6558_v44 = vld [vmem:[#allocation2 + $0x368] sm:$0xf0]  ;;  %v12234_v45 = vrot.slane %v8779_v60, 4 }
 0x211   : > { %12228 = vst [vmem:[#allocation176_spill] sm:$0xff] %v9123_v50  ;;  %3259 = vmatpush.bf16.msrb.mxu0 %v9123_v50  ;;  %3272 = vmatpush.bf16.msrb.mxu1 %v9125_v54  ;;  %v6556_v43 = vld [vmem:[#allocation2 + $0x2f8] sm:$0xf]  ;;  %v11782_v26 = vrot.slane %v9134_v63, 4 }
 0x212   : > { %12229 = vst [vmem:[#allocation177_spill] sm:$0xff] %v9125_v54  ;;  %v7139_v54 = vld [vmem:[#allocation2 + $0x2fc] sm:$0xf]  ;;  %v9151_v0 = vor.u32 %v7153_v29, %v6556_v43 }
 0x213   : > { %793 = vst [vmem:[#allocation2 + $0x218] sm:$0xff] %v721_v6  ;;  %v1479_v6 = vpop.permute.xlu1 %1478  ;;  %v9169_v29 = vor.u32 %v7139_v54, %v6558_v44  ;;  %v6334_v54 = vld [vmem:[#allocation2 + $0x1a0] sm:$0xf0]  ;;  %v7054_v44 = vld [vmem:[#allocation2 + $0x54] sm:$0xf] }
 0x214   : > { %280 = vst [vmem:[#allocation2 + $0xc8] sm:$0xff] %v252_v42  ;;  %v1525_v28 = vrot.slane %v1479_v6, 4  ;;  %v12232_v42 = vrot.slane %v9049_v38, 4  ;;  %3284 = vmatpush.bf16.msrb.mxu2 %v9139_v57  ;;  %3297 = vmatpush.bf16.msrb.mxu3 %v9141_v10 }
 0x215   : > { %12230 = vst [vmem:[#allocation178_spill] sm:$0xff] %v9139_v57 }
 0x216   : > { %12231 = vst [vmem:[#allocation179_spill] sm:$0xff] %v9141_v10  ;;  %v985_v61 = vsel %vm433_vm0, %v12232_v42, %v11782_v26  ;;  %v1566_v55 = vsel %vm433_vm0, %v12234_v45, %v1525_v28  ;;  %v1568_v7 = vsel %vm433_vm0, %v1525_v28, %v1526_v33  ;;  %v7124_v26 = vld [vmem:[#allocation2 + $0x27c] sm:$0xf0]  ;;  %v6442_v10 = vld [vmem:[#allocation2 + $0x280] sm:$0xf0] }
 0x217   : > { %1376 = vst [vmem:[#allocation2 + $0x4c0] sm:$0xff] %v1348_v35  ;;  %v986_v35 = vsel %vm961_vm3, %v9049_v38, %v985_v61  ;;  %v1567_v43 = vsel %vm435_vm1, %v8779_v60, %v1566_v55  ;;  %v1569_v61 = vsel %vm435_vm1, %v1479_v6, %v1568_v7  ;;  %v6440_v33 = vld [vmem:[#allocation2 + $0x210] sm:$0xf]  ;;  %v7110_v28 = vld [vmem:[#allocation2 + $0x214] sm:$0xf]  ;;  %v1363_v7 = vld [vmem:[%s7355_s24 + $0x11c] sm:$0xff] }
 0x218   : > { %1390 = vst [vmem:[#allocation2 + $0x530] sm:$0xff] %v1362_v59  ;;  %v12235_v59 = vrot.slane %v8978_v21, 4  ;;  %v9171_v45 = vor.u32 %v7124_v26, %v6440_v33  ;;  %v9173_v57 = vor.u32 %v7110_v28, %v6442_v10  ;;  %3285 = vmatpush.bf16.msrb.mxu2 %v9151_v0  ;;  %3298 = vmatpush.bf16.msrb.mxu3 %v9169_v29  ;;  %v6332_v60 = vld [vmem:[#allocation2 + $0x130] sm:$0xf]  ;;  %v7096_v6 = vld [vmem:[#allocation2 + $0x19c] sm:$0xf0]  ;;  %v9180_v10 = vpop.permute.xlu2 %928 }
 0x219   : > { %12233 = vst [vmem:[#allocation180_spill] sm:$0xff] %v9151_v0  ;;  %v7068_v26 = vld [vmem:[#allocation2 + $0xbc] sm:$0xf0]  ;;  %v6226_v55 = vld [vmem:[#allocation2 + $0xc0] sm:$0xf0] }
 0x21a   : > { %v748_v42 = vsel %vm433_vm0, %v12235_v59, %v11787_v15  ;;  %1057 = vst [vmem:[#allocation2 + $0x300] sm:$0xff] %v986_v35  ;;  %v6224_v59 = vld [vmem:[#allocation2 + $0x50] sm:$0xf]  ;;  %v1349_v35 = vld [vmem:[%s7355_s24 + $0x88] sm:$0xff]  ;;  %3260 = vmatpush.bf16.msrb.mxu0 %v9171_v45  ;;  %3273 = vmatpush.bf16.msrb.mxu1 %v9173_v57 }
 0x21b   : > { %v749_v38 = vsel %vm698_vm4, %v8978_v21, %v748_v42  ;;  %12236 = vst [vmem:[#allocation181_spill] sm:$0xff] %v9169_v29  ;;  %v7082_v21 = vld [vmem:[#allocation2 + $0x134] sm:$0xf]  ;;  %v1511_v42 = vpop.permute.xlu1 %1510  ;;  %v7266_v33 = vld [vmem:[#allocation2 + $0x6ec] sm:$0xf0]  ;;  %v9183_v29 = vor.u32 %v7096_v6, %v6332_v60 }
 0x21c   : > { %1638 = vst [vmem:[#allocation2 + $0x5a0] sm:$0xff] %v1567_v43  ;;  %v1509_v43 = vpop.permute.xlu0 %1508  ;;  %v1541_v28 = vrot.slane %v1511_v42, 4  ;;  %v9185_v0 = vor.u32 %v7082_v21, %v6334_v54  ;;  %v6448_v54 = vld [vmem:[#allocation2 + $0x218] sm:$0xf] }
 0x21d   : > { %12237 = vst [vmem:[#allocation182_spill] sm:$0xff] %v9171_v45  ;;  %v1540_v15 = vrot.slane %v1509_v43, 4  ;;  %v9187_v45 = vor.u32 %v7068_v26, %v6224_v59 }
 0x21e   : > { %12238 = vst [vmem:[#allocation183_spill] sm:$0xff] %v9173_v57  ;;  %v12242_v57 = vrot.slane %v8945_v40, 4  ;;  %3261 = vmatpush.bf16.msrb.mxu0 %v9183_v29  ;;  %3274 = vmatpush.bf16.msrb.mxu1 %v9185_v0 }
 0x21f   : > { %1639 = vst [vmem:[#allocation2 + $0x5a8] sm:$0xff] %v1569_v61  ;;  %v6996_v61 = vld [vmem:[#allocation2 + $0x680] sm:$0xf]  ;;  %v1596_v36 = vsel %vm433_vm0, %v1540_v15, %v1541_v28  ;;  %v7210_v28 = vld [vmem:[#allocation2 + $0x52c] sm:$0xf0] }
 0x220   : > { %807 = vst [vmem:[#allocation2 + $0x288] sm:$0xff] %v749_v38  ;;  %v7252_v38 = vld [vmem:[#allocation2 + $0x684] sm:$0xf]  ;;  %v1594_v50 = vsel %vm433_vm0, %v12242_v57, %v1540_v15  ;;  %v1597_v6 = vsel %vm435_vm1, %v1509_v43, %v1596_v36  ;;  %v9200_v59 = vor.u32 %v7266_v33, %v6996_v61  ;;  %v7111_v57 = vld [vmem:[#allocation2 + $0x21c] sm:$0xf]  ;;  %v12248_v43 = vrot.slane %v9137_v11, 4 }
 0x221   : > { %1377 = vst [vmem:[#allocation2 + $0x4c8] sm:$0xff] %v1349_v35  ;;  %v9195_v35 = vor.u32 %v7054_v44, %v6226_v55  ;;  %v1595_v60 = vsel %vm435_vm1, %v8945_v40, %v1594_v50  ;;  %v9202_v21 = vor.u32 %v7252_v38, %v6998_v46  ;;  %v9209_v55 = vpop.permute.xlu2 %663  ;;  %v6780_v33 = vld [vmem:[#allocation2 + $0x4c0] sm:$0xf]  ;;  %v7196_v38 = vld [vmem:[#allocation2 + $0x4c4] sm:$0xf] }
 0x222   : > { %12239 = vst [vmem:[#allocation184_spill] sm:$0xff] %v9183_v29  ;;  %3262 = vmatpush.bf16.msrb.mxu0 %v9187_v45  ;;  %v11802_v40 = vrot.slane %v9209_v55, 4 }
 0x223   : > { %12240 = vst [vmem:[#allocation185_spill] sm:$0xff] %v9185_v0  ;;  %3275 = vmatpush.bf16.msrb.mxu1 %v9195_v35  ;;  %v1160_v46 = vpop.permute.xlu1 %1159 }
 0x224   : > { %12241 = vst [vmem:[#allocation186_spill] sm:$0xff] %v9187_v45  ;;  %v9214_v36 = vpop.permute.xlu0 %397  ;;  %v750_v61 = vsel %vm433_vm0, %v12248_v43, %v11802_v40  ;;  %v6888_v40 = vld [vmem:[#allocation2 + $0x5a0] sm:$0xf] }
 0x225   : > { %1391 = vst [vmem:[#allocation2 + $0x538] sm:$0xff] %v1363_v7  ;;  %v1207_v7 = vrot.slane %v9095_v48, 4  ;;  %v1206_v48 = vrot.slane %v1160_v46, 4  ;;  %v11811_v50 = vrot.slane %v9214_v36, 4 }
 0x226   : > { %12243 = vst [vmem:[#allocation187_spill] sm:$0xff] %v9195_v35  ;;  %3307 = vmatpush.bf16.msra.mxu0 %v9200_v59  ;;  %v6782_v35 = vld [vmem:[#allocation2 + $0x530] sm:$0xf0] }
 0x227   : > { %12244 = vst [vmem:[#allocation188_spill] sm:$0xff] %v9200_v59  ;;  %v7125_v15 = vld [vmem:[#allocation2 + $0x284] sm:$0xf0]  ;;  %v6450_v26 = vld [vmem:[#allocation2 + $0x288] sm:$0xf0]  ;;  %3320 = vmatpush.bf16.msra.mxu1 %v9202_v21 }
 0x228   : > { %12245 = vst [vmem:[#allocation189_spill] sm:$0xff] %v9202_v21  ;;  %v9205_v42 = vor.u32 %v7125_v15, %v6448_v54  ;;  %v9207_v44 = vor.u32 %v7111_v57, %v6450_v26  ;;  %v12249_v54 = vrot.slane %v8861_v32, 4  ;;  %v1250_v15 = vsel %vm433_vm0, %v1206_v48, %v1207_v7  ;;  %v7224_v21 = vld [vmem:[#allocation2 + $0x5a4] sm:$0xf] }
 0x229   : > { %1652 = vst [vmem:[#allocation2 + $0x610] sm:$0xff] %v1595_v60  ;;  %v9229_v60 = vld [vmem:[%s11446_s2] sm:$0xf]  ;;  %v12250_v26 = vrot.slane %v9046_v4, 4 }
 0x22a   : > { %1653 = vst [vmem:[#allocation2 + $0x618] sm:$0xff] %v1597_v6  ;;  %3286 = vmatpush.bf16.msrb.mxu2 %v9205_v42  ;;  %3299 = vmatpush.bf16.msrb.mxu3 %v9207_v44  ;;  %v751_v6 = vsel %vm698_vm4, %v9137_v11, %v750_v61  ;;  %v1248_v57 = vsel %vm433_vm0, %v12249_v54, %v1206_v48 }
 0x22b   : > { %12246 = vst [vmem:[#allocation190_spill] sm:$0xff] %v9205_v42  ;;  %3263 = vmatmul.bf16.vlgmr.msrb.gmra.mxu0 %v9229_v60  ;;  %3276 = vmatmul.bf16.vlgmr.msrb.gmra.mxu1 %v9229_v60  ;;  %v485_v43 = vsel %vm433_vm0, %v12250_v26, %v11811_v50  ;;  %v1251_v11 = vsel %vm1224_vm2, %v1160_v46, %v1250_v15  ;;  %v9253_v26 = vpop.f32.mrf.mxu0  ;;  %v9255_v50 = vpop.f32.mrf.mxu2 }
 0x22c   : > { %12247 = vst [vmem:[#allocation191_spill] sm:$0xff] %v9207_v44  ;;  %v1249_v44 = vsel %vm1224_vm2, %v8861_v32, %v1248_v57  ;;  %v486_v61 = vsel %vm435_vm1, %v9046_v4, %v485_v43  ;;  %v9259_v32 = vor.u32 %v7210_v28, %v6780_v33  ;;  %v9261_v4 = vor.u32 %v7196_v38, %v6782_v35  ;;  %v239_v43 = vld [vmem:[%s7355_s24 + $0x60] sm:$0xff]  ;;  %v6340_v28 = vld [vmem:[#allocation2 + $0x138] sm:$0xf]  ;;  %v7083_v38 = vld [vmem:[#allocation2 + $0x13c] sm:$0xf] }
 0x22d   : > { %808 = vst [vmem:[#allocation2 + $0x290] sm:$0xff] %v751_v6  ;;  %v12257_v6 = vrot.slane %v9025_v56, 4 }
 0x22e   : > { %1320 = vst [vmem:[#allocation2 + $0x3e0] sm:$0xff] %v1249_v44  ;;  %v1192_v44 = vpop.permute.xlu1 %1191 }
 0x22f   : > { %12253 = vst [vmem:[#allocation194_spill] sm:$0xff] %v9253_v26 }
 0x230   : > { %v7238_v54 = vld [vmem:[#allocation2 + $0x60c] sm:$0xf0]  ;;  %v6890_v7 = vld [vmem:[#allocation2 + $0x610] sm:$0xf0]  ;;  %12254 = vst [vmem:[#allocation195_spill] sm:$0xff] %v9255_v50 }
 0x231   : > { %v9249_v48 = vor.u32 %v7238_v54, %v6888_v40  ;;  %v9251_v0 = vor.u32 %v7224_v21, %v6890_v7  ;;  %1321 = vst [vmem:[#allocation2 + $0x3e8] sm:$0xff] %v1251_v11  ;;  %v1190_v40 = vpop.permute.xlu0 %1189  ;;  %v1222_v21 = vrot.slane %v1192_v44, 4  ;;  %v6232_v11 = vld [vmem:[#allocation2 + $0x58] sm:$0xf]  ;;  %v7055_v54 = vld [vmem:[#allocation2 + $0x5c] sm:$0xf] }
 0x232   : > { %544 = vst [vmem:[#allocation2 + $0x1a8] sm:$0xff] %v486_v61  ;;  %v1221_v46 = vrot.slane %v1190_v40, 4  ;;  %v7069_v61 = vld [vmem:[#allocation2 + $0xc4] sm:$0xf0]  ;;  %v253_v7 = vld [vmem:[%s7355_s24 + $0xf4] sm:$0xff] }
 0x233   : > { %12251 = vst [vmem:[#allocation192_spill] sm:$0xff] %v9249_v48  ;;  %3308 = vmatpush.bf16.msra.mxu0 %v9249_v48  ;;  %3321 = vmatpush.bf16.msra.mxu1 %v9251_v0  ;;  %v6234_v44 = vld [vmem:[#allocation2 + $0xc8] sm:$0xf0] }
 0x234   : > { %12252 = vst [vmem:[#allocation193_spill] sm:$0xff] %v9251_v0  ;;  %v1276_v57 = vsel %vm433_vm0, %v12257_v6, %v1221_v46  ;;  %v1278_v15 = vsel %vm433_vm0, %v1221_v46, %v1222_v21  ;;  %v7004_v21 = vld [vmem:[#allocation2 + $0x688] sm:$0xf]  ;;  %v3006_v46 = vpop.f32.mrf.mxu0  ;;  %v3032_v6 = vpop.f32.mrf.mxu2  ;;  %v254_v0 = vld [vmem:[%s7355_s24 + $0xfc] sm:$0xff] }
 0x235   : > { %12255 = vst [vmem:[#allocation196_spill] sm:$0xff] %v9259_v32  ;;  %v1277_v35 = vsel %vm1224_vm2, %v9025_v56, %v1276_v57  ;;  %v1279_v33 = vsel %vm1224_vm2, %v1190_v40, %v1278_v15  ;;  %v959_v56 = vrot.slane %v9180_v10, 4  ;;  %v7267_v15 = vld [vmem:[#allocation2 + $0x6f4] sm:$0xf0]  ;;  %v9283_v46 = vor.u32 %v7069_v61, %v6232_v11  ;;  %v6672_v6 = vld [vmem:[#allocation2 + $0x3e0] sm:$0xf] }
 0x236   : > { %12256 = vst [vmem:[#allocation197_spill] sm:$0xff] %v9261_v4  ;;  %v927_v42 = vpop.permute.xlu1 %926  ;;  %v9285_v10 = vor.u32 %v7055_v54, %v6234_v44  ;;  %v7168_v44 = vld [vmem:[#allocation2 + $0x3e4] sm:$0xf] }
 0x237   : > { %3309 = vmatpush.bf16.msra.mxu0 %v9259_v32  ;;  %3322 = vmatpush.bf16.msra.mxu1 %v9261_v4  ;;  %267 = vst [vmem:[#allocation2 + $0x60] sm:$0xff] %v239_v43  ;;  %v240_v4 = vld [vmem:[%s7355_s24 + $0x68] sm:$0xff]  ;;  %s7307_s24 = smov 124  }
 0x238   : > { %1334 = vst [vmem:[#allocation2 + $0x450] sm:$0xff] %v1277_v35  ;;  %v958_v35 = vrot.slane %v927_v42, 4 }
 0x239   : > { %1335 = vst [vmem:[#allocation2 + $0x458] sm:$0xff] %v1279_v33  ;;  %v7097_v50 = vld [vmem:[#allocation2 + $0x1a4] sm:$0xf0]  ;;  %v6342_v26 = vld [vmem:[#allocation2 + $0x1a8] sm:$0xf0]  ;;  %v899_v43 = vpop.permute.xlu0 %898 }
 0x23a   : > { %v9275_v40 = vor.u32 %v7097_v50, %v6340_v28  ;;  %v9277_v57 = vor.u32 %v7083_v38, %v6342_v26  ;;  %281 = vst [vmem:[#allocation2 + $0xd0] sm:$0xff] %v253_v7  ;;  %v944_v33 = vrot.slane %v899_v43, 4  ;;  %v9287_v50 = vor.u32 %v7267_v15, %v7004_v21  ;;  %v7239_v43 = vld [vmem:[#allocation2 + $0x614] sm:$0xf0] }
 0x23b   : > { %268 = vst [vmem:[#allocation2 + $0x68] sm:$0xff] %v240_v4  ;;  %v12263_v26 = vrot.slane %v8942_v23, 4  ;;  %v1015_v38 = vsel %vm433_vm0, %v958_v35, %v959_v56  ;;  %v12264_v4 = vrot.slane %v9134_v63, 4 }
 0x23c   : > { %12258 = vst [vmem:[#allocation198_spill] sm:$0xff] %v9275_v40  ;;  %3287 = vmatpush.bf16.msrb.mxu2 %v9275_v40  ;;  %3300 = vmatpush.bf16.msrb.mxu3 %v9277_v57  ;;  %v1016_v61 = vsel %vm961_vm3, %v927_v42, %v1015_v38  ;;  %v7211_v42 = vld [vmem:[#allocation2 + $0x534] sm:$0xf0] }
 0x23d   : > { %12259 = vst [vmem:[#allocation199_spill] sm:$0xff] %v9277_v57  ;;  %v1013_v28 = vsel %vm433_vm0, %v12263_v26, %v958_v35  ;;  %v987_v7 = vsel %vm433_vm0, %v12264_v4, %v944_v33  ;;  %v9311_v35 = vpop.f32.mrf.mxu1  ;;  %v9313_v33 = vpop.f32.mrf.mxu3 }
 0x23e   : > { %12260 = vst [vmem:[#allocation200_spill] sm:$0xff] %v9283_v46  ;;  %v1014_v11 = vsel %vm961_vm3, %v8942_v23, %v1013_v28  ;;  %v6896_v23 = vld [vmem:[#allocation2 + $0x5a8] sm:$0xf]  ;;  %v636_v26 = vpop.permute.xlu1 %635 }
 0x23f   : > { %12261 = vst [vmem:[#allocation201_spill] sm:$0xff] %v9285_v10  ;;  %v7182_v54 = vld [vmem:[#allocation2 + $0x44c] sm:$0xf0]  ;;  %v6674_v21 = vld [vmem:[#allocation2 + $0x450] sm:$0xf0]  ;;  %v9315_v38 = vor.u32 %v7239_v43, %v6896_v23  ;;  %v681_v4 = vrot.slane %v636_v26, 4 }
 0x240   : > { %282 = vst [vmem:[#allocation2 + $0xd8] sm:$0xff] %v254_v0  ;;  %v988_v0 = vsel %vm961_vm3, %v9134_v63, %v987_v7  ;;  %3288 = vmatpush.bf16.msrb.mxu2 %v9283_v46  ;;  %3301 = vmatpush.bf16.msrb.mxu3 %v9285_v10  ;;  %v9303_v56 = vor.u32 %v7182_v54, %v6672_v6  ;;  %v6788_v63 = vld [vmem:[#allocation2 + $0x4c8] sm:$0xf]  ;;  %v6564_v54 = vld [vmem:[#allocation2 + $0x300] sm:$0xf] }
 0x241   : > { %12262 = vst [vmem:[#allocation202_spill] sm:$0xff] %v9287_v50  ;;  %v9305_v15 = vor.u32 %v7168_v44, %v6674_v21  ;;  %v634_v28 = vpop.permute.xlu0 %633  ;;  %v9321_v6 = vor.u32 %v7211_v42, %v6788_v63  ;;  %v7140_v23 = vld [vmem:[#allocation2 + $0x304] sm:$0xf]  ;;  %v7183_v42 = vld [vmem:[#allocation2 + $0x454] sm:$0xf0] }
 0x242   : > { %1071 = vst [vmem:[#allocation2 + $0x370] sm:$0xff] %v1014_v11  ;;  %3310 = vmatpush.bf16.msra.mxu0 %v9303_v56  ;;  %v680_v7 = vrot.slane %v634_v28, 4  ;;  %v12271_v11 = vrot.slane %v9097_v20, 4 }
 0x243   : > { %12265 = vst [vmem:[#allocation203_spill] sm:$0xff] %v9303_v56  ;;  %3323 = vmatpush.bf16.msra.mxu1 %v9305_v15  ;;  %3289 = vmatmul.bf16.vlgmr.msrb.gmra.mxu2 %v9229_v60 }
 0x244   : > { %12266 = vst [vmem:[#allocation204_spill] sm:$0xff] %v9305_v15  ;;  %3333 = vmatpush.bf16.msra.mxu2 %v9287_v50  ;;  %3380 = vmatpush.bf16.msra.mxu3 %v7562_v13 }
 0x245   : > { %1072 = vst [vmem:[#allocation2 + $0x378] sm:$0xff] %v1016_v61  ;;  %3302 = vmatmul.bf16.vlgmr.msrb.gmra.mxu3 %v9229_v60  ;;  %v722_v61 = vsel %vm433_vm0, %v12271_v11, %v680_v7 }
 0x246   : > { %1058 = vst [vmem:[#allocation2 + $0x308] sm:$0xff] %v988_v0  ;;  %v724_v0 = vsel %vm433_vm0, %v680_v7, %v681_v4  ;;  %v723_v44 = vsel %vm698_vm4, %v9097_v20, %v722_v61  ;;  %v3019_v4 = vpop.f32.mrf.mxu1  ;;  %v3045_v7 = vpop.f32.mrf.mxu3 }
 0x247   : > { %12267 = vst [vmem:[#allocation205_spill] sm:$0xff] %v9311_v35  ;;  %v725_v21 = vsel %vm698_vm4, %v634_v28, %v724_v0  ;;  %v6680_v28 = vld [vmem:[#allocation2 + $0x3e8] sm:$0xf]  ;;  %v400_v11 = vpop.permute.xlu1 %399 }
 0x248   : > { %12268 = vst [vmem:[#allocation206_spill] sm:$0xff] %v9313_v33  ;;  %3334 = vmatpush.bf16.msra.mxu2 %v9315_v38  ;;  %3381 = vmatpush.bf16.msra.mxu3 %v7659_v17  ;;  %v402_v33 = vpop.permute.xlu2 %401  ;;  %v9338_v0 = vor.u32 %v7183_v42, %v6680_v28  ;;  %v12278_v42 = vrot.slane %v9209_v55, 4 }
 0x249   : > { %12269 = vst [vmem:[#allocation207_spill] sm:$0xff] %v9315_v38  ;;  %v7154_v43 = vld [vmem:[#allocation2 + $0x36c] sm:$0xf0]  ;;  %v6566_v26 = vld [vmem:[#allocation2 + $0x370] sm:$0xf0]  ;;  %v432_v20 = vrot.slane %v402_v33, 4  ;;  %v666_v61 = vpop.permute.xlu0 %665 }
 0x24a   : > { %12270 = vst [vmem:[#allocation208_spill] sm:$0xff] %v9321_v6  ;;  %v9330_v35 = vor.u32 %v7154_v43, %v6564_v54  ;;  %v9332_v63 = vor.u32 %v7140_v23, %v6566_v26  ;;  %v431_v54 = vrot.slane %v400_v11, 4  ;;  %v9340_v23 = vpop.f32.mrf.mxu0  ;;  %v9342_v26 = vpop.f32.mrf.mxu2  ;;  %v12277_v33 = vrot.slane %v9214_v36, 4 }
 0x24b   : > { %794 = vst [vmem:[#allocation2 + $0x220] sm:$0xff] %v723_v44  ;;  %v696_v44 = vrot.slane %v666_v61, 4  ;;  %v7126_v61 = vld [vmem:[#allocation2 + $0x28c] sm:$0xf0] }
 0x24c   : > { %12272 = vst [vmem:[#allocation209_spill] sm:$0xff] %v9330_v35  ;;  %3335 = vmatpush.bf16.msra.mxu2 %v9321_v6  ;;  %3382 = vmatpush.bf16.msra.mxu3 %v7672_v47  ;;  %v487_v4 = vsel %vm433_vm0, %v12277_v33, %v431_v54  ;;  %v489_v7 = vsel %vm433_vm0, %v431_v54, %v432_v20  ;;  %v6458_v33 = vld [vmem:[#allocation2 + $0x290] sm:$0xf0] }
 0x24d   : > { %12273 = vst [vmem:[#allocation210_spill] sm:$0xff] %v9332_v63  ;;  %3311 = vmatpush.bf16.msra.mxu0 %v9330_v35  ;;  %3324 = vmatpush.bf16.msra.mxu1 %v9332_v63  ;;  %v6572_v43 = vld [vmem:[#allocation2 + $0x308] sm:$0xf]  ;;  %v752_v28 = vsel %vm433_vm0, %v12278_v42, %v696_v44  ;;  %v7084_v44 = vld [vmem:[#allocation2 + $0x144] sm:$0xf] }
 0x24e   : > { %795 = vst [vmem:[#allocation2 + $0x228] sm:$0xff] %v725_v21  ;;  %v7155_v21 = vld [vmem:[#allocation2 + $0x374] sm:$0xf0]  ;;  %v753_v63 = vsel %vm698_vm4, %v9209_v55, %v752_v28 }
 0x24f   : > { %12274 = vst [vmem:[#allocation211_spill] sm:$0xff] %v9338_v0 }
 0x250   : > { %12275 = vst [vmem:[#allocation212_spill] sm:$0xff] %v9340_v23  ;;  %3336 = vmatpush.bf16.msra.mxu2 %v9338_v0  ;;  %3383 = vmatpush.bf16.msra.mxu3 %v7804_v53  ;;  %v488_v23 = vsel %vm435_vm1, %v9214_v36, %v487_v4  ;;  %v9358_v0 = vor.u32 %v7155_v21, %v6572_v43  ;;  %v7070_v21 = vld [vmem:[#allocation2 + $0xcc] sm:$0xf0]  ;;  %v7056_v4 = vld [vmem:[#allocation2 + $0x64] sm:$0xf] }
 0x251   : > { %12276 = vst [vmem:[#allocation213_spill] sm:$0xff] %v9342_v26  ;;  %v490_v26 = vsel %vm435_vm1, %v400_v11, %v489_v7  ;;  %v6348_v11 = vld [vmem:[#allocation2 + $0x140] sm:$0xf] }
 0x252   : > { %12279 = vst [vmem:[#allocation214_spill] sm:$0xff] %v9358_v0  ;;  %v6456_v15 = vld [vmem:[#allocation2 + $0x220] sm:$0xf]  ;;  %v7112_v53 = vld [vmem:[#allocation2 + $0x224] sm:$0xf]  ;;  %v3058_v55 = vpop.f32.mrf.mxu0  ;;  %v3084_v36 = vpop.f32.mrf.mxu2 }
 0x253   : > { %545 = vst [vmem:[#allocation2 + $0x1b0] sm:$0xff] %v488_v23  ;;  %v9360_v20 = vor.u32 %v7126_v61, %v6456_v15  ;;  %v9362_v54 = vor.u32 %v7112_v53, %v6458_v33  ;;  %v6240_v15 = vld [vmem:[#allocation2 + $0x60] sm:$0xf]  ;;  %v6356_v36 = vld [vmem:[#allocation2 + $0x148] sm:$0xf] }
 0x254   : > { %546 = vst [vmem:[#allocation2 + $0x1b8] sm:$0xff] %v490_v26  ;;  %3337 = vmatpush.bf16.msra.mxu2 %v9358_v0  ;;  %3384 = vmatpush.bf16.msra.mxu3 %v7934_v9  ;;  %v9378_v61 = vor.u32 %v7070_v21, %v6240_v15  ;;  %v9391_v15 = vld [vmem:[%s11446_s2 + $0x4] sm:$0xf]  ;;  %v9397_v21 = vpop.f32.mrf.mxu3 }
 0x255   : > { %12280 = vst [vmem:[#allocation215_spill] sm:$0xff] %v9360_v20  ;;  %3312 = vmatpush.bf16.msra.mxu0 %v9360_v20  ;;  %3325 = vmatpush.bf16.msra.mxu1 %v9362_v54  ;;  %v6464_v7 = vld [vmem:[#allocation2 + $0x228] sm:$0xf] }
 0x256   : > { %12281 = vst [vmem:[#allocation216_spill] sm:$0xff] %v9362_v54 }
 0x257   : > { %809 = vst [vmem:[#allocation2 + $0x298] sm:$0xff] %v753_v63  ;;  %v6242_v63 = vld [vmem:[#allocation2 + $0xd0] sm:$0xf0] }
 0x258   : > { %3385 = vmatpush.bf16.msra.mxu3 %v7972_v39  ;;  %12285 = vst [vmem:[#allocation220_spill] sm:$0xff] %v9378_v61  ;;  %v9380_v33 = vor.u32 %v7056_v4, %v6242_v63 }
 0x259   : > { %12289 = vst [vmem:[#allocation224_spill] sm:$0xff] %v9397_v21  ;;  %v12296_v21 = vld [vmem:[#allocation21_spill] sm:$0xff] }
 0x25a   : > { %v7098_v43 = vld [vmem:[#allocation2 + $0x1ac] sm:$0xf0]  ;;  %v6350_v53 = vld [vmem:[#allocation2 + $0x1b0] sm:$0xf0]  ;;  %12286 = vst [vmem:[#allocation221_spill] sm:$0xff] %v9380_v33 }
 0x25b   : > { %v9369_v23 = vor.u32 %v7098_v43, %v6348_v11  ;;  %v9371_v26 = vor.u32 %v7084_v44, %v6350_v53  ;;  %v7099_v55 = vld [vmem:[#allocation2 + $0x1b4] sm:$0xf0]  ;;  %v6248_v11 = vld [vmem:[#allocation2 + $0x68] sm:$0xf]  ;;  %v9395_v53 = vpop.f32.mrf.mxu1 }
 0x25c   : > { %3386 = vmatpush.bf16.msra.mxu3 %v7986_v49  ;;  %v7071_v44 = vld [vmem:[#allocation2 + $0xd4] sm:$0xf0]  ;;  %v9386_v43 = vor.u32 %v7099_v55, %v6356_v36  ;;  %12288 = vst [vmem:[#allocation223_spill] sm:$0xff] %v9395_v53  ;;  %v9415_v55 = vpop.f32.mrf.mxu0  ;;  %v9417_v36 = vpop.f32.mrf.mxu2  ;;  %v12297_v53 = vld [vmem:[#allocation16_spill] sm:$0xff] }
 0x25d   : > { %12282 = vst [vmem:[#allocation217_spill] sm:$0xff] %v9369_v23  ;;  %3313 = vmatpush.bf16.msra.mxu0 %v9369_v23  ;;  %3326 = vmatpush.bf16.msra.mxu1 %v9371_v26  ;;  %v9401_v4 = vor.u32 %v7071_v44, %v6248_v11  ;;  %v12294_v11 = vld [vmem:[#allocation11_spill] sm:$0xff]  ;;  %v12295_v44 = vld [vmem:[#allocation50_spill] sm:$0xff] }
 0x25e   : > { %12283 = vst [vmem:[#allocation218_spill] sm:$0xff] %v9371_v26  ;;  %v7127_v42 = vld [vmem:[#allocation2 + $0x294] sm:$0xf0] }
 0x25f   : > { %v9376_v28 = vor.u32 %v7127_v42, %v6464_v7  ;;  %12287 = vst [vmem:[#allocation222_spill] sm:$0xff] %v9386_v43  ;;  %v3097_v7 = vpop.f32.mrf.mxu3  ;;  %v12291_v42 = vld [vmem:[#allocation13_spill] sm:$0xff] }
 0x260   : > { %3387 = vmatpush.bf16.msra.mxu3 %v8016_v58  ;;  %12290 = vst [vmem:[#allocation225_spill] sm:$0xff] %v9401_v4 }
 0x261   : > { %12284 = vst [vmem:[#allocation219_spill] sm:$0xff] %v9376_v28  ;;  %3338 = vmatpush.bf16.msra.mxu2 %v9376_v28  ;;  %3314 = vmatpush.bf16.msra.mxu0 %v9378_v61 }
 0x262   : > { %3327 = vmatpush.bf16.msra.mxu1 %v9380_v33  ;;  %12292 = vst [vmem:[#allocation226_spill] sm:$0xff] %v9415_v55 }
 0x263   : > { %3388 = vmatmul.bf16.vlgmr.msra.gmra.mxu3 %v9391_v15  ;;  %v3071_v63 = vpop.f32.mrf.mxu1  ;;  %12293 = vst [vmem:[#allocation227_spill] sm:$0xff] %v9417_v36  ;;  %v12303_v36 = vld [vmem:[#allocation36_spill] sm:$0xff] }
 0x264   : > { %3432 = vmatpush.bf16.msrb.mxu3 %v8020_v12  ;;  %3315 = vmatmul.bf16.vlgmr.msra.gmra.mxu0 %v9229_v60  ;;  %v12301_v63 = vld [vmem:[#allocation18_spill] sm:$0xff]  ;;  %v3110_v7 = vpop.f32.mrf.mxu0  ;;  %v3136_v55 = vpop.f32.mrf.mxu2 }
 0x265   : > { %3393 = vmatpush.bf16.msrb.mxu0 %v7565_v14  ;;  %3339 = vmatpush.bf16.msra.mxu2 %v9386_v43  ;;  %v12309_v55 = vld [vmem:[#allocation64_spill] sm:$0xff]  ;;  %v12310_v7 = vld [vmem:[#allocation39_spill] sm:$0xff] }
 0x266   : > { %3406 = vmatpush.bf16.msrb.mxu1 %v7629_v51 }
 0x267   : > { %3328 = vmatmul.bf16.vlgmr.msra.gmra.mxu1 %v9229_v60 }
 0x268   : > { %3433 = vmatpush.bf16.msrb.mxu3 %v8056_v31 }
 0x269   : > { %3394 = vmatpush.bf16.msrb.mxu0 %v7661_v18  ;;  %3340 = vmatpush.bf16.msra.mxu2 %v9401_v4 }
 0x26a   : > { %3407 = vmatpush.bf16.msrb.mxu1 %v7665_v24 }
 0x26c   : > { %3434 = vmatpush.bf16.msrb.mxu3 %v8072_v27  ;;  %3341 = vmatmul.bf16.vlgmr.msra.gmra.mxu2 %v9229_v60  ;;  %v12298_v27 = vld [vmem:[#allocation15_spill] sm:$0xff] }
 0x26d   : > { %3419 = vmatpush.bf16.msrb.mxu2 %v7631_v52  ;;  %3395 = vmatpush.bf16.msrb.mxu0 %v7682_v34  ;;  %v12299_v34 = vld [vmem:[#allocation52_spill] sm:$0xff]  ;;  %v12300_v60 = vld [vmem:[#allocation35_spill] sm:$0xff] }
 0x26e   : > { %3408 = vmatpush.bf16.msrb.mxu1 %v12291_v42  ;;  %v12302_v42 = vld [vmem:[#allocation17_spill] sm:$0xff] }
 0x270   : > { %3435 = vmatpush.bf16.msrb.mxu3 %v12295_v44  ;;  %v12304_v44 = vld [vmem:[#allocation22_spill] sm:$0xff] }
 0x271   : > { %3420 = vmatpush.bf16.msrb.mxu2 %v12294_v11  ;;  %3396 = vmatpush.bf16.msrb.mxu0 %v12296_v21  ;;  %v12305_v21 = vld [vmem:[#allocation19_spill] sm:$0xff] }
 0x272   : > { %3409 = vmatpush.bf16.msrb.mxu1 %v12297_v53 }
 0x274   : > { %3436 = vmatpush.bf16.msrb.mxu3 %v12299_v34  ;;  %v12307_v34 = vld [vmem:[#allocation24_spill] sm:$0xff] }
 0x275   : > { %3421 = vmatpush.bf16.msrb.mxu2 %v12298_v27  ;;  %3397 = vmatpush.bf16.msrb.mxu0 %v12300_v60  ;;  %v12306_v27 = vld [vmem:[#allocation37_spill] sm:$0xff]  ;;  %v12308_v60 = vld [vmem:[#allocation23_spill] sm:$0xff] }
 0x276   : > { %3410 = vmatpush.bf16.msrb.mxu1 %v12301_v63 }
 0x278   : > { %3437 = vmatpush.bf16.msrb.mxu3 %v8154_v16  ;;  %v12311_v16 = vld [vmem:[#allocation26_spill] sm:$0xff] }
 0x279   : > { %3422 = vmatpush.bf16.msrb.mxu2 %v12302_v42  ;;  %3398 = vmatpush.bf16.msrb.mxu0 %v12303_v36  ;;  %v12312_v36 = vld [vmem:[#allocation43_spill] sm:$0xff]  ;;  %v12332_v42 = vld [vmem:[#allocation82_spill] sm:$0xff] }
 0x27a   : > { %3411 = vmatpush.bf16.msrb.mxu1 %v12304_v44  ;;  %v9441_v44 = vpop.f32.mrf.mxu1 }
 0x27b   : > { %12313 = vst [vmem:[#allocation228_spill] sm:$0xff] %v9441_v44  ;;  %v12321_v44 = vld [vmem:[#allocation29_spill] sm:$0xff] }
 0x27c   : > { %3438 = vmatpush.bf16.msrb.mxu3 %v8162_v22  ;;  %v12315_v22 = vld [vmem:[#allocation25_spill] sm:$0xff] }
 0x27d   : > { %3423 = vmatpush.bf16.msrb.mxu2 %v12305_v21  ;;  %3399 = vmatpush.bf16.msrb.mxu0 %v12306_v27  ;;  %v9443_v21 = vpop.f32.mrf.mxu3  ;;  %v12316_v27 = vld [vmem:[#allocation28_spill] sm:$0xff] }
 0x27e   : > { %3412 = vmatpush.bf16.msrb.mxu1 %v12307_v34  ;;  %12314 = vst [vmem:[#allocation229_spill] sm:$0xff] %v9443_v21  ;;  %v12322_v21 = vld [vmem:[#allocation72_spill] sm:$0xff]  ;;  %v9461_v34 = vpop.f32.mrf.mxu2 }
 0x27f   : > { %12326 = vst [vmem:[#allocation231_spill] sm:$0xff] %v9461_v34  ;;  %v12336_v34 = vld [vmem:[#allocation86_spill] sm:$0xff] }
 0x280   : > { %3439 = vmatpush.bf16.msrb.mxu3 %v8182_v19  ;;  %v12317_v19 = vld [vmem:[#allocation70_spill] sm:$0xff] }
 0x281   : > { %3424 = vmatpush.bf16.msrb.mxu2 %v12308_v60  ;;  %3400 = vmatpush.bf16.msrb.mxu0 %v12310_v7  ;;  %v12318_v7 = vld [vmem:[#allocation45_spill] sm:$0xff]  ;;  %v12324_v60 = vld [vmem:[#allocation32_spill] sm:$0xff] }
 0x282   : > { %3413 = vmatpush.bf16.msrb.mxu1 %v12311_v16  ;;  %v12319_v16 = vld [vmem:[#allocation27_spill] sm:$0xff] }
 0x283   : > { %3440 = vmatmul.bf16.vlgmr.msrb.gmra.mxu3 %v9391_v15 }
 0x284   : > { %3484 = vmatpush.bf16.msra.mxu3 %v12309_v55  ;;  %3401 = vmatmul.bf16.vlgmr.msrb.gmra.mxu0 %v9391_v15 }
 0x285   : > { %3445 = vmatpush.bf16.msra.mxu0 %v12312_v36  ;;  %3425 = vmatpush.bf16.msrb.mxu2 %v12315_v22  ;;  %v12320_v36 = vld [vmem:[#allocation30_spill] sm:$0xff]  ;;  %v3123_v22 = vpop.f32.mrf.mxu1  ;;  %v3149_v55 = vpop.f32.mrf.mxu3 }
 0x286   : > { %3458 = vmatpush.bf16.msra.mxu1 %v12316_v27  ;;  %v12323_v27 = vld [vmem:[#allocation47_spill] sm:$0xff]  ;;  %v12333_v22 = vld [vmem:[#allocation53_spill] sm:$0xff]  ;;  %v12334_v55 = vld [vmem:[#allocation48_spill] sm:$0xff] }
 0x287   : > { %3414 = vmatmul.bf16.vlgmr.msrb.gmra.mxu1 %v9391_v15 }
 0x288   : > { %3485 = vmatpush.bf16.msra.mxu3 %v12317_v19  ;;  %v9459_v19 = vpop.f32.mrf.mxu0 }
 0x289   : > { %3446 = vmatpush.bf16.msra.mxu0 %v12318_v7  ;;  %3426 = vmatpush.bf16.msrb.mxu2 %v12319_v16  ;;  %12325 = vst [vmem:[#allocation230_spill] sm:$0xff] %v9459_v19  ;;  %v12327_v7 = vld [vmem:[#allocation31_spill] sm:$0xff]  ;;  %v12328_v16 = vld [vmem:[#allocation78_spill] sm:$0xff]  ;;  %v3188_v19 = vpop.f32.mrf.mxu2 }
 0x28a   : > { %3459 = vmatpush.bf16.msra.mxu1 %v12320_v36  ;;  %v12329_v36 = vld [vmem:[#allocation51_spill] sm:$0xff]  ;;  %v12345_v19 = vld [vmem:[#allocation94_spill] sm:$0xff] }
 0x28c   : > { %3486 = vmatpush.bf16.msra.mxu3 %v12322_v21  ;;  %3427 = vmatmul.bf16.vlgmr.msrb.gmra.mxu2 %v9391_v15  ;;  %v12331_v21 = vld [vmem:[#allocation33_spill] sm:$0xff] }
 0x28d   : > { %3471 = vmatpush.bf16.msra.mxu2 %v12321_v44  ;;  %3447 = vmatpush.bf16.msra.mxu0 %v12323_v27  ;;  %v12330_v44 = vld [vmem:[#allocation41_spill] sm:$0xff]  ;;  %v12335_v27 = vld [vmem:[#allocation42_spill] sm:$0xff] }
 0x28e   : > { %3460 = vmatpush.bf16.msra.mxu1 %v12324_v60 }
 0x290   : > { %3487 = vmatpush.bf16.msra.mxu3 %v12328_v16  ;;  %v3162_v60 = vpop.f32.mrf.mxu0  ;;  %v12338_v16 = vld [vmem:[#allocation58_spill] sm:$0xff] }
 0x291   : > { %3472 = vmatpush.bf16.msra.mxu2 %v12327_v7  ;;  %3448 = vmatpush.bf16.msra.mxu0 %v12329_v36  ;;  %v12337_v7 = vld [vmem:[#allocation55_spill] sm:$0xff]  ;;  %v12339_v36 = vld [vmem:[#allocation49_spill] sm:$0xff]  ;;  %v12344_v60 = vld [vmem:[#allocation92_spill] sm:$0xff] }
 0x292   : > { %3461 = vmatpush.bf16.msra.mxu1 %v12330_v44  ;;  %v12340_v44 = vld [vmem:[#allocation90_spill] sm:$0xff] }
 0x294   : > { %3488 = vmatpush.bf16.msra.mxu3 %v12332_v42  ;;  %v12342_v42 = vld [vmem:[#allocation60_spill] sm:$0xff] }
 0x295   : > { %3473 = vmatpush.bf16.msra.mxu2 %v12331_v21  ;;  %3449 = vmatpush.bf16.msra.mxu0 %v12333_v22  ;;  %v12341_v21 = vld [vmem:[#allocation57_spill] sm:$0xff]  ;;  %v12343_v22 = vld [vmem:[#allocation59_spill] sm:$0xff] }
 0x296   : > { %3462 = vmatpush.bf16.msra.mxu1 %v12334_v55 }
 0x298   : > { %3489 = vmatpush.bf16.msra.mxu3 %v12336_v34  ;;  %v12347_v34 = vld [vmem:[#allocation66_spill] sm:$0xff] }
 0x299   : > { %3474 = vmatpush.bf16.msra.mxu2 %v12335_v27  ;;  %3450 = vmatpush.bf16.msra.mxu0 %v12337_v7  ;;  %v12346_v27 = vld [vmem:[#allocation63_spill] sm:$0xff]  ;;  %v12348_v7 = vld [vmem:[#allocation65_spill] sm:$0xff] }
 0x29a   : > { %3463 = vmatpush.bf16.msra.mxu1 %v12338_v16  ;;  %v9485_v16 = vpop.f32.mrf.mxu1 }
 0x29b   : > { %12349 = vst [vmem:[#allocation60_spill] sm:$0xff] %v9485_v16  ;;  %v12357_v16 = vld [vmem:[#allocation69_spill] sm:$0xff] }
 0x29c   : > { %3490 = vmatpush.bf16.msra.mxu3 %v12340_v44  ;;  %v12351_v44 = vld [vmem:[#allocation61_spill] sm:$0xff] }
 0x29d   : > { %3475 = vmatpush.bf16.msra.mxu2 %v12339_v36  ;;  %3451 = vmatpush.bf16.msra.mxu0 %v12341_v21  ;;  %v9487_v36 = vpop.f32.mrf.mxu3  ;;  %v12352_v21 = vld [vmem:[#allocation68_spill] sm:$0xff] }
 0x29e   : > { %3464 = vmatpush.bf16.msra.mxu1 %v12342_v42  ;;  %12350 = vst [vmem:[#allocation232_spill] sm:$0xff] %v9487_v36  ;;  %v12358_v36 = vld [vmem:[#allocation73_spill] sm:$0xff] }
 0x2a0   : > { %3491 = vmatpush.bf16.msra.mxu3 %v12344_v60  ;;  %v12353_v60 = vld [vmem:[#allocation96_spill] sm:$0xff] }
 0x2a1   : > { %3476 = vmatpush.bf16.msra.mxu2 %v12343_v22  ;;  %3452 = vmatpush.bf16.msra.mxu0 %v12346_v27  ;;  %v12354_v27 = vld [vmem:[#allocation71_spill] sm:$0xff]  ;;  %v9505_v22 = vpop.f32.mrf.mxu2 }
 0x2a2   : > { %3465 = vmatpush.bf16.msra.mxu1 %v12347_v34  ;;  %v12355_v34 = vld [vmem:[#allocation67_spill] sm:$0xff]  ;;  %12361 = vst [vmem:[#allocation234_spill] sm:$0xff] %v9505_v22 }
 0x2a3   : > { %3492 = vmatmul.bf16.vlgmr.msra.gmra.mxu3 %v9391_v15  ;;  %v12369_v22 = vld [vmem:[#allocation87_spill] sm:$0xff] }
 0x2a4   : > { %3536 = vmatpush.bf16.msrb.mxu3 %v12345_v19  ;;  %3453 = vmatmul.bf16.vlgmr.msra.gmra.mxu0 %v9391_v15  ;;  %v12359_v19 = vld [vmem:[#allocation76_spill] sm:$0xff] }
 0x2a5   : > { %3497 = vmatpush.bf16.msrb.mxu0 %v12348_v7  ;;  %3477 = vmatpush.bf16.msra.mxu2 %v12351_v44  ;;  %v12356_v7 = vld [vmem:[#allocation74_spill] sm:$0xff]  ;;  %v3201_v44 = vpop.f32.mrf.mxu3 }
 0x2a6   : > { %3510 = vmatpush.bf16.msrb.mxu1 %v12352_v21  ;;  %v3175_v21 = vpop.f32.mrf.mxu1  ;;  %v12367_v44 = vld [vmem:[#allocation84_spill] sm:$0xff] }
 0x2a7   : > { %3466 = vmatmul.bf16.vlgmr.msra.gmra.mxu1 %v9391_v15  ;;  %v12366_v21 = vld [vmem:[#allocation83_spill] sm:$0xff] }
 0x2a8   : > { %3537 = vmatpush.bf16.msrb.mxu3 %v12353_v60  ;;  %v9503_v60 = vpop.f32.mrf.mxu0 }
 0x2a9   : > { %3498 = vmatpush.bf16.msrb.mxu0 %v12354_v27  ;;  %3478 = vmatpush.bf16.msra.mxu2 %v12355_v34  ;;  %12360 = vst [vmem:[#allocation233_spill] sm:$0xff] %v9503_v60  ;;  %v12362_v27 = vld [vmem:[#allocation75_spill] sm:$0xff]  ;;  %v3240_v60 = vpop.f32.mrf.mxu2 }
 0x2aa   : > { %3511 = vmatpush.bf16.msrb.mxu1 %v12356_v7  ;;  %v12363_v7 = vld [vmem:[#allocation79_spill] sm:$0xff] }
 0x2ac   : > { %3538 = vmatpush.bf16.msrb.mxu3 %v8518_v1  ;;  %3479 = vmatmul.bf16.vlgmr.msra.gmra.mxu2 %v9391_v15  ;;  %v12365_v1 = vld [vmem:[#allocation77_spill] sm:$0xff] }
 0x2ad   : > { %3523 = vmatpush.bf16.msrb.mxu2 %v12357_v16  ;;  %3499 = vmatpush.bf16.msrb.mxu0 %v12358_v36  ;;  %v12364_v16 = vld [vmem:[#allocation80_spill] sm:$0xff]  ;;  %v12368_v36 = vld [vmem:[#allocation81_spill] sm:$0xff]  ;;  %v9525_v60 = vpop.f32.mrf.mxu3 }
 0x2ae   : > { %3512 = vmatpush.bf16.msrb.mxu1 %v12359_v19  ;;  %12375 = vst [vmem:[#allocation235_spill] sm:$0xff] %v9525_v60  ;;  %v12384_v60 = vld [vmem:[#allocation97_spill] sm:$0xff] }
 0x2b0   : > { %3539 = vmatpush.bf16.msrb.mxu3 %v8566_v2  ;;  %v3214_v19 = vpop.f32.mrf.mxu0  ;;  %v12370_v2 = vld [vmem:[#allocation88_spill] sm:$0xff] }
 0x2b1   : > { %3524 = vmatpush.bf16.msrb.mxu2 %v12362_v27  ;;  %3500 = vmatpush.bf16.msrb.mxu0 %v12363_v7  ;;  %v12371_v7 = vld [vmem:[#allocation85_spill] sm:$0xff]  ;;  %v12374_v19 = vld [vmem:[#allocation122_spill] sm:$0xff] }
 0x2b2   : > { %3513 = vmatpush.bf16.msrb.mxu1 %v12364_v16 }
 0x2b4   : > { %3540 = vmatpush.bf16.msrb.mxu3 %v8614_v8 }
 0x2b5   : > { %3525 = vmatpush.bf16.msrb.mxu2 %v12365_v1  ;;  %3501 = vmatpush.bf16.msrb.mxu0 %v12366_v21  ;;  %v12372_v1 = vld [vmem:[#allocation91_spill] sm:$0xff]  ;;  %v12373_v21 = vld [vmem:[#allocation89_spill] sm:$0xff] }
 0x2b6   : > { %3514 = vmatpush.bf16.msrb.mxu1 %v12367_v44 }
 0x2b8   : > { %3541 = vmatpush.bf16.msrb.mxu3 %v8670_v41  ;;  %v12377_v41 = vld [vmem:[#allocation93_spill] sm:$0xff] }
 0x2b9   : > { %3526 = vmatpush.bf16.msrb.mxu2 %v12368_v36  ;;  %3502 = vmatpush.bf16.msrb.mxu0 %v12369_v22  ;;  %v12376_v36 = vld [vmem:[#allocation126_spill] sm:$0xff]  ;;  %v12378_v22 = vld [vmem:[#allocation101_spill] sm:$0xff] }
 0x2ba   : > { %3515 = vmatpush.bf16.msrb.mxu1 %v12370_v2  ;;  %v12379_v2 = vld [vmem:[#allocation95_spill] sm:$0xff] }
 0x2bc   : > { %3542 = vmatpush.bf16.msrb.mxu3 %v8690_v62  ;;  %v12381_v62 = vld [vmem:[#allocation99_spill] sm:$0xff] }
 0x2bd   : > { %3527 = vmatpush.bf16.msrb.mxu2 %v12371_v7  ;;  %3503 = vmatpush.bf16.msrb.mxu0 %v12372_v1  ;;  %v9531_v7 = vpop.f32.mrf.mxu1  ;;  %v12382_v1 = vld [vmem:[#allocation104_spill] sm:$0xff] }
 0x2be   : > { %3516 = vmatpush.bf16.msrb.mxu1 %v8512_v25  ;;  %12380 = vst [vmem:[#allocation236_spill] sm:$0xff] %v9531_v7  ;;  %v12388_v7 = vld [vmem:[#allocation105_spill] sm:$0xff] }
 0x2bf   : > { %v12392_v25 = vld [vmem:[#allocation109_spill] sm:$0xff] }
 0x2c0   : > { %3543 = vmatpush.bf16.msrb.mxu3 %v12374_v19  ;;  %v12383_v19 = vld [vmem:[#allocation128_spill] sm:$0xff] }
 0x2c1   : > { %3528 = vmatpush.bf16.msrb.mxu2 %v12373_v21  ;;  %3504 = vmatpush.bf16.msrb.mxu0 %v12377_v41  ;;  %v12385_v41 = vld [vmem:[#allocation103_spill] sm:$0xff]  ;;  %v12391_v21 = vld [vmem:[#allocation110_spill] sm:$0xff] }
 0x2c2   : > { %3517 = vmatpush.bf16.msrb.mxu1 %v12378_v22  ;;  %v12386_v22 = vld [vmem:[#allocation108_spill] sm:$0xff] }
 0x2c3   : > { %3544 = vmatmul.bf16.vlgmr.msrb.gmra.mxu3 %v9391_v15 }
 0x2c4   : > { %3588 = vmatpush.bf16.msra.mxu3 %v12376_v36  ;;  %3505 = vmatmul.bf16.vlgmr.msrb.gmra.mxu0 %v9391_v15  ;;  %v12390_v36 = vld [vmem:[#allocation102_spill] sm:$0xff] }
 0x2c5   : > { %3549 = vmatpush.bf16.msra.mxu0 %v12379_v2  ;;  %3529 = vmatpush.bf16.msrb.mxu2 %v12381_v62  ;;  %v9542_v2 = vpop.f32.mrf.mxu0  ;;  %v3253_v62 = vpop.f32.mrf.mxu3 }
 0x2c6   : > { %3562 = vmatpush.bf16.msra.mxu1 %v12382_v1  ;;  %12387 = vst [vmem:[#allocation237_spill] sm:$0xff] %v9542_v2  ;;  %v12389_v1 = vld [vmem:[#allocation130_spill] sm:$0xff]  ;;  %v12396_v62 = vld [vmem:[#allocation113_spill] sm:$0xff] }
 0x2c7   : > { %3518 = vmatmul.bf16.vlgmr.msrb.gmra.mxu1 %v9391_v15 }
 0x2c8   : > { %3589 = vmatpush.bf16.msra.mxu3 %v12383_v19  ;;  %v3227_v19 = vpop.f32.mrf.mxu1 }
 0x2c9   : > { %3550 = vmatpush.bf16.msra.mxu0 %v12384_v60  ;;  %3530 = vmatpush.bf16.msrb.mxu2 %v12385_v41  ;;  %v12393_v41 = vld [vmem:[#allocation107_spill] sm:$0xff] }
 0x2ca   : > { %3563 = vmatpush.bf16.msra.mxu1 %v12386_v22  ;;  %v12394_v22 = vld [vmem:[#allocation114_spill] sm:$0xff] }
 0x2cc   : > { %3590 = vmatpush.bf16.msra.mxu3 %v12389_v1  ;;  %3531 = vmatmul.bf16.vlgmr.msrb.gmra.mxu2 %v9391_v15 }
 0x2cd   : > { %3575 = vmatpush.bf16.msra.mxu2 %v12388_v7  ;;  %3551 = vmatpush.bf16.msra.mxu0 %v12390_v36  ;;  %v3266_v2 = vpop.f32.mrf.mxu0  ;;  %v12395_v7 = vld [vmem:[#allocation111_spill] sm:$0xff]  ;;  %v9556_v36 = vpop.f32.mrf.mxu2 }
 0x2ce   : > { %3564 = vmatpush.bf16.msra.mxu1 %v12391_v21  ;;  %12397 = vst [vmem:[#allocation238_spill] sm:$0xff] %v9556_v36  ;;  %v9558_v19 = vpop.f32.mrf.mxu3  ;;  %v12399_v21 = vld [vmem:[#allocation116_spill] sm:$0xff] }
 0x2cf   : > { %12398 = vst [vmem:[#allocation239_spill] sm:$0xff] %v9558_v19  ;;  %v12403_v2 = vld [vmem:[#allocation124_spill] sm:$0xff] }
 0x2d0   : > { %3591 = vmatpush.bf16.msra.mxu3 %v8849_v3 }
 0x2d1   : > { %3576 = vmatpush.bf16.msra.mxu2 %v12392_v25  ;;  %3552 = vmatpush.bf16.msra.mxu0 %v12393_v41  ;;  %v12400_v25 = vld [vmem:[#allocation115_spill] sm:$0xff]  ;;  %v9563_v41 = vpop.f32.mrf.mxu1 }
 0x2d2   : > { %3565 = vmatpush.bf16.msra.mxu1 %v12394_v22  ;;  %12401 = vst [vmem:[#allocation240_spill] sm:$0xff] %v9563_v41  ;;  %v12402_v22 = vld [vmem:[#allocation119_spill] sm:$0xff]  ;;  %v12409_v41 = vld [vmem:[#allocation156_spill] sm:$0xff] }
 0x2d4   : > { %3592 = vmatpush.bf16.msra.mxu3 %v8881_v37  ;;  %v12406_v37 = vld [vmem:[#allocation132_spill] sm:$0xff] }
 0x2d5   : > { %3577 = vmatpush.bf16.msra.mxu2 %v12395_v7  ;;  %3553 = vmatpush.bf16.msra.mxu0 %v12396_v62  ;;  %v12404_v7 = vld [vmem:[#allocation117_spill] sm:$0xff]  ;;  %v3292_v36 = vpop.f32.mrf.mxu2 }
 0x2d6   : > { %3566 = vmatpush.bf16.msra.mxu1 %v12399_v21  ;;  %v12405_v62 = vld [vmem:[#allocation121_spill] sm:$0xff]  ;;  %v3305_v19 = vpop.f32.mrf.mxu3  ;;  %v12415_v36 = vld [vmem:[#allocation160_spill] sm:$0xff] }
 0x2d7   : > { %v12407_v21 = vld [vmem:[#allocation125_spill] sm:$0xff]  ;;  %v12417_v19 = vld [vmem:[#allocation135_spill] sm:$0xff] }
 0x2d8   : > { %3593 = vmatpush.bf16.msra.mxu3 %v8935_v5 }
 0x2d9   : > { %3578 = vmatpush.bf16.msra.mxu2 %v12400_v25  ;;  %3554 = vmatpush.bf16.msra.mxu0 %v12402_v22  ;;  %v12408_v25 = vld [vmem:[#allocation154_spill] sm:$0xff]  ;;  %v3279_v5 = vpop.f32.mrf.mxu1  ;;  %v12410_v22 = vld [vmem:[#allocation123_spill] sm:$0xff] }
 0x2da   : > { %3567 = vmatpush.bf16.msra.mxu1 %v12403_v2  ;;  %v12411_v2 = vld [vmem:[#allocation134_spill] sm:$0xff]  ;;  %v12416_v5 = vld [vmem:[#allocation129_spill] sm:$0xff] }
 0x2dc   : > { %3594 = vmatpush.bf16.msra.mxu3 %v8947_v30  ;;  %v12413_v30 = vld [vmem:[#allocation133_spill] sm:$0xff] }
 0x2dd   : > { %3579 = vmatpush.bf16.msra.mxu2 %v12404_v7  ;;  %3555 = vmatpush.bf16.msra.mxu0 %v12405_v62  ;;  %v12412_v7 = vld [vmem:[#allocation127_spill] sm:$0xff]  ;;  %v12414_v62 = vld [vmem:[#allocation136_spill] sm:$0xff] }
 0x2de   : > { %3568 = vmatpush.bf16.msra.mxu1 %v12406_v37 }
 0x2e0   : > { %3595 = vmatpush.bf16.msra.mxu3 %v12408_v25 }
 0x2e1   : > { %3580 = vmatpush.bf16.msra.mxu2 %v12407_v21  ;;  %3556 = vmatpush.bf16.msra.mxu0 %v12410_v22  ;;  %v12418_v22 = vld [vmem:[#allocation140_spill] sm:$0xff]  ;;  %v9593_v25 = vpop.f32.mrf.mxu0  ;;  %v12431_v21 = vld [vmem:[#allocation145_spill] sm:$0xff] }
 0x2e2   : > { %3569 = vmatpush.bf16.msra.mxu1 %v12411_v2  ;;  %v12419_v2 = vld [vmem:[#allocation137_spill] sm:$0xff]  ;;  %12425 = vst [vmem:[#allocation241_spill] sm:$0xff] %v9593_v25  ;;  %v12434_v25 = vld [vmem:[#allocation182_spill] sm:$0xff] }
 0x2e3   : > { %3596 = vmatmul.bf16.vlgmr.msra.gmra.mxu3 %v9391_v15 }
 0x2e4   : > { %3640 = vmatpush.bf16.msrb.mxu3 %v12409_v41  ;;  %3557 = vmatmul.bf16.vlgmr.msra.gmra.mxu0 %v9391_v15  ;;  %v12423_v41 = vld [vmem:[#allocation141_spill] sm:$0xff] }
 0x2e5   : > { %3601 = vmatpush.bf16.msrb.mxu0 %v12412_v7  ;;  %3581 = vmatpush.bf16.msra.mxu2 %v12413_v30  ;;  %v12420_v7 = vld [vmem:[#allocation162_spill] sm:$0xff] }
 0x2e6   : > { %3614 = vmatpush.bf16.msrb.mxu1 %v12414_v62  ;;  %v12421_v62 = vld [vmem:[#allocation131_spill] sm:$0xff]  ;;  %v12422_v30 = vld [vmem:[#allocation142_spill] sm:$0xff] }
 0x2e7   : > { %3570 = vmatmul.bf16.vlgmr.msra.gmra.mxu1 %v9391_v15 }
 0x2e8   : > { %3641 = vmatpush.bf16.msrb.mxu3 %v12415_v36  ;;  %v12424_v36 = vld [vmem:[#allocation170_spill] sm:$0xff] }
 0x2e9   : > { %3602 = vmatpush.bf16.msrb.mxu0 %v12416_v5  ;;  %3582 = vmatpush.bf16.msra.mxu2 %v12417_v19  ;;  %v12426_v5 = vld [vmem:[#allocation139_spill] sm:$0xff]  ;;  %v9596_v19 = vpop.f32.mrf.mxu1 }
 0x2ea   : > { %3615 = vmatpush.bf16.msrb.mxu1 %v12418_v22  ;;  %12427 = vst [vmem:[#allocation242_spill] sm:$0xff] %v9596_v19  ;;  %v12428_v22 = vld [vmem:[#allocation146_spill] sm:$0xff]  ;;  %v12435_v19 = vld [vmem:[#allocation151_spill] sm:$0xff] }
 0x2ec   : > { %3642 = vmatpush.bf16.msrb.mxu3 %v12420_v7  ;;  %3583 = vmatmul.bf16.vlgmr.msra.gmra.mxu2 %v9391_v15  ;;  %v12430_v7 = vld [vmem:[#allocation176_spill] sm:$0xff] }
 0x2ed   : > { %3627 = vmatpush.bf16.msrb.mxu2 %v12419_v2  ;;  %3603 = vmatpush.bf16.msrb.mxu0 %v12421_v62  ;;  %v12429_v2 = vld [vmem:[#allocation143_spill] sm:$0xff]  ;;  %v12432_v62 = vld [vmem:[#allocation148_spill] sm:$0xff] }
 0x2ee   : > { %3616 = vmatpush.bf16.msrb.mxu1 %v12422_v30  ;;  %v3389_v30 = vpop.f32.mrf.mxu3 }
 0x2ef   : > { %3772 = vrot.lane.b32.xlu0 %v3389_v30, %s7304_s12  ;;  %v12441_v30 = vld [vmem:[#allocation159_spill] sm:$0xff] }
 0x2f0   : > { %3643 = vmatpush.bf16.msrb.mxu3 %v12424_v36  ;;  %v12436_v36 = vld [vmem:[#allocation158_spill] sm:$0xff] }
 0x2f1   : > { %3628 = vmatpush.bf16.msrb.mxu2 %v12423_v41  ;;  %3604 = vmatpush.bf16.msrb.mxu0 %v12426_v5  ;;  %v12433_v41 = vld [vmem:[#allocation147_spill] sm:$0xff]  ;;  %v3318_v5 = vpop.f32.mrf.mxu0 }
 0x2f2   : > { %3617 = vmatpush.bf16.msrb.mxu1 %v12428_v22  ;;  %v3331_v22 = vpop.f32.mrf.mxu1  ;;  %v12443_v5 = vld [vmem:[#allocation166_spill] sm:$0xff] }
 0x2f3   : > { %v12442_v22 = vld [vmem:[#allocation155_spill] sm:$0xff] }
 0x2f4   : > { %3644 = vmatpush.bf16.msrb.mxu3 %v12430_v7 }
 0x2f5   : > { %3629 = vmatpush.bf16.msrb.mxu2 %v12429_v2  ;;  %3605 = vmatpush.bf16.msrb.mxu0 %v12431_v21  ;;  %v12437_v2 = vld [vmem:[#allocation149_spill] sm:$0xff]  ;;  %v9610_v21 = vpop.f32.mrf.mxu2 }
 0x2f6   : > { %3618 = vmatpush.bf16.msrb.mxu1 %v12432_v62  ;;  %12438 = vst [vmem:[#allocation151_spill] sm:$0xff] %v9610_v21  ;;  %v12439_v62 = vld [vmem:[#allocation153_spill] sm:$0xff]  ;;  %v3391_v7 = vpop.f32.mrf.mxu3  ;;  %v12446_v21 = vld [vmem:[#allocation168_spill] sm:$0xff] }
 0x2f7   : > { %v12447_v7 = vld [vmem:[#allocation161_spill] sm:$0xff] }
 0x2f8   : > { %3645 = vmatpush.bf16.msrb.mxu3 %v12434_v25 }
 0x2f9   : > { %3630 = vmatpush.bf16.msrb.mxu2 %v12433_v41  ;;  %3606 = vmatpush.bf16.msrb.mxu0 %v12435_v19  ;;  %v12440_v41 = vld [vmem:[#allocation164_spill] sm:$0xff] }
 0x2fa   : > { %3619 = vmatpush.bf16.msrb.mxu1 %v12436_v36 }
 0x2fc   : > { %3646 = vmatpush.bf16.msrb.mxu3 %v9183_v29  ;;  %v12445_v29 = vld [vmem:[#allocation165_spill] sm:$0xff] }
 0x2fd   : > { %3631 = vmatpush.bf16.msrb.mxu2 %v12437_v2  ;;  %3607 = vmatpush.bf16.msrb.mxu0 %v12439_v62  ;;  %v12444_v2 = vld [vmem:[#allocation157_spill] sm:$0xff] }
 0x2fe   : > { %3620 = vmatpush.bf16.msrb.mxu1 %v12440_v41  ;;  %v3344_v41 = vpop.f32.mrf.mxu2 }
 0x2ff   : > { %v12452_v41 = vld [vmem:[#allocation174_spill] sm:$0xff] }
 0x300   : > { %3647 = vmatpush.bf16.msrb.mxu3 %v9187_v45 }
 0x301   : > { %3632 = vmatpush.bf16.msrb.mxu2 %v12441_v30  ;;  %3608 = vmatpush.bf16.msrb.mxu0 %v12442_v22  ;;  %v12448_v22 = vld [vmem:[#allocation167_spill] sm:$0xff] }
 0x302   : > { %3621 = vmatpush.bf16.msrb.mxu1 %v12443_v5  ;;  %v12449_v5 = vld [vmem:[#allocation172_spill] sm:$0xff] }
 0x303   : > { %3648 = vmatmul.bf16.vlgmr.msrb.gmra.mxu3 %v9391_v15 }
 0x304   : > { %3692 = vmatpush.bf16.msra.mxu3 %v9200_v59  ;;  %3609 = vmatmul.bf16.vlgmr.msrb.gmra.mxu0 %v9391_v15 }
 0x305   : > { %3653 = vmatpush.bf16.msra.mxu0 %v12444_v2  ;;  %3633 = vmatpush.bf16.msrb.mxu2 %v12445_v29  ;;  %v12450_v2 = vld [vmem:[#allocation169_spill] sm:$0xff] }
 0x306   : > { %3666 = vmatpush.bf16.msra.mxu1 %v12446_v21  ;;  %v12451_v21 = vld [vmem:[#allocation163_spill] sm:$0xff]  ;;  %v12453_v29 = vld [vmem:[#allocation173_spill] sm:$0xff] }
 0x307   : > { %3622 = vmatmul.bf16.vlgmr.msrb.gmra.mxu1 %v9391_v15 }
 0x308   : > { %3693 = vmatpush.bf16.msra.mxu3 %v9249_v48  ;;  %v3402_v48 = vpop.f32.mrf.mxu0 }
 0x309   : > { %3654 = vmatpush.bf16.msra.mxu0 %v12447_v7  ;;  %3634 = vmatpush.bf16.msrb.mxu2 %v12448_v22  ;;  %v12454_v7 = vld [vmem:[#allocation171_spill] sm:$0xff]  ;;  %v12455_v22 = vld [vmem:[#allocation178_spill] sm:$0xff] }
 0x30a   : > { %3667 = vmatpush.bf16.msra.mxu1 %v12449_v5  ;;  %3774 = vrot.lane.b32.xlu1 %v3402_v48, %s7304_s12  ;;  %v3415_v5 = vpop.f32.mrf.mxu1  ;;  %v12460_v48 = vld [vmem:[#allocation183_spill] sm:$0xff] }
 0x30b   : > { %3776 = vrot.lane.b32.xlu2 %v3415_v5, %s7304_s12  ;;  %v12461_v5 = vld [vmem:[#allocation190_spill] sm:$0xff] }
 0x30c   : > { %3694 = vmatpush.bf16.msra.mxu3 %v9259_v32  ;;  %3635 = vmatmul.bf16.vlgmr.msrb.gmra.mxu2 %v9391_v15  ;;  %v12456_v32 = vld [vmem:[#allocation175_spill] sm:$0xff] }
 0x30d   : > { %3679 = vmatpush.bf16.msra.mxu2 %v12450_v2  ;;  %3655 = vmatpush.bf16.msra.mxu0 %v12451_v21  ;;  %v12457_v21 = vld [vmem:[#allocation177_spill] sm:$0xff] }
 0x30e   : > { %3668 = vmatpush.bf16.msra.mxu1 %v12452_v41  ;;  %v12458_v41 = vld [vmem:[#allocation180_spill] sm:$0xff] }
 0x310   : > { %3695 = vmatpush.bf16.msra.mxu3 %v9303_v56  ;;  %v12459_v56 = vld [vmem:[#allocation179_spill] sm:$0xff] }
 0x311   : > { %3680 = vmatpush.bf16.msra.mxu2 %v12453_v29  ;;  %3656 = vmatpush.bf16.msra.mxu0 %v12454_v7  ;;  %v3441_v29 = vpop.f32.mrf.mxu3  ;;  %v3404_v7 = vpop.f32.mrf.mxu0 }
 0x312   : > { %3669 = vmatpush.bf16.msra.mxu1 %v12455_v22  ;;  %3780 = vrot.lane.b32.xlu1 %v3441_v29, %s7304_s12  ;;  %v3417_v22 = vpop.f32.mrf.mxu1  ;;  %v12464_v7 = vld [vmem:[#allocation191_spill] sm:$0xff] }
 0x313   : > { %v12465_v29 = vld [vmem:[#allocation187_spill] sm:$0xff]  ;;  %v7253_v22 = vld [vmem:[#allocation2 + $0x68c] sm:$0xf] }
 0x314   : > { %3696 = vmatpush.bf16.msra.mxu3 %v9330_v35  ;;  %v3428_v35 = vpop.f32.mrf.mxu2 }
 0x315   : > { %3681 = vmatpush.bf16.msra.mxu2 %v12456_v32  ;;  %3657 = vmatpush.bf16.msra.mxu0 %v12457_v21  ;;  %v12462_v32 = vld [vmem:[#allocation181_spill] sm:$0xff] }
 0x316   : > { %3670 = vmatpush.bf16.msra.mxu1 %v12458_v41  ;;  %3778 = vrot.lane.b32.xlu0 %v3428_v35, %s7304_s12  ;;  %v12463_v41 = vld [vmem:[#allocation185_spill] sm:$0xff]  ;;  %v5506_v35 = vld [vmem:[%s11447_s3] sm:$0xff] }
 0x318   : > { %3697 = vmatpush.bf16.msra.mxu3 %v9360_v20 }
 0x319   : > { %3682 = vmatpush.bf16.msra.mxu2 %v12459_v56  ;;  %3658 = vmatpush.bf16.msra.mxu0 %v12460_v48  ;;  %v3443_v20 = vpop.f32.mrf.mxu3 }
 0x31a   : > { %3671 = vmatpush.bf16.msra.mxu1 %v12461_v5  ;;  %5509 = vperm.xlu1 %7287, %v5506_v35  }
 0x31c   : > { %3698 = vmatpush.bf16.msra.mxu3 %v9369_v23  ;;  %v12466_v23 = vld [vmem:[#allocation189_spill] sm:$0xff] }
 0x31d   : > { %3683 = vmatpush.bf16.msra.mxu2 %v12462_v32  ;;  %3659 = vmatpush.bf16.msra.mxu0 %v12463_v41  ;;  %v7035_v32 = vld [vmem:[#allocation2 + $0x6f8] sm:$0xf0] }
 0x31e   : > { %3672 = vmatpush.bf16.msra.mxu1 %v9275_v40  ;;  %v9667_v20 = vor.u32 %v7253_v22, %v7035_v32  ;;  %v7197_v32 = vld [vmem:[#allocation2 + $0x4cc] sm:$0xf]  ;;  %v7027_v22 = vld [vmem:[#allocation2 + $0x538] sm:$0xf0] }
 0x31f   : > { %v9682_v35 = vor.u32 %v7197_v32, %v7027_v22  ;;  %v12474_v32 = vld [vmem:[#allocation210_spill] sm:$0xff] }
 0x320   : > { %3699 = vmatpush.bf16.msra.mxu3 %v9378_v61  ;;  %12467 = vst [vmem:[#allocation179_spill] sm:$0xff] %v9667_v20 }
 0x321   : > { %3684 = vmatpush.bf16.msra.mxu2 %v12464_v7  ;;  %3660 = vmatpush.bf16.msra.mxu0 %v12465_v29  ;;  %v3430_v29 = vpop.f32.mrf.mxu2 }
 0x322   : > { %3673 = vmatpush.bf16.msra.mxu1 %v9283_v46  ;;  %v12469_v29 = vld [vmem:[#allocation197_spill] sm:$0xff] }
 0x323   : > { %3700 = vmatmul.bf16.vlgmr.msra.gmra.mxu3 %v9391_v15 }
 0x324   : > { %3912 = vmatpush.bf16.msrb.mxu3 %v7562_v13  ;;  %3661 = vmatmul.bf16.vlgmr.msra.gmra.mxu0 %v9391_v15 }
 0x325   : > { %3705 = vmatpush.bf16.msrb.mxu0 %v12466_v23  ;;  %3685 = vmatpush.bf16.msra.mxu2 %v9277_v57  ;;  %v12468_v23 = vld [vmem:[#allocation193_spill] sm:$0xff] }
 0x326   : > { %3718 = vmatpush.bf16.msrb.mxu1 %v9287_v50  ;;  %v7031_v50 = vld [vmem:[#allocation2 + $0x618] sm:$0xf0]  ;;  %v7225_v57 = vld [vmem:[#allocation2 + $0x5ac] sm:$0xf] }
 0x327   : > { %3674 = vmatmul.bf16.vlgmr.msra.gmra.mxu1 %v9391_v15 }
 0x328   : > { %3913 = vmatpush.bf16.msrb.mxu3 %v7659_v17  ;;  %v9677_v17 = vor.u32 %v7225_v57, %v7031_v50  ;;  %v7023_v57 = vld [vmem:[#allocation2 + $0x458] sm:$0xf0]  ;;  %v7169_v50 = vld [vmem:[#allocation2 + $0x3ec] sm:$0xf] }
 0x329   : > { %3706 = vmatpush.bf16.msrb.mxu0 %v12468_v23  ;;  %3686 = vmatpush.bf16.msra.mxu2 %v9285_v10  ;;  %v3467_v10 = vpop.f32.mrf.mxu1  ;;  %v12473_v23 = vld [vmem:[#allocation211_spill] sm:$0xff]  ;;  %v9692_v22 = vor.u32 %v7169_v50, %v7023_v57 }
 0x32a   : > { %3719 = vmatpush.bf16.msrb.mxu1 %v9315_v38  ;;  %12470 = vst [vmem:[#allocation183_spill] sm:$0xff] %v9677_v17  ;;  %v12471_v38 = vld [vmem:[#allocation20_spill] sm:$0xff]  ;;  %3784 = vrot.lane.b32.xlu0 %v3467_v10, %s7304_s12  ;;  %v7015_v57 = vld [vmem:[#allocation2 + $0x298] sm:$0xf0] }
 0x32b   : > { %12475 = vst [vmem:[#allocation191_spill] sm:$0xff] %v9692_v22 }
 0x32c   : > { %3914 = vmatpush.bf16.msrb.mxu3 %v7672_v47  ;;  %3687 = vmatmul.bf16.vlgmr.msra.gmra.mxu2 %v9391_v15  ;;  %v12472_v47 = vld [vmem:[#allocation204_spill] sm:$0xff] }
 0x32d   : > { %3731 = vmatpush.bf16.msrb.mxu2 %v9667_v20  ;;  %3707 = vmatpush.bf16.msrb.mxu0 %v12469_v29  ;;  %v3454_v20 = vpop.f32.mrf.mxu0 }
 0x32e   : > { %3720 = vmatpush.bf16.msrb.mxu1 %v9321_v6  ;;  %3782 = vrot.lane.b32.xlu2 %v3454_v20, %s7304_s12 }
 0x32f   : > { %v3480_v50 = vpop.f32.mrf.mxu2 }
 0x330   : > { %3915 = vmatpush.bf16.msrb.mxu3 %v12471_v38  ;;  %v7141_v38 = vld [vmem:[#allocation2 + $0x30c] sm:$0xf]  ;;  %3786 = vrot.lane.b32.xlu1 %v3480_v50, %s7304_s12 }
 0x331   : > { %3732 = vmatpush.bf16.msrb.mxu2 %v9677_v17  ;;  %3708 = vmatpush.bf16.msrb.mxu0 %v12472_v47  ;;  %v7019_v47 = vld [vmem:[#allocation2 + $0x378] sm:$0xf0]  ;;  %v3493_v17 = vpop.f32.mrf.mxu3 }
 0x332   : > { %3721 = vmatpush.bf16.msrb.mxu1 %v12473_v23  ;;  %v9698_v20 = vor.u32 %v7141_v38, %v7019_v47  ;;  %v7011_v47 = vld [vmem:[#allocation2 + $0x1b8] sm:$0xf0]  ;;  %v7057_v38 = vld [vmem:[#allocation2 + $0x6c] sm:$0xf] }
 0x334   : > { %3916 = vmatpush.bf16.msrb.mxu3 %v7934_v9  ;;  %12476 = vst [vmem:[#allocation211_spill] sm:$0xff] %v9698_v20  ;;  %v3469_v9 = vpop.f32.mrf.mxu1 }
 0x335   : > { %3733 = vmatpush.bf16.msrb.mxu2 %v9682_v35  ;;  %3709 = vmatpush.bf16.msrb.mxu0 %v12474_v32  ;;  %v3456_v10 = vpop.f32.mrf.mxu0 }
 0x336   : > { %3722 = vmatpush.bf16.msrb.mxu1 %v9358_v0  ;;  %3788 = vrot.lane.b32.xlu2 %v3493_v17, %s7304_s12  ;;  %v7113_v0 = vld [vmem:[#allocation2 + $0x22c] sm:$0xf] }
 0x337   : > { %v9706_v10 = vor.u32 %v7113_v0, %v7015_v57  ;;  %v7085_v17 = vld [vmem:[#allocation2 + $0x14c] sm:$0xf]  ;;  %v9718_v0 = vld [vmem:[%s11446_s2 + $0x8] sm:$0xf] }
 0x338   : > { %3917 = vmatpush.bf16.msrb.mxu3 %v7972_v39  ;;  %v9713_v50 = vor.u32 %v7085_v17, %v7011_v47  ;;  %v3482_v47 = vpop.f32.mrf.mxu2  ;;  %v12482_v17 = vld [vmem:[#allocation13_spill] sm:$0xff] }
 0x339   : > { %3734 = vmatpush.bf16.msrb.mxu2 %v9692_v22  ;;  %3710 = vmatpush.bf16.msrb.mxu0 %v9362_v54  ;;  %12477 = vst [vmem:[#allocation243_spill] sm:$0xff] %v9706_v10  ;;  %v3495_v9 = vpop.f32.mrf.mxu3 }
 0x33a   : > { %3723 = vmatpush.bf16.msrb.mxu1 %v9376_v28  ;;  %12478 = vst [vmem:[#allocation244_spill] sm:$0xff] %v9713_v50  ;;  %v12480_v9 = vld [vmem:[#allocation46_spill] sm:$0xff] }
 0x33c   : > { %3918 = vmatpush.bf16.msrb.mxu3 %v7986_v49 }
 0x33d   : > { %3735 = vmatpush.bf16.msrb.mxu2 %v9698_v20  ;;  %3711 = vmatpush.bf16.msrb.mxu0 %v9371_v26  ;;  %v7007_v20 = vld [vmem:[#allocation2 + $0xd8] sm:$0xf0] }
 0x33e   : > { %3724 = vmatpush.bf16.msrb.mxu1 %v9386_v43  ;;  %v9724_v57 = vor.u32 %v7057_v38, %v7007_v20  ;;  %v12481_v20 = vld [vmem:[#allocation14_spill] sm:$0xff] }
 0x33f   : > { %v12483_v38 = vld [vmem:[#allocation50_spill] sm:$0xff] }
 0x340   : > { %3919 = vmatpush.bf16.msrb.mxu3 %v8016_v58  ;;  %12479 = vst [vmem:[#allocation245_spill] sm:$0xff] %v9724_v57 }
 0x341   : > { %3736 = vmatpush.bf16.msrb.mxu2 %v9706_v10  ;;  %3712 = vmatpush.bf16.msrb.mxu0 %v9380_v33  ;;  %v3506_v47 = vpop.f32.mrf.mxu0 }
 0x342   : > { %3725 = vmatpush.bf16.msrb.mxu1 %v9401_v4  ;;  %3790 = vrot.lane.b32.xlu0 %v3506_v47, %s7304_s12 }
 0x343   : > { %3920 = vmatmul.bf16.vlgmr.msrb.gmra.mxu3 %v9718_v0 }
 0x344   : > { %3964 = vmatpush.bf16.msra.mxu3 %v8020_v12  ;;  %3713 = vmatmul.bf16.vlgmr.msrb.gmra.mxu0 %v9391_v15 }
 0x345   : > { %3925 = vmatpush.bf16.msra.mxu0 %v7565_v14  ;;  %3737 = vmatpush.bf16.msrb.mxu2 %v9713_v50 }
 0x346   : > { %3938 = vmatpush.bf16.msra.mxu1 %v7629_v51 }
 0x347   : > { %3726 = vmatmul.bf16.vlgmr.msrb.gmra.mxu1 %v9391_v15 }
 0x348   : > { %3965 = vmatpush.bf16.msra.mxu3 %v8056_v31  ;;  %v12484_v31 = vld [vmem:[#allocation21_spill] sm:$0xff] }
 0x349   : > { %3926 = vmatpush.bf16.msra.mxu0 %v7661_v18  ;;  %3738 = vmatpush.bf16.msrb.mxu2 %v9724_v57  ;;  %v3519_v18 = vpop.f32.mrf.mxu1 }
 0x34a   : > { %3939 = vmatpush.bf16.msra.mxu1 %v7665_v24  ;;  %3792 = vrot.lane.b32.xlu1 %v3519_v18, %s7304_s12  ;;  %v12491_v18 = vld [vmem:[#allocation22_spill] sm:$0xff] }
 0x34c   : > { %3966 = vmatpush.bf16.msra.mxu3 %v12480_v9  ;;  %3739 = vmatmul.bf16.vlgmr.msrb.gmra.mxu2 %v9391_v15  ;;  %v12485_v9 = vld [vmem:[#allocation15_spill] sm:$0xff]  ;;  %v12486_v15 = vld [vmem:[#allocation52_spill] sm:$0xff] }
 0x34d   : > { %3951 = vmatpush.bf16.msra.mxu2 %v7631_v52  ;;  %3927 = vmatpush.bf16.msra.mxu0 %v12481_v20  ;;  %v12487_v20 = vld [vmem:[#allocation35_spill] sm:$0xff]  ;;  %v12490_v52 = vld [vmem:[#allocation36_spill] sm:$0xff] }
 0x34e   : > { %3940 = vmatpush.bf16.msra.mxu1 %v12482_v17  ;;  %v12489_v17 = vld [vmem:[#allocation54_spill] sm:$0xff] }
 0x350   : > { %3967 = vmatpush.bf16.msra.mxu3 %v12483_v38  ;;  %v12488_v38 = vld [vmem:[#allocation17_spill] sm:$0xff] }
 0x351   : > { %3952 = vmatpush.bf16.msra.mxu2 %v12294_v11  ;;  %3928 = vmatpush.bf16.msra.mxu0 %v12484_v31  ;;  %v3545_v11 = vpop.f32.mrf.mxu3  ;;  %v3508_v31 = vpop.f32.mrf.mxu0 }
 0x352   : > { %3941 = vmatpush.bf16.msra.mxu1 %v12297_v53  ;;  %3796 = vrot.lane.b32.xlu0 %v3545_v11, %s7304_s12  ;;  %v3521_v47 = vpop.f32.mrf.mxu1  ;;  %v12494_v53 = vld [vmem:[#allocation37_spill] sm:$0xff]  ;;  %v12496_v31 = vld [vmem:[#allocation23_spill] sm:$0xff]  ;;  %v12498_v11 = vld [vmem:[#allocation64_spill] sm:$0xff] }
 0x353   : > { %v12499_v47 = vld [vmem:[#allocation39_spill] sm:$0xff] }
 0x354   : > { %3968 = vmatpush.bf16.msra.mxu3 %v12486_v15  ;;  %v12493_v15 = vld [vmem:[#allocation56_spill] sm:$0xff] }
 0x355   : > { %3953 = vmatpush.bf16.msra.mxu2 %v12485_v9  ;;  %3929 = vmatpush.bf16.msra.mxu0 %v12487_v20  ;;  %v12492_v9 = vld [vmem:[#allocation19_spill] sm:$0xff]  ;;  %v3532_v20 = vpop.f32.mrf.mxu2 }
 0x356   : > { %3942 = vmatpush.bf16.msra.mxu1 %v12301_v63  ;;  %3794 = vrot.lane.b32.xlu2 %v3532_v20, %s7304_s12 }
 0x358   : > { %3969 = vmatpush.bf16.msra.mxu3 %v12489_v17 }
 0x359   : > { %3954 = vmatpush.bf16.msra.mxu2 %v12488_v38  ;;  %3930 = vmatpush.bf16.msra.mxu0 %v12490_v52  ;;  %v12495_v38 = vld [vmem:[#allocation24_spill] sm:$0xff]  ;;  %v3547_v17 = vpop.f32.mrf.mxu3  ;;  %v12497_v52 = vld [vmem:[#allocation62_spill] sm:$0xff] }
 0x35a   : > { %3943 = vmatpush.bf16.msra.mxu1 %v12491_v18  ;;  %v12500_v18 = vld [vmem:[#allocation26_spill] sm:$0xff] }
 0x35b   : > { %v12504_v17 = vld [vmem:[#allocation70_spill] sm:$0xff] }
 0x35c   : > { %3970 = vmatpush.bf16.msra.mxu3 %v12493_v15  ;;  %v12502_v15 = vld [vmem:[#allocation25_spill] sm:$0xff] }
 0x35d   : > { %3955 = vmatpush.bf16.msra.mxu2 %v12492_v9  ;;  %3931 = vmatpush.bf16.msra.mxu0 %v12494_v53  ;;  %v12501_v9 = vld [vmem:[#allocation43_spill] sm:$0xff]  ;;  %v12503_v53 = vld [vmem:[#allocation28_spill] sm:$0xff]  ;;  %v3534_v20 = vpop.f32.mrf.mxu2 }
 0x35e   : > { %3944 = vmatpush.bf16.msra.mxu1 %v12495_v38  ;;  %v12511_v20 = vld [vmem:[#allocation32_spill] sm:$0xff]  ;;  %v12524_v38 = vld [vmem:[#allocation90_spill] sm:$0xff] }
 0x360   : > { %3971 = vmatpush.bf16.msra.mxu3 %v12497_v52  ;;  %v12512_v52 = vld [vmem:[#allocation31_spill] sm:$0xff] }
 0x361   : > { %3956 = vmatpush.bf16.msra.mxu2 %v12496_v31  ;;  %3932 = vmatpush.bf16.msra.mxu0 %v12499_v47  ;;  %v12506_v47 = vld [vmem:[#allocation27_spill] sm:$0xff]  ;;  %v3558_v31 = vpop.f32.mrf.mxu0 }
 0x362   : > { %3945 = vmatpush.bf16.msra.mxu1 %v12500_v18  ;;  %v12507_v18 = vld [vmem:[#allocation30_spill] sm:$0xff]  ;;  %3798 = vrot.lane.b32.xlu1 %v3558_v31, %s7304_s12  ;;  %v12521_v31 = vld [vmem:[#allocation55_spill] sm:$0xff] }
 0x363   : > { %3972 = vmatmul.bf16.vlgmr.msra.gmra.mxu3 %v9718_v0 }
 0x364   : > { %4016 = vmatpush.bf16.msrb.mxu3 %v12498_v11  ;;  %3933 = vmatmul.bf16.vlgmr.msra.gmra.mxu0 %v9718_v0  ;;  %v12505_v11 = vld [vmem:[#allocation45_spill] sm:$0xff] }
 0x365   : > { %3977 = vmatpush.bf16.msrb.mxu0 %v12501_v9  ;;  %3957 = vmatpush.bf16.msra.mxu2 %v12502_v15  ;;  %v12508_v9 = vld [vmem:[#allocation29_spill] sm:$0xff]  ;;  %v12509_v15 = vld [vmem:[#allocation72_spill] sm:$0xff] }
 0x366   : > { %3990 = vmatpush.bf16.msrb.mxu1 %v12503_v53  ;;  %v12510_v53 = vld [vmem:[#allocation47_spill] sm:$0xff] }
 0x367   : > { %3946 = vmatmul.bf16.vlgmr.msra.gmra.mxu1 %v9718_v0 }
 0x368   : > { %4017 = vmatpush.bf16.msrb.mxu3 %v12504_v17  ;;  %v12513_v17 = vld [vmem:[#allocation78_spill] sm:$0xff] }
 0x369   : > { %3978 = vmatpush.bf16.msrb.mxu0 %v12505_v11  ;;  %3958 = vmatpush.bf16.msra.mxu2 %v12506_v47  ;;  %v12514_v11 = vld [vmem:[#allocation51_spill] sm:$0xff]  ;;  %v12515_v47 = vld [vmem:[#allocation41_spill] sm:$0xff] }
 0x36a   : > { %3991 = vmatpush.bf16.msrb.mxu1 %v12507_v18  ;;  %v3571_v18 = vpop.f32.mrf.mxu1 }
 0x36b   : > { %3800 = vrot.lane.b32.xlu2 %v3571_v18, %s7304_s12  ;;  %v12522_v18 = vld [vmem:[#allocation58_spill] sm:$0xff] }
 0x36c   : > { %4018 = vmatpush.bf16.msrb.mxu3 %v12509_v15  ;;  %3959 = vmatmul.bf16.vlgmr.msra.gmra.mxu2 %v9718_v0  ;;  %v12516_v15 = vld [vmem:[#allocation33_spill] sm:$0xff] }
 0x36d   : > { %4003 = vmatpush.bf16.msrb.mxu2 %v12508_v9  ;;  %3979 = vmatpush.bf16.msrb.mxu0 %v12510_v53  ;;  %v12517_v9 = vld [vmem:[#allocation82_spill] sm:$0xff]  ;;  %v12518_v53 = vld [vmem:[#allocation53_spill] sm:$0xff] }
 0x36e   : > { %3992 = vmatpush.bf16.msrb.mxu1 %v12511_v20  ;;  %v12520_v20 = vld [vmem:[#allocation86_spill] sm:$0xff] }
 0x370   : > { %4019 = vmatpush.bf16.msrb.mxu3 %v12513_v17  ;;  %v12519_v17 = vld [vmem:[#allocation42_spill] sm:$0xff] }
 0x371   : > { %4004 = vmatpush.bf16.msrb.mxu2 %v12512_v52  ;;  %3980 = vmatpush.bf16.msrb.mxu0 %v12514_v11  ;;  %v3597_v52 = vpop.f32.mrf.mxu3  ;;  %v3560_v11 = vpop.f32.mrf.mxu0 }
 0x372   : > { %3993 = vmatpush.bf16.msrb.mxu1 %v12515_v47  ;;  %3804 = vrot.lane.b32.xlu1 %v3597_v52, %s7304_s12  ;;  %v3573_v47 = vpop.f32.mrf.mxu1  ;;  %v12526_v11 = vld [vmem:[#allocation59_spill] sm:$0xff]  ;;  %v12528_v52 = vld [vmem:[#allocation94_spill] sm:$0xff] }
 0x373   : > { %v12529_v47 = vld [vmem:[#allocation63_spill] sm:$0xff] }
 0x374   : > { %4020 = vmatpush.bf16.msrb.mxu3 %v12517_v9  ;;  %v3584_v9 = vpop.f32.mrf.mxu2 }
 0x375   : > { %4005 = vmatpush.bf16.msrb.mxu2 %v12516_v15  ;;  %3981 = vmatpush.bf16.msrb.mxu0 %v12518_v53  ;;  %v12523_v15 = vld [vmem:[#allocation49_spill] sm:$0xff] }
 0x376   : > { %3994 = vmatpush.bf16.msrb.mxu1 %v12334_v55  ;;  %3802 = vrot.lane.b32.xlu0 %v3584_v9, %s7304_s12  ;;  %v12525_v55 = vld [vmem:[#allocation57_spill] sm:$0xff]  ;;  %v12533_v9 = vld [vmem:[#allocation68_spill] sm:$0xff] }
 0x378   : > { %4021 = vmatpush.bf16.msrb.mxu3 %v12520_v20 }
 0x379   : > { %4006 = vmatpush.bf16.msrb.mxu2 %v12519_v17  ;;  %3982 = vmatpush.bf16.msrb.mxu0 %v12521_v31  ;;  %v3599_v20 = vpop.f32.mrf.mxu3  ;;  %v12527_v31 = vld [vmem:[#allocation92_spill] sm:$0xff] }
 0x37a   : > { %3995 = vmatpush.bf16.msrb.mxu1 %v12522_v18  ;;  %v12530_v18 = vld [vmem:[#allocation66_spill] sm:$0xff] }
 0x37c   : > { %4022 = vmatpush.bf16.msrb.mxu3 %v12524_v38  ;;  %v12532_v38 = vld [vmem:[#allocation61_spill] sm:$0xff]  ;;  %v3586_v20 = vpop.f32.mrf.mxu2 }
 0x37d   : > { %4007 = vmatpush.bf16.msrb.mxu2 %v12523_v15  ;;  %3983 = vmatpush.bf16.msrb.mxu0 %v12525_v55  ;;  %v12531_v15 = vld [vmem:[#allocation65_spill] sm:$0xff]  ;;  %v12541_v20 = vld [vmem:[#allocation106_spill] sm:$0xff] }
 0x37e   : > { %3996 = vmatpush.bf16.msrb.mxu1 %v12342_v42 }
 0x380   : > { %4023 = vmatpush.bf16.msrb.mxu3 %v12527_v31  ;;  %v12542_v31 = vld [vmem:[#allocation79_spill] sm:$0xff] }
 0x381   : > { %4008 = vmatpush.bf16.msrb.mxu2 %v12526_v11  ;;  %3984 = vmatpush.bf16.msrb.mxu0 %v12529_v47  ;;  %v12534_v11 = vld [vmem:[#allocation96_spill] sm:$0xff] }
 0x382   : > { %3997 = vmatpush.bf16.msrb.mxu1 %v12530_v18  ;;  %v12536_v18 = vld [vmem:[#allocation74_spill] sm:$0xff]  ;;  %v12540_v47 = vld [vmem:[#allocation76_spill] sm:$0xff] }
 0x383   : > { %4024 = vmatmul.bf16.vlgmr.msrb.gmra.mxu3 %v9718_v0 }
 0x384   : > { %4068 = vmatpush.bf16.msra.mxu3 %v12528_v52  ;;  %3985 = vmatmul.bf16.vlgmr.msrb.gmra.mxu0 %v9718_v0  ;;  %v12535_v52 = vld [vmem:[#allocation71_spill] sm:$0xff] }
 0x385   : > { %4029 = vmatpush.bf16.msra.mxu0 %v12531_v15  ;;  %4009 = vmatpush.bf16.msrb.mxu2 %v12532_v38  ;;  %v12537_v15 = vld [vmem:[#allocation69_spill] sm:$0xff]  ;;  %v12538_v38 = vld [vmem:[#allocation100_spill] sm:$0xff] }
 0x386   : > { %4042 = vmatpush.bf16.msra.mxu1 %v12533_v9  ;;  %v12539_v9 = vld [vmem:[#allocation73_spill] sm:$0xff] }
 0x387   : > { %3998 = vmatmul.bf16.vlgmr.msrb.gmra.mxu1 %v9718_v0 }
 0x388   : > { %4069 = vmatpush.bf16.msra.mxu3 %v12534_v11  ;;  %v3610_v11 = vpop.f32.mrf.mxu0 }
 0x389   : > { %4030 = vmatpush.bf16.msra.mxu0 %v12535_v52  ;;  %4010 = vmatpush.bf16.msrb.mxu2 %v12355_v34  ;;  %v3623_v52 = vpop.f32.mrf.mxu1 }
 0x38a   : > { %4043 = vmatpush.bf16.msra.mxu1 %v12536_v18  ;;  %3806 = vrot.lane.b32.xlu2 %v3610_v11, %s7304_s12 }
 0x38b   : > { %3808 = vrot.lane.b32.xlu0 %v3623_v52, %s7304_s12  ;;  %v12548_v52 = vld [vmem:[#allocation88_spill] sm:$0xff] }
 0x38c   : > { %4070 = vmatpush.bf16.msra.mxu3 %v12538_v38  ;;  %4011 = vmatmul.bf16.vlgmr.msrb.gmra.mxu2 %v9718_v0  ;;  %v12543_v38 = vld [vmem:[#allocation77_spill] sm:$0xff] }
 0x38d   : > { %4055 = vmatpush.bf16.msra.mxu2 %v12537_v15  ;;  %4031 = vmatpush.bf16.msra.mxu0 %v12539_v9  ;;  %v12544_v9 = vld [vmem:[#allocation83_spill] sm:$0xff] }
 0x38e   : > { %4044 = vmatpush.bf16.msra.mxu1 %v12540_v47  ;;  %v12546_v47 = vld [vmem:[#allocation118_spill] sm:$0xff]  ;;  %v12547_v15 = vld [vmem:[#allocation87_spill] sm:$0xff] }
 0x390   : > { %4071 = vmatpush.bf16.msra.mxu3 %v12541_v20  ;;  %v12545_v20 = vld [vmem:[#allocation81_spill] sm:$0xff] }
 0x391   : > { %4056 = vmatpush.bf16.msra.mxu2 %v12362_v27  ;;  %4032 = vmatpush.bf16.msra.mxu0 %v12542_v31  ;;  %v3649_v27 = vpop.f32.mrf.mxu3  ;;  %v3612_v31 = vpop.f32.mrf.mxu0 }
 0x392   : > { %4045 = vmatpush.bf16.msra.mxu1 %v12364_v16  ;;  %v3625_v11 = vpop.f32.mrf.mxu1  ;;  %3812 = vrot.lane.b32.xlu2 %v3649_v27, %s7304_s12  ;;  %v12550_v16 = vld [vmem:[#allocation120_spill] sm:$0xff]  ;;  %v12553_v31 = vld [vmem:[#allocation89_spill] sm:$0xff] }
 0x393   : > { %v12555_v11 = vld [vmem:[#allocation126_spill] sm:$0xff]  ;;  %v12556_v27 = vld [vmem:[#allocation93_spill] sm:$0xff] }
 0x394   : > { %4072 = vmatpush.bf16.msra.mxu3 %v8614_v8  ;;  %v3636_v8 = vpop.f32.mrf.mxu2 }
 0x395   : > { %4057 = vmatpush.bf16.msra.mxu2 %v12543_v38  ;;  %4033 = vmatpush.bf16.msra.mxu0 %v12544_v9  ;;  %v12549_v38 = vld [vmem:[#allocation85_spill] sm:$0xff] }
 0x396   : > { %4046 = vmatpush.bf16.msra.mxu1 %v12367_v44  ;;  %3810 = vrot.lane.b32.xlu1 %v3636_v8, %s7304_s12  ;;  %v12551_v44 = vld [vmem:[#allocation91_spill] sm:$0xff]  ;;  %v12560_v8 = vld [vmem:[#allocation104_spill] sm:$0xff] }
 0x398   : > { %4073 = vmatpush.bf16.msra.mxu3 %v12546_v47 }
 0x399   : > { %4058 = vmatpush.bf16.msra.mxu2 %v12545_v20  ;;  %4034 = vmatpush.bf16.msra.mxu0 %v12547_v15  ;;  %v12552_v20 = vld [vmem:[#allocation98_spill] sm:$0xff]  ;;  %v3651_v47 = vpop.f32.mrf.mxu3 }
 0x39a   : > { %4047 = vmatpush.bf16.msra.mxu1 %v12548_v52  ;;  %v12554_v15 = vld [vmem:[#allocation122_spill] sm:$0xff]  ;;  %v12557_v52 = vld [vmem:[#allocation101_spill] sm:$0xff] }
 0x39c   : > { %4074 = vmatpush.bf16.msra.mxu3 %v12550_v16  ;;  %v12559_v16 = vld [vmem:[#allocation99_spill] sm:$0xff]  ;;  %v3638_v47 = vpop.f32.mrf.mxu2 }
 0x39d   : > { %4059 = vmatpush.bf16.msra.mxu2 %v12549_v38  ;;  %4035 = vmatpush.bf16.msra.mxu0 %v12551_v44  ;;  %v12558_v38 = vld [vmem:[#allocation95_spill] sm:$0xff]  ;;  %v12567_v47 = vld [vmem:[#allocation109_spill] sm:$0xff] }
 0x39e   : > { %4048 = vmatpush.bf16.msra.mxu1 %v12552_v20 }
 0x3a0   : > { %4075 = vmatpush.bf16.msra.mxu3 %v12554_v15  ;;  %v12576_v15 = vld [vmem:[#allocation119_spill] sm:$0xff] }
 0x3a1   : > { %4060 = vmatpush.bf16.msra.mxu2 %v12553_v31  ;;  %4036 = vmatpush.bf16.msra.mxu0 %v12556_v27  ;;  %v12561_v31 = vld [vmem:[#allocation128_spill] sm:$0xff]  ;;  %v12562_v27 = vld [vmem:[#allocation103_spill] sm:$0xff] }
 0x3a2   : > { %4049 = vmatpush.bf16.msra.mxu1 %v12557_v52  ;;  %v12563_v52 = vld [vmem:[#allocation108_spill] sm:$0xff] }
 0x3a3   : > { %4076 = vmatmul.bf16.vlgmr.msra.gmra.mxu3 %v9718_v0 }
 0x3a4   : > { %4120 = vmatpush.bf16.msrb.mxu3 %v12555_v11  ;;  %4037 = vmatmul.bf16.vlgmr.msra.gmra.mxu0 %v9718_v0  ;;  %v12568_v11 = vld [vmem:[#allocation107_spill] sm:$0xff] }
 0x3a5   : > { %4081 = vmatpush.bf16.msrb.mxu0 %v12558_v38  ;;  %4061 = vmatpush.bf16.msra.mxu2 %v12559_v16  ;;  %v12564_v38 = vld [vmem:[#allocation105_spill] sm:$0xff]  ;;  %v12566_v16 = vld [vmem:[#allocation110_spill] sm:$0xff] }
 0x3a6   : > { %4094 = vmatpush.bf16.msrb.mxu1 %v12560_v8  ;;  %v12565_v8 = vld [vmem:[#allocation102_spill] sm:$0xff] }
 0x3a7   : > { %4050 = vmatmul.bf16.vlgmr.msra.gmra.mxu1 %v9718_v0 }
 0x3a8   : > { %4121 = vmatpush.bf16.msrb.mxu3 %v12561_v31  ;;  %v3662_v31 = vpop.f32.mrf.mxu0 }
 0x3a9   : > { %4082 = vmatpush.bf16.msrb.mxu0 %v12384_v60  ;;  %4062 = vmatpush.bf16.msra.mxu2 %v12562_v27  ;;  %v3675_v60 = vpop.f32.mrf.mxu1  ;;  %v12575_v27 = vld [vmem:[#allocation150_spill] sm:$0xff] }
 0x3aa   : > { %4095 = vmatpush.bf16.msrb.mxu1 %v12563_v52  ;;  %3814 = vrot.lane.b32.xlu0 %v3662_v31, %s7304_s12  ;;  %v12569_v52 = vld [vmem:[#allocation114_spill] sm:$0xff] }
 0x3ab   : > { %3816 = vrot.lane.b32.xlu1 %v3675_v60, %s7304_s12  ;;  %v12577_v60 = vld [vmem:[#allocation124_spill] sm:$0xff] }
 0x3ac   : > { %4122 = vmatpush.bf16.msrb.mxu3 %v12389_v1  ;;  %4063 = vmatmul.bf16.vlgmr.msra.gmra.mxu2 %v9718_v0  ;;  %v12570_v1 = vld [vmem:[#allocation111_spill] sm:$0xff] }
 0x3ad   : > { %4107 = vmatpush.bf16.msrb.mxu2 %v12564_v38  ;;  %4083 = vmatpush.bf16.msrb.mxu0 %v12565_v8  ;;  %v12571_v38 = vld [vmem:[#allocation144_spill] sm:$0xff]  ;;  %v12572_v8 = vld [vmem:[#allocation113_spill] sm:$0xff] }
 0x3ae   : > { %4096 = vmatpush.bf16.msrb.mxu1 %v12566_v16  ;;  %v12573_v16 = vld [vmem:[#allocation116_spill] sm:$0xff] }
 0x3b0   : > { %4123 = vmatpush.bf16.msrb.mxu3 %v8849_v3  ;;  %v12574_v3 = vld [vmem:[#allocation115_spill] sm:$0xff] }
 0x3b1   : > { %4108 = vmatpush.bf16.msrb.mxu2 %v12567_v47  ;;  %4084 = vmatpush.bf16.msrb.mxu0 %v12568_v11  ;;  %v3701_v47 = vpop.f32.mrf.mxu3  ;;  %v3664_v11 = vpop.f32.mrf.mxu0 }
 0x3b2   : > { %4097 = vmatpush.bf16.msrb.mxu1 %v12569_v52  ;;  %3820 = vrot.lane.b32.xlu0 %v3701_v47, %s7304_s12  ;;  %v3677_v31 = vpop.f32.mrf.mxu1  ;;  %v12580_v52 = vld [vmem:[#allocation121_spill] sm:$0xff]  ;;  %v12583_v47 = vld [vmem:[#allocation156_spill] sm:$0xff] }
 0x3b3   : > { %v12581_v11 = vld [vmem:[#allocation125_spill] sm:$0xff]  ;;  %v12584_v31 = vld [vmem:[#allocation123_spill] sm:$0xff] }
 0x3b4   : > { %4124 = vmatpush.bf16.msrb.mxu3 %v12571_v38  ;;  %v12579_v38 = vld [vmem:[#allocation152_spill] sm:$0xff] }
 0x3b5   : > { %4109 = vmatpush.bf16.msrb.mxu2 %v12570_v1  ;;  %4085 = vmatpush.bf16.msrb.mxu0 %v12572_v8  ;;  %v12578_v1 = vld [vmem:[#allocation117_spill] sm:$0xff]  ;;  %v3688_v8 = vpop.f32.mrf.mxu2 }
 0x3b6   : > { %4098 = vmatpush.bf16.msrb.mxu1 %v12573_v16  ;;  %3818 = vrot.lane.b32.xlu2 %v3688_v8, %s7304_s12 }
 0x3b8   : > { %4125 = vmatpush.bf16.msrb.mxu3 %v12575_v27 }
 0x3b9   : > { %4110 = vmatpush.bf16.msrb.mxu2 %v12574_v3  ;;  %4086 = vmatpush.bf16.msrb.mxu0 %v12576_v15  ;;  %v3703_v27 = vpop.f32.mrf.mxu3  ;;  %v12582_v15 = vld [vmem:[#allocation154_spill] sm:$0xff] }
 0x3ba   : > { %4099 = vmatpush.bf16.msrb.mxu1 %v12577_v60  ;;  %v12585_v60 = vld [vmem:[#allocation134_spill] sm:$0xff]  ;;  %v12589_v27 = vld [vmem:[#allocation160_spill] sm:$0xff] }
 0x3bc   : > { %4126 = vmatpush.bf16.msrb.mxu3 %v12579_v38  ;;  %v12587_v38 = vld [vmem:[#allocation133_spill] sm:$0xff] }
 0x3bd   : > { %4111 = vmatpush.bf16.msrb.mxu2 %v12578_v1  ;;  %4087 = vmatpush.bf16.msrb.mxu0 %v12580_v52  ;;  %v12586_v1 = vld [vmem:[#allocation127_spill] sm:$0xff]  ;;  %v12588_v52 = vld [vmem:[#allocation136_spill] sm:$0xff]  ;;  %v3690_v8 = vpop.f32.mrf.mxu2 }
 0x3be   : > { %4100 = vmatpush.bf16.msrb.mxu1 %v12406_v37  ;;  %v12596_v8 = vld [vmem:[#allocation142_spill] sm:$0xff]  ;;  %v12606_v37 = vld [vmem:[#allocation147_spill] sm:$0xff] }
 0x3c0   : > { %4127 = vmatpush.bf16.msrb.mxu3 %v12582_v15  ;;  %v12597_v15 = vld [vmem:[#allocation141_spill] sm:$0xff] }
 0x3c1   : > { %4112 = vmatpush.bf16.msrb.mxu2 %v12581_v11  ;;  %4088 = vmatpush.bf16.msrb.mxu0 %v12584_v31  ;;  %v12591_v31 = vld [vmem:[#allocation135_spill] sm:$0xff]  ;;  %v3714_v11 = vpop.f32.mrf.mxu0 }
 0x3c2   : > { %4101 = vmatpush.bf16.msrb.mxu1 %v12585_v60  ;;  %v12592_v60 = vld [vmem:[#allocation140_spill] sm:$0xff]  ;;  %3822 = vrot.lane.b32.xlu1 %v3714_v11, %s7304_s12 }
 0x3c3   : > { %4128 = vmatmul.bf16.vlgmr.msrb.gmra.mxu3 %v9718_v0 }
 0x3c4   : > { %4172 = vmatpush.bf16.msra.mxu3 %v12583_v47  ;;  %4089 = vmatmul.bf16.vlgmr.msrb.gmra.mxu0 %v9718_v0  ;;  %v12590_v47 = vld [vmem:[#allocation129_spill] sm:$0xff] }
 0x3c5   : > { %4133 = vmatpush.bf16.msra.mxu0 %v12586_v1  ;;  %4113 = vmatpush.bf16.msrb.mxu2 %v12587_v38  ;;  %v12593_v1 = vld [vmem:[#allocation137_spill] sm:$0xff]  ;;  %v12594_v38 = vld [vmem:[#allocation162_spill] sm:$0xff] }
 0x3c6   : > { %4146 = vmatpush.bf16.msra.mxu1 %v12588_v52  ;;  %v12595_v52 = vld [vmem:[#allocation131_spill] sm:$0xff] }
 0x3c7   : > { %4102 = vmatmul.bf16.vlgmr.msrb.gmra.mxu1 %v9718_v0 }
 0x3c8   : > { %4173 = vmatpush.bf16.msra.mxu3 %v12589_v27  ;;  %v12598_v27 = vld [vmem:[#allocation170_spill] sm:$0xff] }
 0x3c9   : > { %4134 = vmatpush.bf16.msra.mxu0 %v12590_v47  ;;  %4114 = vmatpush.bf16.msrb.mxu2 %v12591_v31  ;;  %v12599_v47 = vld [vmem:[#allocation139_spill] sm:$0xff]  ;;  %v12600_v31 = vld [vmem:[#allocation146_spill] sm:$0xff]  ;;  %v3716_v11 = vpop.f32.mrf.mxu0 }
 0x3ca   : > { %4147 = vmatpush.bf16.msra.mxu1 %v12592_v60  ;;  %v3727_v60 = vpop.f32.mrf.mxu1 }
 0x3cb   : > { %3824 = vrot.lane.b32.xlu2 %v3727_v60, %s7304_s12 }
 0x3cc   : > { %4174 = vmatpush.bf16.msra.mxu3 %v12594_v38  ;;  %4115 = vmatmul.bf16.vlgmr.msrb.gmra.mxu2 %v9718_v0  ;;  %v12601_v38 = vld [vmem:[#allocation143_spill] sm:$0xff] }
 0x3cd   : > { %4159 = vmatpush.bf16.msra.mxu2 %v12593_v1  ;;  %4135 = vmatpush.bf16.msra.mxu0 %v12595_v52  ;;  %v12602_v1 = vld [vmem:[#allocation176_spill] sm:$0xff]  ;;  %v12603_v52 = vld [vmem:[#allocation145_spill] sm:$0xff] }
 0x3ce   : > { %4148 = vmatpush.bf16.msra.mxu1 %v12596_v8  ;;  %v12604_v8 = vld [vmem:[#allocation148_spill] sm:$0xff] }
 0x3d0   : > { %4175 = vmatpush.bf16.msra.mxu3 %v12598_v27  ;;  %v9908_v27 = vpop.permute.xlu1 %3774 }
 0x3d1   : > { %4160 = vmatpush.bf16.msra.mxu2 %v12597_v15  ;;  %4136 = vmatpush.bf16.msra.mxu0 %v12599_v47  ;;  %v3921_v15 = vpop.f32.mrf.mxu3  ;;  %12605 = vst [vmem:[#allocation57_spill] sm:$0xff] %v9908_v27  ;;  %v12609_v27 = vld [vmem:[#allocation164_spill] sm:$0xff] }
 0x3d2   : > { %4149 = vmatpush.bf16.msra.mxu1 %v12600_v31  ;;  %4304 = vrot.lane.b32.xlu1 %v3921_v15, %s7305_s17  ;;  %v3729_v60 = vpop.f32.mrf.mxu1 }
 0x3d3   : > { %v12612_v60 = vld [vmem:[#allocation155_spill] sm:$0xff] }
 0x3d4   : > { %4176 = vmatpush.bf16.msra.mxu3 %v12602_v1  ;;  %v12607_v1 = vld [vmem:[#allocation149_spill] sm:$0xff] }
 0x3d5   : > { %4161 = vmatpush.bf16.msra.mxu2 %v12601_v38  ;;  %4137 = vmatpush.bf16.msra.mxu0 %v12603_v52  ;;  %v3740_v52 = vpop.f32.mrf.mxu2 }
 0x3d6   : > { %4150 = vmatpush.bf16.msra.mxu1 %v12604_v8  ;;  %v12608_v8 = vld [vmem:[#allocation184_spill] sm:$0xff]  ;;  %3826 = vrot.lane.b32.xlu0 %v3740_v52, %s7304_s12  ;;  %v12614_v52 = vld [vmem:[#allocation157_spill] sm:$0xff] }
 0x3d8   : > { %4177 = vmatpush.bf16.msra.mxu3 %v12434_v25  ;;  %v9920_v25 = vpop.permute.xlu2 %3776  ;;  %v9924_v15 = vpop.permute.xlu1 %3780 }
 0x3d9   : > { %4162 = vmatpush.bf16.msra.mxu2 %v12606_v37  ;;  %4138 = vmatpush.bf16.msra.mxu0 %v12435_v19  ;;  %v3923_v11 = vpop.f32.mrf.mxu3  ;;  %12610 = vst [vmem:[#allocation143_spill] sm:$0xff] %v9920_v25  ;;  %v12617_v25 = vld [vmem:[#allocation192_spill] sm:$0xff] }
 0x3da   : > { %4151 = vmatpush.bf16.msra.mxu1 %v12436_v36  ;;  %12611 = vst [vmem:[#allocation246_spill] sm:$0xff] %v9924_v15  ;;  %v12618_v15 = vld [vmem:[#allocation161_spill] sm:$0xff] }
 0x3dc   : > { %4178 = vmatpush.bf16.msra.mxu3 %v12608_v8  ;;  %v12613_v8 = vld [vmem:[#allocation166_spill] sm:$0xff] }
 0x3dd   : > { %4163 = vmatpush.bf16.msra.mxu2 %v12607_v1  ;;  %4139 = vmatpush.bf16.msra.mxu0 %v12439_v62  ;;  %v12615_v62 = vld [vmem:[#allocation165_spill] sm:$0xff]  ;;  %v3742_v11 = vpop.f32.mrf.mxu2 }
 0x3de   : > { %4152 = vmatpush.bf16.msra.mxu1 %v12609_v27  ;;  %v12616_v27 = vld [vmem:[#allocation168_spill] sm:$0xff]  ;;  %v12625_v11 = vld [vmem:[#allocation174_spill] sm:$0xff] }
 0x3e0   : > { %4179 = vmatpush.bf16.msra.mxu3 %v9187_v45  ;;  %v12629_v45 = vld [vmem:[#allocation171_spill] sm:$0xff] }
 0x3e1   : > { %4164 = vmatpush.bf16.msra.mxu2 %v12441_v30  ;;  %4140 = vmatpush.bf16.msra.mxu0 %v12612_v60  ;;  %v12619_v60 = vld [vmem:[#allocation167_spill] sm:$0xff] }
 0x3e2   : > { %4153 = vmatpush.bf16.msra.mxu1 %v12613_v8  ;;  %v12620_v8 = vld [vmem:[#allocation172_spill] sm:$0xff] }
 0x3e3   : > { %4180 = vmatmul.bf16.vlgmr.msra.gmra.mxu3 %v9718_v0 }
 0x3e4   : > { %4224 = vmatpush.bf16.msrb.mxu3 %v9200_v59  ;;  %4141 = vmatmul.bf16.vlgmr.msra.gmra.mxu0 %v9718_v0  ;;  %v12624_v59 = vld [vmem:[#allocation163_spill] sm:$0xff] }
 0x3e5   : > { %4185 = vmatpush.bf16.msrb.mxu0 %v12614_v52  ;;  %4165 = vmatpush.bf16.msra.mxu2 %v12615_v62  ;;  %v9940_v62 = vpop.permute.xlu2 %3782  ;;  %v12623_v52 = vld [vmem:[#allocation196_spill] sm:$0xff] }
 0x3e6   : > { %4198 = vmatpush.bf16.msrb.mxu1 %v12616_v27  ;;  %12621 = vst [vmem:[#allocation247_spill] sm:$0xff] %v9940_v62  ;;  %v9942_v27 = vpop.permute.xlu1 %5509  ;;  %v12631_v62 = vld [vmem:[#allocation175_spill] sm:$0xff] }
 0x3e7   : > { %4154 = vmatmul.bf16.vlgmr.msra.gmra.mxu1 %v9718_v0  ;;  %12622 = vst [vmem:[#allocation248_spill] sm:$0xff] %v9942_v27  ;;  %v12630_v27 = vld [vmem:[#allocation178_spill] sm:$0xff] }
 0x3e8   : > { %4225 = vmatpush.bf16.msrb.mxu3 %v12617_v25  ;;  %v9948_v25 = vpop.permute.xlu0 %3772 }
 0x3e9   : > { %4186 = vmatpush.bf16.msrb.mxu0 %v12618_v15  ;;  %4166 = vmatpush.bf16.msra.mxu2 %v12619_v60  ;;  %12626 = vst [vmem:[#allocation196_spill] sm:$0xff] %v9948_v25  ;;  %v12627_v15 = vld [vmem:[#allocation173_spill] sm:$0xff]  ;;  %v12628_v60 = vld [vmem:[#allocation203_spill] sm:$0xff] }
 0x3ea   : > { %4199 = vmatpush.bf16.msrb.mxu1 %v12620_v8  ;;  %v3934_v8 = vpop.f32.mrf.mxu0 }
 0x3eb   : > { %4306 = vrot.lane.b32.xlu2 %v3934_v8, %s7305_s17  ;;  %v12637_v8 = vld [vmem:[#allocation215_spill] sm:$0xff] }
 0x3ec   : > { %4226 = vmatpush.bf16.msrb.mxu3 %v12623_v52  ;;  %4167 = vmatmul.bf16.vlgmr.msra.gmra.mxu2 %v9718_v0 }
 0x3ed   : > { %4211 = vmatpush.bf16.msrb.mxu2 %v12450_v2  ;;  %4187 = vmatpush.bf16.msrb.mxu0 %v12624_v59  ;;  %v3947_v2 = vpop.f32.mrf.mxu1  ;;  %v9957_v59 = vpop.permute.xlu2 %3788 }
 0x3ee   : > { %4200 = vmatpush.bf16.msrb.mxu1 %v12625_v11  ;;  %4308 = vrot.lane.b32.xlu0 %v3947_v2, %s7305_s17  ;;  %12632 = vst [vmem:[#allocation178_spill] sm:$0xff] %v9957_v59  ;;  %v12633_v11 = vld [vmem:[#allocation209_spill] sm:$0xff]  ;;  %v9961_v25 = vpop.permute.xlu1 %3786 }
 0x3ef   : > { %12634 = vst [vmem:[#allocation249_spill] sm:$0xff] %v9961_v25  ;;  %v12638_v59 = vld [vmem:[#allocation181_spill] sm:$0xff] }
 0x3f0   : > { %4227 = vmatpush.bf16.msrb.mxu3 %v12628_v60  ;;  %v12635_v60 = vld [vmem:[#allocation180_spill] sm:$0xff] }
 0x3f1   : > { %4212 = vmatpush.bf16.msrb.mxu2 %v12627_v15  ;;  %4188 = vmatpush.bf16.msrb.mxu0 %v12629_v45  ;;  %v3973_v15 = vpop.f32.mrf.mxu3  ;;  %v9964_v45 = vpop.permute.xlu0 %3778 }
 0x3f2   : > { %4201 = vmatpush.bf16.msrb.mxu1 %v12630_v27  ;;  %12636 = vst [vmem:[#allocation250_spill] sm:$0xff] %v9964_v45  ;;  %v3936_v2 = vpop.f32.mrf.mxu0 }
 0x3f3   : > { %4312 = vrot.lane.b32.xlu2 %v3973_v15, %s7305_s17  ;;  %v12643_v15 = vld [vmem:[#allocation187_spill] sm:$0xff] }
 0x3f4   : > { %4228 = vmatpush.bf16.msrb.mxu3 %v12633_v11 }
 0x3f5   : > { %4213 = vmatpush.bf16.msrb.mxu2 %v12631_v62  ;;  %4189 = vmatpush.bf16.msrb.mxu0 %v12457_v21  ;;  %v3949_v62 = vpop.f32.mrf.mxu1  ;;  %v9972_v25 = vpop.permute.xlu2 %3794  ;;  %v12640_v21 = vld [vmem:[#allocation217_spill] sm:$0xff] }
 0x3f6   : > { %4202 = vmatpush.bf16.msrb.mxu1 %v12635_v60  ;;  %12639 = vst [vmem:[#allocation215_spill] sm:$0xff] %v9972_v25  ;;  %v3960_v60 = vpop.f32.mrf.mxu2  ;;  %v9977_v45 = vpop.permute.xlu1 %3792  ;;  %v12645_v25 = vld [vmem:[#allocation199_spill] sm:$0xff] }
 0x3f7   : > { %4310 = vrot.lane.b32.xlu1 %v3960_v60, %s7305_s17  ;;  %12641 = vst [vmem:[#allocation251_spill] sm:$0xff] %v9977_v45  ;;  %v12644_v60 = vld [vmem:[#allocation189_spill] sm:$0xff]  ;;  %v12646_v45 = vld [vmem:[#allocation202_spill] sm:$0xff] }
 0x3f8   : > { %4229 = vmatpush.bf16.msrb.mxu3 %v12637_v8 }
 0x3f9   : > { %4214 = vmatpush.bf16.msrb.mxu2 %v12459_v56  ;;  %4190 = vmatpush.bf16.msrb.mxu0 %v12460_v48  ;;  %v3975_v62 = vpop.f32.mrf.mxu3  ;;  %v9980_v2 = vpop.permute.xlu0 %3784 }
 0x3fa   : > { %4203 = vmatpush.bf16.msrb.mxu1 %v12461_v5  ;;  %12642 = vst [vmem:[#allocation252_spill] sm:$0xff] %v9980_v2  ;;  %v12648_v2 = vld [vmem:[#allocation8_spill] sm:$0xff] }
 0x3fc   : > { %4230 = vmatpush.bf16.msrb.mxu3 %v12640_v21 }
 0x3fd   : > { %4215 = vmatpush.bf16.msrb.mxu2 %v12638_v59  ;;  %4191 = vmatpush.bf16.msrb.mxu0 %v12463_v41 }
 0x3fe   : > { %4204 = vmatpush.bf16.msrb.mxu1 %v9275_v40  ;;  %v9990_v40 = vpop.permute.xlu2 %3800  ;;  %v3962_v62 = vpop.f32.mrf.mxu2 }
 0x3ff   : > { %12647 = vst [vmem:[#allocation253_spill] sm:$0xff] %v9990_v40  ;;  %v12654_v40 = vld [vmem:[#allocation179_spill] sm:$0xff] }
 0x400   : > { %4231 = vmatpush.bf16.msrb.mxu3 %v9378_v61  ;;  %v12656_v62 = vld [vmem:[#allocation183_spill] sm:$0xff] }
 0x401   : > { %4216 = vmatpush.bf16.msrb.mxu2 %v12464_v7  ;;  %4192 = vmatpush.bf16.msrb.mxu0 %v12643_v15  ;;  %v9996_v15 = vpop.permute.xlu1 %3798 }
 0x402   : > { %4205 = vmatpush.bf16.msrb.mxu1 %v9283_v46  ;;  %12649 = vst [vmem:[#allocation254_spill] sm:$0xff] %v9996_v15  ;;  %v12650_v46 = vld [vmem:[#allocation193_spill] sm:$0xff]  ;;  %v12657_v15 = vld [vmem:[#allocation20_spill] sm:$0xff] }
 0x403   : > { %4232 = vmatmul.bf16.vlgmr.msrb.gmra.mxu3 %v9718_v0 }
 0x404   : > { %4444 = vmatpush.bf16.msra.mxu3 %v7562_v13  ;;  %4193 = vmatmul.bf16.vlgmr.msrb.gmra.mxu0 %v9718_v0  ;;  %v12655_v13 = vld [vmem:[#allocation12_spill] sm:$0xff] }
 0x405   : > { %4237 = vmatpush.bf16.msra.mxu0 %v12644_v60  ;;  %4217 = vmatpush.bf16.msrb.mxu2 %v12645_v25  ;;  %v9999_v60 = vpop.permute.xlu0 %3790  ;;  %v12652_v25 = vld [vmem:[#allocation201_spill] sm:$0xff] }
 0x406   : > { %4250 = vmatpush.bf16.msra.mxu1 %v12646_v45  ;;  %12651 = vst [vmem:[#allocation255_spill] sm:$0xff] %v9999_v60  ;;  %v12653_v45 = vld [vmem:[#allocation207_spill] sm:$0xff]  ;;  %v10010_v60 = vpop.permute.xlu2 %3806 }
 0x407   : > { %4206 = vmatmul.bf16.vlgmr.msrb.gmra.mxu1 %v9718_v0  ;;  %12658 = vst [vmem:[#allocation256_spill] sm:$0xff] %v10010_v60  ;;  %v12663_v60 = vld [vmem:[#allocation214_spill] sm:$0xff] }
 0x408   : > { %4445 = vmatpush.bf16.msra.mxu3 %v12648_v2  ;;  %v12659_v2 = vld [vmem:[#allocation204_spill] sm:$0xff] }
 0x409   : > { %4238 = vmatpush.bf16.msra.mxu0 %v12650_v46  ;;  %4218 = vmatpush.bf16.msrb.mxu2 %v12652_v25  ;;  %v3986_v46 = vpop.f32.mrf.mxu0  ;;  %v3999_v25 = vpop.f32.mrf.mxu1 }
 0x40a   : > { %4251 = vmatpush.bf16.msra.mxu1 %v12653_v45  ;;  %4314 = vrot.lane.b32.xlu0 %v3986_v46, %s7305_s17 }
 0x40b   : > { %4316 = vrot.lane.b32.xlu1 %v3999_v25, %s7305_s17 }
 0x40c   : > { %4446 = vmatpush.bf16.msra.mxu3 %v12655_v13  ;;  %4219 = vmatmul.bf16.vlgmr.msrb.gmra.mxu2 %v9718_v0  ;;  %v10016_v13 = vpop.permute.xlu1 %3804 }
 0x40d   : > { %4263 = vmatpush.bf16.msra.mxu2 %v12654_v40  ;;  %4239 = vmatpush.bf16.msra.mxu0 %v12469_v29  ;;  %12660 = vst [vmem:[#allocation204_spill] sm:$0xff] %v10016_v13 }
 0x40e   : > { %4252 = vmatpush.bf16.msra.mxu1 %v9321_v6  ;;  %v10019_v6 = vpop.permute.xlu0 %3796  ;;  %v3813_v25 = vpop.permute.xlu2 %3812 }
 0x40f   : > { %12661 = vst [vmem:[#allocation257_spill] sm:$0xff] %v10019_v6  ;;  %v12664_v6 = vld [vmem:[#allocation211_spill] sm:$0xff] }
 0x410   : > { %4447 = vmatpush.bf16.msra.mxu3 %v12657_v15  ;;  %v4025_v15 = vpop.f32.mrf.mxu3 }
 0x411   : > { %4264 = vmatpush.bf16.msra.mxu2 %v12656_v62  ;;  %4240 = vmatpush.bf16.msra.mxu0 %v12659_v2  ;;  %v12662_v62 = vld [vmem:[#allocation34_spill] sm:$0xff]  ;;  %v3988_v46 = vpop.f32.mrf.mxu0  ;;  %v4001_v13 = vpop.f32.mrf.mxu1 }
 0x412   : > { %4253 = vmatpush.bf16.msra.mxu1 %v12473_v23  ;;  %4320 = vrot.lane.b32.xlu0 %v4025_v15, %s7305_s17  ;;  %v4012_v46 = vpop.f32.mrf.mxu2  ;;  %v10049_v15 = vld [vmem:[%s11446_s2 + $0xc] sm:$0xf] }
 0x413   : > { %4318 = vrot.lane.b32.xlu2 %v4012_v46, %s7305_s17 }
 0x414   : > { %4448 = vmatpush.bf16.msra.mxu3 %v12662_v62 }
 0x415   : > { %4265 = vmatpush.bf16.msra.mxu2 %v9682_v35  ;;  %4241 = vmatpush.bf16.msra.mxu0 %v12474_v32  ;;  %v10030_v32 = vpop.permute.xlu1 %3810 }
 0x416   : > { %4254 = vmatpush.bf16.msra.mxu1 %v12663_v60  ;;  %v10032_v60 = vpop.permute.xlu0 %3802 }
 0x417   : > { %12665 = vst [vmem:[#allocation34_spill] sm:$0xff] %v10032_v60  ;;  %v12666_v60 = vld [vmem:[#allocation44_spill] sm:$0xff] }
 0x418   : > { %4449 = vmatpush.bf16.msra.mxu3 %v7972_v39  ;;  %v4027_v13 = vpop.f32.mrf.mxu3 }
 0x419   : > { %4266 = vmatpush.bf16.msra.mxu2 %v9692_v22  ;;  %4242 = vmatpush.bf16.msra.mxu0 %v9362_v54  ;;  %v10036_v22 = vsel %vm3828_vm5, %v10030_v32, %v3813_v25 }
 0x41a   : > { %4255 = vmatpush.bf16.msra.mxu1 %v9376_v28  ;;  %v4014_v13 = vpop.f32.mrf.mxu2 }
 0x41b   : > { %v12671_v13 = vld [vmem:[#allocation13_spill] sm:$0xff] }
 0x41c   : > { %4450 = vmatpush.bf16.msra.mxu3 %v7986_v49 }
 0x41d   : > { %4267 = vmatpush.bf16.msra.mxu2 %v12664_v6  ;;  %4243 = vmatpush.bf16.msra.mxu0 %v9371_v26 }
 0x41e   : > { %4256 = vmatpush.bf16.msra.mxu1 %v9386_v43  ;;  %v10055_v46 = vpop.permute.xlu0 %3808 }
 0x420   : > { %4451 = vmatpush.bf16.msra.mxu3 %v8016_v58  ;;  %v12673_v58 = vld [vmem:[#allocation50_spill] sm:$0xff] }
 0x421   : > { %4268 = vmatpush.bf16.msra.mxu2 %v9706_v10  ;;  %4244 = vmatpush.bf16.msra.mxu0 %v9380_v33  ;;  %v12667_v33 = vld [vmem:[#allocation9_spill] sm:$0xff] }
 0x422   : > { %4257 = vmatpush.bf16.msra.mxu1 %v9401_v4  ;;  %v3819_v4 = vpop.permute.xlu2 %3818 }
 0x423   : > { %4452 = vmatmul.bf16.vlgmr.msra.gmra.mxu3 %v10049_v15 }
 0x424   : > { %4496 = vmatpush.bf16.msrb.mxu3 %v8020_v12  ;;  %4245 = vmatmul.bf16.vlgmr.msra.gmra.mxu0 %v9718_v0 }
 0x425   : > { %4457 = vmatpush.bf16.msrb.mxu0 %v7565_v14  ;;  %4269 = vmatpush.bf16.msra.mxu2 %v9713_v50  ;;  %v12668_v50 = vld [vmem:[#allocation7_spill] sm:$0xff]  ;;  %v12670_v14 = vld [vmem:[#allocation14_spill] sm:$0xff] }
 0x426   : > { %4470 = vmatpush.bf16.msrb.mxu1 %v7629_v51  ;;  %v12669_v51 = vld [vmem:[#allocation46_spill] sm:$0xff]  ;;  %v3815_v12 = vpop.permute.xlu0 %3814 }
 0x427   : > { %4258 = vmatmul.bf16.vlgmr.msra.gmra.mxu1 %v9718_v0 }
 0x428   : > { %4497 = vmatpush.bf16.msrb.mxu3 %v12666_v60  ;;  %v12672_v60 = vld [vmem:[#allocation11_spill] sm:$0xff] }
 0x429   : > { %4458 = vmatpush.bf16.msrb.mxu0 %v12667_v33  ;;  %4270 = vmatpush.bf16.msra.mxu2 %v9724_v57  ;;  %v10072_v57 = vsel %vm3828_vm5, %v3813_v25, %v3815_v12  ;;  %v4038_v33 = vpop.f32.mrf.mxu0  ;;  %v12680_v25 = vld [vmem:[#allocation52_spill] sm:$0xff] }
 0x42a   : > { %4471 = vmatpush.bf16.msrb.mxu1 %v7665_v24  ;;  %12674 = vst [vmem:[#allocation46_spill] sm:$0xff] %v10072_v57  ;;  %v3817_v24 = vpop.permute.xlu1 %3816  ;;  %4322 = vrot.lane.b32.xlu1 %v4038_v33, %s7305_s17  ;;  %v12681_v57 = vld [vmem:[#allocation35_spill] sm:$0xff] }
 0x42c   : > { %4498 = vmatpush.bf16.msrb.mxu3 %v12669_v51  ;;  %4271 = vmatmul.bf16.vlgmr.msra.gmra.mxu2 %v9718_v0  ;;  %v10078_v0 = vsel %vm3828_vm5, %v3817_v24, %v3819_v4 }
 0x42d   : > { %4483 = vmatpush.bf16.msrb.mxu2 %v12668_v50  ;;  %4459 = vmatpush.bf16.msrb.mxu0 %v12670_v14  ;;  %v10075_v50 = vsel %vm3828_vm5, %v3815_v12, %v3817_v24  ;;  %12676 = vst [vmem:[#allocation259_spill] sm:$0xff] %v10078_v0  ;;  %v12677_v14 = vld [vmem:[#allocation21_spill] sm:$0xff]  ;;  %v4077_v12 = vpop.f32.mrf.mxu3 }
 0x42e   : > { %4472 = vmatpush.bf16.msrb.mxu1 %v12671_v13  ;;  %12675 = vst [vmem:[#allocation258_spill] sm:$0xff] %v10075_v50  ;;  %v4051_v13 = vpop.f32.mrf.mxu1  ;;  %v12682_v24 = vld [vmem:[#allocation17_spill] sm:$0xff]  ;;  %v3821_v0 = vpop.permute.xlu0 %3820  ;;  %v12685_v50 = vld [vmem:[#allocation36_spill] sm:$0xff] }
 0x42f   : > { %4324 = vrot.lane.b32.xlu2 %v4051_v13, %s7305_s17  ;;  %v10091_v33 = vsel %vm3828_vm5, %v3819_v4, %v3821_v0 }
 0x430   : > { %4499 = vmatpush.bf16.msrb.mxu3 %v12673_v58  ;;  %v12679_v58 = vld [vmem:[#allocation15_spill] sm:$0xff]  ;;  %12684 = vst [vmem:[#allocation260_spill] sm:$0xff] %v10091_v33  ;;  %v12692_v33 = vld [vmem:[#allocation62_spill] sm:$0xff] }
 0x431   : > { %4484 = vmatpush.bf16.msrb.mxu2 %v12672_v60  ;;  %4460 = vmatpush.bf16.msrb.mxu0 %v12677_v14  ;;  %v12678_v60 = vld [vmem:[#allocation16_spill] sm:$0xff]  ;;  %v12683_v14 = vld [vmem:[#allocation54_spill] sm:$0xff] }
 0x432   : > { %4473 = vmatpush.bf16.msrb.mxu1 %v12678_v60  ;;  %v4040_v60 = vpop.f32.mrf.mxu0  ;;  %4328 = vrot.lane.b32.xlu1 %v4077_v12, %s7305_s17  ;;  %v12693_v12 = vld [vmem:[#allocation64_spill] sm:$0xff] }
 0x433   : > { %v12691_v60 = vld [vmem:[#allocation23_spill] sm:$0xff] }
 0x434   : > { %4500 = vmatpush.bf16.msrb.mxu3 %v12680_v25  ;;  %v12686_v25 = vld [vmem:[#allocation22_spill] sm:$0xff] }
 0x435   : > { %4485 = vmatpush.bf16.msrb.mxu2 %v12679_v58  ;;  %4461 = vmatpush.bf16.msrb.mxu0 %v12681_v57  ;;  %v12687_v57 = vld [vmem:[#allocation19_spill] sm:$0xff]  ;;  %v12688_v58 = vld [vmem:[#allocation56_spill] sm:$0xff]  ;;  %v4079_v4 = vpop.f32.mrf.mxu3 }
 0x436   : > { %4474 = vmatpush.bf16.msrb.mxu1 %v12301_v63  ;;  %v4053_v13 = vpop.f32.mrf.mxu1  ;;  %v4064_v63 = vpop.f32.mrf.mxu2 }
 0x437   : > { %4326 = vrot.lane.b32.xlu0 %v4064_v63, %s7305_s17  ;;  %v12694_v13 = vld [vmem:[#allocation39_spill] sm:$0xff]  ;;  %v12698_v63 = vld [vmem:[#allocation28_spill] sm:$0xff] }
 0x438   : > { %4501 = vmatpush.bf16.msrb.mxu3 %v12683_v14  ;;  %v12690_v14 = vld [vmem:[#allocation24_spill] sm:$0xff] }
 0x439   : > { %4486 = vmatpush.bf16.msrb.mxu2 %v12682_v24  ;;  %4462 = vmatpush.bf16.msrb.mxu0 %v12685_v50  ;;  %v12689_v24 = vld [vmem:[#allocation37_spill] sm:$0xff] }
 0x43a   : > { %4475 = vmatpush.bf16.msrb.mxu1 %v12686_v25  ;;  %v12695_v25 = vld [vmem:[#allocation26_spill] sm:$0xff] }
 0x43c   : > { %4502 = vmatpush.bf16.msrb.mxu3 %v12688_v58  ;;  %v12697_v58 = vld [vmem:[#allocation25_spill] sm:$0xff] }
 0x43d   : > { %4487 = vmatpush.bf16.msrb.mxu2 %v12687_v57  ;;  %4463 = vmatpush.bf16.msrb.mxu0 %v12689_v24  ;;  %v12696_v57 = vld [vmem:[#allocation43_spill] sm:$0xff]  ;;  %v12708_v24 = vld [vmem:[#allocation78_spill] sm:$0xff] }
 0x43e   : > { %4476 = vmatpush.bf16.msrb.mxu1 %v12690_v14  ;;  %v4066_v4 = vpop.f32.mrf.mxu2  ;;  %v3823_v14 = vpop.permute.xlu1 %3822 }
 0x43f   : > { %v12706_v4 = vld [vmem:[#allocation32_spill] sm:$0xff] }
 0x440   : > { %4503 = vmatpush.bf16.msrb.mxu3 %v12692_v33  ;;  %v12704_v33 = vld [vmem:[#allocation72_spill] sm:$0xff] }
 0x441   : > { %4488 = vmatpush.bf16.msrb.mxu2 %v12691_v60  ;;  %4464 = vmatpush.bf16.msrb.mxu0 %v12694_v13  ;;  %v12699_v60 = vld [vmem:[#allocation70_spill] sm:$0xff]  ;;  %v12701_v13 = vld [vmem:[#allocation27_spill] sm:$0xff] }
 0x442   : > { %4477 = vmatpush.bf16.msrb.mxu1 %v12695_v25  ;;  %v12702_v25 = vld [vmem:[#allocation30_spill] sm:$0xff] }
 0x443   : > { %4504 = vmatmul.bf16.vlgmr.msrb.gmra.mxu3 %v10049_v15 }
 0x444   : > { %4548 = vmatpush.bf16.msra.mxu3 %v12693_v12  ;;  %4465 = vmatmul.bf16.vlgmr.msrb.gmra.mxu0 %v10049_v15  ;;  %v12700_v12 = vld [vmem:[#allocation45_spill] sm:$0xff] }
 0x445   : > { %4509 = vmatpush.bf16.msra.mxu0 %v12696_v57  ;;  %4489 = vmatpush.bf16.msrb.mxu2 %v12697_v58  ;;  %v12703_v57 = vld [vmem:[#allocation29_spill] sm:$0xff]  ;;  %v3825_v58 = vpop.permute.xlu2 %3824 }
 0x446   : > { %4522 = vmatpush.bf16.msra.mxu1 %v12698_v63  ;;  %v12705_v63 = vld [vmem:[#allocation47_spill] sm:$0xff] }
 0x447   : > { %4478 = vmatmul.bf16.vlgmr.msrb.gmra.mxu1 %v10049_v15 }
 0x448   : > { %4549 = vmatpush.bf16.msra.mxu3 %v12699_v60  ;;  %v12707_v60 = vld [vmem:[#allocation31_spill] sm:$0xff] }
 0x449   : > { %4510 = vmatpush.bf16.msra.mxu0 %v12700_v12  ;;  %4490 = vmatpush.bf16.msrb.mxu2 %v12701_v13  ;;  %v10124_v13 = vsel %vm3828_vm5, %v3821_v0, %v3823_v14  ;;  %v4103_v12 = vpop.f32.mrf.mxu1 }
 0x44a   : > { %4523 = vmatpush.bf16.msra.mxu1 %v12702_v25  ;;  %12709 = vst [vmem:[#allocation261_spill] sm:$0xff] %v10124_v13  ;;  %v10127_v25 = vsel %vm3828_vm5, %v3823_v14, %v3825_v58  ;;  %4332 = vrot.lane.b32.xlu0 %v4103_v12, %s7305_s17  ;;  %v12715_v14 = vld [vmem:[#allocation48_spill] sm:$0xff]  ;;  %v12721_v13 = vld [vmem:[#allocation90_spill] sm:$0xff] }
 0x44b   : > { %12710 = vst [vmem:[#allocation262_spill] sm:$0xff] %v10127_v25  ;;  %v12716_v25 = vld [vmem:[#allocation86_spill] sm:$0xff] }
 0x44c   : > { %4550 = vmatpush.bf16.msra.mxu3 %v12704_v33  ;;  %4491 = vmatmul.bf16.vlgmr.msrb.gmra.mxu2 %v10049_v15  ;;  %v12711_v33 = vld [vmem:[#allocation51_spill] sm:$0xff] }
 0x44d   : > { %4535 = vmatpush.bf16.msra.mxu2 %v12703_v57  ;;  %4511 = vmatpush.bf16.msra.mxu0 %v12705_v63  ;;  %v4090_v57 = vpop.f32.mrf.mxu0  ;;  %v12712_v63 = vld [vmem:[#allocation41_spill] sm:$0xff]  ;;  %v4307_v0 = vpop.permute.xlu2 %4306 }
 0x44e   : > { %4524 = vmatpush.bf16.msra.mxu1 %v12706_v4  ;;  %4330 = vrot.lane.b32.xlu2 %v4090_v57, %s7305_s17  ;;  %v12714_v4 = vld [vmem:[#allocation82_spill] sm:$0xff] }
 0x450   : > { %4551 = vmatpush.bf16.msra.mxu3 %v12708_v24  ;;  %v4129_v24 = vpop.f32.mrf.mxu3 }
 0x451   : > { %4536 = vmatpush.bf16.msra.mxu2 %v12707_v60  ;;  %4512 = vmatpush.bf16.msra.mxu0 %v12711_v33  ;;  %v12713_v60 = vld [vmem:[#allocation33_spill] sm:$0xff]  ;;  %v4305_v33 = vpop.permute.xlu1 %4304 }
 0x452   : > { %4525 = vmatpush.bf16.msra.mxu1 %v12712_v63  ;;  %v10140_v57 = vsel %vm4360_vm6, %v4305_v33, %v4307_v0  ;;  %v12718_v63 = vld [vmem:[#allocation55_spill] sm:$0xff] }
 0x453   : > { %12717 = vst [vmem:[#allocation86_spill] sm:$0xff] %v10140_v57  ;;  %v12725_v57 = vld [vmem:[#allocation63_spill] sm:$0xff] }
 0x454   : > { %4552 = vmatpush.bf16.msra.mxu3 %v12714_v4  ;;  %v12720_v4 = vld [vmem:[#allocation49_spill] sm:$0xff] }
 0x455   : > { %4537 = vmatpush.bf16.msra.mxu2 %v12713_v60  ;;  %4513 = vmatpush.bf16.msra.mxu0 %v12518_v53  ;;  %v4092_v12 = vpop.f32.mrf.mxu0  ;;  %v4105_v60 = vpop.f32.mrf.mxu1  ;;  %v12719_v53 = vld [vmem:[#allocation58_spill] sm:$0xff] }
 0x456   : > { %4526 = vmatpush.bf16.msra.mxu1 %v12715_v14  ;;  %4336 = vrot.lane.b32.xlu2 %v4129_v24, %s7305_s17  ;;  %v3827_v14 = vpop.permute.xlu0 %3826  ;;  %v12722_v60 = vld [vmem:[#allocation59_spill] sm:$0xff]  ;;  %v12723_v24 = vld [vmem:[#allocation92_spill] sm:$0xff]  ;;  %v12724_v12 = vld [vmem:[#allocation94_spill] sm:$0xff] }
 0x457   : > { %v10147_v50 = vsel %vm3828_vm5, %v3825_v58, %v3827_v14  ;;  %v12726_v58 = vld [vmem:[#allocation66_spill] sm:$0xff]  ;;  %v12727_v14 = vld [vmem:[#allocation65_spill] sm:$0xff] }
 0x458   : > { %4553 = vmatpush.bf16.msra.mxu3 %v12716_v25  ;;  %v4131_v33 = vpop.f32.mrf.mxu3 }
 0x459   : > { %4538 = vmatpush.bf16.msra.mxu2 %v12519_v17  ;;  %4514 = vmatpush.bf16.msra.mxu0 %v12718_v63  ;;  %v4116_v17 = vpop.f32.mrf.mxu2 }
 0x45a   : > { %4527 = vmatpush.bf16.msra.mxu1 %v12719_v53  ;;  %4334 = vrot.lane.b32.xlu1 %v4116_v17, %s7305_s17  ;;  %v12729_v17 = vld [vmem:[#allocation68_spill] sm:$0xff] }
 0x45c   : > { %4554 = vmatpush.bf16.msra.mxu3 %v12721_v13  ;;  %v12728_v13 = vld [vmem:[#allocation61_spill] sm:$0xff] }
 0x45d   : > { %4539 = vmatpush.bf16.msra.mxu2 %v12720_v4  ;;  %4515 = vmatpush.bf16.msra.mxu0 %v12525_v55 }
 0x45e   : > { %4528 = vmatpush.bf16.msra.mxu1 %v12342_v42 }
 0x460   : > { %4555 = vmatpush.bf16.msra.mxu3 %v12723_v24  ;;  %v12739_v24 = vld [vmem:[#allocation79_spill] sm:$0xff] }
 0x461   : > { %4540 = vmatpush.bf16.msra.mxu2 %v12722_v60  ;;  %4516 = vmatpush.bf16.msra.mxu0 %v12725_v57  ;;  %v4118_v33 = vpop.f32.mrf.mxu2  ;;  %v12730_v60 = vld [vmem:[#allocation96_spill] sm:$0xff]  ;;  %v4309_v57 = vpop.permute.xlu0 %4308 }
 0x462   : > { %4529 = vmatpush.bf16.msra.mxu1 %v12726_v58  ;;  %v12735_v58 = vld [vmem:[#allocation76_spill] sm:$0xff]  ;;  %v12736_v33 = vld [vmem:[#allocation75_spill] sm:$0xff] }
 0x463   : > { %4556 = vmatmul.bf16.vlgmr.msra.gmra.mxu3 %v10049_v15 }
 0x464   : > { %4600 = vmatpush.bf16.msrb.mxu3 %v12724_v12  ;;  %4517 = vmatmul.bf16.vlgmr.msra.gmra.mxu0 %v10049_v15  ;;  %v12731_v12 = vld [vmem:[#allocation71_spill] sm:$0xff] }
 0x465   : > { %4561 = vmatpush.bf16.msrb.mxu0 %v12727_v14  ;;  %4541 = vmatpush.bf16.msra.mxu2 %v12728_v13  ;;  %v12732_v14 = vld [vmem:[#allocation69_spill] sm:$0xff]  ;;  %v12733_v13 = vld [vmem:[#allocation100_spill] sm:$0xff] }
 0x466   : > { %4574 = vmatpush.bf16.msrb.mxu1 %v12729_v17  ;;  %v12734_v17 = vld [vmem:[#allocation73_spill] sm:$0xff] }
 0x467   : > { %4530 = vmatmul.bf16.vlgmr.msra.gmra.mxu1 %v10049_v15 }
 0x468   : > { %4601 = vmatpush.bf16.msrb.mxu3 %v12730_v60  ;;  %v12737_v60 = vld [vmem:[#allocation106_spill] sm:$0xff] }
 0x469   : > { %4562 = vmatpush.bf16.msrb.mxu0 %v12731_v12  ;;  %4542 = vmatpush.bf16.msra.mxu2 %v12355_v34  ;;  %v4142_v12 = vpop.f32.mrf.mxu0  ;;  %v10176_v34 = vsel %vm4360_vm6, %v4307_v0, %v4309_v57  ;;  %v12744_v0 = vld [vmem:[#allocation81_spill] sm:$0xff] }
 0x46a   : > { %4575 = vmatpush.bf16.msrb.mxu1 %v12536_v18  ;;  %12738 = vst [vmem:[#allocation55_spill] sm:$0xff] %v10176_v34  ;;  %v4155_v18 = vpop.f32.mrf.mxu1  ;;  %4338 = vrot.lane.b32.xlu0 %v4142_v12, %s7305_s17  ;;  %v12745_v34 = vld [vmem:[#allocation118_spill] sm:$0xff]  ;;  %v4313_v12 = vpop.permute.xlu2 %4312 }
 0x46b   : > { %4340 = vrot.lane.b32.xlu1 %v4155_v18, %s7305_s17 }
 0x46c   : > { %4602 = vmatpush.bf16.msrb.mxu3 %v12733_v13  ;;  %4543 = vmatmul.bf16.vlgmr.msra.gmra.mxu2 %v10049_v15  ;;  %v12740_v13 = vld [vmem:[#allocation80_spill] sm:$0xff] }
 0x46d   : > { %4587 = vmatpush.bf16.msrb.mxu2 %v12732_v14  ;;  %4563 = vmatpush.bf16.msrb.mxu0 %v12734_v17  ;;  %v12741_v17 = vld [vmem:[#allocation77_spill] sm:$0xff]  ;;  %v12746_v14 = vld [vmem:[#allocation87_spill] sm:$0xff] }
 0x46e   : > { %4576 = vmatpush.bf16.msrb.mxu1 %v12735_v58  ;;  %v12742_v58 = vld [vmem:[#allocation112_spill] sm:$0xff] }
 0x470   : > { %4603 = vmatpush.bf16.msrb.mxu3 %v12737_v60  ;;  %v12743_v60 = vld [vmem:[#allocation84_spill] sm:$0xff] }
 0x471   : > { %4588 = vmatpush.bf16.msrb.mxu2 %v12736_v33  ;;  %4564 = vmatpush.bf16.msrb.mxu0 %v12739_v24  ;;  %v4181_v33 = vpop.f32.mrf.mxu3  ;;  %v4144_v24 = vpop.f32.mrf.mxu0 }
 0x472   : > { %4577 = vmatpush.bf16.msrb.mxu1 %v12740_v13  ;;  %4344 = vrot.lane.b32.xlu0 %v4181_v33, %s7305_s17  ;;  %v4157_v18 = vpop.f32.mrf.mxu1  ;;  %v12747_v13 = vld [vmem:[#allocation88_spill] sm:$0xff]  ;;  %v4168_v24 = vpop.f32.mrf.mxu2 }
 0x473   : > { %4342 = vrot.lane.b32.xlu2 %v4168_v24, %s7305_s17  ;;  %v12750_v18 = vld [vmem:[#allocation89_spill] sm:$0xff] }
 0x474   : > { %4604 = vmatpush.bf16.msrb.mxu3 %v12742_v58  ;;  %v4311_v58 = vpop.permute.xlu1 %4310 }
 0x475   : > { %4589 = vmatpush.bf16.msrb.mxu2 %v12741_v17  ;;  %4565 = vmatpush.bf16.msrb.mxu0 %v12544_v9  ;;  %v12748_v17 = vld [vmem:[#allocation85_spill] sm:$0xff]  ;;  %v10193_v9 = vsel %vm4360_vm6, %v4309_v57, %v4311_v58 }
 0x476   : > { %4578 = vmatpush.bf16.msrb.mxu1 %v12743_v60  ;;  %v10196_v60 = vsel %vm4360_vm6, %v4311_v58, %v4313_v12  ;;  %v12753_v57 = vld [vmem:[#allocation93_spill] sm:$0xff] }
 0x477   : > { %v12754_v58 = vld [vmem:[#allocation101_spill] sm:$0xff] }
 0x478   : > { %4605 = vmatpush.bf16.msrb.mxu3 %v12745_v34 }
 0x479   : > { %4590 = vmatpush.bf16.msrb.mxu2 %v12744_v0  ;;  %4566 = vmatpush.bf16.msrb.mxu0 %v12746_v14  ;;  %v12749_v0 = vld [vmem:[#allocation120_spill] sm:$0xff]  ;;  %v4183_v33 = vpop.f32.mrf.mxu3  ;;  %v12755_v14 = vld [vmem:[#allocation95_spill] sm:$0xff] }
 0x47a   : > { %4579 = vmatpush.bf16.msrb.mxu1 %v12747_v13  ;;  %v12752_v13 = vld [vmem:[#allocation126_spill] sm:$0xff]  ;;  %v4170_v24 = vpop.f32.mrf.mxu2  ;;  %v12758_v33 = vld [vmem:[#allocation128_spill] sm:$0xff] }
 0x47b   : > { %v12765_v24 = vld [vmem:[#allocation110_spill] sm:$0xff] }
 0x47c   : > { %4606 = vmatpush.bf16.msrb.mxu3 %v12749_v0  ;;  %v12756_v0 = vld [vmem:[#allocation99_spill] sm:$0xff] }
 0x47d   : > { %4591 = vmatpush.bf16.msrb.mxu2 %v12748_v17  ;;  %4567 = vmatpush.bf16.msrb.mxu0 %v12551_v44  ;;  %v12751_v17 = vld [vmem:[#allocation122_spill] sm:$0xff]  ;;  %v12757_v44 = vld [vmem:[#allocation104_spill] sm:$0xff] }
 0x47e   : > { %4580 = vmatpush.bf16.msrb.mxu1 %v12552_v20  ;;  %v12767_v20 = vld [vmem:[#allocation138_spill] sm:$0xff] }
 0x480   : > { %4607 = vmatpush.bf16.msrb.mxu3 %v12751_v17  ;;  %v4319_v17 = vpop.permute.xlu2 %4318 }
 0x481   : > { %4592 = vmatpush.bf16.msrb.mxu2 %v12750_v18  ;;  %4568 = vmatpush.bf16.msrb.mxu0 %v12753_v57  ;;  %v12760_v57 = vld [vmem:[#allocation103_spill] sm:$0xff]  ;;  %v4315_v18 = vpop.permute.xlu0 %4314 }
 0x482   : > { %4581 = vmatpush.bf16.msrb.mxu1 %v12754_v58  ;;  %v12761_v58 = vld [vmem:[#allocation108_spill] sm:$0xff] }
 0x483   : > { %4608 = vmatmul.bf16.vlgmr.msrb.gmra.mxu3 %v10049_v15 }
 0x484   : > { %4652 = vmatpush.bf16.msra.mxu3 %v12752_v13  ;;  %4569 = vmatmul.bf16.vlgmr.msrb.gmra.mxu0 %v10049_v15  ;;  %v12759_v13 = vld [vmem:[#allocation97_spill] sm:$0xff] }
 0x485   : > { %4613 = vmatpush.bf16.msra.mxu0 %v12755_v14  ;;  %4593 = vmatpush.bf16.msrb.mxu2 %v12756_v0  ;;  %v12762_v14 = vld [vmem:[#allocation105_spill] sm:$0xff]  ;;  %v12763_v0 = vld [vmem:[#allocation130_spill] sm:$0xff] }
 0x486   : > { %4626 = vmatpush.bf16.msra.mxu1 %v12757_v44  ;;  %v12764_v44 = vld [vmem:[#allocation102_spill] sm:$0xff] }
 0x487   : > { %4582 = vmatmul.bf16.vlgmr.msrb.gmra.mxu1 %v10049_v15 }
 0x488   : > { %4653 = vmatpush.bf16.msra.mxu3 %v12758_v33  ;;  %v12766_v33 = vld [vmem:[#allocation109_spill] sm:$0xff] }
 0x489   : > { %4614 = vmatpush.bf16.msra.mxu0 %v12759_v13  ;;  %4594 = vmatpush.bf16.msrb.mxu2 %v12760_v57  ;;  %v10225_v57 = vsel %vm4360_vm6, %v4313_v12, %v4315_v18  ;;  %v4194_v13 = vpop.f32.mrf.mxu0  ;;  %v12773_v12 = vld [vmem:[#allocation144_spill] sm:$0xff] }
 0x48a   : > { %4627 = vmatpush.bf16.msra.mxu1 %v12761_v58  ;;  %12768 = vst [vmem:[#allocation58_spill] sm:$0xff] %v10225_v57  ;;  %v4317_v58 = vpop.permute.xlu1 %4316  ;;  %4346 = vrot.lane.b32.xlu1 %v4194_v13, %s7305_s17  ;;  %v12774_v57 = vld [vmem:[#allocation113_spill] sm:$0xff] }
 0x48c   : > { %4654 = vmatpush.bf16.msra.mxu3 %v12763_v0  ;;  %4595 = vmatmul.bf16.vlgmr.msrb.gmra.mxu2 %v10049_v15  ;;  %v10231_v0 = vsel %vm4360_vm6, %v4317_v58, %v4319_v17 }
 0x48d   : > { %4639 = vmatpush.bf16.msra.mxu2 %v12762_v14  ;;  %4615 = vmatpush.bf16.msra.mxu0 %v12764_v44  ;;  %v10228_v14 = vsel %vm4360_vm6, %v4315_v18, %v4317_v58  ;;  %12769 = vst [vmem:[#allocation49_spill] sm:$0xff] %v10231_v0  ;;  %v12770_v44 = vld [vmem:[#allocation107_spill] sm:$0xff]  ;;  %v4233_v18 = vpop.f32.mrf.mxu3  ;;  %v4321_v58 = vpop.permute.xlu0 %4320  ;;  %v12775_v0 = vld [vmem:[#allocation150_spill] sm:$0xff] }
 0x48e   : > { %4628 = vmatpush.bf16.msra.mxu1 %v12765_v24  ;;  %v4207_v24 = vpop.f32.mrf.mxu1  ;;  %v10244_v13 = vsel %vm4360_vm6, %v4319_v17, %v4321_v58 }
 0x48f   : > { %4348 = vrot.lane.b32.xlu2 %v4207_v24, %s7305_s17  ;;  %12776 = vst [vmem:[#allocation118_spill] sm:$0xff] %v10244_v13  ;;  %v12784_v13 = vld [vmem:[#allocation154_spill] sm:$0xff] }
 0x490   : > { %4655 = vmatpush.bf16.msra.mxu3 %v12767_v20  ;;  %v12772_v20 = vld [vmem:[#allocation111_spill] sm:$0xff] }
 0x491   : > { %4640 = vmatpush.bf16.msra.mxu2 %v12766_v33  ;;  %4616 = vmatpush.bf16.msra.mxu0 %v12770_v44  ;;  %v12771_v33 = vld [vmem:[#allocation114_spill] sm:$0xff]  ;;  %v12777_v44 = vld [vmem:[#allocation119_spill] sm:$0xff] }
 0x492   : > { %4629 = vmatpush.bf16.msra.mxu1 %v12771_v33  ;;  %v4196_v33 = vpop.f32.mrf.mxu0  ;;  %4352 = vrot.lane.b32.xlu1 %v4233_v18, %s7305_s17  ;;  %v12785_v18 = vld [vmem:[#allocation156_spill] sm:$0xff] }
 0x493   : > { %v12783_v33 = vld [vmem:[#allocation125_spill] sm:$0xff] }
 0x494   : > { %4656 = vmatpush.bf16.msra.mxu3 %v12773_v12  ;;  %v12778_v12 = vld [vmem:[#allocation124_spill] sm:$0xff] }
 0x495   : > { %4641 = vmatpush.bf16.msra.mxu2 %v12772_v20  ;;  %4617 = vmatpush.bf16.msra.mxu0 %v12774_v57  ;;  %v12779_v57 = vld [vmem:[#allocation117_spill] sm:$0xff]  ;;  %v12780_v20 = vld [vmem:[#allocation152_spill] sm:$0xff]  ;;  %v4235_v17 = vpop.f32.mrf.mxu3 }
 0x496   : > { %4630 = vmatpush.bf16.msra.mxu1 %v12573_v16  ;;  %v4209_v24 = vpop.f32.mrf.mxu1  ;;  %v4220_v16 = vpop.f32.mrf.mxu2 }
 0x497   : > { %4350 = vrot.lane.b32.xlu0 %v4220_v16, %s7305_s17  ;;  %v12786_v24 = vld [vmem:[#allocation123_spill] sm:$0xff]  ;;  %v12790_v16 = vld [vmem:[#allocation136_spill] sm:$0xff] }
 0x498   : > { %4657 = vmatpush.bf16.msra.mxu3 %v12775_v0  ;;  %v12782_v0 = vld [vmem:[#allocation132_spill] sm:$0xff] }
 0x499   : > { %4642 = vmatpush.bf16.msra.mxu2 %v12574_v3  ;;  %4618 = vmatpush.bf16.msra.mxu0 %v12777_v44  ;;  %v12781_v3 = vld [vmem:[#allocation121_spill] sm:$0xff] }
 0x49a   : > { %4631 = vmatpush.bf16.msra.mxu1 %v12778_v12  ;;  %v12787_v12 = vld [vmem:[#allocation134_spill] sm:$0xff] }
 0x49c   : > { %4658 = vmatpush.bf16.msra.mxu3 %v12780_v20  ;;  %v12789_v20 = vld [vmem:[#allocation133_spill] sm:$0xff] }
 0x49d   : > { %4643 = vmatpush.bf16.msra.mxu2 %v12779_v57  ;;  %4619 = vmatpush.bf16.msra.mxu0 %v12781_v3  ;;  %v12788_v57 = vld [vmem:[#allocation127_spill] sm:$0xff]  ;;  %v12800_v3 = vld [vmem:[#allocation170_spill] sm:$0xff] }
 0x49e   : > { %4632 = vmatpush.bf16.msra.mxu1 %v12782_v0  ;;  %v4222_v17 = vpop.f32.mrf.mxu2  ;;  %v4323_v0 = vpop.permute.xlu1 %4322 }
 0x49f   : > { %v12798_v17 = vld [vmem:[#allocation142_spill] sm:$0xff] }
 0x4a0   : > { %4659 = vmatpush.bf16.msra.mxu3 %v12784_v13  ;;  %v12796_v13 = vld [vmem:[#allocation162_spill] sm:$0xff] }
 0x4a1   : > { %4644 = vmatpush.bf16.msra.mxu2 %v12783_v33  ;;  %4620 = vmatpush.bf16.msra.mxu0 %v12786_v24  ;;  %v12791_v33 = vld [vmem:[#allocation160_spill] sm:$0xff]  ;;  %v12793_v24 = vld [vmem:[#allocation135_spill] sm:$0xff] }
 0x4a2   : > { %4633 = vmatpush.bf16.msra.mxu1 %v12787_v12  ;;  %v12794_v12 = vld [vmem:[#allocation140_spill] sm:$0xff] }
 0x4a3   : > { %4660 = vmatmul.bf16.vlgmr.msra.gmra.mxu3 %v10049_v15 }
 0x4a4   : > { %4704 = vmatpush.bf16.msrb.mxu3 %v12785_v18  ;;  %4621 = vmatmul.bf16.vlgmr.msra.gmra.mxu0 %v10049_v15  ;;  %v12792_v18 = vld [vmem:[#allocation129_spill] sm:$0xff] }
 0x4a5   : > { %4665 = vmatpush.bf16.msrb.mxu0 %v12788_v57  ;;  %4645 = vmatpush.bf16.msra.mxu2 %v12789_v20  ;;  %v12795_v57 = vld [vmem:[#allocation137_spill] sm:$0xff]  ;;  %v4325_v20 = vpop.permute.xlu2 %4324 }
 0x4a6   : > { %4678 = vmatpush.bf16.msrb.mxu1 %v12790_v16  ;;  %v12797_v16 = vld [vmem:[#allocation131_spill] sm:$0xff] }
 0x4a7   : > { %4634 = vmatmul.bf16.vlgmr.msra.gmra.mxu1 %v10049_v15 }
 0x4a8   : > { %4705 = vmatpush.bf16.msrb.mxu3 %v12791_v33  ;;  %v12799_v33 = vld [vmem:[#allocation141_spill] sm:$0xff] }
 0x4a9   : > { %4666 = vmatpush.bf16.msrb.mxu0 %v12792_v18  ;;  %4646 = vmatpush.bf16.msra.mxu2 %v12793_v24  ;;  %v10277_v24 = vsel %vm4360_vm6, %v4321_v58, %v4323_v0  ;;  %v4259_v18 = vpop.f32.mrf.mxu1 }
 0x4aa   : > { %4679 = vmatpush.bf16.msrb.mxu1 %v12794_v12  ;;  %v10280_v12 = vsel %vm4360_vm6, %v4323_v0, %v4325_v20  ;;  %4356 = vrot.lane.b32.xlu0 %v4259_v18, %s7305_s17  ;;  %v4453_v0 = vpop.f32.mrf.mxu3 }
 0x4ab   : > { %12801 = vst [vmem:[#allocation119_spill] sm:$0xff] %v10280_v12  ;;  %v4329_v12 = vpop.permute.xlu1 %4328 }
 0x4ac   : > { %4706 = vmatpush.bf16.msrb.mxu3 %v12796_v13  ;;  %4647 = vmatmul.bf16.vlgmr.msra.gmra.mxu2 %v10049_v15 }
 0x4ad   : > { %4691 = vmatpush.bf16.msrb.mxu2 %v12795_v57  ;;  %4667 = vmatpush.bf16.msrb.mxu0 %v12797_v16  ;;  %v4246_v57 = vpop.f32.mrf.mxu0  ;;  %v4331_v58 = vpop.permute.xlu2 %4330 }
 0x4ae   : > { %4680 = vmatpush.bf16.msrb.mxu1 %v12798_v17  ;;  %4354 = vrot.lane.b32.xlu2 %v4246_v57, %s7305_s17  ;;  %v12804_v17 = vld [vmem:[#allocation148_spill] sm:$0xff]  ;;  %v10293_v57 = vsel %vm4360_vm6, %v4329_v12, %v4331_v58 }
 0x4af   : > { %12806 = vst [vmem:[#allocation162_spill] sm:$0xff] %v10293_v57  ;;  %v12807_v57 = vld [vmem:[#allocation184_spill] sm:$0xff] }
 0x4b0   : > { %4707 = vmatpush.bf16.msrb.mxu3 %v12800_v3  ;;  %v12803_v3 = vld [vmem:[#allocation145_spill] sm:$0xff] }
 0x4b1   : > { %4692 = vmatpush.bf16.msrb.mxu2 %v12799_v33  ;;  %4668 = vmatpush.bf16.msrb.mxu0 %v12599_v47  ;;  %v12802_v33 = vld [vmem:[#allocation176_spill] sm:$0xff]  ;;  %v12805_v47 = vld [vmem:[#allocation182_spill] sm:$0xff]  ;;  %v4261_v18 = vpop.f32.mrf.mxu1 }
 0x4b2   : > { %4681 = vmatpush.bf16.msrb.mxu1 %v12600_v31  ;;  %v12809_v18 = vld [vmem:[#allocation164_spill] sm:$0xff] }
 0x4b4   : > { %4708 = vmatpush.bf16.msrb.mxu3 %v12802_v33 }
 0x4b5   : > { %4693 = vmatpush.bf16.msrb.mxu2 %v12601_v38  ;;  %4669 = vmatpush.bf16.msrb.mxu0 %v12803_v3  ;;  %v4248_v31 = vpop.f32.mrf.mxu0  ;;  %v4272_v3 = vpop.f32.mrf.mxu2 }
 0x4b6   : > { %4682 = vmatpush.bf16.msrb.mxu1 %v12804_v17  ;;  %4836 = vrot.lane.b32.xlu2 %v4453_v0, %s7306_s0  ;;  %v4327_v17 = vpop.permute.xlu0 %4326  ;;  %v12808_v31 = vld [vmem:[#allocation153_spill] sm:$0xff]  ;;  %v4455_v0 = vpop.f32.mrf.mxu3 }
 0x4b7   : > { %4358 = vrot.lane.b32.xlu1 %v4272_v3, %s7305_s17  ;;  %v12816_v3 = vld [vmem:[#allocation168_spill] sm:$0xff] }
 0x4b8   : > { %4709 = vmatpush.bf16.msrb.mxu3 %v12805_v47  ;;  %v10303_v47 = vsel %vm4360_vm6, %v4327_v17, %v4329_v12  ;;  %v12813_v12 = vld [vmem:[#allocation166_spill] sm:$0xff] }
 0x4b9   : > { %4694 = vmatpush.bf16.msrb.mxu2 %v12606_v37  ;;  %4670 = vmatpush.bf16.msrb.mxu0 %v12435_v19  ;;  %v10300_v37 = vsel %vm4360_vm6, %v4325_v20, %v4327_v17  ;;  %v12812_v20 = vld [vmem:[#allocation155_spill] sm:$0xff]  ;;  %v12814_v17 = vld [vmem:[#allocation157_spill] sm:$0xff] }
 0x4ba   : > { %4683 = vmatpush.bf16.msrb.mxu1 %v12436_v36  ;;  %v12811_v36 = vld [vmem:[#allocation188_spill] sm:$0xff] }
 0x4bc   : > { %4710 = vmatpush.bf16.msrb.mxu3 %v12807_v57  ;;  %v12815_v57 = vld [vmem:[#allocation165_spill] sm:$0xff] }
 0x4bd   : > { %4695 = vmatpush.bf16.msrb.mxu2 %v12607_v1  ;;  %4671 = vmatpush.bf16.msrb.mxu0 %v12808_v31  ;;  %v12810_v1 = vld [vmem:[#allocation186_spill] sm:$0xff]  ;;  %v4274_v0 = vpop.f32.mrf.mxu2 }
 0x4be   : > { %4684 = vmatpush.bf16.msrb.mxu1 %v12809_v18  ;;  %v12824_v0 = vld [vmem:[#allocation173_spill] sm:$0xff]  ;;  %v12826_v18 = vld [vmem:[#allocation171_spill] sm:$0xff] }
 0x4c0   : > { %4711 = vmatpush.bf16.msrb.mxu3 %v12810_v1  ;;  %v4333_v1 = vpop.permute.xlu0 %4332 }
 0x4c1   : > { %4696 = vmatpush.bf16.msrb.mxu2 %v12441_v30  ;;  %4672 = vmatpush.bf16.msrb.mxu0 %v12812_v20  ;;  %v12817_v30 = vld [vmem:[#allocation192_spill] sm:$0xff]  ;;  %v12819_v20 = vld [vmem:[#allocation167_spill] sm:$0xff] }
 0x4c2   : > { %4685 = vmatpush.bf16.msrb.mxu1 %v12813_v12  ;;  %v12820_v12 = vld [vmem:[#allocation172_spill] sm:$0xff] }
 0x4c3   : > { %4712 = vmatmul.bf16.vlgmr.msrb.gmra.mxu3 %v10049_v15 }
 0x4c4   : > { %4756 = vmatpush.bf16.msra.mxu3 %v12811_v36  ;;  %4673 = vmatmul.bf16.vlgmr.msrb.gmra.mxu0 %v10049_v15  ;;  %v12818_v36 = vld [vmem:[#allocation161_spill] sm:$0xff] }
 0x4c5   : > { %4717 = vmatpush.bf16.msra.mxu0 %v12814_v17  ;;  %4697 = vmatpush.bf16.msrb.mxu2 %v12815_v57  ;;  %v12821_v17 = vld [vmem:[#allocation169_spill] sm:$0xff]  ;;  %v12823_v57 = vld [vmem:[#allocation174_spill] sm:$0xff] }
 0x4c6   : > { %4730 = vmatpush.bf16.msra.mxu1 %v12816_v3  ;;  %v12822_v3 = vld [vmem:[#allocation163_spill] sm:$0xff] }
 0x4c7   : > { %4686 = vmatmul.bf16.vlgmr.msrb.gmra.mxu1 %v10049_v15 }
 0x4c8   : > { %4757 = vmatpush.bf16.msra.mxu3 %v12817_v30  ;;  %v12825_v30 = vld [vmem:[#allocation203_spill] sm:$0xff] }
 0x4c9   : > { %4718 = vmatpush.bf16.msra.mxu0 %v12818_v36  ;;  %4698 = vmatpush.bf16.msrb.mxu2 %v12819_v20  ;;  %v4466_v36 = vpop.f32.mrf.mxu0  ;;  %v10332_v20 = vsel %vm4360_vm6, %v4331_v58, %v4333_v1 }
 0x4ca   : > { %4731 = vmatpush.bf16.msra.mxu1 %v12820_v12  ;;  %v4479_v12 = vpop.f32.mrf.mxu1  ;;  %4838 = vrot.lane.b32.xlu0 %v4466_v36, %s7306_s0  ;;  %v4337_v36 = vpop.permute.xlu2 %4336 }
 0x4cb   : > { %4840 = vrot.lane.b32.xlu1 %v4479_v12, %s7306_s0 }
 0x4cc   : > { %4758 = vmatpush.bf16.msra.mxu3 %v12623_v52  ;;  %4699 = vmatmul.bf16.vlgmr.msrb.gmra.mxu2 %v10049_v15 }
 0x4cd   : > { %4743 = vmatpush.bf16.msra.mxu2 %v12821_v17  ;;  %4719 = vmatpush.bf16.msra.mxu0 %v12822_v3  ;;  %v12827_v3 = vld [vmem:[#allocation175_spill] sm:$0xff] }
 0x4ce   : > { %4732 = vmatpush.bf16.msra.mxu1 %v12823_v57  ;;  %v4505_v57 = vpop.f32.mrf.mxu3 }
 0x4d0   : > { %4759 = vmatpush.bf16.msra.mxu3 %v12825_v30  ;;  %v12829_v30 = vld [vmem:[#allocation180_spill] sm:$0xff] }
 0x4d1   : > { %4744 = vmatpush.bf16.msra.mxu2 %v12824_v0  ;;  %4720 = vmatpush.bf16.msra.mxu0 %v12826_v18  ;;  %v12828_v0 = vld [vmem:[#allocation177_spill] sm:$0xff]  ;;  %v4468_v58 = vpop.f32.mrf.mxu0 }
 0x4d2   : > { %4733 = vmatpush.bf16.msra.mxu1 %v12630_v27  ;;  %4844 = vrot.lane.b32.xlu0 %v4505_v57, %s7306_s0  ;;  %v4481_v12 = vpop.f32.mrf.mxu1  ;;  %v4492_v58 = vpop.f32.mrf.mxu2  ;;  %v12830_v57 = vld [vmem:[#allocation198_spill] sm:$0xff] }
 0x4d3   : > { %4842 = vrot.lane.b32.xlu2 %v4492_v58, %s7306_s0 }
 0x4d4   : > { %4760 = vmatpush.bf16.msra.mxu3 %v12633_v11  ;;  %v4335_v11 = vpop.permute.xlu1 %4334 }
 0x4d5   : > { %4745 = vmatpush.bf16.msra.mxu2 %v12827_v3  ;;  %4721 = vmatpush.bf16.msra.mxu0 %v12828_v0  ;;  %v10349_v0 = vsel %vm4360_vm6, %v4333_v1, %v4335_v11  ;;  %v12832_v1 = vld [vmem:[#allocation187_spill] sm:$0xff] }
 0x4d6   : > { %4734 = vmatpush.bf16.msra.mxu1 %v12829_v30  ;;  %v10352_v30 = vsel %vm4360_vm6, %v4335_v11, %v4337_v36  ;;  %v4507_v12 = vpop.f32.mrf.mxu3  ;;  %v12833_v11 = vld [vmem:[#allocation200_spill] sm:$0xff] }
 0x4d7   : > { %v12837_v12 = vld [vmem:[#allocation8_spill] sm:$0xff] }
 0x4d8   : > { %4761 = vmatpush.bf16.msra.mxu3 %v12637_v8 }
 0x4d9   : > { %4746 = vmatpush.bf16.msra.mxu2 %v12459_v56  ;;  %4722 = vmatpush.bf16.msra.mxu0 %v12460_v48 }
 0x4da   : > { %4735 = vmatpush.bf16.msra.mxu1 %v12461_v5  ;;  %v12834_v5 = vld [vmem:[#allocation189_spill] sm:$0xff]  ;;  %v4494_v58 = vpop.f32.mrf.mxu2 }
 0x4db   : > { %v3847_v58 = vsel %vm3828_vm5, %v10055_v46, %v10030_v32 }
 0x4dc   : > { %4762 = vmatpush.bf16.msra.mxu3 %v12640_v21  ;;  %v12835_v21 = vld [vmem:[#allocation199_spill] sm:$0xff] }
 0x4dd   : > { %4747 = vmatpush.bf16.msra.mxu2 %v12638_v59  ;;  %4723 = vmatpush.bf16.msra.mxu0 %v12463_v41  ;;  %v12831_v59 = vld [vmem:[#allocation4_spill] sm:$0xff]  ;;  %v12836_v41 = vld [vmem:[#allocation202_spill] sm:$0xff] }
 0x4de   : > { %4736 = vmatpush.bf16.msra.mxu1 %v12830_v57 }
 0x4e0   : > { %4763 = vmatpush.bf16.msra.mxu3 %v9378_v61 }
 0x4e1   : > { %4748 = vmatpush.bf16.msra.mxu2 %v12464_v7  ;;  %4724 = vmatpush.bf16.msra.mxu0 %v12832_v1  ;;  %v12839_v1 = vld [vmem:[#allocation201_spill] sm:$0xff]  ;;  %v4518_v61 = vpop.f32.mrf.mxu0 }
 0x4e2   : > { %4737 = vmatpush.bf16.msra.mxu1 %v12833_v11  ;;  %v12844_v11 = vld [vmem:[#allocation20_spill] sm:$0xff]  ;;  %4846 = vrot.lane.b32.xlu1 %v4518_v61, %s7306_s0  ;;  %v12849_v61 = vld [vmem:[#allocation191_spill] sm:$0xff] }
 0x4e3   : > { %4764 = vmatmul.bf16.vlgmr.msra.gmra.mxu3 %v10049_v15 }
 0x4e4   : > { %4976 = vmatpush.bf16.msrb.mxu3 %v12831_v59  ;;  %4725 = vmatmul.bf16.vlgmr.msra.gmra.mxu0 %v10049_v15  ;;  %v12838_v59 = vld [vmem:[#allocation193_spill] sm:$0xff] }
 0x4e5   : > { %4769 = vmatpush.bf16.msrb.mxu0 %v12834_v5  ;;  %4749 = vmatpush.bf16.msra.mxu2 %v12835_v21  ;;  %v12840_v21 = vld [vmem:[#allocation12_spill] sm:$0xff]  ;;  %v12843_v5 = vld [vmem:[#allocation234_spill] sm:$0xff] }
 0x4e6   : > { %4782 = vmatpush.bf16.msrb.mxu1 %v12836_v41  ;;  %v4343_v41 = vpop.permute.xlu2 %4342 }
 0x4e7   : > { %4738 = vmatmul.bf16.vlgmr.msra.gmra.mxu1 %v10049_v15 }
 0x4e8   : > { %4977 = vmatpush.bf16.msrb.mxu3 %v12837_v12  ;;  %v12841_v12 = vld [vmem:[#allocation208_spill] sm:$0xff] }
 0x4e9   : > { %4770 = vmatpush.bf16.msrb.mxu0 %v12838_v59  ;;  %4750 = vmatpush.bf16.msra.mxu2 %v12839_v1  ;;  %v12842_v59 = vld [vmem:[#allocation183_spill] sm:$0xff]  ;;  %v4339_v1 = vpop.permute.xlu0 %4338 }
 0x4ea   : > { %4783 = vmatpush.bf16.msrb.mxu1 %v12653_v45  ;;  %v3901_v45 = vadd.f32 %v3847_v58, %v12843_v5  ;;  %v12846_v5 = vld [vmem:[#allocation210_spill] sm:$0xff] }
 0x4ec   : > { %4978 = vmatpush.bf16.msrb.mxu3 %v12840_v21  ;;  %4751 = vmatmul.bf16.vlgmr.msra.gmra.mxu2 %v10049_v15  ;;  %v10385_v21 = vsel %vm4360_vm6, %v4337_v36, %v4339_v1  ;;  %v12847_v36 = vld [vmem:[#allocation214_spill] sm:$0xff] }
 0x4ed   : > { %4795 = vmatpush.bf16.msrb.mxu2 %v12654_v40  ;;  %4771 = vmatpush.bf16.msrb.mxu0 %v12469_v29  ;;  %v4341_v40 = vpop.permute.xlu1 %4340 }
 0x4ee   : > { %4784 = vmatpush.bf16.msrb.mxu1 %v12841_v12  ;;  %v10388_v32 = vsel %vm4360_vm6, %v4339_v1, %v4341_v40  ;;  %v4379_v29 = vsel %vm4360_vm6, %v4341_v40, %v4343_v41  ;;  %v4557_v40 = vpop.f32.mrf.mxu3  ;;  %v12848_v1 = vld [vmem:[#allocation235_spill] sm:$0xff] }
 0x4ef   : > { %v10393_v12 = vadd.f32 %v4379_v29, %v3901_v45  ;;  %4852 = vrot.lane.b32.xlu1 %v4557_v40, %s7306_s0  ;;  %v12852_v40 = vld [vmem:[#allocation40_spill] sm:$0xff] }
 0x4f0   : > { %4979 = vmatpush.bf16.msrb.mxu3 %v12844_v11  ;;  %v3902_v11 = vadd.f32 %v10036_v22, %v12848_v1  ;;  %v4544_v22 = vpop.f32.mrf.mxu2  ;;  %v12853_v1 = vld [vmem:[#allocation221_spill] sm:$0xff] }
 0x4f1   : > { %4796 = vmatpush.bf16.msrb.mxu2 %v12842_v59  ;;  %4772 = vmatpush.bf16.msrb.mxu0 %v12659_v2  ;;  %v4531_v59 = vpop.f32.mrf.mxu1  ;;  %12845 = vst [vmem:[#allocation131_spill] sm:$0xff] %v10393_v12  ;;  %v4345_v45 = vpop.permute.xlu0 %4344 }
 0x4f2   : > { %4785 = vmatpush.bf16.msrb.mxu1 %v12473_v23  ;;  %4848 = vrot.lane.b32.xlu2 %v4531_v59, %s7306_s0  ;;  %v4380_v29 = vsel %vm4360_vm6, %v4343_v41, %v4345_v45  ;;  %v4520_v59 = vpop.f32.mrf.mxu0  ;;  %v12851_v41 = vld [vmem:[#allocation38_spill] sm:$0xff] }
 0x4f3   : > { %v10406_v58 = vadd.f32 %v4380_v29, %v3902_v11  ;;  %4850 = vrot.lane.b32.xlu0 %v4544_v22, %s7306_s0  ;;  %v10423_v11 = vld [vmem:[%s11446_s2 + $0x10] sm:$0xf]  ;;  %v12855_v29 = vld [vmem:[#allocation5_spill] sm:$0xff]  ;;  %v12856_v59 = vld [vmem:[#allocation244_spill] sm:$0xff] }
 0x4f4   : > { %4980 = vmatpush.bf16.msrb.mxu3 %v12662_v62 }
 0x4f5   : > { %4797 = vmatpush.bf16.msrb.mxu2 %v9682_v35  ;;  %4773 = vmatpush.bf16.msrb.mxu0 %v12846_v5  ;;  %12850 = vst [vmem:[#allocation176_spill] sm:$0xff] %v10406_v58  ;;  %v12870_v58 = vld [vmem:[#allocation50_spill] sm:$0xff] }
 0x4f6   : > { %4786 = vmatpush.bf16.msrb.mxu1 %v12847_v36 }
 0x4f8   : > { %4981 = vmatpush.bf16.msrb.mxu3 %v7972_v39  ;;  %v4559_v39 = vpop.f32.mrf.mxu3  ;;  %v4546_v22 = vpop.f32.mrf.mxu2 }
 0x4f9   : > { %4798 = vmatpush.bf16.msrb.mxu2 %v12849_v61  ;;  %4774 = vmatpush.bf16.msrb.mxu0 %v9362_v54  ;;  %v4533_v62 = vpop.f32.mrf.mxu1  ;;  %v12858_v39 = vld [vmem:[#allocation44_spill] sm:$0xff]  ;;  %v12864_v22 = vld [vmem:[#allocation13_spill] sm:$0xff]  ;;  %v12888_v54 = vld [vmem:[#allocation19_spill] sm:$0xff] }
 0x4fa   : > { %4787 = vmatpush.bf16.msrb.mxu1 %v9376_v28  ;;  %v12857_v62 = vld [vmem:[#allocation6_spill] sm:$0xff] }
 0x4fc   : > { %4982 = vmatpush.bf16.msrb.mxu3 %v7986_v49  ;;  %v12854_v49 = vld [vmem:[#allocation225_spill] sm:$0xff] }
 0x4fd   : > { %4799 = vmatpush.bf16.msrb.mxu2 %v12664_v6  ;;  %4775 = vmatpush.bf16.msrb.mxu0 %v9371_v26  ;;  %v12872_v6 = vld [vmem:[#allocation21_spill] sm:$0xff] }
 0x4fe   : > { %4788 = vmatpush.bf16.msrb.mxu1 %v9386_v43  ;;  %v12867_v43 = vld [vmem:[#allocation240_spill] sm:$0xff] }
 0x500   : > { %4983 = vmatpush.bf16.msrb.mxu3 %v12851_v41  ;;  %v12859_v41 = vld [vmem:[#allocation9_spill] sm:$0xff] }
 0x501   : > { %4800 = vmatpush.bf16.msrb.mxu2 %v9706_v10  ;;  %4776 = vmatpush.bf16.msrb.mxu0 %v12853_v1  ;;  %v12866_v1 = vld [vmem:[#allocation46_spill] sm:$0xff] }
 0x502   : > { %4789 = vmatpush.bf16.msrb.mxu1 %v12854_v49  ;;  %v12861_v49 = vld [vmem:[#allocation10_spill] sm:$0xff] }
 0x503   : > { %4984 = vmatmul.bf16.vlgmr.msrb.gmra.mxu3 %v10423_v11 }
 0x504   : > { %5028 = vmatpush.bf16.msra.mxu3 %v12852_v40  ;;  %4777 = vmatmul.bf16.vlgmr.msrb.gmra.mxu0 %v10049_v15  ;;  %v12860_v40 = vld [vmem:[#allocation245_spill] sm:$0xff] }
 0x505   : > { %4989 = vmatpush.bf16.msra.mxu0 %v12855_v29  ;;  %4801 = vmatpush.bf16.msrb.mxu2 %v12856_v59  ;;  %v12862_v29 = vld [vmem:[#allocation7_spill] sm:$0xff]  ;;  %v4349_v59 = vpop.permute.xlu2 %4348 }
 0x506   : > { %5002 = vmatpush.bf16.msra.mxu1 %v12857_v62  ;;  %v12863_v62 = vld [vmem:[#allocation14_spill] sm:$0xff] }
 0x507   : > { %4790 = vmatmul.bf16.vlgmr.msrb.gmra.mxu1 %v10049_v15 }
 0x508   : > { %5029 = vmatpush.bf16.msra.mxu3 %v12858_v39  ;;  %v12865_v39 = vld [vmem:[#allocation237_spill] sm:$0xff] }
 0x509   : > { %4990 = vmatpush.bf16.msra.mxu0 %v12859_v41  ;;  %4802 = vmatpush.bf16.msrb.mxu2 %v12860_v40  ;;  %v3903_v10 = vadd.f32 %v12866_v1, %v12865_v39  ;;  %v12868_v41 = vld [vmem:[#allocation258_spill] sm:$0xff]  ;;  %v12869_v40 = vld [vmem:[#allocation11_spill] sm:$0xff]  ;;  %v12878_v39 = vld [vmem:[#allocation241_spill] sm:$0xff] }
 0x50a   : > { %5003 = vmatpush.bf16.msra.mxu1 %v12861_v49  ;;  %v3904_v26 = vadd.f32 %v12868_v41, %v12867_v43  ;;  %v4347_v49 = vpop.permute.xlu1 %4346  ;;  %v12873_v43 = vld [vmem:[#allocation16_spill] sm:$0xff]  ;;  %v12874_v1 = vld [vmem:[#allocation15_spill] sm:$0xff]  ;;  %v12879_v41 = vld [vmem:[#allocation261_spill] sm:$0xff] }
 0x50c   : > { %5030 = vmatpush.bf16.msra.mxu3 %v12669_v51  ;;  %4803 = vmatmul.bf16.vlgmr.msrb.gmra.mxu2 %v10049_v15  ;;  %v4382_v51 = vsel %vm4360_vm6, %v4347_v49, %v4349_v59 }
 0x50d   : > { %5015 = vmatpush.bf16.msra.mxu2 %v12862_v29  ;;  %4991 = vmatpush.bf16.msra.mxu0 %v12863_v62  ;;  %v4381_v29 = vsel %vm4360_vm6, %v4345_v45, %v4347_v49  ;;  %v4570_v62 = vpop.f32.mrf.mxu0  ;;  %v10451_v15 = vadd.f32 %v4382_v51, %v3904_v26  ;;  %v12876_v45 = vld [vmem:[#allocation35_spill] sm:$0xff]  ;;  %v4609_v26 = vpop.f32.mrf.mxu3  ;;  %v3907_v49 = vadd.f32 %v12879_v41, %v12878_v39  ;;  %v12881_v51 = vld [vmem:[#allocation54_spill] sm:$0xff] }
 0x50e   : > { %5004 = vmatpush.bf16.msra.mxu1 %v12864_v22  ;;  %v10449_v12 = vadd.f32 %v4381_v29, %v3903_v10  ;;  %v4583_v22 = vpop.f32.mrf.mxu1  ;;  %4854 = vrot.lane.b32.xlu2 %v4570_v62, %s7306_s0  ;;  %v12877_v10 = vld [vmem:[#allocation18_spill] sm:$0xff]  ;;  %v12886_v41 = vld [vmem:[#allocation239_spill] sm:$0xff] }
 0x50f   : > { %12871 = vst [vmem:[#allocation153_spill] sm:$0xff] %v10451_v15  ;;  %4856 = vrot.lane.b32.xlu0 %v4583_v22, %s7306_s0  ;;  %v12885_v15 = vld [vmem:[#allocation259_spill] sm:$0xff] }
 0x510   : > { %5031 = vmatpush.bf16.msra.mxu3 %v12870_v58  ;;  %v12875_v58 = vld [vmem:[#allocation52_spill] sm:$0xff] }
 0x511   : > { %5016 = vmatpush.bf16.msra.mxu2 %v12869_v40  ;;  %4992 = vmatpush.bf16.msra.mxu0 %v12872_v6  ;;  %v4355_v40 = vpop.permute.xlu2 %4354  ;;  %v12880_v6 = vld [vmem:[#allocation17_spill] sm:$0xff] }
 0x512   : > { %5005 = vmatpush.bf16.msra.mxu1 %v12873_v43  ;;  %v4353_v29 = vpop.permute.xlu1 %4352 }
 0x513   : > { %v4385_v62 = vsel %vm4360_vm6, %v4353_v29, %v4355_v40 }
 0x514   : > { %5032 = vmatpush.bf16.msra.mxu3 %v12875_v58  ;;  %v10466_v43 = vadd.f32 %v4385_v62, %v3907_v49  ;;  %v4596_v62 = vpop.f32.mrf.mxu2 }
 0x515   : > { %5017 = vmatpush.bf16.msra.mxu2 %v12874_v1  ;;  %4993 = vmatpush.bf16.msra.mxu0 %v12876_v45  ;;  %v4572_v22 = vpop.f32.mrf.mxu0  ;;  %v12882_v1 = vld [vmem:[#allocation36_spill] sm:$0xff]  ;;  %v12883_v45 = vld [vmem:[#allocation22_spill] sm:$0xff] }
 0x516   : > { %5006 = vmatpush.bf16.msra.mxu1 %v12877_v10  ;;  %v4585_v58 = vpop.f32.mrf.mxu1  ;;  %4860 = vrot.lane.b32.xlu2 %v4609_v26, %s7306_s0  ;;  %v12884_v10 = vld [vmem:[#allocation238_spill] sm:$0xff] }
 0x517   : > { %v3905_v39 = vadd.f32 %v12885_v15, %v12884_v10  ;;  %4858 = vrot.lane.b32.xlu1 %v4596_v62, %s7306_s0  ;;  %v12890_v15 = vld [vmem:[#allocation37_spill] sm:$0xff]  ;;  %v4611_v10 = vpop.f32.mrf.mxu3 }
 0x518   : > { %5033 = vmatpush.bf16.msra.mxu3 %v12881_v51  ;;  %v4351_v51 = vpop.permute.xlu0 %4350  ;;  %v12901_v62 = vld [vmem:[#allocation45_spill] sm:$0xff]  ;;  %v12905_v10 = vld [vmem:[#allocation72_spill] sm:$0xff] }
 0x519   : > { %5018 = vmatpush.bf16.msra.mxu2 %v12880_v6  ;;  %4994 = vmatpush.bf16.msra.mxu0 %v12882_v1  ;;  %v12887_v6 = vld [vmem:[#allocation260_spill] sm:$0xff]  ;;  %v4383_v22 = vsel %vm4360_vm6, %v4349_v59, %v4351_v51  ;;  %v4384_v49 = vsel %vm4360_vm6, %v4351_v51, %v4353_v29  ;;  %v12895_v29 = vld [vmem:[#allocation39_spill] sm:$0xff] }
 0x51a   : > { %5007 = vmatpush.bf16.msra.mxu1 %v12883_v45  ;;  %v3906_v28 = vadd.f32 %v12887_v6, %v12886_v41  ;;  %v12889_v1 = vld [vmem:[#allocation56_spill] sm:$0xff]  ;;  %v10479_v58 = vadd.f32 %v4383_v22, %v3905_v39  ;;  %v12893_v41 = vld [vmem:[#allocation62_spill] sm:$0xff]  ;;  %v12897_v39 = vld [vmem:[#allocation43_spill] sm:$0xff] }
 0x51b   : > { %v12891_v45 = vld [vmem:[#allocation24_spill] sm:$0xff]  ;;  %v12896_v6 = vld [vmem:[#allocation26_spill] sm:$0xff] }
 0x51c   : > { %5034 = vmatpush.bf16.msra.mxu3 %v12889_v1  ;;  %v10481_v26 = vadd.f32 %v4384_v49, %v3906_v28  ;;  %v12894_v59 = vld [vmem:[#allocation64_spill] sm:$0xff]  ;;  %v12898_v28 = vld [vmem:[#allocation25_spill] sm:$0xff]  ;;  %v4598_v22 = vpop.f32.mrf.mxu2  ;;  %v12900_v49 = vld [vmem:[#allocation70_spill] sm:$0xff] }
 0x51d   : > { %5019 = vmatpush.bf16.msra.mxu2 %v12888_v54  ;;  %4995 = vmatpush.bf16.msra.mxu0 %v12890_v15  ;;  %v12892_v54 = vld [vmem:[#allocation23_spill] sm:$0xff]  ;;  %v12899_v51 = vld [vmem:[#allocation28_spill] sm:$0xff]  ;;  %v12903_v15 = vld [vmem:[#allocation30_spill] sm:$0xff] }
 0x51e   : > { %5008 = vmatpush.bf16.msra.mxu1 %v12891_v45  ;;  %v12902_v1 = vld [vmem:[#allocation27_spill] sm:$0xff]  ;;  %v12904_v45 = vld [vmem:[#allocation29_spill] sm:$0xff] }
 0x520   : > { %5035 = vmatpush.bf16.msra.mxu3 %v12893_v41  ;;  %v12907_v41 = vld [vmem:[#allocation32_spill] sm:$0xff] }
 0x521   : > { %5020 = vmatpush.bf16.msra.mxu2 %v12892_v54  ;;  %4996 = vmatpush.bf16.msra.mxu0 %v12895_v29  ;;  %v12906_v54 = vld [vmem:[#allocation47_spill] sm:$0xff]  ;;  %v12909_v29 = vld [vmem:[#allocation242_spill] sm:$0xff]  ;;  %v4622_v22 = vpop.f32.mrf.mxu0 }
 0x522   : > { %5009 = vmatpush.bf16.msra.mxu1 %v12896_v6  ;;  %v12910_v6 = vld [vmem:[#allocation262_spill] sm:$0xff]  ;;  %4862 = vrot.lane.b32.xlu0 %v4622_v22, %s7306_s0 }
 0x523   : > { %5036 = vmatmul.bf16.vlgmr.msra.gmra.mxu3 %v10423_v11 }
 0x524   : > { %5080 = vmatpush.bf16.msrb.mxu3 %v12894_v59  ;;  %4997 = vmatmul.bf16.vlgmr.msra.gmra.mxu0 %v10423_v11  ;;  %v12908_v59 = vld [vmem:[#allocation31_spill] sm:$0xff] }
 0x525   : > { %5041 = vmatpush.bf16.msrb.mxu0 %v12897_v39  ;;  %5021 = vmatpush.bf16.msra.mxu2 %v12898_v28  ;;  %v3908_v39 = vadd.f32 %v12910_v6, %v12909_v29  ;;  %v12911_v28 = vld [vmem:[#allocation78_spill] sm:$0xff] }
 0x526   : > { %5054 = vmatpush.bf16.msrb.mxu1 %v12899_v51  ;;  %v4357_v51 = vpop.permute.xlu0 %4356  ;;  %v12918_v29 = vld [vmem:[#allocation42_spill] sm:$0xff] }
 0x527   : > { %5010 = vmatmul.bf16.vlgmr.msra.gmra.mxu1 %v10423_v11 }
 0x528   : > { %5081 = vmatpush.bf16.msrb.mxu3 %v12900_v49  ;;  %v4386_v49 = vsel %vm4360_vm6, %v4355_v40, %v4357_v51  ;;  %v4661_v40 = vpop.f32.mrf.mxu3 }
 0x529   : > { %5042 = vmatpush.bf16.msrb.mxu0 %v12901_v62  ;;  %5022 = vmatpush.bf16.msra.mxu2 %v12902_v1  ;;  %v4635_v62 = vpop.f32.mrf.mxu1  ;;  %v12912_v1 = vld [vmem:[#allocation51_spill] sm:$0xff]  ;;  %v4624_v6 = vpop.f32.mrf.mxu0 }
 0x52a   : > { %5055 = vmatpush.bf16.msrb.mxu1 %v12903_v15  ;;  %v10513_v15 = vadd.f32 %v4386_v49, %v3908_v39  ;;  %4864 = vrot.lane.b32.xlu1 %v4635_v62, %s7306_s0  ;;  %v4359_v49 = vpop.permute.xlu1 %4358  ;;  %v12931_v6 = vld [vmem:[#allocation57_spill] sm:$0xff] }
 0x52b   : > { %4868 = vrot.lane.b32.xlu0 %v4661_v40, %s7306_s0  ;;  %v4387_v62 = vsel %vm4360_vm6, %v4357_v51, %v4359_v49  ;;  %v4837_v51 = vpop.permute.xlu2 %4836  ;;  %v12929_v40 = vld [vmem:[#allocation96_spill] sm:$0xff]  ;;  %v12934_v49 = vld [vmem:[#allocation74_spill] sm:$0xff] }
 0x52c   : > { %5082 = vmatpush.bf16.msrb.mxu3 %v12905_v10  ;;  %5023 = vmatmul.bf16.vlgmr.msra.gmra.mxu2 %v10423_v11  ;;  %v12914_v10 = vld [vmem:[#allocation33_spill] sm:$0xff] }
 0x52d   : > { %5067 = vmatpush.bf16.msrb.mxu2 %v12904_v45  ;;  %5043 = vmatpush.bf16.msrb.mxu0 %v12906_v54  ;;  %v12913_v45 = vld [vmem:[#allocation41_spill] sm:$0xff]  ;;  %v12915_v54 = vld [vmem:[#allocation82_spill] sm:$0xff] }
 0x52e   : > { %5056 = vmatpush.bf16.msrb.mxu1 %v12907_v41  ;;  %v12916_v41 = vld [vmem:[#allocation53_spill] sm:$0xff] }
 0x530   : > { %5083 = vmatpush.bf16.msrb.mxu3 %v12911_v28  ;;  %v12919_v28 = vld [vmem:[#allocation151_spill] sm:$0xff] }
 0x531   : > { %5068 = vmatpush.bf16.msrb.mxu2 %v12908_v59  ;;  %5044 = vmatpush.bf16.msrb.mxu0 %v12912_v1  ;;  %v12917_v59 = vld [vmem:[#allocation48_spill] sm:$0xff]  ;;  %v4637_v39 = vpop.f32.mrf.mxu1  ;;  %v3909_v22 = vadd.f32 %v10147_v50, %v12919_v28  ;;  %v12920_v1 = vld [vmem:[#allocation90_spill] sm:$0xff] }
 0x532   : > { %5057 = vmatpush.bf16.msrb.mxu1 %v12913_v45  ;;  %v4648_v45 = vpop.f32.mrf.mxu2  ;;  %v12922_v50 = vld [vmem:[#allocation92_spill] sm:$0xff] }
 0x533   : > { %4866 = vrot.lane.b32.xlu2 %v4648_v45, %s7306_s0  ;;  %v12932_v39 = vld [vmem:[#allocation196_spill] sm:$0xff]  ;;  %v12936_v45 = vld [vmem:[#allocation250_spill] sm:$0xff] }
 0x534   : > { %5084 = vmatpush.bf16.msrb.mxu3 %v12915_v54  ;;  %v12925_v54 = vld [vmem:[#allocation66_spill] sm:$0xff]  ;;  %v3829_v28 = vsel %vm3828_vm5, %v12932_v39, %v12931_v6 }
 0x535   : > { %5069 = vmatpush.bf16.msrb.mxu2 %v12914_v10  ;;  %5045 = vmatpush.bf16.msrb.mxu0 %v12916_v41  ;;  %v12924_v10 = vld [vmem:[#allocation63_spill] sm:$0xff]  ;;  %v12926_v41 = vld [vmem:[#allocation65_spill] sm:$0xff] }
 0x536   : > { %5058 = vmatpush.bf16.msrb.mxu1 %v12917_v59  ;;  %v12927_v59 = vld [vmem:[#allocation61_spill] sm:$0xff] }
 0x538   : > { %5085 = vmatpush.bf16.msrb.mxu3 %v12716_v25  ;;  %v10531_v25 = vadd.f32 %v4387_v62, %v3909_v22  ;;  %v12933_v22 = vld [vmem:[#allocation67_spill] sm:$0xff] }
 0x539   : > { %5070 = vmatpush.bf16.msrb.mxu2 %v12918_v29  ;;  %5046 = vmatpush.bf16.msrb.mxu0 %v12718_v63  ;;  %v12921_v63 = vld [vmem:[#allocation59_spill] sm:$0xff] }
 0x53a   : > { %5059 = vmatpush.bf16.msrb.mxu1 %v12719_v53  ;;  %v4663_v53 = vpop.f32.mrf.mxu3  ;;  %v12930_v29 = vld [vmem:[#allocation71_spill] sm:$0xff] }
 0x53b   : > { %v12935_v62 = vld [vmem:[#allocation143_spill] sm:$0xff] }
 0x53c   : > { %5086 = vmatpush.bf16.msrb.mxu3 %v12920_v1  ;;  %v3830_v1 = vsel %vm3828_vm5, %v12931_v6, %v12935_v62  ;;  %v3831_v53 = vsel %vm3828_vm5, %v12935_v62, %v12936_v45  ;;  %v12944_v6 = vld [vmem:[#allocation86_spill] sm:$0xff]  ;;  %v12946_v62 = vld [vmem:[#allocation55_spill] sm:$0xff] }
 0x53d   : > { %5071 = vmatpush.bf16.msrb.mxu2 %v12720_v4  ;;  %5047 = vmatpush.bf16.msrb.mxu0 %v12525_v55  ;;  %v12923_v4 = vld [vmem:[#allocation94_spill] sm:$0xff]  ;;  %v12928_v55 = vld [vmem:[#allocation68_spill] sm:$0xff] }
 0x53e   : > { %5060 = vmatpush.bf16.msrb.mxu1 %v12342_v42  ;;  %v4650_v42 = vpop.f32.mrf.mxu2 }
 0x540   : > { %5087 = vmatpush.bf16.msrb.mxu3 %v12922_v50  ;;  %v12938_v50 = vld [vmem:[#allocation100_spill] sm:$0xff] }
 0x541   : > { %5072 = vmatpush.bf16.msrb.mxu2 %v12921_v63  ;;  %5048 = vmatpush.bf16.msrb.mxu0 %v12924_v10  ;;  %v12937_v63 = vld [vmem:[#allocation69_spill] sm:$0xff] }
 0x542   : > { %5061 = vmatpush.bf16.msrb.mxu1 %v12925_v54  ;;  %v12940_v54 = vld [vmem:[#allocation73_spill] sm:$0xff] }
 0x543   : > { %5088 = vmatmul.bf16.vlgmr.msrb.gmra.mxu3 %v10423_v11 }
 0x544   : > { %5132 = vmatpush.bf16.msra.mxu3 %v12923_v4  ;;  %5049 = vmatmul.bf16.vlgmr.msrb.gmra.mxu0 %v10423_v11  ;;  %v12939_v4 = vld [vmem:[#allocation194_spill] sm:$0xff] }
 0x545   : > { %5093 = vmatpush.bf16.msra.mxu0 %v12926_v41  ;;  %5073 = vmatpush.bf16.msrb.mxu2 %v12927_v59  ;;  %v3883_v10 = vadd.f32 %v3829_v28, %v12939_v4  ;;  %v12941_v41 = vld [vmem:[#allocation205_spill] sm:$0xff] }
 0x546   : > { %5106 = vmatpush.bf16.msra.mxu1 %v12928_v55  ;;  %v3884_v59 = vadd.f32 %v3830_v1, %v12941_v41  ;;  %v12942_v55 = vld [vmem:[#allocation195_spill] sm:$0xff]  ;;  %v4674_v1 = vpop.f32.mrf.mxu0 }
 0x547   : > { %5062 = vmatmul.bf16.vlgmr.msrb.gmra.mxu1 %v10423_v11  ;;  %v3885_v42 = vadd.f32 %v3831_v53, %v12942_v55  ;;  %v4415_v39 = vadd.f32 %v12944_v6, %v3883_v10  ;;  %v12948_v10 = vld [vmem:[#allocation79_spill] sm:$0xff]  ;;  %4870 = vrot.lane.b32.xlu1 %v4674_v1, %s7306_s0  ;;  %v12951_v6 = vld [vmem:[#allocation80_spill] sm:$0xff] }
 0x548   : > { %5133 = vmatpush.bf16.msra.mxu3 %v12929_v40  ;;  %v12943_v40 = vld [vmem:[#allocation76_spill] sm:$0xff] }
 0x549   : > { %5094 = vmatpush.bf16.msra.mxu0 %v12930_v29  ;;  %5074 = vmatpush.bf16.msrb.mxu2 %v12933_v22  ;;  %v4843_v29 = vpop.permute.xlu2 %4842  ;;  %v12945_v22 = vld [vmem:[#allocation75_spill] sm:$0xff]  ;;  %v4417_v28 = vadd.f32 %v10193_v9, %v3885_v42 }
 0x54a   : > { %5107 = vmatpush.bf16.msra.mxu1 %v12934_v49  ;;  %v4839_v49 = vpop.permute.xlu0 %4838 }
 0x54b   : > { %v4893_v4 = vsel %vm4892_vm7, %v4837_v51, %v4839_v49 }
 0x54c   : > { %5134 = vmatpush.bf16.msra.mxu3 %v12938_v50  ;;  %5075 = vmatmul.bf16.vlgmr.msrb.gmra.mxu2 %v10423_v11  ;;  %v12947_v50 = vld [vmem:[#allocation106_spill] sm:$0xff]  ;;  %v10574_v41 = vadd.f32 %v4893_v4, %v4415_v39  ;;  %v12952_v39 = vld [vmem:[#allocation77_spill] sm:$0xff]  ;;  %v12956_v4 = vld [vmem:[#allocation84_spill] sm:$0xff] }
 0x54d   : > { %5119 = vmatpush.bf16.msra.mxu2 %v12937_v63  ;;  %5095 = vmatpush.bf16.msra.mxu0 %v12940_v54  ;;  %v4416_v63 = vadd.f32 %v12946_v62, %v3884_v59  ;;  %v4841_v54 = vpop.permute.xlu1 %4840  ;;  %v12949_v59 = vld [vmem:[#allocation246_spill] sm:$0xff] }
 0x54e   : > { %5108 = vmatpush.bf16.msra.mxu1 %v12943_v40  ;;  %v4894_v53 = vsel %vm4892_vm7, %v4839_v49, %v4841_v54  ;;  %v4895_v55 = vsel %vm4892_vm7, %v4841_v54, %v4843_v29  ;;  %v4687_v40 = vpop.f32.mrf.mxu1  ;;  %v3832_v9 = vsel %vm3828_vm5, %v12936_v45, %v12949_v59  ;;  %v12954_v49 = vld [vmem:[#allocation206_spill] sm:$0xff]  ;;  %v4713_v54 = vpop.f32.mrf.mxu3 }
 0x54f   : > { %v10583_v42 = vadd.f32 %v4894_v53, %v4416_v63  ;;  %v10585_v51 = vadd.f32 %v4895_v55, %v4417_v28  ;;  %4872 = vrot.lane.b32.xlu2 %v4687_v40, %s7306_s0  ;;  %v3886_v62 = vadd.f32 %v3832_v9, %v12954_v49  ;;  %v12957_v63 = vld [vmem:[#allocation81_spill] sm:$0xff]  ;;  %v4676_v53 = vpop.f32.mrf.mxu0  ;;  %4876 = vrot.lane.b32.xlu1 %v4713_v54, %s7306_s0  ;;  %v12959_v9 = vld [vmem:[#allocation88_spill] sm:$0xff] }
 0x550   : > { %5135 = vmatpush.bf16.msra.mxu3 %v12947_v50  ;;  %v12955_v50 = vld [vmem:[#allocation83_spill] sm:$0xff]  ;;  %v12964_v49 = vld [vmem:[#allocation89_spill] sm:$0xff] }
 0x551   : > { %5120 = vmatpush.bf16.msra.mxu2 %v12945_v22  ;;  %5096 = vmatpush.bf16.msra.mxu0 %v12948_v10  ;;  %12950 = vst [vmem:[#allocation169_spill] sm:$0xff] %v10583_v42  ;;  %v12953_v22 = vld [vmem:[#allocation112_spill] sm:$0xff]  ;;  %v4418_v45 = vadd.f32 %v10196_v60, %v3886_v62  ;;  %v12958_v10 = vld [vmem:[#allocation87_spill] sm:$0xff]  ;;  %v4700_v60 = vpop.f32.mrf.mxu2  ;;  %v12965_v62 = vld [vmem:[#allocation122_spill] sm:$0xff] }
 0x552   : > { %5109 = vmatpush.bf16.msra.mxu1 %v12951_v6  ;;  %v4845_v28 = vpop.permute.xlu0 %4844  ;;  %v12960_v6 = vld [vmem:[#allocation85_spill] sm:$0xff]  ;;  %4874 = vrot.lane.b32.xlu0 %v4700_v60, %s7306_s0  ;;  %v12975_v60 = vld [vmem:[#allocation252_spill] sm:$0xff] }
 0x553   : > { %v4896_v1 = vsel %vm4892_vm7, %v4843_v29, %v4845_v28  ;;  %v12963_v29 = vld [vmem:[#allocation98_spill] sm:$0xff]  ;;  %v12968_v54 = vld [vmem:[#allocation101_spill] sm:$0xff] }
 0x554   : > { %5136 = vmatpush.bf16.msra.mxu3 %v12953_v22  ;;  %v10598_v55 = vadd.f32 %v4896_v1, %v4418_v45  ;;  %v12969_v45 = vld [vmem:[#allocation95_spill] sm:$0xff]  ;;  %v12971_v1 = vld [vmem:[#allocation104_spill] sm:$0xff] }
 0x555   : > { %5121 = vmatpush.bf16.msra.mxu2 %v12952_v39  ;;  %5097 = vmatpush.bf16.msra.mxu0 %v12955_v50  ;;  %v12961_v39 = vld [vmem:[#allocation120_spill] sm:$0xff]  ;;  %v12966_v50 = vld [vmem:[#allocation126_spill] sm:$0xff] }
 0x556   : > { %5110 = vmatpush.bf16.msra.mxu1 %v12956_v4  ;;  %v4689_v40 = vpop.f32.mrf.mxu1  ;;  %v4715_v22 = vpop.f32.mrf.mxu3  ;;  %v12967_v4 = vld [vmem:[#allocation93_spill] sm:$0xff] }
 0x557   : > { %v12973_v40 = vld [vmem:[#allocation97_spill] sm:$0xff] }
 0x558   : > { %5137 = vmatpush.bf16.msra.mxu3 %v12745_v34  ;;  %v12962_v34 = vld [vmem:[#allocation91_spill] sm:$0xff]  ;;  %v12978_v22 = vld [vmem:[#allocation105_spill] sm:$0xff] }
 0x559   : > { %5122 = vmatpush.bf16.msra.mxu2 %v12957_v63  ;;  %5098 = vmatpush.bf16.msra.mxu0 %v12958_v10  ;;  %v12970_v63 = vld [vmem:[#allocation99_spill] sm:$0xff]  ;;  %v4702_v53 = vpop.f32.mrf.mxu2  ;;  %v12972_v10 = vld [vmem:[#allocation128_spill] sm:$0xff] }
 0x55a   : > { %5111 = vmatpush.bf16.msra.mxu1 %v12959_v9  ;;  %v12974_v9 = vld [vmem:[#allocation247_spill] sm:$0xff] }
 0x55c   : > { %5138 = vmatpush.bf16.msra.mxu3 %v12961_v39  ;;  %v3834_v39 = vsel %vm3828_vm5, %v12974_v9, %v12975_v60 }
 0x55d   : > { %5123 = vmatpush.bf16.msra.mxu2 %v12960_v6  ;;  %5099 = vmatpush.bf16.msra.mxu0 %v12962_v34  ;;  %v3833_v6 = vsel %vm3828_vm5, %v12949_v59, %v12974_v9  ;;  %v12976_v34 = vld [vmem:[#allocation103_spill] sm:$0xff]  ;;  %v12983_v59 = vld [vmem:[#allocation110_spill] sm:$0xff]  ;;  %v4847_v9 = vpop.permute.xlu1 %4846 }
 0x55e   : > { %5112 = vmatpush.bf16.msra.mxu1 %v12963_v29  ;;  %v12977_v29 = vld [vmem:[#allocation108_spill] sm:$0xff] }
 0x560   : > { %5139 = vmatpush.bf16.msra.mxu3 %v12965_v62  ;;  %v12979_v62 = vld [vmem:[#allocation130_spill] sm:$0xff] }
 0x561   : > { %5124 = vmatpush.bf16.msra.mxu2 %v12964_v49  ;;  %5100 = vmatpush.bf16.msra.mxu0 %v12967_v4  ;;  %v4849_v49 = vpop.permute.xlu2 %4848 }
 0x562   : > { %5113 = vmatpush.bf16.msra.mxu1 %v12968_v54  ;;  %v12981_v54 = vld [vmem:[#allocation223_spill] sm:$0xff] }
 0x563   : > { %5140 = vmatmul.bf16.vlgmr.msra.gmra.mxu3 %v10423_v11 }
 0x564   : > { %5184 = vmatpush.bf16.msrb.mxu3 %v12966_v50  ;;  %5101 = vmatmul.bf16.vlgmr.msra.gmra.mxu0 %v10423_v11  ;;  %v12980_v50 = vld [vmem:[#allocation212_spill] sm:$0xff] }
 0x565   : > { %5145 = vmatpush.bf16.msrb.mxu0 %v12969_v45  ;;  %5125 = vmatpush.bf16.msra.mxu2 %v12970_v63  ;;  %v3887_v4 = vadd.f32 %v3833_v6, %v12980_v50  ;;  %v3888_v45 = vadd.f32 %v3834_v39, %v12981_v54  ;;  %v12982_v63 = vld [vmem:[#allocation102_spill] sm:$0xff]  ;;  %v4898_v6 = vsel %vm4892_vm7, %v4847_v9, %v4849_v49  ;;  %v4726_v39 = vpop.f32.mrf.mxu0  ;;  %v4739_v50 = vpop.f32.mrf.mxu1  ;;  %v12988_v54 = vld [vmem:[#allocation107_spill] sm:$0xff] }
 0x566   : > { %5158 = vmatpush.bf16.msrb.mxu1 %v12971_v1  ;;  %v12984_v1 = vld [vmem:[#allocation58_spill] sm:$0xff]  ;;  %4878 = vrot.lane.b32.xlu2 %v4726_v39, %s7306_s0  ;;  %v4765_v39 = vpop.f32.mrf.mxu3 }
 0x567   : > { %5114 = vmatmul.bf16.vlgmr.msra.gmra.mxu1 %v10423_v11  ;;  %v4419_v53 = vadd.f32 %v12984_v1, %v3887_v4  ;;  %v12990_v4 = vld [vmem:[#allocation178_spill] sm:$0xff]  ;;  %4880 = vrot.lane.b32.xlu0 %v4739_v50, %s7306_s0 }
 0x568   : > { %5185 = vmatpush.bf16.msrb.mxu3 %v12972_v10  ;;  %v4420_v10 = vadd.f32 %v10228_v14, %v3888_v45  ;;  %v12989_v14 = vld [vmem:[#allocation255_spill] sm:$0xff]  ;;  %v12994_v1 = vld [vmem:[#allocation226_spill] sm:$0xff] }
 0x569   : > { %5146 = vmatpush.bf16.msrb.mxu0 %v12973_v40  ;;  %5126 = vmatpush.bf16.msra.mxu2 %v12976_v34  ;;  %v12985_v40 = vld [vmem:[#allocation109_spill] sm:$0xff]  ;;  %v12986_v34 = vld [vmem:[#allocation138_spill] sm:$0xff]  ;;  %v3837_v45 = vsel %vm3828_vm5, %v12990_v4, %v12989_v14 }
 0x56a   : > { %5159 = vmatpush.bf16.msrb.mxu1 %v12977_v29  ;;  %v4897_v29 = vsel %vm4892_vm7, %v4845_v28, %v4847_v9  ;;  %v12992_v28 = vld [vmem:[#allocation111_spill] sm:$0xff]  ;;  %v12996_v9 = vld [vmem:[#allocation249_spill] sm:$0xff] }
 0x56c   : > { %5186 = vmatpush.bf16.msrb.mxu3 %v12979_v62  ;;  %5127 = vmatmul.bf16.vlgmr.msra.gmra.mxu2 %v10423_v11  ;;  %v10644_v62 = vadd.f32 %v4898_v6, %v4420_v10  ;;  %v12995_v10 = vld [vmem:[#allocation113_spill] sm:$0xff]  ;;  %v12997_v6 = vld [vmem:[#allocation116_spill] sm:$0xff] }
 0x56d   : > { %5171 = vmatpush.bf16.msrb.mxu2 %v12978_v22  ;;  %5147 = vmatpush.bf16.msrb.mxu0 %v12982_v63  ;;  %v10642_v22 = vadd.f32 %v4897_v29, %v4419_v53  ;;  %v12991_v63 = vld [vmem:[#allocation114_spill] sm:$0xff]  ;;  %v3891_v53 = vadd.f32 %v3837_v45, %v12994_v1  ;;  %v3836_v29 = vsel %vm3828_vm5, %v12996_v9, %v12990_v4  ;;  %v13000_v1 = vld [vmem:[#allocation213_spill] sm:$0xff]  ;;  %v4741_v4 = vpop.f32.mrf.mxu1 }
 0x56e   : > { %5160 = vmatpush.bf16.msrb.mxu1 %v12983_v59  ;;  %v12993_v59 = vld [vmem:[#allocation144_spill] sm:$0xff]  ;;  %v12999_v45 = vld [vmem:[#allocation150_spill] sm:$0xff]  ;;  %4884 = vrot.lane.b32.xlu2 %v4765_v39, %s7306_s0  ;;  %v13007_v39 = vld [vmem:[#allocation121_spill] sm:$0xff] }
 0x56f   : > { %12987 = vst [vmem:[#allocation171_spill] sm:$0xff] %v10642_v22  ;;  %v4423_v50 = vadd.f32 %v10277_v24, %v3891_v53  ;;  %v13002_v24 = vld [vmem:[#allocation124_spill] sm:$0xff]  ;;  %v13003_v53 = vld [vmem:[#allocation49_spill] sm:$0xff]  ;;  %v13010_v4 = vld [vmem:[#allocation154_spill] sm:$0xff] }
 0x570   : > { %5187 = vmatpush.bf16.msrb.mxu3 %v12986_v34  ;;  %v3835_v34 = vsel %vm3828_vm5, %v12975_v60, %v12996_v9  ;;  %v13001_v60 = vld [vmem:[#allocation224_spill] sm:$0xff] }
 0x571   : > { %5172 = vmatpush.bf16.msrb.mxu2 %v12985_v40  ;;  %5148 = vmatpush.bf16.msrb.mxu0 %v12988_v54  ;;  %v4855_v40 = vpop.permute.xlu2 %4854  ;;  %v12998_v54 = vld [vmem:[#allocation115_spill] sm:$0xff]  ;;  %v3890_v22 = vadd.f32 %v3836_v29, %v13001_v60  ;;  %v13009_v60 = vld [vmem:[#allocation125_spill] sm:$0xff] }
 0x572   : > { %5161 = vmatpush.bf16.msrb.mxu1 %v12991_v63  ;;  %v4853_v63 = vpop.permute.xlu1 %4852 }
 0x574   : > { %5188 = vmatpush.bf16.msrb.mxu3 %v12993_v59  ;;  %v4728_v59 = vpop.f32.mrf.mxu0 }
 0x575   : > { %5173 = vmatpush.bf16.msrb.mxu2 %v12992_v28  ;;  %5149 = vmatpush.bf16.msrb.mxu0 %v12995_v10  ;;  %v4901_v28 = vsel %vm4892_vm7, %v4853_v63, %v4855_v40  ;;  %v3889_v10 = vadd.f32 %v3835_v34, %v13000_v1  ;;  %v4851_v59 = vpop.permute.xlu0 %4850 }
 0x576   : > { %5162 = vmatpush.bf16.msrb.mxu1 %v12997_v6  ;;  %v10670_v42 = vadd.f32 %v4901_v28, %v4423_v50  ;;  %v13004_v6 = vld [vmem:[#allocation118_spill] sm:$0xff]  ;;  %v4899_v34 = vsel %vm4892_vm7, %v4849_v49, %v4851_v59  ;;  %v4900_v29 = vsel %vm4892_vm7, %v4851_v59, %v4853_v63  ;;  %v4752_v50 = vpop.f32.mrf.mxu2  ;;  %v13006_v28 = vld [vmem:[#allocation152_spill] sm:$0xff]  ;;  %v13012_v63 = vld [vmem:[#allocation123_spill] sm:$0xff] }
 0x577   : > { %v4421_v9 = vadd.f32 %v13003_v53, %v3889_v10  ;;  %4882 = vrot.lane.b32.xlu1 %v4752_v50, %s7306_s0  ;;  %v13008_v10 = vld [vmem:[#allocation132_spill] sm:$0xff]  ;;  %v13014_v53 = vld [vmem:[#allocation127_spill] sm:$0xff]  ;;  %v13018_v59 = vld [vmem:[#allocation129_spill] sm:$0xff] }
 0x578   : > { %5189 = vmatpush.bf16.msrb.mxu3 %v12999_v45  ;;  %v13005_v45 = vld [vmem:[#allocation117_spill] sm:$0xff]  ;;  %v13011_v49 = vld [vmem:[#allocation156_spill] sm:$0xff]  ;;  %v13021_v50 = vld [vmem:[#allocation251_spill] sm:$0xff] }
 0x579   : > { %5174 = vmatpush.bf16.msrb.mxu2 %v12998_v54  ;;  %5150 = vmatpush.bf16.msrb.mxu0 %v12777_v44  ;;  %v4422_v54 = vadd.f32 %v13004_v6, %v3890_v22  ;;  %v10681_v44 = vadd.f32 %v4899_v34, %v4421_v9  ;;  %v4767_v22 = vpop.f32.mrf.mxu3  ;;  %v13015_v9 = vld [vmem:[#allocation133_spill] sm:$0xff]  ;;  %v13016_v6 = vld [vmem:[#allocation136_spill] sm:$0xff]  ;;  %v13019_v34 = vld [vmem:[#allocation135_spill] sm:$0xff] }
 0x57a   : > { %5163 = vmatpush.bf16.msrb.mxu1 %v13002_v24  ;;  %v13013_v24 = vld [vmem:[#allocation134_spill] sm:$0xff] }
 0x57b   : > { %v10683_v1 = vadd.f32 %v4900_v29, %v4422_v54  ;;  %v13020_v29 = vld [vmem:[#allocation140_spill] sm:$0xff] }
 0x57c   : > { %5190 = vmatpush.bf16.msrb.mxu3 %v13006_v28  ;;  %v3838_v28 = vsel %vm3828_vm5, %v12989_v14, %v13021_v50 }
 0x57d   : > { %5175 = vmatpush.bf16.msrb.mxu2 %v13005_v45  ;;  %5151 = vmatpush.bf16.msrb.mxu0 %v13007_v39  ;;  %v13017_v45 = vld [vmem:[#allocation160_spill] sm:$0xff]  ;;  %v13022_v39 = vld [vmem:[#allocation137_spill] sm:$0xff] }
 0x57e   : > { %5164 = vmatpush.bf16.msrb.mxu1 %v13008_v10  ;;  %v4754_v54 = vpop.f32.mrf.mxu2  ;;  %v13023_v10 = vld [vmem:[#allocation228_spill] sm:$0xff] }
 0x57f   : > { %v3892_v22 = vadd.f32 %v3838_v28, %v13023_v10  ;;  %v13029_v54 = vld [vmem:[#allocation146_spill] sm:$0xff]  ;;  %v13033_v28 = vld [vmem:[#allocation148_spill] sm:$0xff]  ;;  %v13034_v10 = vld [vmem:[#allocation147_spill] sm:$0xff] }
 0x580   : > { %5191 = vmatpush.bf16.msrb.mxu3 %v13010_v4  ;;  %v13025_v4 = vld [vmem:[#allocation141_spill] sm:$0xff] }
 0x581   : > { %5176 = vmatpush.bf16.msrb.mxu2 %v13009_v60  ;;  %5152 = vmatpush.bf16.msrb.mxu0 %v13012_v63  ;;  %v13024_v60 = vld [vmem:[#allocation142_spill] sm:$0xff]  ;;  %v4778_v14 = vpop.f32.mrf.mxu0 }
 0x582   : > { %5165 = vmatpush.bf16.msrb.mxu1 %v13013_v24  ;;  %v13027_v24 = vld [vmem:[#allocation170_spill] sm:$0xff]  ;;  %4886 = vrot.lane.b32.xlu0 %v4778_v14, %s7306_s0 }
 0x583   : > { %5192 = vmatmul.bf16.vlgmr.msrb.gmra.mxu3 %v10423_v11 }
 0x584   : > { %5236 = vmatpush.bf16.msra.mxu3 %v13011_v49  ;;  %5153 = vmatmul.bf16.vlgmr.msrb.gmra.mxu0 %v10423_v11  ;;  %v13026_v49 = vld [vmem:[#allocation119_spill] sm:$0xff] }
 0x585   : > { %5197 = vmatpush.bf16.msra.mxu0 %v13014_v53  ;;  %5177 = vmatpush.bf16.msrb.mxu2 %v13015_v9  ;;  %v4424_v63 = vadd.f32 %v13026_v49, %v3892_v22  ;;  %v4857_v53 = vpop.permute.xlu0 %4856  ;;  %v13035_v22 = vld [vmem:[#allocation182_spill] sm:$0xff] }
 0x586   : > { %5210 = vmatpush.bf16.msra.mxu1 %v13016_v6  ;;  %v4902_v9 = vsel %vm4892_vm7, %v4855_v40, %v4857_v53  ;;  %v4791_v6 = vpop.f32.mrf.mxu1 }
 0x587   : > { %5166 = vmatmul.bf16.vlgmr.msrb.gmra.mxu1 %v10423_v11  ;;  %4888 = vrot.lane.b32.xlu1 %v4791_v6, %s7306_s0  ;;  %v13039_v6 = vld [vmem:[#allocation149_spill] sm:$0xff] }
 0x588   : > { %5237 = vmatpush.bf16.msra.mxu3 %v13017_v45  ;;  %v13030_v45 = vld [vmem:[#allocation145_spill] sm:$0xff] }
 0x589   : > { %5198 = vmatpush.bf16.msra.mxu0 %v13018_v59  ;;  %5178 = vmatpush.bf16.msrb.mxu2 %v13019_v34  ;;  %v13031_v59 = vld [vmem:[#allocation215_spill] sm:$0xff]  ;;  %v13032_v34 = vld [vmem:[#allocation257_spill] sm:$0xff] }
 0x58a   : > { %5211 = vmatpush.bf16.msra.mxu1 %v13020_v29  ;;  %v3839_v40 = vsel %vm3828_vm5, %v13021_v50, %v13031_v59  ;;  %v3840_v29 = vsel %vm3828_vm5, %v13031_v59, %v13032_v34  ;;  %v13040_v59 = vld [vmem:[#allocation184_spill] sm:$0xff] }
 0x58c   : > { %5238 = vmatpush.bf16.msra.mxu3 %v12796_v13  ;;  %5179 = vmatmul.bf16.vlgmr.msrb.gmra.mxu2 %v10423_v11  ;;  %v13028_v13 = vld [vmem:[#allocation139_spill] sm:$0xff] }
 0x58d   : > { %5223 = vmatpush.bf16.msra.mxu2 %v13022_v39  ;;  %5199 = vmatpush.bf16.msra.mxu0 %v12797_v16  ;;  %v10718_v16 = vadd.f32 %v4902_v9, %v4424_v63  ;;  %v4985_v39 = vpop.f32.mrf.mxu3  ;;  %v4861_v63 = vpop.permute.xlu2 %4860 }
 0x58e   : > { %5212 = vmatpush.bf16.msra.mxu1 %v13024_v60  ;;  %v13036_v60 = vld [vmem:[#allocation227_spill] sm:$0xff]  ;;  %5368 = vrot.lane.b32.xlu0 %v4985_v39, %s7307_s24  ;;  %v4793_v50 = vpop.f32.mrf.mxu1  ;;  %v13043_v39 = vld [vmem:[#allocation186_spill] sm:$0xff] }
 0x58f   : > { %v13052_v50 = vld [vmem:[#allocation254_spill] sm:$0xff] }
 0x590   : > { %5239 = vmatpush.bf16.msra.mxu3 %v13027_v24  ;;  %v13038_v24 = vld [vmem:[#allocation158_spill] sm:$0xff] }
 0x591   : > { %5224 = vmatpush.bf16.msra.mxu2 %v13025_v4  ;;  %5200 = vmatpush.bf16.msra.mxu0 %v13028_v13  ;;  %v13037_v4 = vld [vmem:[#allocation229_spill] sm:$0xff]  ;;  %v4859_v13 = vpop.permute.xlu1 %4858 }
 0x592   : > { %5213 = vmatpush.bf16.msra.mxu1 %v13029_v54  ;;  %v3894_v49 = vadd.f32 %v3840_v29, %v13037_v4  ;;  %v4903_v54 = vsel %vm4892_vm7, %v4857_v53, %v4859_v13  ;;  %v13044_v53 = vld [vmem:[#allocation188_spill] sm:$0xff] }
 0x593   : > { %v13050_v4 = vld [vmem:[#allocation192_spill] sm:$0xff] }
 0x594   : > { %5240 = vmatpush.bf16.msra.mxu3 %v12802_v33  ;;  %v3893_v33 = vadd.f32 %v3839_v40, %v13036_v60  ;;  %v4426_v9 = vadd.f32 %v10303_v47, %v3894_v49  ;;  %v13048_v60 = vld [vmem:[#allocation165_spill] sm:$0xff] }
 0x595   : > { %5225 = vmatpush.bf16.msra.mxu2 %v12601_v38  ;;  %5201 = vmatpush.bf16.msra.mxu0 %v13030_v45  ;;  %v4780_v38 = vpop.f32.mrf.mxu0  ;;  %v4904_v45 = vsel %vm4892_vm7, %v4859_v13, %v4861_v63  ;;  %v4987_v47 = vpop.f32.mrf.mxu3  ;;  %v13051_v49 = vld [vmem:[#allocation161_spill] sm:$0xff] }
 0x596   : > { %5214 = vmatpush.bf16.msra.mxu1 %v13033_v28  ;;  %v4425_v14 = vadd.f32 %v10300_v37, %v3893_v33  ;;  %v10747_v29 = vadd.f32 %v4904_v45, %v4426_v9  ;;  %v13041_v37 = vld [vmem:[#allocation164_spill] sm:$0xff]  ;;  %v13042_v28 = vld [vmem:[#allocation159_spill] sm:$0xff]  ;;  %v13047_v38 = vld [vmem:[#allocation157_spill] sm:$0xff] }
 0x597   : > { %v13054_v9 = vld [vmem:[#allocation172_spill] sm:$0xff] }
 0x598   : > { %5241 = vmatpush.bf16.msra.mxu3 %v13035_v22  ;;  %v10745_v40 = vadd.f32 %v4903_v54, %v4425_v14  ;;  %v13046_v22 = vld [vmem:[#allocation166_spill] sm:$0xff]  ;;  %v13053_v14 = vld [vmem:[#allocation167_spill] sm:$0xff] }
 0x599   : > { %5226 = vmatpush.bf16.msra.mxu2 %v13034_v10  ;;  %5202 = vmatpush.bf16.msra.mxu0 %v12435_v19  ;;  %v4804_v19 = vpop.f32.mrf.mxu2  ;;  %v13045_v10 = vld [vmem:[#allocation155_spill] sm:$0xff]  ;;  %v13056_v54 = vld [vmem:[#allocation34_spill] sm:$0xff] }
 0x59a   : > { %5215 = vmatpush.bf16.msra.mxu1 %v13038_v24  ;;  %4890 = vrot.lane.b32.xlu2 %v4804_v19, %s7306_s0  ;;  %v3841_v24 = vsel %vm3828_vm5, %v13032_v34, %v13052_v50  ;;  %v13058_v34 = vld [vmem:[#allocation163_spill] sm:$0xff] }
 0x59c   : > { %5242 = vmatpush.bf16.msra.mxu3 %v13040_v59  ;;  %v13057_v59 = vld [vmem:[#allocation230_spill] sm:$0xff] }
 0x59d   : > { %5227 = vmatpush.bf16.msra.mxu2 %v13039_v6  ;;  %5203 = vmatpush.bf16.msra.mxu0 %v12808_v31  ;;  %v13049_v31 = vld [vmem:[#allocation168_spill] sm:$0xff]  ;;  %v13055_v6 = vld [vmem:[#allocation253_spill] sm:$0xff]  ;;  %v3895_v19 = vadd.f32 %v3841_v24, %v13057_v59 }
 0x59e   : > { %5216 = vmatpush.bf16.msra.mxu1 %v13041_v37  ;;  %v3842_v13 = vsel %vm3828_vm5, %v13052_v50, %v13055_v6  ;;  %v3843_v45 = vsel %vm3828_vm5, %v13055_v6, %v13056_v54  ;;  %v13059_v37 = vld [vmem:[#allocation60_spill] sm:$0xff] }
 0x59f   : > { %v3896_v47 = vadd.f32 %v3842_v13, %v13059_v37 }
 0x5a0   : > { %5243 = vmatpush.bf16.msra.mxu3 %v13043_v39 }
 0x5a1   : > { %5228 = vmatpush.bf16.msra.mxu2 %v13042_v28  ;;  %5204 = vmatpush.bf16.msra.mxu0 %v13045_v10  ;;  %v4806_v33 = vpop.f32.mrf.mxu2  ;;  %v13060_v28 = vld [vmem:[#allocation231_spill] sm:$0xff]  ;;  %v4867_v10 = vpop.permute.xlu2 %4866 }
 0x5a2   : > { %5217 = vmatpush.bf16.msra.mxu1 %v13046_v22  ;;  %v3897_v39 = vadd.f32 %v3843_v45, %v13060_v28  ;;  %v13062_v22 = vld [vmem:[#allocation162_spill] sm:$0xff]  ;;  %v13064_v33 = vld [vmem:[#allocation203_spill] sm:$0xff]  ;;  %v4998_v50 = vpop.f32.mrf.mxu0  ;;  %v13066_v45 = vld [vmem:[#allocation209_spill] sm:$0xff] }
 0x5a3   : > { %5244 = vmatmul.bf16.vlgmr.msra.gmra.mxu3 %v10423_v11  ;;  %5370 = vrot.lane.b32.xlu1 %v4998_v50, %s7307_s24  ;;  %v13082_v50 = vld [vmem:[#allocation201_spill] sm:$0xff] }
 0x5a4   : > { %5288 = vmatpush.bf16.msrb.mxu3 %v13044_v53  ;;  %5205 = vmatmul.bf16.vlgmr.msra.gmra.mxu0 %v10423_v11  ;;  %v13061_v53 = vld [vmem:[#allocation174_spill] sm:$0xff]  ;;  %v5011_v6 = vpop.f32.mrf.mxu1 }
 0x5a5   : > { %5249 = vmatpush.bf16.msrb.mxu0 %v13047_v38  ;;  %5229 = vmatpush.bf16.msra.mxu2 %v13048_v60  ;;  %v4427_v38 = vadd.f32 %v13062_v22, %v3895_v19  ;;  %v13063_v60 = vld [vmem:[#allocation173_spill] sm:$0xff] }
 0x5a6   : > { %5262 = vmatpush.bf16.msrb.mxu1 %v13049_v31  ;;  %v4429_v31 = vadd.f32 %v10349_v0, %v3897_v39  ;;  %5372 = vrot.lane.b32.xlu2 %v5011_v6, %s7307_s24  ;;  %v13068_v19 = vld [vmem:[#allocation177_spill] sm:$0xff]  ;;  %v5037_v37 = vpop.f32.mrf.mxu3 }
 0x5a7   : > { %5218 = vmatmul.bf16.vlgmr.msra.gmra.mxu1 %v10423_v11  ;;  %v13071_v22 = vld [vmem:[#allocation181_spill] sm:$0xff] }
 0x5a8   : > { %5289 = vmatpush.bf16.msrb.mxu3 %v13050_v4 }
 0x5a9   : > { %5250 = vmatpush.bf16.msrb.mxu0 %v13051_v49  ;;  %5230 = vmatpush.bf16.msra.mxu2 %v13053_v14  ;;  %v4865_v49 = vpop.permute.xlu1 %4864  ;;  %v4873_v6 = vpop.permute.xlu2 %4872 }
 0x5aa   : > { %5263 = vmatpush.bf16.msrb.mxu1 %v13054_v9  ;;  %v4907_v9 = vsel %vm4892_vm7, %v4865_v49, %v4867_v10  ;;  %v5000_v28 = vpop.f32.mrf.mxu0 }
 0x5ab   : > { %5376 = vrot.lane.b32.xlu1 %v5037_v37, %s7307_s24  ;;  %v13089_v37 = vld [vmem:[#allocation183_spill] sm:$0xff] }
 0x5ac   : > { %5290 = vmatpush.bf16.msrb.mxu3 %v12623_v52  ;;  %5231 = vmatmul.bf16.vlgmr.msra.gmra.mxu2 %v10423_v11  ;;  %v4428_v52 = vadd.f32 %v10332_v20, %v3896_v47  ;;  %v13065_v20 = vld [vmem:[#allocation204_spill] sm:$0xff]  ;;  %v5013_v39 = vpop.f32.mrf.mxu1 }
 0x5ad   : > { %5275 = vmatpush.bf16.msrb.mxu2 %v12821_v17  ;;  %5251 = vmatpush.bf16.msrb.mxu0 %v13058_v34  ;;  %v4863_v17 = vpop.permute.xlu0 %4862  ;;  %v3844_v0 = vsel %vm3828_vm5, %v13056_v54, %v13065_v20  ;;  %v13069_v34 = vld [vmem:[#allocation180_spill] sm:$0xff] }
 0x5ae   : > { %5264 = vmatpush.bf16.msrb.mxu1 %v13061_v53  ;;  %v4905_v4 = vsel %vm4892_vm7, %v4861_v63, %v4863_v17  ;;  %v4906_v14 = vsel %vm4892_vm7, %v4863_v17, %v4865_v49  ;;  %v10801_v63 = vadd.f32 %v4907_v9, %v4429_v31  ;;  %v13070_v53 = vld [vmem:[#allocation190_spill] sm:$0xff]  ;;  %v13077_v17 = vld [vmem:[#allocation189_spill] sm:$0xff]  ;;  %v13084_v9 = vld [vmem:[#allocation179_spill] sm:$0xff] }
 0x5af   : > { %v10790_v24 = vadd.f32 %v4905_v4, %v4427_v38  ;;  %v10799_v13 = vadd.f32 %v4906_v14, %v4428_v52  ;;  %v13072_v38 = vld [vmem:[#allocation217_spill] sm:$0xff]  ;;  %v13078_v52 = vld [vmem:[#allocation199_spill] sm:$0xff]  ;;  %v13079_v31 = vld [vmem:[#allocation202_spill] sm:$0xff] }
 0x5b0   : > { %5291 = vmatpush.bf16.msrb.mxu3 %v13064_v33  ;;  %v13081_v33 = vld [vmem:[#allocation256_spill] sm:$0xff]  ;;  %v13083_v14 = vld [vmem:[#allocation207_spill] sm:$0xff] }
 0x5b1   : > { %5276 = vmatpush.bf16.msrb.mxu2 %v13063_v60  ;;  %5252 = vmatpush.bf16.msrb.mxu0 %v12826_v18  ;;  %v13067_v18 = vld [vmem:[#allocation232_spill] sm:$0xff]  ;;  %v3845_v4 = vsel %vm3828_vm5, %v13065_v20, %v13081_v33  ;;  %v3846_v49 = vsel %vm3828_vm5, %v13081_v33, %v10055_v46  ;;  %v13097_v33 = vld [vmem:[#allocation243_spill] sm:$0xff] }
 0x5b2   : > { %5265 = vmatpush.bf16.msrb.mxu1 %v12630_v27  ;;  %v3898_v59 = vadd.f32 %v3844_v0, %v13067_v18  ;;  %v13076_v60 = vld [vmem:[#allocation200_spill] sm:$0xff]  ;;  %v13085_v0 = vld [vmem:[#allocation233_spill] sm:$0xff] }
 0x5b3   : > { %v13086_v18 = vld [vmem:[#allocation236_spill] sm:$0xff] }
 0x5b4   : > { %5292 = vmatpush.bf16.msrb.mxu3 %v13066_v45  ;;  %v4430_v54 = vadd.f32 %v10352_v30, %v3898_v59  ;;  %v5024_v30 = vpop.f32.mrf.mxu2  ;;  %v3899_v45 = vadd.f32 %v3845_v4, %v13085_v0  ;;  %v3900_v59 = vadd.f32 %v3846_v49, %v13086_v18  ;;  %v13088_v20 = vld [vmem:[#allocation208_spill] sm:$0xff]  ;;  %v13098_v4 = vld [vmem:[#allocation221_spill] sm:$0xff] }
 0x5b5   : > { %5277 = vmatpush.bf16.msrb.mxu2 %v12827_v3  ;;  %5253 = vmatpush.bf16.msrb.mxu0 %v13068_v19  ;;  %v4869_v47 = vpop.permute.xlu0 %4868  ;;  %v13087_v19 = vld [vmem:[#allocation197_spill] sm:$0xff] }
 0x5b6   : > { %5266 = vmatpush.bf16.msrb.mxu1 %v13069_v34  ;;  %v4908_v27 = vsel %vm4892_vm7, %v4867_v10, %v4869_v47  ;;  %5374 = vrot.lane.b32.xlu0 %v5024_v30, %s7307_s24  ;;  %v13075_v10 = vld [vmem:[#allocation187_spill] sm:$0xff]  ;;  %v4431_v34 = vadd.f32 %v10385_v21, %v3899_v45  ;;  %v4432_v46 = vadd.f32 %v10388_v32, %v3900_v59  ;;  %v13099_v49 = vld [vmem:[#allocation225_spill] sm:$0xff] }
 0x5b7   : > { %v10814_v3 = vadd.f32 %v4908_v27, %v4430_v54  ;;  %v13102_v59 = vld [vmem:[#allocation153_spill] sm:$0xff] }
 0x5b8   : > { %5293 = vmatpush.bf16.msrb.mxu3 %v12637_v8  ;;  %v5039_v8 = vpop.f32.mrf.mxu3 }
 0x5b9   : > { %5278 = vmatpush.bf16.msrb.mxu2 %v12459_v56  ;;  %5254 = vmatpush.bf16.msrb.mxu0 %v12460_v48  ;;  %v13073_v56 = vld [vmem:[#allocation185_spill] sm:$0xff]  ;;  %v13074_v48 = vld [vmem:[#allocation220_spill] sm:$0xff]  ;;  %v4871_v54 = vpop.permute.xlu1 %4870 }
 0x5ba   : > { %5267 = vmatpush.bf16.msrb.mxu1 %v13070_v53  ;;  %v4909_v27 = vsel %vm4892_vm7, %v4869_v47, %v4871_v54  ;;  %v4910_v28 = vsel %vm4892_vm7, %v4871_v54, %v4873_v6 }
 0x5bb   : > { %v10854_v53 = vadd.f32 %v4909_v27, %v4431_v34 }
 0x5bc   : > { %5294 = vmatpush.bf16.msrb.mxu3 %v13072_v38 }
 0x5bd   : > { %5279 = vmatpush.bf16.msrb.mxu2 %v13071_v22  ;;  %5255 = vmatpush.bf16.msrb.mxu0 %v13073_v56  ;;  %v10856_v22 = vadd.f32 %v4910_v28, %v4432_v46 }
 0x5be   : > { %5268 = vmatpush.bf16.msrb.mxu1 %v12830_v57  ;;  %v5026_v57 = vpop.f32.mrf.mxu2 }
 0x5bf   : > { %v13096_v57 = vld [vmem:[#allocation222_spill] sm:$0xff] }
 0x5c0   : > { %5295 = vmatpush.bf16.msrb.mxu3 %v13074_v48  ;;  %v4879_v21 = vpop.permute.xlu2 %4878 }
 0x5c1   : > { %5280 = vmatpush.bf16.msrb.mxu2 %v12464_v7  ;;  %5256 = vmatpush.bf16.msrb.mxu0 %v13075_v10  ;;  %v13080_v7 = vld [vmem:[#allocation193_spill] sm:$0xff]  ;;  %v5050_v39 = vpop.f32.mrf.mxu0  ;;  %v4877_v47 = vpop.permute.xlu1 %4876 }
 0x5c2   : > { %5269 = vmatpush.bf16.msrb.mxu1 %v13076_v60  ;;  %5378 = vrot.lane.b32.xlu2 %v5050_v39, %s7307_s24  ;;  %v4913_v38 = vsel %vm4892_vm7, %v4877_v47, %v4879_v21  ;;  %v13093_v60 = vld [vmem:[#allocation131_spill] sm:$0xff] }
 0x5c3   : > { %5296 = vmatmul.bf16.vlgmr.msrb.gmra.mxu3 %v10423_v11  ;;  %v10868_v56 = vadd.f32 %v4913_v38, %v10449_v12  ;;  %v13094_v12 = vld [vmem:[#allocation176_spill] sm:$0xff] }
 0x5c4   : > { %5257 = vmatmul.bf16.vlgmr.msrb.gmra.mxu0 %v10423_v11  ;;  %v5063_v30 = vpop.f32.mrf.mxu1 }
 0x5c5   : > { %5301 = vmatpush.bf16.msra.mxu0 %v13077_v17  ;;  %5281 = vmatpush.bf16.msrb.mxu2 %v13078_v52 }
 0x5c6   : > { %5314 = vmatpush.bf16.msra.mxu1 %v13079_v31  ;;  %5380 = vrot.lane.b32.xlu0 %v5063_v30, %s7307_s24  ;;  %v5089_v32 = vpop.f32.mrf.mxu3  ;;  %v13095_v31 = vld [vmem:[#allocation218_spill] sm:$0xff] }
 0x5c7   : > { %5270 = vmatmul.bf16.vlgmr.msrb.gmra.mxu1 %v10423_v11 }
 0x5c8   : > { %v4885_v46 = vpop.permute.xlu2 %4884 }
 0x5c9   : > { %5302 = vmatpush.bf16.msra.mxu0 %v13080_v7  ;;  %5282 = vmatpush.bf16.msrb.mxu2 %v13082_v50  ;;  %v13100_v50 = vld [vmem:[#allocation244_spill] sm:$0xff] }
 0x5ca   : > { %5315 = vmatpush.bf16.msra.mxu1 %v13083_v14  ;;  %5384 = vrot.lane.b32.xlu2 %v5089_v32, %s7307_s24 }
 0x5cc   : > { %5283 = vmatmul.bf16.vlgmr.msrb.gmra.mxu2 %v10423_v11  ;;  %v5065_v8 = vpop.f32.mrf.mxu1 }
 0x5cd   : > { %5327 = vmatpush.bf16.msra.mxu2 %v13084_v9  ;;  %5303 = vmatpush.bf16.msra.mxu0 %v13087_v19  ;;  %v13101_v9 = vld [vmem:[#allocation245_spill] sm:$0xff] }
 0x5ce   : > { %5316 = vmatpush.bf16.msra.mxu1 %v13088_v20  ;;  %v5091_v7 = vpop.f32.mrf.mxu3 }
 0x5cf   : > { %v5076_v10 = vpop.f32.mrf.mxu2 }
 0x5d0   : > { %5382 = vrot.lane.b32.xlu1 %v5076_v10, %s7307_s24 }
 0x5d1   : > { %5328 = vmatpush.bf16.msra.mxu2 %v13089_v37  ;;  %5304 = vmatpush.bf16.msra.mxu0 %v12659_v2  ;;  %v5052_v2 = vpop.f32.mrf.mxu0 }
 0x5d2   : > { %5317 = vmatpush.bf16.msra.mxu1 %v12473_v23  ;;  %v13090_v23 = vld [vmem:[#allocation216_spill] sm:$0xff] }
 0x5d5   : > { %5329 = vmatpush.bf16.msra.mxu2 %v9682_v35  ;;  %5305 = vmatpush.bf16.msra.mxu0 %v12846_v5  ;;  %v13091_v35 = vld [vmem:[#allocation219_spill] sm:$0xff] }
 0x5d6   : > { %5318 = vmatpush.bf16.msra.mxu1 %v12847_v36  ;;  %v13092_v5 = vld [vmem:[#allocation211_spill] sm:$0xff]  ;;  %v4875_v36 = vpop.permute.xlu0 %4874 }
 0x5d7   : > { %v4911_v48 = vsel %vm4892_vm7, %v4873_v6, %v4875_v36  ;;  %v5078_v14 = vpop.f32.mrf.mxu2 }
 0x5d8   : > { %v10877_v17 = vadd.f32 %v4911_v48, %v13093_v60 }
 0x5d9   : > { %5330 = vmatpush.bf16.msra.mxu2 %v12849_v61  ;;  %5306 = vmatpush.bf16.msra.mxu0 %v13090_v23  ;;  %v4912_v61 = vsel %vm4892_vm7, %v4875_v36, %v4877_v47 }
 0x5da   : > { %5319 = vmatpush.bf16.msra.mxu1 %v13091_v35  ;;  %v10880_v52 = vadd.f32 %v4912_v61, %v13094_v12 }
 0x5dd   : > { %5331 = vmatpush.bf16.msra.mxu2 %v13092_v5  ;;  %5307 = vmatpush.bf16.msra.mxu0 %v13095_v31 }
 0x5de   : > { %5320 = vmatpush.bf16.msra.mxu1 %v13096_v57  ;;  %v4881_v6 = vpop.permute.xlu0 %4880 }
 0x5df   : > { %v4914_v45 = vsel %vm4892_vm7, %v4879_v21, %v4881_v6 }
 0x5e0   : > { %v10896_v19 = vadd.f32 %v4914_v45, %v13102_v59 }
 0x5e1   : > { %5332 = vmatpush.bf16.msra.mxu2 %v13097_v33  ;;  %5308 = vmatpush.bf16.msra.mxu0 %v13098_v4  ;;  %v5102_v0 = vpop.f32.mrf.mxu0 }
 0x5e2   : > { %5321 = vmatpush.bf16.msra.mxu1 %v13099_v49  ;;  %5386 = vrot.lane.b32.xlu0 %v5102_v0, %s7307_s24 }
 0x5e4   : > { %5309 = vmatmul.bf16.vlgmr.msra.gmra.mxu0 %v10423_v11  ;;  %v5115_v18 = vpop.f32.mrf.mxu1 }
 0x5e5   : > { %5333 = vmatpush.bf16.msra.mxu2 %v13100_v50  ;;  %5322 = vmatmul.bf16.vlgmr.msra.gmra.mxu1 %v10423_v11 }
 0x5e6   : > { %5388 = vrot.lane.b32.xlu1 %v5115_v18, %s7307_s24  ;;  %v5141_v20 = vpop.f32.mrf.mxu3 }
 0x5e9   : > { %5334 = vmatpush.bf16.msra.mxu2 %v13101_v9  ;;  %v5104_v34 = vpop.f32.mrf.mxu0  ;;  %v4883_v54 = vpop.permute.xlu1 %4882 }
 0x5ea   : > { %5392 = vrot.lane.b32.xlu0 %v5141_v20, %s7307_s24  ;;  %v4916_v27 = vsel %vm4892_vm7, %v4883_v54, %v4885_v46 }
 0x5eb   : > { %v10906_v30 = vadd.f32 %v4916_v27, %v10481_v26 }
 0x5ec   : > { %5335 = vmatmul.bf16.vlgmr.msra.gmra.mxu2 %v10423_v11  ;;  %v5117_v37 = vpop.f32.mrf.mxu1  ;;  %v4915_v11 = vsel %vm4892_vm7, %v4881_v6, %v4883_v54 }
 0x5ed   : > { %v10903_v39 = vadd.f32 %v4915_v11, %v10479_v58 }
 0x5ee   : > { %v5143_v21 = vpop.f32.mrf.mxu3 }
 0x5ef   : > { %v5128_v28 = vpop.f32.mrf.mxu2 }
 0x5f0   : > { %5390 = vrot.lane.b32.xlu2 %v5128_v28, %s7307_s24 }
 0x5f4   : > { %v4891_v47 = vpop.permute.xlu2 %4890  ;;  %v4887_v38 = vpop.permute.xlu0 %4886 }
 0x5f5   : > { %v4917_v2 = vsel %vm4892_vm7, %v4885_v46, %v4887_v38 }
 0x5f6   : > { %v10911_v35 = vadd.f32 %v4917_v2, %v10466_v43  ;;  %v13103_v2 = vld [vmem:[#allocation248_spill] sm:$0xff] }
 0x5f7   : > { %v5130_v32 = vpop.f32.mrf.mxu2 }
 0x5f9   : > { %v4889_v23 = vpop.permute.xlu1 %4888 }
 0x5fa   : > { %v4918_v5 = vsel %vm4892_vm7, %v4887_v38, %v4889_v23  ;;  %v4919_v58 = vsel %vm4892_vm7, %v4889_v23, %v4891_v47 }
 0x5fb   : > { %v10917_v36 = vadd.f32 %v4918_v5, %v10513_v15  ;;  %v10920_v48 = vadd.f32 %v4919_v58, %v10531_v25  ;;  %v10940_v58 = vstv %s5539_s25 }
 0x600   : > { %v5369_v6 = vpop.permute.xlu0 %5368  ;;  %v5373_v37 = vpop.permute.xlu2 %5372 }
 0x601   : > { %v5154_v8 = vpop.f32.mrf.mxu0 }
 0x602   : > { %5394 = vrot.lane.b32.xlu1 %v5154_v8, %s7307_s24 }
 0x604   : > { %v5167_v26 = vpop.f32.mrf.mxu1 }
 0x605   : > { %5396 = vrot.lane.b32.xlu2 %v5167_v26, %s7307_s24 }
 0x606   : > { %v5193_v61 = vpop.f32.mrf.mxu3 }
 0x609   : > { %v5156_v10 = vpop.f32.mrf.mxu0 }
 0x60a   : > { %5400 = vrot.lane.b32.xlu1 %v5193_v61, %s7307_s24 }
 0x60c   : > { %v5169_v43 = vpop.f32.mrf.mxu1 }
 0x60e   : > { %v5195_v12 = vpop.f32.mrf.mxu3 }
 0x60f   : > { %v5180_v60 = vpop.f32.mrf.mxu2 }
 0x610   : > { %5398 = vrot.lane.b32.xlu0 %v5180_v60, %s7307_s24 }
 0x615   : > { %v5371_v34 = vpop.permute.xlu1 %5370 }
 0x616   : > { %v5425_v11 = vsel %vm5424_vm8, %v5369_v6, %v5371_v34  ;;  %v5426_v61 = vsel %vm5424_vm8, %v5371_v34, %v5373_v37 }
 0x617   : > { %v5182_v31 = vpop.f32.mrf.mxu2  ;;  %v5479_v32 = vadd.f32 %v5425_v11, %v10574_v41 }
 0x619   : > { %v5512_v8 = vadd.f32 %v13103_v2, %v5479_v32 }
 0x61b   : > { %v5568_v60 = vmul.f32 %v10940_v58, %v5512_v8  ;;  %vm5540_vm10 = vcmp.ge.f32.partialorder %v5512_v8, 0.0 }
 0x61c   : > { %v5379_v38 = vpop.permute.xlu2 %5378 }
 0x61d   : > { %v5377_v47 = vpop.permute.xlu1 %5376 }
 0x621   : > { %v5206_v57 = vpop.f32.mrf.mxu0 }
 0x622   : > { %5402 = vrot.lane.b32.xlu2 %v5206_v57, %s7307_s24  ;;  %v10952_v57 = vld [vmem:[%s11448_s4] sm:$0xff] }
 0x623   : > { %v5635_v32 = vperm.slane %v10952_v57, 5 }
 0x624   : > { %v5219_v7 = vpop.f32.mrf.mxu1 }
 0x625   : > { %5404 = vrot.lane.b32.xlu0 %v5219_v7, %s7307_s24  ;;  %v13104_v7 = vld [vmem:[#allocation169_spill] sm:$0xff] }
 0x626   : > { %v5245_v15 = vpop.f32.mrf.mxu3 }
 0x628   : > { %v5375_v20 = vpop.permute.xlu0 %5374 }
 0x629   : > { %v5208_v25 = vpop.f32.mrf.mxu0  ;;  %v5427_v54 = vsel %vm5424_vm8, %v5373_v37, %v5375_v20  ;;  %v5428_v26 = vsel %vm5424_vm8, %v5375_v20, %v5377_v47 }
 0x62a   : > { %5408 = vrot.lane.b32.xlu2 %v5245_v15, %s7307_s24  ;;  %v5481_v28 = vadd.f32 %v5427_v54, %v10585_v51  ;;  %v5482_v12 = vadd.f32 %v5428_v26, %v10598_v55  ;;  %v5632_v25 = vperm.slane %v10952_v57, 2  ;;  %v5385_v55 = vpop.permute.xlu2 %5384 }
 0x62c   : > { %v5221_v33 = vpop.f32.mrf.mxu1  ;;  %v5514_v23 = vadd.f32 %v13103_v2, %v5481_v28  ;;  %v13105_v28 = vld [vmem:[#allocation171_spill] sm:$0xff] }
 0x62e   : > { %v5247_v49 = vpop.f32.mrf.mxu3  ;;  %v5570_v10 = vmul.f32 %v10940_v58, %v5514_v23  ;;  %vm5542_vm9 = vcmp.ge.f32.partialorder %v5514_v23, 0.0 }
 0x62f   : > { %v5232_v4 = vpop.f32.mrf.mxu2  ;;  %v5630_v49 = vperm.slane %v10952_v57, 0 }
 0x630   : > { %5406 = vrot.lane.b32.xlu1 %v5232_v4, %s7307_s24  ;;  %v5597_v4 = vsel %vm5542_vm9, %v5514_v23, %v5570_v10 }
 0x637   : > { %v5234_v50 = vpop.f32.mrf.mxu2 }
 0x638   : > { %v5381_v21 = vpop.permute.xlu0 %5380  ;;  %v5515_v50 = vadd.f32 %v13103_v2, %v5482_v12  ;;  %v5631_v12 = vperm.slane %v10952_v57, 1 }
 0x639   : > { %v5430_v5 = vsel %vm5424_vm8, %v5379_v38, %v5381_v21 }
 0x63a   : > { %v5484_v51 = vadd.f32 %v5430_v5, %v10644_v62  ;;  %v5480_v62 = vadd.f32 %v5426_v61, %v13104_v7  ;;  %v5571_v37 = vmul.f32 %v10940_v58, %v5515_v50  ;;  %vm5543_vm12 = vcmp.ge.f32.partialorder %v5515_v50, 0.0 }
 0x63b   : > { %v5633_v5 = vperm.slane %v10952_v57, 3 }
 0x63c   : > { %v5517_v33 = vadd.f32 %v13103_v2, %v5484_v51  ;;  %v5598_v10 = vsel %vm5543_vm12, %v5515_v50, %v5571_v37 }
 0x63e   : > { %vm5545_vm11 = vcmp.ge.f32.partialorder %v5517_v33, 0.0 }
 0x641   : > { %v5258_v14 = vpop.f32.mrf.mxu0 }
 0x642   : > { %5410 = vrot.lane.b32.xlu0 %v5258_v14, %s7307_s24  ;;  %v5383_v15 = vpop.permute.xlu1 %5382 }
 0x643   : > { %v5431_v6 = vsel %vm5424_vm8, %v5381_v21, %v5383_v15 }
 0x644   : > { %v5271_v9 = vpop.f32.mrf.mxu1  ;;  %v5485_v54 = vadd.f32 %v5431_v6, %v10681_v44 }
 0x645   : > { %5412 = vrot.lane.b32.xlu1 %v5271_v9, %s7307_s24  ;;  %v5595_v9 = vsel %vm5540_vm10, %v5512_v8, %v5568_v60 }
 0x646   : > { %v5297_v0 = vpop.f32.mrf.mxu3  ;;  %v10968_v34 = vadd.f32 %v5630_v49, %v5595_v9  ;;  %v5518_v26 = vadd.f32 %v13103_v2, %v5485_v54 }
 0x648   : > { %vm5546_vm15 = vcmp.ge.f32.partialorder %v5518_v26, 0.0 }
 0x649   : > { %v5260_v45 = vpop.f32.mrf.mxu0 }
 0x64a   : > { %5416 = vrot.lane.b32.xlu0 %v5297_v0, %s7307_s24  ;;  %v5513_v0 = vadd.f32 %v13103_v2, %v5480_v62  ;;  %v10963_v45 = vadd.f32 %v5632_v25, %v5597_v4  ;;  %v10995_v62 = vadd.f32 %v5633_v5, %v5598_v10  ;;  %v5432_v4 = vsel %vm5424_vm8, %v5383_v15, %v5385_v55 }
 0x64b   : > { %v5486_v9 = vadd.f32 %v5432_v4, %v10683_v1 }
 0x64c   : > { %v5273_v18 = vpop.f32.mrf.mxu1  ;;  %vm5541_vm13 = vcmp.ge.f32.partialorder %v5513_v0, 0.0 }
 0x64d   : > { %v5429_v18 = vsel %vm5424_vm8, %v5377_v47, %v5379_v38  ;;  %v5569_v47 = vmul.f32 %v10940_v58, %v5513_v0  ;;  %v5391_v38 = vpop.permute.xlu2 %5390 }
 0x64e   : > { %v5299_v46 = vpop.f32.mrf.mxu3 }
 0x64f   : > { %v5284_v59 = vpop.f32.mrf.mxu2  ;;  %v5596_v25 = vsel %vm5541_vm13, %v5513_v0, %v5569_v47 }
 0x650   : > { %5414 = vrot.lane.b32.xlu2 %v5284_v59, %s7307_s24  ;;  %v5573_v59 = vmul.f32 %v10940_v58, %v5517_v33  ;;  %v11010_v50 = vadd.f32 %v5631_v12, %v5596_v25 }
 0x652   : > { %v5600_v8 = vsel %vm5545_vm11, %v5517_v33, %v5573_v59  ;;  %v11000_v33 = vld [vmem:[%s11448_s4 + $0x8] sm:$0xff] }
 0x653   : > { %v10990_v60 = vadd.f32 %v5635_v32, %v5600_v8  ;;  %v5641_v32 = vperm.slane %v11000_v33, 3  ;;  %v5639_v8 = vperm.slane %v11000_v33, 1 }
 0x654   : > { %v5387_v43 = vpop.permute.xlu0 %5386 }
 0x655   : > { %v5433_v14 = vsel %vm5424_vm8, %v5385_v55, %v5387_v43 }
 0x656   : > { %v5487_v20 = vadd.f32 %v5433_v14, %v10670_v42  ;;  %v5483_v42 = vadd.f32 %v5429_v18, %v13105_v28  ;;  %v5638_v14 = vperm.slane %v11000_v33, 0 }
 0x657   : > { %v5286_v27 = vpop.f32.mrf.mxu2 }
 0x658   : > { %v5389_v21 = vpop.permute.xlu1 %5388  ;;  %v5520_v44 = vadd.f32 %v13103_v2, %v5487_v20  ;;  %v5634_v20 = vperm.slane %v10952_v57, 4 }
 0x659   : > { %v5434_v51 = vsel %vm5424_vm8, %v5387_v43, %v5389_v21  ;;  %v5574_v43 = vmul.f32 %v10940_v58, %v5518_v26 }
 0x65a   : > { %vm5548_vm14 = vcmp.ge.f32.partialorder %v5520_v44, 0.0  ;;  %v5488_v49 = vadd.f32 %v5434_v51, %v10718_v16  ;;  %v5636_v16 = vperm.slane %v10952_v57, 6  ;;  %v5637_v51 = vperm.slane %v10952_v57, 7 }
 0x65b   : > { %v5601_v18 = vsel %vm5546_vm15, %v5518_v26, %v5574_v43  ;;  %v5642_v43 = vperm.slane %v11000_v33, 4 }
 0x65c   : > { %v10974_v27 = vpop.permute.xlu0 %5392  ;;  %v5521_v0 = vadd.f32 %v13103_v2, %v5488_v49  ;;  %v11024_v37 = vadd.f32 %v5636_v16, %v5601_v18 }
 0x65d   : > { %v5436_v61 = vsel %vm5424_vm8, %v5391_v38, %v10974_v27 }
 0x65e   : > { %v5490_v7 = vadd.f32 %v5436_v61, %v10747_v29  ;;  %v5577_v28 = vmul.f32 %v10940_v58, %v5521_v0  ;;  %vm5549_vm3 = vcmp.ge.f32.partialorder %v5521_v0, 0.0 }
 0x660   : > { %v5523_v15 = vadd.f32 %v13103_v2, %v5490_v7  ;;  %v5604_v26 = vsel %vm5549_vm3, %v5521_v0, %v5577_v28 }
 0x661   : > { %v5310_v41 = vpop.f32.mrf.mxu0  ;;  %v11048_v12 = vadd.f32 %v5639_v8, %v5604_v26 }
 0x662   : > { %v5323_v31 = vpop.f32.mrf.mxu1  ;;  %5418 = vrot.lane.b32.xlu1 %v5310_v41, %s7307_s24  ;;  %v5516_v41 = vadd.f32 %v13103_v2, %v5483_v42  ;;  %v5579_v1 = vmul.f32 %v10940_v58, %v5523_v15  ;;  %vm5551_vm1 = vcmp.ge.f32.partialorder %v5523_v15, 0.0 }
 0x663   : > { %5420 = vrot.lane.b32.xlu2 %v5323_v31, %s7307_s24  ;;  %v5576_v31 = vmul.f32 %v10940_v58, %v5520_v44 }
 0x664   : > { %v5572_v29 = vmul.f32 %v10940_v58, %v5516_v41  ;;  %vm5544_vm0 = vcmp.ge.f32.partialorder %v5516_v41, 0.0 }
 0x665   : > { %v5603_v6 = vsel %vm5548_vm14, %v5520_v44, %v5576_v31 }
 0x666   : > { %v11019_v59 = vadd.f32 %v5638_v14, %v5603_v6  ;;  %v5599_v54 = vsel %vm5544_vm0, %v5516_v41, %v5572_v29  ;;  %v5640_v14 = vperm.slane %v11000_v33, 2 }
 0x667   : > { %v11032_v42 = vadd.f32 %v5634_v20, %v5599_v54 }
 0x669   : > { %v5312_v46 = vpop.f32.mrf.mxu0 }
 0x66a   : > { %5742 = vrot.lane.b32.xlu1 %v10963_v45, %s7304_s12  ;;  %v5325_v11 = vpop.f32.mrf.mxu1  ;;  %v5519_v46 = vadd.f32 %v13103_v2, %v5486_v9 }
 0x66b   : > { %5738 = vrot.lane.b32.xlu2 %v10968_v34, %s7304_s12  ;;  %v5435_v11 = vsel %vm5424_vm8, %v5389_v21, %v5391_v38  ;;  %v5397_v21 = vpop.permute.xlu2 %5396  ;;  %v5606_v38 = vsel %vm5551_vm1, %v5523_v15, %v5579_v1 }
 0x66c   : > { %v5575_v47 = vmul.f32 %v10940_v58, %v5519_v46  ;;  %v5489_v44 = vadd.f32 %v5435_v11, %v10745_v40  ;;  %vm5547_vm4 = vcmp.ge.f32.partialorder %v5519_v46, 0.0  ;;  %v11043_v10 = vadd.f32 %v5641_v32, %v5606_v38 }
 0x66e   : > { %v5522_v40 = vadd.f32 %v13103_v2, %v5489_v44  ;;  %v5602_v31 = vsel %vm5547_vm4, %v5519_v46, %v5575_v47 }
 0x66f   : > { %v5336_v23 = vpop.f32.mrf.mxu2 }
 0x670   : > { %5422 = vrot.lane.b32.xlu0 %v5336_v23, %s7307_s24  ;;  %v5578_v57 = vmul.f32 %v10940_v58, %v5522_v40  ;;  %vm5550_vm7 = vcmp.ge.f32.partialorder %v5522_v40, 0.0 }
 0x672   : > { %5748 = vrot.lane.b32.xlu1 %v10990_v60, %s7304_s12  ;;  %v5605_v6 = vsel %vm5550_vm7, %v5522_v40, %v5578_v57 }
 0x673   : > { %5744 = vrot.lane.b32.xlu2 %v10995_v62, %s7304_s12  ;;  %v11074_v46 = vadd.f32 %v5640_v14, %v5605_v6 }
 0x674   : > { %v5395_v23 = vpop.permute.xlu1 %5394 }
 0x675   : > { %v5437_v5 = vsel %vm5424_vm8, %v10974_v27, %v5395_v23  ;;  %v5438_v7 = vsel %vm5424_vm8, %v5395_v23, %v5397_v21 }
 0x676   : > { %v5491_v61 = vadd.f32 %v5437_v5, %v10790_v24  ;;  %v11056_v24 = vadd.f32 %v5637_v51, %v5602_v31  ;;  %v5492_v25 = vadd.f32 %v5438_v7, %v10799_v13 }
 0x677   : > { %v5338_v55 = vpop.f32.mrf.mxu2 }
 0x678   : > { %5740 = vrot.lane.b32.xlu0 %v11010_v50, %s7304_s12  ;;  %v5524_v41 = vadd.f32 %v13103_v2, %v5491_v61  ;;  %v5525_v9 = vadd.f32 %v13103_v2, %v5492_v25 }
 0x67a   : > { %5754 = vrot.lane.b32.xlu1 %v11019_v59, %s7304_s12  ;;  %vm5552_vm6 = vcmp.ge.f32.partialorder %v5524_v41, 0.0  ;;  %v5580_v27 = vmul.f32 %v10940_v58, %v5524_v41  ;;  %v5581_v1 = vmul.f32 %v10940_v58, %v5525_v9  ;;  %vm5553_vm9 = vcmp.ge.f32.partialorder %v5525_v9, 0.0 }
 0x67b   : > { %5750 = vrot.lane.b32.xlu2 %v11024_v37, %s7304_s12 }
 0x67c   : > { %v5607_v4 = vsel %vm5552_vm6, %v5524_v41, %v5580_v27  ;;  %v5401_v49 = vpop.permute.xlu1 %5400  ;;  %v5403_v29 = vpop.permute.xlu2 %5402  ;;  %v5608_v38 = vsel %vm5553_vm9, %v5525_v9, %v5581_v1 }
 0x67d   : > { %v11065_v55 = vadd.f32 %v5642_v43, %v5607_v4  ;;  %v5441_v16 = vsel %vm5424_vm8, %v5401_v49, %v5403_v29 }
 0x67e   : > { %v5495_v54 = vadd.f32 %v5441_v16, %v10854_v53  ;;  %v5643_v53 = vperm.slane %v11000_v33, 5 }
 0x680   : > { %5746 = vrot.lane.b32.xlu0 %v11032_v42, %s7304_s12  ;;  %v5528_v44 = vadd.f32 %v13103_v2, %v5495_v54  ;;  %v11096_v26 = vadd.f32 %v5643_v53, %v5608_v38 }
 0x682   : > { %5760 = vrot.lane.b32.xlu1 %v11043_v10, %s7304_s12  ;;  %v5399_v15 = vpop.permute.xlu0 %5398  ;;  %v5584_v61 = vmul.f32 %v10940_v58, %v5528_v44  ;;  %vm5556_vm12 = vcmp.ge.f32.partialorder %v5528_v44, 0.0 }
 0x683   : > { %5756 = vrot.lane.b32.xlu2 %v11048_v12, %s7304_s12  ;;  %v5439_v13 = vsel %vm5424_vm8, %v5397_v21, %v5399_v15  ;;  %v5440_v0 = vsel %vm5424_vm8, %v5399_v15, %v5401_v49 }
 0x684   : > { %v5493_v18 = vadd.f32 %v5439_v13, %v10801_v63  ;;  %v5494_v20 = vadd.f32 %v5440_v0, %v10814_v3  ;;  %v5644_v63 = vperm.slane %v11000_v33, 6  ;;  %v5645_v3 = vperm.slane %v11000_v33, 7  ;;  %v11102_v33 = vld [vmem:[%s11448_s4 + $0x10] sm:$0xff]  ;;  %v5409_v49 = vpop.permute.xlu2 %5408 }
 0x685   : > { %v5646_v51 = vperm.slane %v11102_v33, 0  ;;  %v5611_v40 = vsel %vm5556_vm12, %v5528_v44, %v5584_v61  ;;  %v5647_v25 = vperm.slane %v11102_v33, 1  ;;  %v5649_v0 = vperm.slane %v11102_v33, 3 }
 0x686   : > { %v5526_v11 = vadd.f32 %v13103_v2, %v5493_v18  ;;  %v5527_v28 = vadd.f32 %v13103_v2, %v5494_v20  ;;  %v5648_v18 = vperm.slane %v11102_v33, 2 }
 0x687   : > { %v11108_v7 = vadd.f32 %v5646_v51, %v5611_v40  ;;  %v5650_v40 = vperm.slane %v11102_v33, 4 }
 0x688   : > { %5752 = vrot.lane.b32.xlu0 %v11056_v24, %s7304_s12  ;;  %vm5554_vm10 = vcmp.ge.f32.partialorder %v5526_v11, 0.0  ;;  %vm5555_vm11 = vcmp.ge.f32.partialorder %v5527_v28, 0.0  ;;  %v5582_v32 = vmul.f32 %v10940_v58, %v5526_v11  ;;  %v5583_v47 = vmul.f32 %v10940_v58, %v5527_v28 }
 0x68a   : > { %v5609_v23 = vsel %vm5554_vm10, %v5526_v11, %v5582_v32  ;;  %v5610_v21 = vsel %vm5555_vm11, %v5527_v28, %v5583_v47 }
 0x68b   : > { %5762 = vrot.lane.b32.xlu2 %v11065_v55, %s7304_s12  ;;  %v11088_v8 = vadd.f32 %v5644_v63, %v5609_v23  ;;  %v11090_v5 = vadd.f32 %v5645_v3, %v5610_v21 }
 0x68d   : > { %5766 = vrot.lane.b32.xlu1 %v11088_v8, %s7304_s12 }
 0x690   : > { %5758 = vrot.lane.b32.xlu0 %v11074_v46, %s7304_s12 }
 0x693   : > { %5768 = vrot.lane.b32.xlu2 %v11090_v5, %s7304_s12 }
 0x697   : > { %v5405_v41 = vpop.permute.xlu0 %5404 }
 0x698   : > { %5764 = vrot.lane.b32.xlu0 %v11096_v26, %s7304_s12  ;;  %v5442_v31 = vsel %vm5424_vm8, %v5403_v29, %v5405_v41 }
 0x699   : > { %v5496_v27 = vadd.f32 %v5442_v31, %v10856_v22  ;;  %v5651_v31 = vperm.slane %v11102_v33, 5 }
 0x69b   : > { %v5529_v57 = vadd.f32 %v13103_v2, %v5496_v27 }
 0x69d   : > { %vm5557_vm13 = vcmp.ge.f32.partialorder %v5529_v57, 0.0  ;;  %v5585_v43 = vmul.f32 %v10940_v58, %v5529_v57 }
 0x69f   : > { %v5612_v4 = vsel %vm5557_vm13, %v5529_v57, %v5585_v43 }
 0x6a0   : > { %5770 = vrot.lane.b32.xlu0 %v11108_v7, %s7304_s12  ;;  %v11116_v14 = vadd.f32 %v5647_v25, %v5612_v4 }
 0x6a2   : > { %v5407_v9 = vpop.permute.xlu1 %5406  ;;  %5772 = vrot.lane.b32.xlu1 %v11116_v14, %s7304_s12 }
 0x6a3   : > { %v5443_v22 = vsel %vm5424_vm8, %v5405_v41, %v5407_v9  ;;  %v5444_v29 = vsel %vm5424_vm8, %v5407_v9, %v5409_v49 }
 0x6a4   : > { %v5497_v15 = vadd.f32 %v5443_v22, %v10877_v17  ;;  %v5498_v6 = vadd.f32 %v5444_v29, %v10880_v52 }
 0x6a6   : > { %v5530_v16 = vadd.f32 %v13103_v2, %v5497_v15  ;;  %v5531_v13 = vadd.f32 %v13103_v2, %v5498_v6  ;;  %v5653_v6 = vperm.slane %v11102_v33, 7 }
 0x6a8   : > { %vm5558_vm14 = vcmp.ge.f32.partialorder %v5530_v16, 0.0  ;;  %v5586_v20 = vmul.f32 %v10940_v58, %v5530_v16  ;;  %vm5559_vm15 = vcmp.ge.f32.partialorder %v5531_v13, 0.0  ;;  %v5587_v1 = vmul.f32 %v10940_v58, %v5531_v13 }
 0x6aa   : > { %v5614_v54 = vsel %vm5559_vm15, %v5531_v13, %v5587_v1  ;;  %v5613_v11 = vsel %vm5558_vm14, %v5530_v16, %v5586_v20  ;;  %v5415_v63 = vpop.permute.xlu2 %5414 }
 0x6ab   : > { %v11130_v28 = vadd.f32 %v5649_v0, %v5614_v54  ;;  %v11132_v17 = vadd.f32 %v5648_v18, %v5613_v11 }
 0x6ad   : > { %5776 = vrot.lane.b32.xlu0 %v11130_v28, %s7304_s12  ;;  %5774 = vrot.lane.b32.xlu2 %v11132_v17, %s7304_s12 }
 0x6b4   : > { %v5411_v52 = vpop.permute.xlu0 %5410 }
 0x6b5   : > { %v5445_v3 = vsel %vm5424_vm8, %v5409_v49, %v5411_v52 }
 0x6b6   : > { %v5499_v47 = vadd.f32 %v5445_v3, %v10868_v56  ;;  %v5652_v56 = vperm.slane %v11102_v33, 6  ;;  %v5625_v33 = vld [vmem:[%s11448_s4 + $0x18] sm:$0x7] }
 0x6b7   : > { %v5413_v32 = vpop.permute.xlu1 %5412  ;;  %v5654_v3 = vperm.slane %v5625_v33, 0 }
 0x6b8   : > { %v5446_v53 = vsel %vm5424_vm8, %v5411_v52, %v5413_v32  ;;  %v5447_v44 = vsel %vm5424_vm8, %v5413_v32, %v5415_v63  ;;  %v5532_v38 = vadd.f32 %v13103_v2, %v5499_v47  ;;  %v5655_v32 = vperm.slane %v5625_v33, 1 }
 0x6b9   : > { %v5500_v23 = vadd.f32 %v5446_v53, %v10896_v19  ;;  %v5501_v21 = vadd.f32 %v5447_v44, %v10903_v39 }
 0x6ba   : > { %vm5560_vm0 = vcmp.ge.f32.partialorder %v5532_v38, 0.0  ;;  %v5588_v41 = vmul.f32 %v10940_v58, %v5532_v38 }
 0x6bb   : > { %v5533_v61 = vadd.f32 %v13103_v2, %v5500_v23  ;;  %v5534_v51 = vadd.f32 %v13103_v2, %v5501_v21 }
 0x6bc   : > { %v5417_v27 = vpop.permute.xlu0 %5416  ;;  %v5615_v57 = vsel %vm5560_vm0, %v5532_v38, %v5588_v41 }
 0x6bd   : > { %vm5561_vm1 = vcmp.ge.f32.partialorder %v5533_v61, 0.0  ;;  %vm5562_vm3 = vcmp.ge.f32.partialorder %v5534_v51, 0.0  ;;  %v5589_v19 = vmul.f32 %v10940_v58, %v5533_v61  ;;  %v5590_v39 = vmul.f32 %v10940_v58, %v5534_v51  ;;  %v5421_v0 = vpop.permute.xlu2 %5420 }
 0x6be   : > { %v5448_v25 = vsel %vm5424_vm8, %v5415_v63, %v5417_v27  ;;  %v11154_v43 = vadd.f32 %v5650_v40, %v5615_v57 }
 0x6bf   : > { %v5617_v4 = vsel %vm5562_vm3, %v5534_v51, %v5590_v39  ;;  %v5616_v49 = vsel %vm5561_vm1, %v5533_v61, %v5589_v19  ;;  %v5502_v9 = vadd.f32 %v5448_v25, %v10906_v30 }
 0x6c0   : > { %v11157_v22 = vadd.f32 %v5652_v56, %v5617_v4  ;;  %v11159_v29 = vadd.f32 %v5651_v31, %v5616_v49  ;;  %5778 = vrot.lane.b32.xlu1 %v11154_v43, %s7304_s12  ;;  %v5656_v31 = vperm.slane %v5625_v33, 2 }
 0x6c1   : > { %v5535_v15 = vadd.f32 %v13103_v2, %v5502_v9 }
 0x6c2   : > { %5782 = vrot.lane.b32.xlu0 %v11157_v22, %s7304_s12  ;;  %5780 = vrot.lane.b32.xlu2 %v11159_v29, %s7304_s12 }
 0x6c3   : > { %vm5563_vm4 = vcmp.ge.f32.partialorder %v5535_v15, 0.0  ;;  %v5591_v30 = vmul.f32 %v10940_v58, %v5535_v15 }
 0x6c5   : > { %v5618_v16 = vsel %vm5563_vm4, %v5535_v15, %v5591_v30  ;;  %v5739_v44 = vpop.permute.xlu2 %5738 }
 0x6c6   : > { %v11170_v13 = vadd.f32 %v5653_v6, %v5618_v16 }
 0x6c8   : > { %5784 = vrot.lane.b32.xlu1 %v11170_v13, %s7304_s12 }
 0x6cd   : > { %v5745_v56 = vpop.permute.xlu2 %5744 }
 0x6d4   : > { %v5419_v18 = vpop.permute.xlu1 %5418 }
 0x6d5   : > { %v5449_v20 = vsel %vm5424_vm8, %v5417_v27, %v5419_v18  ;;  %v5450_v1 = vsel %vm5424_vm8, %v5419_v18, %v5421_v0  ;;  %v5751_v9 = vpop.permute.xlu2 %5750 }
 0x6d6   : > { %v5503_v54 = vadd.f32 %v5449_v20, %v10911_v35  ;;  %v5504_v11 = vadd.f32 %v5450_v1, %v10917_v36 }
 0x6d8   : > { %v5536_v52 = vadd.f32 %v13103_v2, %v5503_v54  ;;  %v5537_v63 = vadd.f32 %v13103_v2, %v5504_v11 }
 0x6da   : > { %vm5564_vm6 = vcmp.ge.f32.partialorder %v5536_v52, 0.0  ;;  %vm5565_vm7 = vcmp.ge.f32.partialorder %v5537_v63, 0.0  ;;  %v5592_v47 = vmul.f32 %v10940_v58, %v5536_v52  ;;  %v5593_v53 = vmul.f32 %v10940_v58, %v5537_v63 }
 0x6dc   : > { %v5619_v35 = vsel %vm5564_vm6, %v5536_v52, %v5592_v47  ;;  %v5620_v23 = vsel %vm5565_vm7, %v5537_v63, %v5593_v53  ;;  %v5743_v51 = vpop.permute.xlu1 %5742 }
 0x6dd   : > { %v11185_v36 = vadd.f32 %v5654_v3, %v5619_v35  ;;  %v11187_v21 = vadd.f32 %v5655_v32, %v5620_v23  ;;  %v5757_v20 = vpop.permute.xlu2 %5756 }
 0x6df   : > { %5786 = vrot.lane.b32.xlu2 %v11185_v36, %s7304_s12  ;;  %5788 = vrot.lane.b32.xlu0 %v11187_v21, %s7304_s12 }
 0x6e2   : > { %v5423_v38 = vpop.permute.xlu0 %5422 }
 0x6e3   : > { %v5451_v61 = vsel %vm5424_vm8, %v5421_v0, %v5423_v38 }
 0x6e4   : > { %v5505_v40 = vadd.f32 %v5451_v61, %v10920_v48 }
 0x6e5   : > { %v5763_v47 = vpop.permute.xlu2 %5762 }
 0x6e6   : > { %v5538_v41 = vadd.f32 %v13103_v2, %v5505_v40  ;;  %v5749_v2 = vpop.permute.xlu1 %5748 }
 0x6e8   : > { %vm5566_vm9 = vcmp.ge.f32.partialorder %v5538_v41, 0.0  ;;  %v5594_v19 = vmul.f32 %v10940_v58, %v5538_v41  ;;  %v5794_v58 = vsel %vm3828_vm5, %v5743_v51, %v5745_v56 }
 0x6ea   : > { %v5741_v39 = vpop.permute.xlu0 %5740  ;;  %v5621_v27 = vsel %vm5566_vm9, %v5538_v41, %v5594_v19 }
 0x6eb   : > { %v5792_v57 = vsel %vm3828_vm5, %v5739_v44, %v5741_v39  ;;  %v5793_v25 = vsel %vm3828_vm5, %v5741_v39, %v5743_v51  ;;  %v11199_v4 = vadd.f32 %v5656_v31, %v5621_v27 }
 0x6ec   : > { %v11202_v49 = vmax.f32 %v10968_v34, %v5792_v57  ;;  %v11205_v48 = vmax.f32 %v11010_v50, %v5793_v25  ;;  %v11215_v34 = vmax.f32 %v10963_v45, %v5794_v58  ;;  %v5797_v45 = vsel %vm3828_vm5, %v5749_v2, %v5751_v9 }
 0x6ed   : > { %5790 = vrot.lane.b32.xlu1 %v11199_v4, %s7304_s12  ;;  %s11370_s12 = scalar_lea.vmem %s11449_s5, %s7269_s10 }
 0x6ee   : > { %5901 = vrot.lane.b32.xlu0 %v11205_v48, %s7300_s26  ;;  %5899 = vrot.lane.b32.xlu2 %v11202_v49, %s7300_s26  ;;  %v5755_v0 = vpop.permute.xlu1 %5754 }
 0x6f2   : > { %v5747_v15 = vpop.permute.xlu0 %5746 }
 0x6f3   : > { %v5795_v50 = vsel %vm3828_vm5, %v5745_v56, %v5747_v15  ;;  %v5796_v6 = vsel %vm3828_vm5, %v5747_v15, %v5749_v2 }
 0x6f4   : > { %v11220_v30 = vmax.f32 %v10995_v62, %v5795_v50  ;;  %v11223_v16 = vmax.f32 %v11032_v42, %v5796_v6  ;;  %v11233_v62 = vmax.f32 %v10990_v60, %v5797_v45  ;;  %v5800_v60 = vsel %vm3828_vm5, %v5755_v0, %v5757_v20 }
 0x6f5   : > { %5903 = vrot.lane.b32.xlu1 %v11215_v34, %s7300_s26  ;;  %v11251_v63 = vmax.f32 %v11019_v59, %v5800_v60 }
 0x6f6   : > { %5907 = vrot.lane.b32.xlu0 %v11223_v16, %s7300_s26  ;;  %5905 = vrot.lane.b32.xlu2 %v11220_v30, %s7300_s26  ;;  %v5761_v33 = vpop.permute.xlu1 %5760 }
 0x6f7   : > { %v5803_v59 = vsel %vm3828_vm5, %v5761_v33, %v5763_v47 }
 0x6fa   : > { %v5753_v18 = vpop.permute.xlu0 %5752 }
 0x6fb   : > { %v5798_v42 = vsel %vm3828_vm5, %v5751_v9, %v5753_v18  ;;  %v5799_v1 = vsel %vm3828_vm5, %v5753_v18, %v5755_v0 }
 0x6fc   : > { %v11238_v54 = vmax.f32 %v11024_v37, %v5798_v42  ;;  %v11241_v11 = vmax.f32 %v11056_v24, %v5799_v1 }
 0x6fd   : > { %5909 = vrot.lane.b32.xlu1 %v11233_v62, %s7300_s26 }
 0x6fe   : > { %5913 = vrot.lane.b32.xlu0 %v11241_v11, %s7300_s26  ;;  %5911 = vrot.lane.b32.xlu2 %v11238_v54, %s7300_s26 }
 0x6ff   : > { %v5767_v53 = vpop.permute.xlu1 %5766 }
 0x702   : > { %v5759_v52 = vpop.permute.xlu0 %5758 }
 0x703   : > { %v5801_v37 = vsel %vm3828_vm5, %v5757_v20, %v5759_v52  ;;  %v5802_v24 = vsel %vm3828_vm5, %v5759_v52, %v5761_v33 }
 0x704   : > { %v11256_v3 = vmax.f32 %v11048_v12, %v5801_v37  ;;  %v11259_v32 = vmax.f32 %v11074_v46, %v5802_v24  ;;  %v11269_v12 = vmax.f32 %v11043_v10, %v5803_v59  ;;  %v5769_v10 = vpop.permute.xlu2 %5768 }
 0x705   : > { %5915 = vrot.lane.b32.xlu1 %v11251_v63, %s7300_s26  ;;  %v5806_v61 = vsel %vm3828_vm5, %v5767_v53, %v5769_v10 }
 0x706   : > { %5919 = vrot.lane.b32.xlu0 %v11259_v32, %s7300_s26  ;;  %5917 = vrot.lane.b32.xlu2 %v11256_v3, %s7300_s26  ;;  %v11287_v40 = vmax.f32 %v11088_v8, %v5806_v61 }
 0x70a   : > { %v5765_v44 = vpop.permute.xlu0 %5764 }
 0x70b   : > { %v5804_v46 = vsel %vm3828_vm5, %v5763_v47, %v5765_v44  ;;  %v5805_v35 = vsel %vm3828_vm5, %v5765_v44, %v5767_v53 }
 0x70c   : > { %v11274_v23 = vmax.f32 %v11065_v55, %v5804_v46  ;;  %v11277_v38 = vmax.f32 %v11096_v26, %v5805_v35  ;;  %v5775_v41 = vpop.permute.xlu2 %5774 }
 0x70d   : > { %5921 = vrot.lane.b32.xlu1 %v11269_v12, %s7300_s26 }
 0x70e   : > { %5925 = vrot.lane.b32.xlu0 %v11277_v38, %s7300_s26  ;;  %5923 = vrot.lane.b32.xlu2 %v11274_v23, %s7300_s26 }
 0x712   : > { %v5771_v51 = vpop.permute.xlu0 %5770 }
 0x713   : > { %v5807_v55 = vsel %vm3828_vm5, %v5769_v10, %v5771_v51 }
 0x714   : > { %v11291_v26 = vmax.f32 %v11090_v5, %v5807_v55  ;;  %v5773_v56 = vpop.permute.xlu1 %5772 }
 0x715   : > { %5927 = vrot.lane.b32.xlu1 %v11287_v40, %s7300_s26  ;;  %v5808_v31 = vsel %vm3828_vm5, %v5771_v51, %v5773_v56  ;;  %v5809_v19 = vsel %vm3828_vm5, %v5773_v56, %v5775_v41 }
 0x716   : > { %5929 = vrot.lane.b32.xlu2 %v11291_v26, %s7300_s26  ;;  %v11300_v8 = vmax.f32 %v11108_v7, %v5808_v31  ;;  %v11303_v39 = vmax.f32 %v11116_v14, %v5809_v19 }
 0x718   : > { %5931 = vrot.lane.b32.xlu0 %v11300_v8, %s7300_s26 }
 0x71c   : > { %v5781_v7 = vpop.permute.xlu2 %5780 }
 0x71d   : > { %5933 = vrot.lane.b32.xlu1 %v11303_v39, %s7300_s26 }
 0x71f   : > { %v5777_v5 = vpop.permute.xlu0 %5776 }
 0x720   : > { %v5810_v27 = vsel %vm3828_vm5, %v5775_v41, %v5777_v5 }
 0x721   : > { %v11311_v57 = vmax.f32 %v11132_v17, %v5810_v27 }
 0x723   : > { %5935 = vrot.lane.b32.xlu2 %v11311_v57, %s7300_s26 }
 0x732   : > { %v5779_v25 = vpop.permute.xlu1 %5778 }
 0x733   : > { %v5811_v14 = vsel %vm3828_vm5, %v5777_v5, %v5779_v25  ;;  %v5812_v58 = vsel %vm3828_vm5, %v5779_v25, %v5781_v7 }
 0x734   : > { %v5783_v2 = vpop.permute.xlu0 %5782  ;;  %v11319_v15 = vmax.f32 %v11130_v28, %v5811_v14  ;;  %v11322_v50 = vmax.f32 %v11154_v43, %v5812_v58 }
 0x735   : > { %v5813_v9 = vsel %vm3828_vm5, %v5781_v7, %v5783_v2 }
 0x736   : > { %v11325_v17 = vmax.f32 %v11159_v29, %v5813_v9  ;;  %5937 = vrot.lane.b32.xlu0 %v11319_v15, %s7300_s26  ;;  %5939 = vrot.lane.b32.xlu1 %v11322_v50, %s7300_s26 }
 0x738   : > { %5941 = vrot.lane.b32.xlu2 %v11325_v17, %s7300_s26 }
 0x739   : > { %v5787_v6 = vpop.permute.xlu2 %5786 }
 0x73a   : > { %v5785_v45 = vpop.permute.xlu1 %5784 }
 0x73b   : > { %v5814_v28 = vsel %vm3828_vm5, %v5783_v2, %v5785_v45  ;;  %v5815_v0 = vsel %vm3828_vm5, %v5785_v45, %v5787_v6 }
 0x73c   : > { %v11336_v43 = vmax.f32 %v11157_v22, %v5814_v28  ;;  %v11339_v29 = vmax.f32 %v11170_v13, %v5815_v0 }
 0x73e   : > { %5943 = vrot.lane.b32.xlu0 %v11336_v43, %s7300_s26  ;;  %5945 = vrot.lane.b32.xlu1 %v11339_v29, %s7300_s26 }
 0x748   : > { %v5900_v42 = vpop.permute.xlu2 %5899 }
 0x750   : > { %v5906_v22 = vpop.permute.xlu2 %5905 }
 0x751   : > { %v5789_v18 = vpop.permute.xlu0 %5788 }
 0x752   : > { %v5816_v20 = vsel %vm3828_vm5, %v5787_v6, %v5789_v18 }
 0x753   : > { %v11347_v1 = vmax.f32 %v11185_v36, %v5816_v20 }
 0x755   : > { %5947 = vrot.lane.b32.xlu2 %v11347_v1, %s7300_s26 }
 0x758   : > { %v5912_v44 = vpop.permute.xlu2 %5911 }
 0x75f   : > { %v5791_v13 = vpop.permute.xlu1 %5790 }
 0x760   : > { %v5817_v60 = vsel %vm3828_vm5, %v5789_v18, %v5791_v13  ;;  %v5871_v33 = vmax.f32 %v11199_v4, %v5791_v13  ;;  %v5902_v52 = vpop.permute.xlu0 %5901  ;;  %v5918_v19 = vpop.permute.xlu2 %5917 }
 0x761   : > { %v11354_v37 = vmax.f32 %v11187_v21, %v5817_v60  ;;  %v5954_v36 = vsel %vm1224_vm2, %v5900_v42, %v5902_v52 }
 0x762   : > { %5951 = vrot.lane.b32.xlu1 %v5871_v33, %s7300_s26  ;;  %v6006_v4 = vmax.f32 %v11202_v49, %v5954_v36 }
 0x763   : > { %5949 = vrot.lane.b32.xlu0 %v11354_v37, %s7300_s26 }
 0x767   : > { %v5904_v24 = vpop.permute.xlu1 %5903 }
 0x768   : > { %v5955_v47 = vsel %vm1224_vm2, %v5902_v52, %v5904_v24  ;;  %v5956_v59 = vsel %vm1224_vm2, %v5904_v24, %v5906_v22  ;;  %v5908_v53 = vpop.permute.xlu0 %5907  ;;  %v5924_v0 = vpop.permute.xlu2 %5923 }
 0x769   : > { %v6007_v21 = vmax.f32 %v11205_v48, %v5955_v47  ;;  %v6008_v46 = vmax.f32 %v11215_v34, %v5956_v59  ;;  %v5957_v35 = vsel %vm1224_vm2, %v5906_v22, %v5908_v53 }
 0x76a   : > { %v6009_v10 = vmax.f32 %v11220_v30, %v5957_v35 }
 0x76b   : > { %v6032_v61 = vmax.f32 %v6006_v4, %v6008_v46 }
 0x76c   : > { %v6033_v51 = vmax.f32 %v6007_v21, %v6009_v10 }
 0x76d   : > { %6056 = vst [vmem:[%s11370_s12] sm:$0xff] %v6032_v61 }
 0x76e   : > { %6057 = vst [vmem:[%s11370_s12 + $0x8] sm:$0xff] %v6033_v51 }
 0x76f   : > { %v5910_v49 = vpop.permute.xlu1 %5909 }
 0x770   : > { %v5958_v48 = vsel %vm1224_vm2, %v5908_v53, %v5910_v49  ;;  %v5959_v34 = vsel %vm1224_vm2, %v5910_v49, %v5912_v44  ;;  %v5914_v55 = vpop.permute.xlu0 %5913  ;;  %v5930_v36 = vpop.permute.xlu2 %5929 }
 0x771   : > { %v6010_v41 = vmax.f32 %v11223_v16, %v5958_v48  ;;  %v6011_v56 = vmax.f32 %v11233_v62, %v5959_v34  ;;  %v5960_v31 = vsel %vm1224_vm2, %v5912_v44, %v5914_v55 }
 0x772   : > { %v6012_v30 = vmax.f32 %v11238_v54, %v5960_v31 }
 0x773   : > { %v6034_v5 = vmax.f32 %v6008_v46, %v6010_v41  ;;  %v6035_v27 = vmax.f32 %v6009_v10, %v6011_v56 }
 0x774   : > { %v6036_v7 = vmax.f32 %v6010_v41, %v6012_v30 }
 0x775   : > { %6058 = vst [vmem:[%s11370_s12 + $0x10] sm:$0xff] %v6034_v5 }
 0x776   : > { %6059 = vst [vmem:[%s11370_s12 + $0x18] sm:$0xff] %v6035_v27 }
 0x777   : > { %6060 = vst [vmem:[%s11370_s12 + $0x20] sm:$0xff] %v6036_v7  ;;  %v5916_v25 = vpop.permute.xlu1 %5915 }
 0x778   : > { %v5961_v2 = vsel %vm1224_vm2, %v5914_v55, %v5916_v25  ;;  %v5962_v16 = vsel %vm1224_vm2, %v5916_v25, %v5918_v19  ;;  %v5920_v62 = vpop.permute.xlu0 %5919 }
 0x779   : > { %v6013_v14 = vmax.f32 %v11241_v11, %v5961_v2  ;;  %v6014_v54 = vmax.f32 %v11251_v63, %v5962_v16  ;;  %v5963_v58 = vsel %vm1224_vm2, %v5918_v19, %v5920_v62 }
 0x77a   : > { %v6015_v9 = vmax.f32 %v11256_v3, %v5963_v58 }
 0x77b   : > { %v6037_v6 = vmax.f32 %v6011_v56, %v6013_v14  ;;  %v6038_v45 = vmax.f32 %v6012_v30, %v6014_v54 }
 0x77c   : > { %v6039_v28 = vmax.f32 %v6013_v14, %v6015_v9 }
 0x77d   : > { %6061 = vst [vmem:[%s11370_s12 + $0x28] sm:$0xff] %v6037_v6  ;;  %v5936_v44 = vpop.permute.xlu2 %5935 }
 0x77e   : > { %6062 = vst [vmem:[%s11370_s12 + $0x30] sm:$0xff] %v6038_v45 }
 0x77f   : > { %6063 = vst [vmem:[%s11370_s12 + $0x38] sm:$0xff] %v6039_v28  ;;  %v5922_v18 = vpop.permute.xlu1 %5921 }
 0x780   : > { %v5964_v20 = vsel %vm1224_vm2, %v5920_v62, %v5922_v18  ;;  %v5965_v11 = vsel %vm1224_vm2, %v5922_v18, %v5924_v0  ;;  %v5926_v63 = vpop.permute.xlu0 %5925 }
 0x781   : > { %v6016_v42 = vmax.f32 %v11259_v32, %v5964_v20  ;;  %v6017_v3 = vmax.f32 %v11269_v12, %v5965_v11  ;;  %v5966_v22 = vsel %vm1224_vm2, %v5924_v0, %v5926_v63 }
 0x782   : > { %v6018_v13 = vmax.f32 %v11274_v23, %v5966_v22 }
 0x783   : > { %v6040_v60 = vmax.f32 %v6014_v54, %v6016_v42  ;;  %v6041_v33 = vmax.f32 %v6015_v9, %v6017_v3 }
 0x784   : > { %v6042_v52 = vmax.f32 %v6016_v42, %v6018_v13 }
 0x785   : > { %6064 = vst [vmem:[%s11370_s12 + $0x40] sm:$0xff] %v6040_v60 }
 0x786   : > { %6065 = vst [vmem:[%s11370_s12 + $0x48] sm:$0xff] %v6041_v33 }
 0x787   : > { %6066 = vst [vmem:[%s11370_s12 + $0x50] sm:$0xff] %v6042_v52  ;;  %v5928_v24 = vpop.permute.xlu1 %5927 }
 0x788   : > { %v5967_v47 = vsel %vm1224_vm2, %v5926_v63, %v5928_v24  ;;  %v5968_v32 = vsel %vm1224_vm2, %v5928_v24, %v5930_v36 }
 0x789   : > { %v6019_v12 = vmax.f32 %v11277_v38, %v5967_v47  ;;  %v6020_v59 = vmax.f32 %v11287_v40, %v5968_v32 }
 0x78a   : > { %v5932_v4 = vpop.permute.xlu0 %5931 }
 0x78b   : > { %v6043_v53 = vmax.f32 %v6017_v3, %v6019_v12  ;;  %v6044_v23 = vmax.f32 %v6018_v13, %v6020_v59  ;;  %v5969_v46 = vsel %vm1224_vm2, %v5930_v36, %v5932_v4 }
 0x78c   : > { %v6021_v38 = vmax.f32 %v11291_v26, %v5969_v46 }
 0x78d   : > { %6067 = vst [vmem:[%s11370_s12 + $0x58] sm:$0xff] %v6043_v53 }
 0x78e   : > { %6068 = vst [vmem:[%s11370_s12 + $0x60] sm:$0xff] %v6044_v23  ;;  %v6045_v51 = vmax.f32 %v6019_v12, %v6021_v38 }
 0x78f   : > { %v5934_v21 = vpop.permute.xlu1 %5933 }
 0x790   : > { %v5970_v35 = vsel %vm1224_vm2, %v5932_v4, %v5934_v21  ;;  %v5971_v10 = vsel %vm1224_vm2, %v5934_v21, %v5936_v44  ;;  %6069 = vst [vmem:[%s11370_s12 + $0x68] sm:$0xff] %v6045_v51 }
 0x791   : > { %v6022_v40 = vmax.f32 %v11300_v8, %v5970_v35  ;;  %v6023_v61 = vmax.f32 %v11303_v39, %v5971_v10 }
 0x792   : > { %v5942_v34 = vpop.permute.xlu2 %5941 }
 0x793   : > { %v6046_v49 = vmax.f32 %v6020_v59, %v6022_v40  ;;  %v6047_v48 = vmax.f32 %v6021_v38, %v6023_v61 }
 0x795   : > { %6070 = vst [vmem:[%s11370_s12 + $0x70] sm:$0xff] %v6046_v49 }
 0x796   : > { %6071 = vst [vmem:[%s11370_s12 + $0x78] sm:$0xff] %v6047_v48 }
 0x7a8   : > { %v5938_v55 = vpop.permute.xlu0 %5937  ;;  %v5940_v41 = vpop.permute.xlu1 %5939 }
 0x7a9   : > { %v5972_v56 = vsel %vm1224_vm2, %v5936_v44, %v5938_v55  ;;  %v5973_v26 = vsel %vm1224_vm2, %v5938_v55, %v5940_v41  ;;  %v5974_v8 = vsel %vm1224_vm2, %v5940_v41, %v5942_v34 }
 0x7aa   : > { %v6024_v39 = vmax.f32 %v11311_v57, %v5972_v56  ;;  %v6025_v31 = vmax.f32 %v11319_v15, %v5973_v26  ;;  %v6026_v30 = vmax.f32 %v11322_v50, %v5974_v8 }
 0x7ac   : > { %v6048_v19 = vmax.f32 %v6022_v40, %v6024_v39  ;;  %v6049_v5 = vmax.f32 %v6023_v61, %v6025_v31  ;;  %v6050_v27 = vmax.f32 %v6024_v39, %v6026_v30 }
 0x7ae   : > { %6072 = vst [vmem:[%s11370_s12 + $0x80] sm:$0xff] %v6048_v19 }
 0x7af   : > { %6073 = vst [vmem:[%s11370_s12 + $0x88] sm:$0xff] %v6049_v5  ;;  %v5948_v7 = vpop.permute.xlu2 %5947 }
 0x7b0   : > { %6074 = vst [vmem:[%s11370_s12 + $0x90] sm:$0xff] %v6050_v27  ;;  %v5944_v25 = vpop.permute.xlu0 %5943  ;;  %v5946_v2 = vpop.permute.xlu1 %5945 }
 0x7b1   : > { %v5975_v16 = vsel %vm1224_vm2, %v5942_v34, %v5944_v25  ;;  %v5976_v57 = vsel %vm1224_vm2, %v5944_v25, %v5946_v2  ;;  %v5977_v15 = vsel %vm1224_vm2, %v5946_v2, %v5948_v7 }
 0x7b2   : > { %v6027_v50 = vmax.f32 %v11325_v17, %v5975_v16  ;;  %v6028_v62 = vmax.f32 %v11336_v43, %v5976_v57  ;;  %v6029_v14 = vmax.f32 %v11339_v29, %v5977_v15 }
 0x7b4   : > { %v6051_v54 = vmax.f32 %v6025_v31, %v6027_v50  ;;  %v6052_v58 = vmax.f32 %v6026_v30, %v6028_v62  ;;  %v6053_v9 = vmax.f32 %v6027_v50, %v6029_v14 }
 0x7b6   : > { %6075 = vst [vmem:[%s11370_s12 + $0x98] sm:$0xff] %v6051_v54 }
 0x7b7   : > { %6076 = vst [vmem:[%s11370_s12 + $0xa0] sm:$0xff] %v6052_v58 }
 0x7b8   : > { %6077 = vst [vmem:[%s11370_s12 + $0xa8] sm:$0xff] %v6053_v9 }
 0x7d4   : > { %v5952_v6 = vpop.permute.xlu1 %5951 }
 0x7d5   : > { %v5950_v45 = vpop.permute.xlu0 %5949 }
 0x7d6   : > { %v5978_v28 = vsel %vm1224_vm2, %v5948_v7, %v5950_v45  ;;  %v5979_v0 = vsel %vm1224_vm2, %v5950_v45, %v5952_v6 }
 0x7d7   : > { %v6030_v17 = vmax.f32 %v11347_v1, %v5978_v28  ;;  %v6031_v43 = vmax.f32 %v11354_v37, %v5979_v0 }
 0x7d9   : > { %v6054_v18 = vmax.f32 %v6028_v62, %v6030_v17  ;;  %v6055_v20 = vmax.f32 %v6029_v14, %v6031_v43 }
 0x7db   : > { %6078 = vst [vmem:[%s11370_s12 + $0xb0] sm:$0xff] %v6054_v18 }
 0x7dc   : > { %6079 = vst [vmem:[%s11370_s12 + $0xb8] sm:$0xff] %v6055_v20 }
 0x7dd PF: > { %s16_s20 = sadd.s32 1, %s7297_s20  }
 0x7de   : > { %p13_p4 = scmp.ge.s32.totalorder %s16_s20, 4  }
 0x7e0   :  { %15 = sbr.rel (!%p13_p4) target bundleno = 2 (0x2), region = 74 }

</bundles_post_ra>
